<compile_context>
chip_gen: v7x
topology: tpu7x:2x2x1
jax: 0.10.0
libtpu: 0.0.40
codegen_flags: <defaults>
</compile_context>

<pallas_src>
import functools

import jax
import jax.numpy as jnp
from jax.experimental import pallas as pl
from jax.experimental.pallas import tpu as pltpu


# -----------------------------------------------------------------------------
# Kernel 1/2: Conv3d(k=3, p=1) + ReLU + MaxPool3d(2), fused.
# -----------------------------------------------------------------------------

def _conv3d_relu_pool_kernel(x_ref, w_ref, b_ref, o_ref):
    # x_ref: (8, tp, K)  dim0 = position inside the 2x2x2 pooling window
    # w_ref: (K, Cout)   b_ref: (1, Cout)   o_ref: (tp, Cout)
    w = w_ref[...]
    m = jnp.dot(x_ref[0], w, preferred_element_type=jnp.float32)
    for j in range(1, 8):
        m = jnp.maximum(m, jnp.dot(x_ref[j], w, preferred_element_type=jnp.float32))
    # relu(max_j(x_j @ w) + b) == maxpool(relu(conv))  (bias const, relu monotone)
    o_ref[...] = jnp.maximum(m + b_ref[...], 0.0)


def conv3d_relu_pool(x, w_flat, b):
    """x: (B,T,H,W,Cin) NDHWC; w_flat: (27*Cin, Cout); b: (1, Cout) -> (B,T/2,H/2,W/2,Cout)."""
    B, T, H, W, C = x.shape
    T2, H2, W2 = T // 2, H // 2, W // 2
    K = 27 * C
    Cout = w_flat.shape[1]
    Mp = B * T2 * H2 * W2

    # im2col with pooling-window-major layout (plain-JAX glue; (dt,dh,dw)-major,
    # input-channel-minor feature order, matching the flattened weight rows).
    xp = jnp.pad(x, ((0, 0), (1, 1), (1, 1), (1, 1), (0, 0)))
    cols = [xp[:, dt:dt + T, dh:dh + H, dw:dw + W, :]
            for dt in range(3) for dh in range(3) for dw in range(3)]
    patches = jnp.concatenate(cols, axis=-1)                 # (B,T,H,W,K)
    patches = patches.reshape(B, T2, 2, H2, 2, W2, 2, K)
    patches = patches.transpose(2, 4, 6, 0, 1, 3, 5, 7)      # window offset major
    patches = patches.reshape(8, Mp, K)

    # >=2 grid steps on the big layer so v7x's second TensorCore gets work.
    if Mp > 128 and (Mp // 2) % 8 == 0:
        tp = Mp // 2
    else:
        tp = Mp
    out = pl.pallas_call(
        _conv3d_relu_pool_kernel,
        out_shape=jax.ShapeDtypeStruct((Mp, Cout), jnp.float32),
        grid=(Mp // tp,),
        in_specs=[
            pl.BlockSpec((8, tp, K), lambda i: (0, i, 0)),
            pl.BlockSpec((K, Cout), lambda i: (0, 0)),
            pl.BlockSpec((1, Cout), lambda i: (0, 0)),
        ],
        out_specs=pl.BlockSpec((tp, Cout), lambda i: (i, 0)),
        compiler_params=pltpu.CompilerParams(dimension_semantics=("parallel",)),
    )(patches, w_flat, b)
    return out.reshape(B, T2, H2, W2, Cout)


# -----------------------------------------------------------------------------
# Kernel 3: Conv3d(k=3, p=1) + ReLU + AdaptiveAvgPool3d(1), fused; grid over batch.
# -----------------------------------------------------------------------------

def _conv3d_relu_avgpool_kernel(x_ref, w_ref, b_ref, o_ref):
    # x_ref: (1, S, K); w_ref: (K, Cout); b_ref: (1, Cout); o_ref: (1, 1, Cout)
    y = jnp.dot(x_ref[0], w_ref[...], preferred_element_type=jnp.float32)
    y = jnp.maximum(y + b_ref[...], 0.0)                      # (S, Cout)
    o_ref[0] = jnp.mean(y, axis=0, keepdims=True)


def conv3d_relu_avgpool(x, w_flat, b):
    """x: (B,T,H,W,Cin) -> (B, Cout); conv + relu + global mean over (T,H,W)."""
    B, T, H, W, C = x.shape
    K = 27 * C
    Cout = w_flat.shape[1]
    S = T * H * W
    xp = jnp.pad(x, ((0, 0), (1, 1), (1, 1), (1, 1), (0, 0)))
    cols = [xp[:, dt:dt + T, dh:dh + H, dw:dw + W, :]
            for dt in range(3) for dh in range(3) for dw in range(3)]
    patches = jnp.concatenate(cols, axis=-1).reshape(B, S, K)
    out = pl.pallas_call(
        _conv3d_relu_avgpool_kernel,
        out_shape=jax.ShapeDtypeStruct((B, 1, Cout), jnp.float32),
        grid=(B,),
        in_specs=[
            pl.BlockSpec((1, S, K), lambda b: (b, 0, 0)),
            pl.BlockSpec((K, Cout), lambda b: (0, 0)),
            pl.BlockSpec((1, Cout), lambda b: (0, 0)),
        ],
        out_specs=pl.BlockSpec((1, 1, Cout), lambda b: (b, 0, 0)),
        compiler_params=pltpu.CompilerParams(dimension_semantics=("parallel",)),
    )(patches, w_flat, b)
    return out.reshape(B, Cout)


# -----------------------------------------------------------------------------
# Kernel 4: the whole audio branch (3x [Conv1d(k=3,p=1) + ReLU + MaxPool1d(2)]).
# Grid over batch; every intermediate stays in registers/VMEM values.
# Pooling = two 0/1 selection-matrix matmuls (even rows / odd rows) + max, which
# avoids strided VMEM access and scratch buffers entirely.
# -----------------------------------------------------------------------------

def _audio_branch_kernel(a_ref, w1_ref, b1_ref, w2_ref, b2_ref, w3_ref, b3_ref,
                         o_ref):
    def conv_relu_pool(x, w_ref, b_ref):
        # x: (L, Cin) value; w_ref: (3, Cin, Cout); b_ref: (1, Cout)
        L, Cin = x.shape
        Cout = w_ref.shape[2]
        zrow = jnp.zeros((1, Cin), jnp.float32)
        xpad = jnp.concatenate([zrow, x, zrow], axis=0)       # zero padding = 1
        acc = jnp.zeros((L, Cout), jnp.float32) + b_ref[...]
        for d in range(3):                                    # 3 shifted taps
            xd = xpad[d:d + L, :]
            wd = w_ref[d]                                     # (Cin, Cout)
            if Cin == 1:
                acc = acc + xd * wd                           # (L,1)*(1,Cout)
            else:
                acc = acc + jnp.dot(xd, wd, preferred_element_type=jnp.float32)
        y = jnp.maximum(acc, 0.0)                             # (L, Cout)
        # MaxPool1d(2): out[i] = max(y[2i], y[2i+1]) via selection matmuls.
        half = L // 2
        r = jax.lax.broadcasted_iota(jnp.int32, (half, L), 0)
        c = jax.lax.broadcasted_iota(jnp.int32, (half, L), 1)
        s_even = (c == 2 * r).astype(jnp.float32)
        s_odd = (c == 2 * r + 1).astype(jnp.float32)
        return jnp.maximum(
            jnp.dot(s_even, y, preferred_element_type=jnp.float32),
            jnp.dot(s_odd, y, preferred_element_type=jnp.float32))

    x = a_ref[0]                                      # (L0, 1)
    x = conv_relu_pool(x, w1_ref, b1_ref)             # (L0/2, 32)
    x = conv_relu_pool(x, w2_ref, b2_ref)             # (L0/4, 64)
    x = conv_relu_pool(x, w3_ref, b3_ref)             # (L0/8, hidden)
    o_ref[0] = x


def audio_branch(audio, p):
    """audio: (B, L) -> (B, L//8, hidden); the whole CNN branch in one pallas_call."""
    B, L = audio.shape
    hidden = p["ab3"].shape[1]
    a3 = audio[:, :, None]                            # NLC with Cin = 1
    return pl.pallas_call(
        _audio_branch_kernel,
        out_shape=jax.ShapeDtypeStruct((B, L // 8, hidden), jnp.float32),
        grid=(B,),
        in_specs=[
            pl.BlockSpec((1, L, 1), lambda b: (b, 0, 0)),
            pl.BlockSpec((3, 1, 32), lambda b: (0, 0, 0)),
            pl.BlockSpec((1, 32), lambda b: (0, 0)),
            pl.BlockSpec((3, 32, 64), lambda b: (0, 0, 0)),
            pl.BlockSpec((1, 64), lambda b: (0, 0)),
            pl.BlockSpec((3, 64, hidden), lambda b: (0, 0, 0)),
            pl.BlockSpec((1, hidden), lambda b: (0, 0)),
        ],
        out_specs=pl.BlockSpec((1, L // 8, hidden), lambda b: (b, 0, 0)),
        compiler_params=pltpu.CompilerParams(dimension_semantics=("parallel",)),
    )(a3, p["aw1"], p["ab1"], p["aw2"], p["ab2"], p["aw3"], p["ab3"])


# -----------------------------------------------------------------------------
# Kernel 5: fused MLP head (fc1 + ReLU + noise add + fc2 + ReLU + fc3), gridless.
# The feature concat is folded into two partial fc1 matmuls (video / audio parts).
# -----------------------------------------------------------------------------

def _mlp_head_kernel(vf_ref, af_ref, noise_ref, w1v_ref, w1a_ref, b1_ref,
                     w2_ref, b2_ref, w3_ref, b3_ref, o_ref):
    h = jnp.dot(vf_ref[...], w1v_ref[...], preferred_element_type=jnp.float32)
    h = h + jnp.dot(af_ref[...], w1a_ref[...], preferred_element_type=jnp.float32)
    h = jnp.maximum(h + b1_ref[...], 0.0)
    # TODO(synk): Dropout(p=0.0) is the identity; omitted.
    # x + beta * mean(|x|) * N(0,1); noise already carries beta, and the mean is
    # over the whole (B, mlp) tensor, matching torch abs(x).mean().
    scale = jnp.mean(jnp.abs(h), keepdims=True)               # (1, 1)
    h = h + scale * noise_ref[...]
    h = jnp.maximum(
        jnp.dot(h, w2_ref[...], preferred_element_type=jnp.float32) + b2_ref[...], 0.0)
    o_ref[...] = (jnp.dot(h, w3_ref[...], preferred_element_type=jnp.float32)
                  + b3_ref[...])


def mlp_head(video_feature, audio_feature_lc, scaled_noise, p):
    B = video_feature.shape[0]
    out_dim = p["b3"].shape[1]
    return pl.pallas_call(
        _mlp_head_kernel,
        out_shape=jax.ShapeDtypeStruct((B, out_dim), jnp.float32),
    )(video_feature, audio_feature_lc, scaled_noise,
      p["w1v"], p["w1a_lc"], p["b1"], p["w2"], p["b2"], p["w3"], p["b3"])


# -----------------------------------------------------------------------------
# Parameters (deterministic, PyTorch-default-style uniform init).
# -----------------------------------------------------------------------------

def init_params(key, hidden=32, mlp=32, out_dim=8):
    ks = jax.random.split(key, 18)

    def u(k, shape, fan_in):
        bound = 1.0 / (fan_in ** 0.5)
        return jax.random.uniform(k, shape, jnp.float32, -bound, bound)

    p = {}
    # Conv3d weights stored pre-flattened (27*Cin, Cout); row order is (dt,dh,dw)-major,
    # input-channel-minor == the im2col patch order.  (Porting real PyTorch weights
    # (Cout,Cin,kT,kH,kW) requires transpose(2,3,4,1,0).reshape(27*Cin, Cout).)
    p["vw1"] = u(ks[0], (27 * 3, 32), 27 * 3)
    p["vb1"] = u(ks[1], (1, 32), 27 * 3)
    p["vw2"] = u(ks[2], (27 * 32, 64), 27 * 32)
    p["vb2"] = u(ks[3], (1, 64), 27 * 32)
    p["vw3"] = u(ks[4], (27 * 64, hidden), 27 * 64)
    p["vb3"] = u(ks[5], (1, hidden), 27 * 64)
    # Conv1d weights as (tap, Cin, Cout).
    p["aw1"] = u(ks[6], (3, 1, 32), 3 * 1)
    p["ab1"] = u(ks[7], (1, 32), 3 * 1)
    p["aw2"] = u(ks[8], (3, 32, 64), 3 * 32)
    p["ab2"] = u(ks[9], (1, 64), 3 * 32)
    p["aw3"] = u(ks[10], (3, 64, hidden), 3 * 64)
    p["ab3"] = u(ks[11], (1, hidden), 3 * 64)
    # MLP head, stored (in, out) so kernels compute x @ w.  fc1 is split: rows
    # [0:hidden) act on the video feature; the audio rows are re-ordered from
    # PyTorch's (channel-major, length-minor) flatten to the (length-major,
    # channel-minor) order produced by the fused audio kernel, so no runtime
    # transpose/concat is needed.  (Apply the same permutation when porting real
    # PyTorch fc1 weights.)
    w1 = u(ks[12], (hidden * 6, mlp), hidden * 6)
    p["w1v"] = w1[:hidden]
    p["w1a_lc"] = (w1[hidden:].reshape(hidden, 5, mlp)
                   .transpose(1, 0, 2).reshape(5 * hidden, mlp))
    p["b1"] = u(ks[13], (1, mlp), hidden * 6)
    p["w2"] = u(ks[14], (hidden, mlp), hidden)
    p["b2"] = u(ks[15], (1, mlp), hidden)
    p["w3"] = u(ks[16], (hidden, out_dim), hidden)
    p["b3"] = u(ks[17], (1, out_dim), hidden)
    return p


# -----------------------------------------------------------------------------
# Forward pass.
# -----------------------------------------------------------------------------

def mm_student_forward(params, video, audio, beta, noise_key):
    """video: (B,3,T,H,W) NCDHW (PyTorch convention); audio: (B,L); beta: scalar."""
    B = video.shape[0]

    # ----- video branch -----
    v = jnp.transpose(video, (0, 2, 3, 4, 1))                         # -> NDHWC
    v = conv3d_relu_pool(v, params["vw1"], params["vb1"])
    v = conv3d_relu_pool(v, params["vw2"], params["vb2"])
    video_feature = conv3d_relu_avgpool(v, params["vw3"], params["vb3"])   # (B, hidden)

    # ----- audio branch (single fused kernel) -----
    a = audio_branch(audio, params)                                   # (B, 5, hidden)
    audio_feature_lc = a.reshape(B, -1)       # (l, c)-major flatten, matches w1a_lc rows

    # ----- fused MLP head -----
    # torch.randn noise reproduced distributionally with a fixed JAX key.
    mlp = params["b1"].shape[1]
    noise = beta * jax.random.normal(noise_key, (B, mlp), jnp.float32)
    return mlp_head(video_feature, audio_feature_lc, noise, params)


# -----------------------------------------------------------------------------

if __name__ == "__main__":
    key = jax.random.PRNGKey(0)
    k_param, k_video, k_audio, k_noise = jax.random.split(key, 4)

    hidden = 32     # hidden_dim == mlp_dim (required by the module's fc2/fc3 shapes)
    out_dim = 8
    params = init_params(k_param, hidden=hidden, mlp=hidden, out_dim=out_dim)

    B = 2
    video = jax.random.normal(k_video, (B, 3, 8, 16, 16), jnp.float32)   # NCDHW
    audio = jax.random.normal(k_audio, (B, 40), jnp.float32)             # 40 -> /2/2/2 -> 5
    beta = 0.5

    fwd = jax.jit(mm_student_forward)
    out = fwd(params, video, audio, beta, k_noise)
    out = jax.block_until_ready(out)
    assert out.shape == (B, out_dim), out.shape
    assert bool(jnp.all(jnp.isfinite(out)))
    print("KERNEL_OK")
</pallas_src>

<mosaic_0001>
module attributes {stable_mosaic.version = 11 : i64} {
  func.func @_conv3d_relu_pool_kernel(%arg0: i32, %arg1: memref<8x256x81xf32, #tpu.memory_space<vmem>>, %arg2: memref<81x32xf32, #tpu.memory_space<vmem>>, %arg3: memref<1x32xf32, #tpu.memory_space<vmem>>, %arg4: memref<256x32xf32, #tpu.memory_space<vmem>>) attributes {dimension_semantics = [#tpu.dimension_semantics<parallel>], iteration_bounds = array<i64: 2>, scalar_prefetch = 0 : i64, scratch_operands = 0 : i64, tpu.core_type = #tpu.core_type<tc>, window_params = [{transform_indices = @transform_0, window_bounds = array<i64: 8, 256, 81>}, {pipeline_mode = #tpu.pipeline_mode<synchronous>, transform_indices = @transform_1, window_bounds = array<i64: 81, 32>}, {pipeline_mode = #tpu.pipeline_mode<synchronous>, transform_indices = @transform_2, window_bounds = array<i64: 1, 32>}, {transform_indices = @transform_3, window_bounds = array<i64: 256, 32>}]} {
    %c0 = arith.constant 0 : index
    %c0_0 = arith.constant 0 : index
    %0 = vector.load %arg2[%c0, %c0_0] : memref<81x32xf32, #tpu.memory_space<vmem>>, vector<81x32xf32>
    %c0_1 = arith.constant 0 : index
    %c0_2 = arith.constant 0 : index
    %c0_3 = arith.constant 0 : index
    %1 = vector.load %arg1[%c0_1, %c0_2, %c0_3] : memref<8x256x81xf32, #tpu.memory_space<vmem>>, vector<1x256x81xf32>
    %2 = vector.shape_cast %1 : vector<1x256x81xf32> to vector<256x81xf32>
    %cst = arith.constant dense<0.000000e+00> : vector<256x32xf32>
    %3 = tpu.matmul %2, %0, %cst {dimension_numbers = #tpu.dot_dimension_numbers<[1], [0], [0], [1], [0, 0, 1, 1], [], []>} : vector<256x81xf32>, vector<81x32xf32>, vector<256x32xf32> -> vector<256x32xf32>
    %c1 = arith.constant 1 : index
    %c0_4 = arith.constant 0 : index
    %c0_5 = arith.constant 0 : index
    %4 = vector.load %arg1[%c1, %c0_4, %c0_5] : memref<8x256x81xf32, #tpu.memory_space<vmem>>, vector<1x256x81xf32>
    %5 = vector.shape_cast %4 : vector<1x256x81xf32> to vector<256x81xf32>
    %cst_6 = arith.constant dense<0.000000e+00> : vector<256x32xf32>
    %6 = tpu.matmul %5, %0, %cst_6 {dimension_numbers = #tpu.dot_dimension_numbers<[1], [0], [0], [1], [0, 0, 1, 1], [], []>} : vector<256x81xf32>, vector<81x32xf32>, vector<256x32xf32> -> vector<256x32xf32>
    %7 = arith.maximumf %3, %6 : vector<256x32xf32>
    %c2 = arith.constant 2 : index
    %c0_7 = arith.constant 0 : index
    %c0_8 = arith.constant 0 : index
    %8 = vector.load %arg1[%c2, %c0_7, %c0_8] : memref<8x256x81xf32, #tpu.memory_space<vmem>>, vector<1x256x81xf32>
    %9 = vector.shape_cast %8 : vector<1x256x81xf32> to vector<256x81xf32>
    %cst_9 = arith.constant dense<0.000000e+00> : vector<256x32xf32>
    %10 = tpu.matmul %9, %0, %cst_9 {dimension_numbers = #tpu.dot_dimension_numbers<[1], [0], [0], [1], [0, 0, 1, 1], [], []>} : vector<256x81xf32>, vector<81x32xf32>, vector<256x32xf32> -> vector<256x32xf32>
    %11 = arith.maximumf %7, %10 : vector<256x32xf32>
    %c3 = arith.constant 3 : index
    %c0_10 = arith.constant 0 : index
    %c0_11 = arith.constant 0 : index
    %12 = vector.load %arg1[%c3, %c0_10, %c0_11] : memref<8x256x81xf32, #tpu.memory_space<vmem>>, vector<1x256x81xf32>
    %13 = vector.shape_cast %12 : vector<1x256x81xf32> to vector<256x81xf32>
    %cst_12 = arith.constant dense<0.000000e+00> : vector<256x32xf32>
    %14 = tpu.matmul %13, %0, %cst_12 {dimension_numbers = #tpu.dot_dimension_numbers<[1], [0], [0], [1], [0, 0, 1, 1], [], []>} : vector<256x81xf32>, vector<81x32xf32>, vector<256x32xf32> -> vector<256x32xf32>
    %15 = arith.maximumf %11, %14 : vector<256x32xf32>
    %c4 = arith.constant 4 : index
    %c0_13 = arith.constant 0 : index
    %c0_14 = arith.constant 0 : index
    %16 = vector.load %arg1[%c4, %c0_13, %c0_14] : memref<8x256x81xf32, #tpu.memory_space<vmem>>, vector<1x256x81xf32>
    %17 = vector.shape_cast %16 : vector<1x256x81xf32> to vector<256x81xf32>
    %cst_15 = arith.constant dense<0.000000e+00> : vector<256x32xf32>
    %18 = tpu.matmul %17, %0, %cst_15 {dimension_numbers = #tpu.dot_dimension_numbers<[1], [0], [0], [1], [0, 0, 1, 1], [], []>} : vector<256x81xf32>, vector<81x32xf32>, vector<256x32xf32> -> vector<256x32xf32>
    %19 = arith.maximumf %15, %18 : vector<256x32xf32>
    %c5 = arith.constant 5 : index
    %c0_16 = arith.constant 0 : index
    %c0_17 = arith.constant 0 : index
    %20 = vector.load %arg1[%c5, %c0_16, %c0_17] : memref<8x256x81xf32, #tpu.memory_space<vmem>>, vector<1x256x81xf32>
    %21 = vector.shape_cast %20 : vector<1x256x81xf32> to vector<256x81xf32>
    %cst_18 = arith.constant dense<0.000000e+00> : vector<256x32xf32>
    %22 = tpu.matmul %21, %0, %cst_18 {dimension_numbers = #tpu.dot_dimension_numbers<[1], [0], [0], [1], [0, 0, 1, 1], [], []>} : vector<256x81xf32>, vector<81x32xf32>, vector<256x32xf32> -> vector<256x32xf32>
    %23 = arith.maximumf %19, %22 : vector<256x32xf32>
    %c6 = arith.constant 6 : index
    %c0_19 = arith.constant 0 : index
    %c0_20 = arith.constant 0 : index
    %24 = vector.load %arg1[%c6, %c0_19, %c0_20] : memref<8x256x81xf32, #tpu.memory_space<vmem>>, vector<1x256x81xf32>
    %25 = vector.shape_cast %24 : vector<1x256x81xf32> to vector<256x81xf32>
    %cst_21 = arith.constant dense<0.000000e+00> : vector<256x32xf32>
    %26 = tpu.matmul %25, %0, %cst_21 {dimension_numbers = #tpu.dot_dimension_numbers<[1], [0], [0], [1], [0, 0, 1, 1], [], []>} : vector<256x81xf32>, vector<81x32xf32>, vector<256x32xf32> -> vector<256x32xf32>
    %27 = arith.maximumf %23, %26 : vector<256x32xf32>
    %c7 = arith.constant 7 : index
    %c0_22 = arith.constant 0 : index
    %c0_23 = arith.constant 0 : index
    %28 = vector.load %arg1[%c7, %c0_22, %c0_23] : memref<8x256x81xf32, #tpu.memory_space<vmem>>, vector<1x256x81xf32>
    %29 = vector.shape_cast %28 : vector<1x256x81xf32> to vector<256x81xf32>
    %cst_24 = arith.constant dense<0.000000e+00> : vector<256x32xf32>
    %30 = tpu.matmul %29, %0, %cst_24 {dimension_numbers = #tpu.dot_dimension_numbers<[1], [0], [0], [1], [0, 0, 1, 1], [], []>} : vector<256x81xf32>, vector<81x32xf32>, vector<256x32xf32> -> vector<256x32xf32>
    %31 = arith.maximumf %27, %30 : vector<256x32xf32>
    %c0_25 = arith.constant 0 : index
    %c0_26 = arith.constant 0 : index
    %32 = vector.load %arg3[%c0_25, %c0_26] : memref<1x32xf32, #tpu.memory_space<vmem>>, vector<1x32xf32>
    %33 = vector.broadcast %32 : vector<1x32xf32> to vector<256x32xf32>
    %34 = arith.addf %31, %33 : vector<256x32xf32>
    %cst_27 = arith.constant 0.000000e+00 : f32
    %35 = vector.broadcast %cst_27 : f32 to vector<256x32xf32>
    %36 = arith.maximumf %34, %35 : vector<256x32xf32>
    %c0_28 = arith.constant 0 : index
    %c0_29 = arith.constant 0 : index
    %37 = vector.load %arg4[%c0_28, %c0_29] : memref<256x32xf32, #tpu.memory_space<vmem>>, vector<256x32xf32>
    tpu.vector_store %arg4[%c0_28, %c0_29], %36 {strides = array<i32>} : memref<256x32xf32, #tpu.memory_space<vmem>>, vector<256x32xf32>,
    return
  }
  func.func @transform_0(%arg0: i32) -> (i32, i32, i32) {
    %c0_i32 = arith.constant 0 : i32
    %c0_i32_0 = arith.constant 0 : i32
    %c0_i32_1 = arith.constant 0 : i32
    return %c0_i32, %arg0, %c0_i32_0 : i32, i32, i32
  }
  func.func @transform_1(%arg0: i32) -> (i32, i32) {
    %c0_i32 = arith.constant 0 : i32
    %c0_i32_0 = arith.constant 0 : i32
    %c0_i32_1 = arith.constant 0 : i32
    return %c0_i32, %c0_i32_0 : i32, i32
  }
  func.func @transform_2(%arg0: i32) -> (i32, i32) {
    %c0_i32 = arith.constant 0 : i32
    %c0_i32_0 = arith.constant 0 : i32
    %c0_i32_1 = arith.constant 0 : i32
    return %c0_i32, %c0_i32_0 : i32, i32
  }
  func.func @transform_3(%arg0: i32) -> (i32, i32) {
    %c0_i32 = arith.constant 0 : i32
    %c0_i32_0 = arith.constant 0 : i32
    return %arg0, %c0_i32 : i32, i32
  }
}

module attributes {stable_mosaic.version = 11 : i64} {
  func.func @_conv3d_relu_pool_kernel(%arg0: i32, %arg1: memref<8x64x864xf32, #tpu.memory_space<vmem>>, %arg2: memref<864x64xf32, #tpu.memory_space<vmem>>, %arg3: memref<1x64xf32, #tpu.memory_space<vmem>>, %arg4: memref<64x64xf32, #tpu.memory_space<vmem>>) attributes {dimension_semantics = [#tpu.dimension_semantics<parallel>], iteration_bounds = array<i64: 1>, scalar_prefetch = 0 : i64, scratch_operands = 0 : i64, tpu.core_type = #tpu.core_type<tc>, window_params = [{transform_indices = @transform_0, window_bounds = array<i64: 8, 64, 864>}, {pipeline_mode = #tpu.pipeline_mode<synchronous>, transform_indices = @transform_1, window_bounds = array<i64: 864, 64>}, {pipeline_mode = #tpu.pipeline_mode<synchronous>, transform_indices = @transform_2, window_bounds = array<i64: 1, 64>}, {transform_indices = @transform_3, window_bounds = array<i64: 64, 64>}]} {
    %c0 = arith.constant 0 : index
    %c0_0 = arith.constant 0 : index
    %0 = vector.load %arg2[%c0, %c0_0] : memref<864x64xf32, #tpu.memory_space<vmem>>, vector<864x64xf32>
    %c0_1 = arith.constant 0 : index
    %c0_2 = arith.constant 0 : index
    %c0_3 = arith.constant 0 : index
    %1 = vector.load %arg1[%c0_1, %c0_2, %c0_3] : memref<8x64x864xf32, #tpu.memory_space<vmem>>, vector<1x64x864xf32>
    %2 = vector.shape_cast %1 : vector<1x64x864xf32> to vector<64x864xf32>
    %cst = arith.constant dense<0.000000e+00> : vector<64x64xf32>
    %3 = tpu.matmul %2, %0, %cst {dimension_numbers = #tpu.dot_dimension_numbers<[1], [0], [0], [1], [0, 0, 1, 1], [], []>} : vector<64x864xf32>, vector<864x64xf32>, vector<64x64xf32> -> vector<64x64xf32>
    %c1 = arith.constant 1 : index
    %c0_4 = arith.constant 0 : index
    %c0_5 = arith.constant 0 : index
    %4 = vector.load %arg1[%c1, %c0_4, %c0_5] : memref<8x64x864xf32, #tpu.memory_space<vmem>>, vector<1x64x864xf32>
    %5 = vector.shape_cast %4 : vector<1x64x864xf32> to vector<64x864xf32>
    %cst_6 = arith.constant dense<0.000000e+00> : vector<64x64xf32>
    %6 = tpu.matmul %5, %0, %cst_6 {dimension_numbers = #tpu.dot_dimension_numbers<[1], [0], [0], [1], [0, 0, 1, 1], [], []>} : vector<64x864xf32>, vector<864x64xf32>, vector<64x64xf32> -> vector<64x64xf32>
    %7 = arith.maximumf %3, %6 : vector<64x64xf32>
    %c2 = arith.constant 2 : index
    %c0_7 = arith.constant 0 : index
    %c0_8 = arith.constant 0 : index
    %8 = vector.load %arg1[%c2, %c0_7, %c0_8] : memref<8x64x864xf32, #tpu.memory_space<vmem>>, vector<1x64x864xf32>
    %9 = vector.shape_cast %8 : vector<1x64x864xf32> to vector<64x864xf32>
    %cst_9 = arith.constant dense<0.000000e+00> : vector<64x64xf32>
    %10 = tpu.matmul %9, %0, %cst_9 {dimension_numbers = #tpu.dot_dimension_numbers<[1], [0], [0], [1], [0, 0, 1, 1], [], []>} : vector<64x864xf32>, vector<864x64xf32>, vector<64x64xf32> -> vector<64x64xf32>
    %11 = arith.maximumf %7, %10 : vector<64x64xf32>
    %c3 = arith.constant 3 : index
    %c0_10 = arith.constant 0 : index
    %c0_11 = arith.constant 0 : index
    %12 = vector.load %arg1[%c3, %c0_10, %c0_11] : memref<8x64x864xf32, #tpu.memory_space<vmem>>, vector<1x64x864xf32>
    %13 = vector.shape_cast %12 : vector<1x64x864xf32> to vector<64x864xf32>
    %cst_12 = arith.constant dense<0.000000e+00> : vector<64x64xf32>
    %14 = tpu.matmul %13, %0, %cst_12 {dimension_numbers = #tpu.dot_dimension_numbers<[1], [0], [0], [1], [0, 0, 1, 1], [], []>} : vector<64x864xf32>, vector<864x64xf32>, vector<64x64xf32> -> vector<64x64xf32>
    %15 = arith.maximumf %11, %14 : vector<64x64xf32>
    %c4 = arith.constant 4 : index
    %c0_13 = arith.constant 0 : index
    %c0_14 = arith.constant 0 : index
    %16 = vector.load %arg1[%c4, %c0_13, %c0_14] : memref<8x64x864xf32, #tpu.memory_space<vmem>>, vector<1x64x864xf32>
    %17 = vector.shape_cast %16 : vector<1x64x864xf32> to vector<64x864xf32>
    %cst_15 = arith.constant dense<0.000000e+00> : vector<64x64xf32>
    %18 = tpu.matmul %17, %0, %cst_15 {dimension_numbers = #tpu.dot_dimension_numbers<[1], [0], [0], [1], [0, 0, 1, 1], [], []>} : vector<64x864xf32>, vector<864x64xf32>, vector<64x64xf32> -> vector<64x64xf32>
    %19 = arith.maximumf %15, %18 : vector<64x64xf32>
    %c5 = arith.constant 5 : index
    %c0_16 = arith.constant 0 : index
    %c0_17 = arith.constant 0 : index
    %20 = vector.load %arg1[%c5, %c0_16, %c0_17] : memref<8x64x864xf32, #tpu.memory_space<vmem>>, vector<1x64x864xf32>
    %21 = vector.shape_cast %20 : vector<1x64x864xf32> to vector<64x864xf32>
    %cst_18 = arith.constant dense<0.000000e+00> : vector<64x64xf32>
    %22 = tpu.matmul %21, %0, %cst_18 {dimension_numbers = #tpu.dot_dimension_numbers<[1], [0], [0], [1], [0, 0, 1, 1], [], []>} : vector<64x864xf32>, vector<864x64xf32>, vector<64x64xf32> -> vector<64x64xf32>
    %23 = arith.maximumf %19, %22 : vector<64x64xf32>
    %c6 = arith.constant 6 : index
    %c0_19 = arith.constant 0 : index
    %c0_20 = arith.constant 0 : index
    %24 = vector.load %arg1[%c6, %c0_19, %c0_20] : memref<8x64x864xf32, #tpu.memory_space<vmem>>, vector<1x64x864xf32>
    %25 = vector.shape_cast %24 : vector<1x64x864xf32> to vector<64x864xf32>
    %cst_21 = arith.constant dense<0.000000e+00> : vector<64x64xf32>
    %26 = tpu.matmul %25, %0, %cst_21 {dimension_numbers = #tpu.dot_dimension_numbers<[1], [0], [0], [1], [0, 0, 1, 1], [], []>} : vector<64x864xf32>, vector<864x64xf32>, vector<64x64xf32> -> vector<64x64xf32>
    %27 = arith.maximumf %23, %26 : vector<64x64xf32>
    %c7 = arith.constant 7 : index
    %c0_22 = arith.constant 0 : index
    %c0_23 = arith.constant 0 : index
    %28 = vector.load %arg1[%c7, %c0_22, %c0_23] : memref<8x64x864xf32, #tpu.memory_space<vmem>>, vector<1x64x864xf32>
    %29 = vector.shape_cast %28 : vector<1x64x864xf32> to vector<64x864xf32>
    %cst_24 = arith.constant dense<0.000000e+00> : vector<64x64xf32>
    %30 = tpu.matmul %29, %0, %cst_24 {dimension_numbers = #tpu.dot_dimension_numbers<[1], [0], [0], [1], [0, 0, 1, 1], [], []>} : vector<64x864xf32>, vector<864x64xf32>, vector<64x64xf32> -> vector<64x64xf32>
    %31 = arith.maximumf %27, %30 : vector<64x64xf32>
    %c0_25 = arith.constant 0 : index
    %c0_26 = arith.constant 0 : index
    %32 = vector.load %arg3[%c0_25, %c0_26] : memref<1x64xf32, #tpu.memory_space<vmem>>, vector<1x64xf32>
    %33 = vector.broadcast %32 : vector<1x64xf32> to vector<64x64xf32>
    %34 = arith.addf %31, %33 : vector<64x64xf32>
    %cst_27 = arith.constant 0.000000e+00 : f32
    %35 = vector.broadcast %cst_27 : f32 to vector<64x64xf32>
    %36 = arith.maximumf %34, %35 : vector<64x64xf32>
    %c0_28 = arith.constant 0 : index
    %c0_29 = arith.constant 0 : index
    %37 = vector.load %arg4[%c0_28, %c0_29] : memref<64x64xf32, #tpu.memory_space<vmem>>, vector<64x64xf32>
    tpu.vector_store %arg4[%c0_28, %c0_29], %36 {strides = array<i32>} : memref<64x64xf32, #tpu.memory_space<vmem>>, vector<64x64xf32>,
    return
  }
  func.func @transform_0(%arg0: i32) -> (i32, i32, i32) {
    %c0_i32 = arith.constant 0 : i32
    %c0_i32_0 = arith.constant 0 : i32
    %c0_i32_1 = arith.constant 0 : i32
    return %c0_i32, %arg0, %c0_i32_0 : i32, i32, i32
  }
  func.func @transform_1(%arg0: i32) -> (i32, i32) {
    %c0_i32 = arith.constant 0 : i32
    %c0_i32_0 = arith.constant 0 : i32
    %c0_i32_1 = arith.constant 0 : i32
    return %c0_i32, %c0_i32_0 : i32, i32
  }
  func.func @transform_2(%arg0: i32) -> (i32, i32) {
    %c0_i32 = arith.constant 0 : i32
    %c0_i32_0 = arith.constant 0 : i32
    %c0_i32_1 = arith.constant 0 : i32
    return %c0_i32, %c0_i32_0 : i32, i32
  }
  func.func @transform_3(%arg0: i32) -> (i32, i32) {
    %c0_i32 = arith.constant 0 : i32
    %c0_i32_0 = arith.constant 0 : i32
    return %arg0, %c0_i32 : i32, i32
  }
}

module attributes {stable_mosaic.version = 11 : i64} {
  func.func @_conv3d_relu_avgpool_kernel(%arg0: i32, %arg1: memref<1x32x1728xf32, #tpu.memory_space<vmem>>, %arg2: memref<1728x32xf32, #tpu.memory_space<vmem>>, %arg3: memref<1x32xf32, #tpu.memory_space<vmem>>, %arg4: memref<1x1x32xf32, #tpu.memory_space<vmem>>) attributes {dimension_semantics = [#tpu.dimension_semantics<parallel>], iteration_bounds = array<i64: 2>, scalar_prefetch = 0 : i64, scratch_operands = 0 : i64, tpu.core_type = #tpu.core_type<tc>, window_params = [{transform_indices = @transform_0, window_bounds = array<i64: 1, 32, 1728>}, {pipeline_mode = #tpu.pipeline_mode<synchronous>, transform_indices = @transform_1, window_bounds = array<i64: 1728, 32>}, {pipeline_mode = #tpu.pipeline_mode<synchronous>, transform_indices = @transform_2, window_bounds = array<i64: 1, 32>}, {transform_indices = @transform_3, window_bounds = array<i64: 1, 1, 32>}]} {
    %c0 = arith.constant 0 : index
    %c0_0 = arith.constant 0 : index
    %c0_1 = arith.constant 0 : index
    %0 = vector.load %arg1[%c0, %c0_0, %c0_1] : memref<1x32x1728xf32, #tpu.memory_space<vmem>>, vector<1x32x1728xf32>
    %1 = vector.shape_cast %0 : vector<1x32x1728xf32> to vector<32x1728xf32>
    %c0_2 = arith.constant 0 : index
    %c0_3 = arith.constant 0 : index
    %2 = vector.load %arg2[%c0_2, %c0_3] : memref<1728x32xf32, #tpu.memory_space<vmem>>, vector<1728x32xf32>
    %cst = arith.constant dense<0.000000e+00> : vector<32x32xf32>
    %3 = tpu.matmul %1, %2, %cst {dimension_numbers = #tpu.dot_dimension_numbers<[1], [0], [0], [1], [0, 0, 1, 1], [], []>} : vector<32x1728xf32>, vector<1728x32xf32>, vector<32x32xf32> -> vector<32x32xf32>
    %c0_4 = arith.constant 0 : index
    %c0_5 = arith.constant 0 : index
    %4 = vector.load %arg3[%c0_4, %c0_5] : memref<1x32xf32, #tpu.memory_space<vmem>>, vector<1x32xf32>
    %5 = vector.broadcast %4 : vector<1x32xf32> to vector<32x32xf32>
    %6 = arith.addf %3, %5 : vector<32x32xf32>
    %cst_6 = arith.constant 0.000000e+00 : f32
    %7 = vector.broadcast %cst_6 : f32 to vector<32x32xf32>
    %8 = arith.maximumf %6, %7 : vector<32x32xf32>
    %cst_7 = arith.constant dense<0.000000e+00> : vector<32xf32>
    %9 = vector.multi_reduction <add>, %8, %cst_7 [0] : vector<32x32xf32> to vector<32xf32>
    %10 = vector.shape_cast %9 : vector<32xf32> to vector<1x32xf32>
    %cst_8 = arith.constant 3.200000e+01 : f32
    %11 = vector.broadcast %cst_8 : f32 to vector<1x32xf32>
    %12 = arith.divf %10, %11 : vector<1x32xf32>
    %c0_9 = arith.constant 0 : index
    %c0_10 = arith.constant 0 : index
    %c0_11 = arith.constant 0 : index
    %13 = vector.load %arg4[%c0_9, %c0_10, %c0_11] : memref<1x1x32xf32, #tpu.memory_space<vmem>>, vector<1x1x32xf32>
    %14 = vector.shape_cast %13 : vector<1x1x32xf32> to vector<1x32xf32>
    %15 = vector.shape_cast %12 : vector<1x32xf32> to vector<1x1x32xf32>
    tpu.vector_store %arg4[%c0_9, %c0_10, %c0_11], %15 {strides = array<i32>} : memref<1x1x32xf32, #tpu.memory_space<vmem>>, vector<1x1x32xf32>,
    return
  }
  func.func @transform_0(%arg0: i32) -> (i32, i32, i32) {
    %c0_i32 = arith.constant 0 : i32
    %c0_i32_0 = arith.constant 0 : i32
    %c0_i32_1 = arith.constant 0 : i32
    return %arg0, %c0_i32, %c0_i32_0 : i32, i32, i32
  }
  func.func @transform_1(%arg0: i32) -> (i32, i32) {
    %c0_i32 = arith.constant 0 : i32
    %c0_i32_0 = arith.constant 0 : i32
    %c0_i32_1 = arith.constant 0 : i32
    return %c0_i32, %c0_i32_0 : i32, i32
  }
  func.func @transform_2(%arg0: i32) -> (i32, i32) {
    %c0_i32 = arith.constant 0 : i32
    %c0_i32_0 = arith.constant 0 : i32
    %c0_i32_1 = arith.constant 0 : i32
    return %c0_i32, %c0_i32_0 : i32, i32
  }
  func.func @transform_3(%arg0: i32) -> (i32, i32, i32) {
    %c0_i32 = arith.constant 0 : i32
    %c0_i32_0 = arith.constant 0 : i32
    %c0_i32_1 = arith.constant 0 : i32
    return %arg0, %c0_i32, %c0_i32_0 : i32, i32, i32
  }
}

module attributes {stable_mosaic.version = 11 : i64} {
  func.func @_audio_branch_kernel(%arg0: i32, %arg1: memref<1x40x1xf32, #tpu.memory_space<vmem>>, %arg2: memref<3x1x32xf32, #tpu.memory_space<vmem>>, %arg3: memref<1x32xf32, #tpu.memory_space<vmem>>, %arg4: memref<3x32x64xf32, #tpu.memory_space<vmem>>, %arg5: memref<1x64xf32, #tpu.memory_space<vmem>>, %arg6: memref<3x64x32xf32, #tpu.memory_space<vmem>>, %arg7: memref<1x32xf32, #tpu.memory_space<vmem>>, %arg8: memref<1x5x32xf32, #tpu.memory_space<vmem>>) attributes {dimension_semantics = [#tpu.dimension_semantics<parallel>], iteration_bounds = array<i64: 2>, scalar_prefetch = 0 : i64, scratch_operands = 0 : i64, tpu.core_type = #tpu.core_type<tc>, window_params = [{transform_indices = @transform_0, window_bounds = array<i64: 1, 40, 1>}, {pipeline_mode = #tpu.pipeline_mode<synchronous>, transform_indices = @transform_1, window_bounds = array<i64: 3, 1, 32>}, {pipeline_mode = #tpu.pipeline_mode<synchronous>, transform_indices = @transform_2, window_bounds = array<i64: 1, 32>}, {pipeline_mode = #tpu.pipeline_mode<synchronous>, transform_indices = @transform_3, window_bounds = array<i64: 3, 32, 64>}, {pipeline_mode = #tpu.pipeline_mode<synchronous>, transform_indices = @transform_4, window_bounds = array<i64: 1, 64>}, {pipeline_mode = #tpu.pipeline_mode<synchronous>, transform_indices = @transform_5, window_bounds = array<i64: 3, 64, 32>}, {pipeline_mode = #tpu.pipeline_mode<synchronous>, transform_indices = @transform_6, window_bounds = array<i64: 1, 32>}, {transform_indices = @transform_7, window_bounds = array<i64: 1, 5, 32>}]} {
    %c0 = arith.constant 0 : index
    %c0_0 = arith.constant 0 : index
    %c0_1 = arith.constant 0 : index
    %0 = vector.load %arg1[%c0, %c0_0, %c0_1] : memref<1x40x1xf32, #tpu.memory_space<vmem>>, vector<1x40x1xf32>
    %1 = vector.shape_cast %0 : vector<1x40x1xf32> to vector<40x1xf32>
    %cst = arith.constant 0.000000e+00 : f32
    %2 = vector.broadcast %cst : f32 to vector<1x1xf32>
    %3 = tpu.concatenate %2, %1, %2 in 0 : vector<1x1xf32>, vector<40x1xf32>, vector<1x1xf32> -> vector<42x1xf32>
    %cst_2 = arith.constant 0.000000e+00 : f32
    %4 = vector.broadcast %cst_2 : f32 to vector<40x32xf32>
    %c0_3 = arith.constant 0 : index
    %c0_4 = arith.constant 0 : index
    %5 = vector.load %arg3[%c0_3, %c0_4] : memref<1x32xf32, #tpu.memory_space<vmem>>, vector<1x32xf32>
    %6 = vector.broadcast %5 : vector<1x32xf32> to vector<40x32xf32>
    %7 = arith.addf %4, %6 : vector<40x32xf32>
    %8 = vector.extract_strided_slice %3 {offsets = [0, 0], sizes = [40, 1], strides = [1, 1]} : vector<42x1xf32> to vector<40x1xf32>
    %c0_5 = arith.constant 0 : index
    %c0_6 = arith.constant 0 : index
    %c0_7 = arith.constant 0 : index
    %9 = vector.load %arg2[%c0_5, %c0_6, %c0_7] : memref<3x1x32xf32, #tpu.memory_space<vmem>>, vector<1x1x32xf32>
    %10 = vector.shape_cast %9 : vector<1x1x32xf32> to vector<1x32xf32>
    %11 = vector.broadcast %8 : vector<40x1xf32> to vector<40x32xf32>
    %12 = vector.broadcast %10 : vector<1x32xf32> to vector<40x32xf32>
    %13 = arith.mulf %11, %12 : vector<40x32xf32>
    %14 = arith.addf %7, %13 : vector<40x32xf32>
    %15 = vector.extract_strided_slice %3 {offsets = [1, 0], sizes = [40, 1], strides = [1, 1]} : vector<42x1xf32> to vector<40x1xf32>
    %c1 = arith.constant 1 : index
    %c0_8 = arith.constant 0 : index
    %c0_9 = arith.constant 0 : index
    %16 = vector.load %arg2[%c1, %c0_8, %c0_9] : memref<3x1x32xf32, #tpu.memory_space<vmem>>, vector<1x1x32xf32>
    %17 = vector.shape_cast %16 : vector<1x1x32xf32> to vector<1x32xf32>
    %18 = vector.broadcast %15 : vector<40x1xf32> to vector<40x32xf32>
    %19 = vector.broadcast %17 : vector<1x32xf32> to vector<40x32xf32>
    %20 = arith.mulf %18, %19 : vector<40x32xf32>
    %21 = arith.addf %14, %20 : vector<40x32xf32>
    %22 = vector.extract_strided_slice %3 {offsets = [2, 0], sizes = [40, 1], strides = [1, 1]} : vector<42x1xf32> to vector<40x1xf32>
    %c2 = arith.constant 2 : index
    %c0_10 = arith.constant 0 : index
    %c0_11 = arith.constant 0 : index
    %23 = vector.load %arg2[%c2, %c0_10, %c0_11] : memref<3x1x32xf32, #tpu.memory_space<vmem>>, vector<1x1x32xf32>
    %24 = vector.shape_cast %23 : vector<1x1x32xf32> to vector<1x32xf32>
    %25 = vector.broadcast %22 : vector<40x1xf32> to vector<40x32xf32>
    %26 = vector.broadcast %24 : vector<1x32xf32> to vector<40x32xf32>
    %27 = arith.mulf %25, %26 : vector<40x32xf32>
    %28 = arith.addf %21, %27 : vector<40x32xf32>
    %cst_12 = arith.constant 0.000000e+00 : f32
    %29 = vector.broadcast %cst_12 : f32 to vector<40x32xf32>
    %30 = arith.maximumf %28, %29 : vector<40x32xf32>
    %31 = tpu.iota {dimensions = array<i32: 0>} : vector<20x40xi32>
    %32 = tpu.iota {dimensions = array<i32: 1>} : vector<20x40xi32>
    %c2_i32 = arith.constant 2 : i32
    %33 = vector.broadcast %c2_i32 : i32 to vector<20x40xi32>
    %34 = arith.muli %33, %31 : vector<20x40xi32>
    %35 = arith.cmpi eq, %32, %34 : vector<20x40xi32>
    %36 = arith.extui %35 : vector<20x40xi1> to vector<20x40xi32>
    %37 = arith.sitofp %36 : vector<20x40xi32> to vector<20x40xf32>
    %c2_i32_13 = arith.constant 2 : i32
    %38 = vector.broadcast %c2_i32_13 : i32 to vector<20x40xi32>
    %39 = arith.muli %38, %31 : vector<20x40xi32>
    %c1_i32 = arith.constant 1 : i32
    %40 = vector.broadcast %c1_i32 : i32 to vector<20x40xi32>
    %41 = arith.addi %39, %40 : vector<20x40xi32>
    %42 = arith.cmpi eq, %32, %41 : vector<20x40xi32>
    %43 = arith.extui %42 : vector<20x40xi1> to vector<20x40xi32>
    %44 = arith.sitofp %43 : vector<20x40xi32> to vector<20x40xf32>
    %cst_14 = arith.constant dense<0.000000e+00> : vector<20x32xf32>
    %45 = tpu.matmul %37, %30, %cst_14 {dimension_numbers = #tpu.dot_dimension_numbers<[1], [0], [0], [1], [0, 0, 1, 1], [], []>} : vector<20x40xf32>, vector<40x32xf32>, vector<20x32xf32> -> vector<20x32xf32>
    %cst_15 = arith.constant dense<0.000000e+00> : vector<20x32xf32>
    %46 = tpu.matmul %44, %30, %cst_15 {dimension_numbers = #tpu.dot_dimension_numbers<[1], [0], [0], [1], [0, 0, 1, 1], [], []>} : vector<20x40xf32>, vector<40x32xf32>, vector<20x32xf32> -> vector<20x32xf32>
    %47 = arith.maximumf %45, %46 : vector<20x32xf32>
    %cst_16 = arith.constant 0.000000e+00 : f32
    %48 = vector.broadcast %cst_16 : f32 to vector<1x32xf32>
    %49 = tpu.concatenate %48, %47, %48 in 0 : vector<1x32xf32>, vector<20x32xf32>, vector<1x32xf32> -> vector<22x32xf32>
    %cst_17 = arith.constant 0.000000e+00 : f32
    %50 = vector.broadcast %cst_17 : f32 to vector<20x64xf32>
    %c0_18 = arith.constant 0 : index
    %c0_19 = arith.constant 0 : index
    %51 = vector.load %arg5[%c0_18, %c0_19] : memref<1x64xf32, #tpu.memory_space<vmem>>, vector<1x64xf32>
    %52 = vector.broadcast %51 : vector<1x64xf32> to vector<20x64xf32>
    %53 = arith.addf %50, %52 : vector<20x64xf32>
    %54 = vector.extract_strided_slice %49 {offsets = [0, 0], sizes = [20, 32], strides = [1, 1]} : vector<22x32xf32> to vector<20x32xf32>
    %c0_20 = arith.constant 0 : index
    %c0_21 = arith.constant 0 : index
    %c0_22 = arith.constant 0 : index
    %55 = vector.load %arg4[%c0_20, %c0_21, %c0_22] : memref<3x32x64xf32, #tpu.memory_space<vmem>>, vector<1x32x64xf32>
    %56 = vector.shape_cast %55 : vector<1x32x64xf32> to vector<32x64xf32>
    %cst_23 = arith.constant dense<0.000000e+00> : vector<20x64xf32>
    %57 = tpu.matmul %54, %56, %cst_23 {dimension_numbers = #tpu.dot_dimension_numbers<[1], [0], [0], [1], [0, 0, 1, 1], [], []>} : vector<20x32xf32>, vector<32x64xf32>, vector<20x64xf32> -> vector<20x64xf32>
    %58 = arith.addf %53, %57 : vector<20x64xf32>
    %59 = vector.extract_strided_slice %49 {offsets = [1, 0], sizes = [20, 32], strides = [1, 1]} : vector<22x32xf32> to vector<20x32xf32>
    %c1_24 = arith.constant 1 : index
    %c0_25 = arith.constant 0 : index
    %c0_26 = arith.constant 0 : index
    %60 = vector.load %arg4[%c1_24, %c0_25, %c0_26] : memref<3x32x64xf32, #tpu.memory_space<vmem>>, vector<1x32x64xf32>
    %61 = vector.shape_cast %60 : vector<1x32x64xf32> to vector<32x64xf32>
    %cst_27 = arith.constant dense<0.000000e+00> : vector<20x64xf32>
    %62 = tpu.matmul %59, %61, %cst_27 {dimension_numbers = #tpu.dot_dimension_numbers<[1], [0], [0], [1], [0, 0, 1, 1], [], []>} : vector<20x32xf32>, vector<32x64xf32>, vector<20x64xf32> -> vector<20x64xf32>
    %63 = arith.addf %58, %62 : vector<20x64xf32>
    %64 = vector.extract_strided_slice %49 {offsets = [2, 0], sizes = [20, 32], strides = [1, 1]} : vector<22x32xf32> to vector<20x32xf32>
    %c2_28 = arith.constant 2 : index
    %c0_29 = arith.constant 0 : index
    %c0_30 = arith.constant 0 : index
    %65 = vector.load %arg4[%c2_28, %c0_29, %c0_30] : memref<3x32x64xf32, #tpu.memory_space<vmem>>, vector<1x32x64xf32>
    %66 = vector.shape_cast %65 : vector<1x32x64xf32> to vector<32x64xf32>
    %cst_31 = arith.constant dense<0.000000e+00> : vector<20x64xf32>
    %67 = tpu.matmul %64, %66, %cst_31 {dimension_numbers = #tpu.dot_dimension_numbers<[1], [0], [0], [1], [0, 0, 1, 1], [], []>} : vector<20x32xf32>, vector<32x64xf32>, vector<20x64xf32> -> vector<20x64xf32>
    %68 = arith.addf %63, %67 : vector<20x64xf32>
    %cst_32 = arith.constant 0.000000e+00 : f32
    %69 = vector.broadcast %cst_32 : f32 to vector<20x64xf32>
    %70 = arith.maximumf %68, %69 : vector<20x64xf32>
    %71 = tpu.iota {dimensions = array<i32: 0>} : vector<10x20xi32>
    %72 = tpu.iota {dimensions = array<i32: 1>} : vector<10x20xi32>
    %c2_i32_33 = arith.constant 2 : i32
    %73 = vector.broadcast %c2_i32_33 : i32 to vector<10x20xi32>
    %74 = arith.muli %73, %71 : vector<10x20xi32>
    %75 = arith.cmpi eq, %72, %74 : vector<10x20xi32>
    %76 = arith.extui %75 : vector<10x20xi1> to vector<10x20xi32>
    %77 = arith.sitofp %76 : vector<10x20xi32> to vector<10x20xf32>
    %c2_i32_34 = arith.constant 2 : i32
    %78 = vector.broadcast %c2_i32_34 : i32 to vector<10x20xi32>
    %79 = arith.muli %78, %71 : vector<10x20xi32>
    %c1_i32_35 = arith.constant 1 : i32
    %80 = vector.broadcast %c1_i32_35 : i32 to vector<10x20xi32>
    %81 = arith.addi %79, %80 : vector<10x20xi32>
    %82 = arith.cmpi eq, %72, %81 : vector<10x20xi32>
    %83 = arith.extui %82 : vector<10x20xi1> to vector<10x20xi32>
    %84 = arith.sitofp %83 : vector<10x20xi32> to vector<10x20xf32>
    %cst_36 = arith.constant dense<0.000000e+00> : vector<10x64xf32>
    %85 = tpu.matmul %77, %70, %cst_36 {dimension_numbers = #tpu.dot_dimension_numbers<[1], [0], [0], [1], [0, 0, 1, 1], [], []>} : vector<10x20xf32>, vector<20x64xf32>, vector<10x64xf32> -> vector<10x64xf32>
    %cst_37 = arith.constant dense<0.000000e+00> : vector<10x64xf32>
    %86 = tpu.matmul %84, %70, %cst_37 {dimension_numbers = #tpu.dot_dimension_numbers<[1], [0], [0], [1], [0, 0, 1, 1], [], []>} : vector<10x20xf32>, vector<20x64xf32>, vector<10x64xf32> -> vector<10x64xf32>
    %87 = arith.maximumf %85, %86 : vector<10x64xf32>
    %cst_38 = arith.constant 0.000000e+00 : f32
    %88 = vector.broadcast %cst_38 : f32 to vector<1x64xf32>
    %89 = tpu.concatenate %88, %87, %88 in 0 : vector<1x64xf32>, vector<10x64xf32>, vector<1x64xf32> -> vector<12x64xf32>
    %cst_39 = arith.constant 0.000000e+00 : f32
    %90 = vector.broadcast %cst_39 : f32 to vector<10x32xf32>
    %c0_40 = arith.constant 0 : index
    %c0_41 = arith.constant 0 : index
    %91 = vector.load %arg7[%c0_40, %c0_41] : memref<1x32xf32, #tpu.memory_space<vmem>>, vector<1x32xf32>
    %92 = vector.broadcast %91 : vector<1x32xf32> to vector<10x32xf32>
    %93 = arith.addf %90, %92 : vector<10x32xf32>
    %94 = vector.extract_strided_slice %89 {offsets = [0, 0], sizes = [10, 64], strides = [1, 1]} : vector<12x64xf32> to vector<10x64xf32>
    %c0_42 = arith.constant 0 : index
    %c0_43 = arith.constant 0 : index
    %c0_44 = arith.constant 0 : index
    %95 = vector.load %arg6[%c0_42, %c0_43, %c0_44] : memref<3x64x32xf32, #tpu.memory_space<vmem>>, vector<1x64x32xf32>
    %96 = vector.shape_cast %95 : vector<1x64x32xf32> to vector<64x32xf32>
    %cst_45 = arith.constant dense<0.000000e+00> : vector<10x32xf32>
    %97 = tpu.matmul %94, %96, %cst_45 {dimension_numbers = #tpu.dot_dimension_numbers<[1], [0], [0], [1], [0, 0, 1, 1], [], []>} : vector<10x64xf32>, vector<64x32xf32>, vector<10x32xf32> -> vector<10x32xf32>
    %98 = arith.addf %93, %97 : vector<10x32xf32>
    %99 = vector.extract_strided_slice %89 {offsets = [1, 0], sizes = [10, 64], strides = [1, 1]} : vector<12x64xf32> to vector<10x64xf32>
    %c1_46 = arith.constant 1 : index
    %c0_47 = arith.constant 0 : index
    %c0_48 = arith.constant 0 : index
    %100 = vector.load %arg6[%c1_46, %c0_47, %c0_48] : memref<3x64x32xf32, #tpu.memory_space<vmem>>, vector<1x64x32xf32>
    %101 = vector.shape_cast %100 : vector<1x64x32xf32> to vector<64x32xf32>
    %cst_49 = arith.constant dense<0.000000e+00> : vector<10x32xf32>
    %102 = tpu.matmul %99, %101, %cst_49 {dimension_numbers = #tpu.dot_dimension_numbers<[1], [0], [0], [1], [0, 0, 1, 1], [], []>} : vector<10x64xf32>, vector<64x32xf32>, vector<10x32xf32> -> vector<10x32xf32>
    %103 = arith.addf %98, %102 : vector<10x32xf32>
    %104 = vector.extract_strided_slice %89 {offsets = [2, 0], sizes = [10, 64], strides = [1, 1]} : vector<12x64xf32> to vector<10x64xf32>
    %c2_50 = arith.constant 2 : index
    %c0_51 = arith.constant 0 : index
    %c0_52 = arith.constant 0 : index
    %105 = vector.load %arg6[%c2_50, %c0_51, %c0_52] : memref<3x64x32xf32, #tpu.memory_space<vmem>>, vector<1x64x32xf32>
    %106 = vector.shape_cast %105 : vector<1x64x32xf32> to vector<64x32xf32>
    %cst_53 = arith.constant dense<0.000000e+00> : vector<10x32xf32>
    %107 = tpu.matmul %104, %106, %cst_53 {dimension_numbers = #tpu.dot_dimension_numbers<[1], [0], [0], [1], [0, 0, 1, 1], [], []>} : vector<10x64xf32>, vector<64x32xf32>, vector<10x32xf32> -> vector<10x32xf32>
    %108 = arith.addf %103, %107 : vector<10x32xf32>
    %cst_54 = arith.constant 0.000000e+00 : f32
    %109 = vector.broadcast %cst_54 : f32 to vector<10x32xf32>
    %110 = arith.maximumf %108, %109 : vector<10x32xf32>
    %111 = tpu.iota {dimensions = array<i32: 0>} : vector<5x10xi32>
    %112 = tpu.iota {dimensions = array<i32: 1>} : vector<5x10xi32>
    %c2_i32_55 = arith.constant 2 : i32
    %113 = vector.broadcast %c2_i32_55 : i32 to vector<5x10xi32>
    %114 = arith.muli %113, %111 : vector<5x10xi32>
    %115 = arith.cmpi eq, %112, %114 : vector<5x10xi32>
    %116 = arith.extui %115 : vector<5x10xi1> to vector<5x10xi32>
    %117 = arith.sitofp %116 : vector<5x10xi32> to vector<5x10xf32>
    %c2_i32_56 = arith.constant 2 : i32
    %118 = vector.broadcast %c2_i32_56 : i32 to vector<5x10xi32>
    %119 = arith.muli %118, %111 : vector<5x10xi32>
    %c1_i32_57 = arith.constant 1 : i32
    %120 = vector.broadcast %c1_i32_57 : i32 to vector<5x10xi32>
    %121 = arith.addi %119, %120 : vector<5x10xi32>
    %122 = arith.cmpi eq, %112, %121 : vector<5x10xi32>
    %123 = arith.extui %122 : vector<5x10xi1> to vector<5x10xi32>
    %124 = arith.sitofp %123 : vector<5x10xi32> to vector<5x10xf32>
    %cst_58 = arith.constant dense<0.000000e+00> : vector<5x32xf32>
    %125 = tpu.matmul %117, %110, %cst_58 {dimension_numbers = #tpu.dot_dimension_numbers<[1], [0], [0], [1], [0, 0, 1, 1], [], []>} : vector<5x10xf32>, vector<10x32xf32>, vector<5x32xf32> -> vector<5x32xf32>
    %cst_59 = arith.constant dense<0.000000e+00> : vector<5x32xf32>
    %126 = tpu.matmul %124, %110, %cst_59 {dimension_numbers = #tpu.dot_dimension_numbers<[1], [0], [0], [1], [0, 0, 1, 1], [], []>} : vector<5x10xf32>, vector<10x32xf32>, vector<5x32xf32> -> vector<5x32xf32>
    %127 = arith.maximumf %125, %126 : vector<5x32xf32>
    %c0_60 = arith.constant 0 : index
    %c0_61 = arith.constant 0 : index
    %c0_62 = arith.constant 0 : index
    %128 = vector.load %arg8[%c0_60, %c0_61, %c0_62] : memref<1x5x32xf32, #tpu.memory_space<vmem>>, vector<1x5x32xf32>
    %129 = vector.shape_cast %128 : vector<1x5x32xf32> to vector<5x32xf32>
    %130 = vector.shape_cast %127 : vector<5x32xf32> to vector<1x5x32xf32>
    tpu.vector_store %arg8[%c0_60, %c0_61, %c0_62], %130 {strides = array<i32>} : memref<1x5x32xf32, #tpu.memory_space<vmem>>, vector<1x5x32xf32>,
    return
  }
  func.func @transform_0(%arg0: i32) -> (i32, i32, i32) {
    %c0_i32 = arith.constant 0 : i32
    %c0_i32_0 = arith.constant 0 : i32
    %c0_i32_1 = arith.constant 0 : i32
    return %arg0, %c0_i32, %c0_i32_0 : i32, i32, i32
  }
  func.func @transform_1(%arg0: i32) -> (i32, i32, i32) {
    %c0_i32 = arith.constant 0 : i32
    %c0_i32_0 = arith.constant 0 : i32
    %c0_i32_1 = arith.constant 0 : i32
    %c0_i32_2 = arith.constant 0 : i32
    return %c0_i32, %c0_i32_0, %c0_i32_1 : i32, i32, i32
  }
  func.func @transform_2(%arg0: i32) -> (i32, i32) {
    %c0_i32 = arith.constant 0 : i32
    %c0_i32_0 = arith.constant 0 : i32
    %c0_i32_1 = arith.constant 0 : i32
    return %c0_i32, %c0_i32_0 : i32, i32
  }
  func.func @transform_3(%arg0: i32) -> (i32, i32, i32) {
    %c0_i32 = arith.constant 0 : i32
    %c0_i32_0 = arith.constant 0 : i32
    %c0_i32_1 = arith.constant 0 : i32
    %c0_i32_2 = arith.constant 0 : i32
    return %c0_i32, %c0_i32_0, %c0_i32_1 : i32, i32, i32
  }
  func.func @transform_4(%arg0: i32) -> (i32, i32) {
    %c0_i32 = arith.constant 0 : i32
    %c0_i32_0 = arith.constant 0 : i32
    %c0_i32_1 = arith.constant 0 : i32
    return %c0_i32, %c0_i32_0 : i32, i32
  }
  func.func @transform_5(%arg0: i32) -> (i32, i32, i32) {
    %c0_i32 = arith.constant 0 : i32
    %c0_i32_0 = arith.constant 0 : i32
    %c0_i32_1 = arith.constant 0 : i32
    %c0_i32_2 = arith.constant 0 : i32
    return %c0_i32, %c0_i32_0, %c0_i32_1 : i32, i32, i32
  }
  func.func @transform_6(%arg0: i32) -> (i32, i32) {
    %c0_i32 = arith.constant 0 : i32
    %c0_i32_0 = arith.constant 0 : i32
    %c0_i32_1 = arith.constant 0 : i32
    return %c0_i32, %c0_i32_0 : i32, i32
  }
  func.func @transform_7(%arg0: i32) -> (i32, i32, i32) {
    %c0_i32 = arith.constant 0 : i32
    %c0_i32_0 = arith.constant 0 : i32
    %c0_i32_1 = arith.constant 0 : i32
    return %arg0, %c0_i32, %c0_i32_0 : i32, i32, i32
  }
}

module attributes {stable_mosaic.version = 11 : i64} {
  func.func @_mlp_head_kernel(%arg0: memref<2x32xf32, #tpu.memory_space<vmem>>, %arg1: memref<2x160xf32, #tpu.memory_space<vmem>>, %arg2: memref<2x32xf32, #tpu.memory_space<vmem>>, %arg3: memref<32x32xf32, #tpu.memory_space<vmem>>, %arg4: memref<160x32xf32, #tpu.memory_space<vmem>>, %arg5: memref<1x32xf32, #tpu.memory_space<vmem>>, %arg6: memref<32x32xf32, #tpu.memory_space<vmem>>, %arg7: memref<1x32xf32, #tpu.memory_space<vmem>>, %arg8: memref<32x8xf32, #tpu.memory_space<vmem>>, %arg9: memref<1x8xf32, #tpu.memory_space<vmem>>, %arg10: memref<2x8xf32, #tpu.memory_space<vmem>>) attributes {dimension_semantics = [], scalar_prefetch = 0 : i64, scratch_operands = 0 : i64, tpu.core_type = #tpu.core_type<tc>} {
    %c0 = arith.constant 0 : index
    %c0_0 = arith.constant 0 : index
    %0 = vector.load %arg0[%c0, %c0_0] : memref<2x32xf32, #tpu.memory_space<vmem>>, vector<2x32xf32>
    %c0_1 = arith.constant 0 : index
    %c0_2 = arith.constant 0 : index
    %1 = vector.load %arg3[%c0_1, %c0_2] : memref<32x32xf32, #tpu.memory_space<vmem>>, vector<32x32xf32>
    %cst = arith.constant dense<0.000000e+00> : vector<2x32xf32>
    %2 = tpu.matmul %0, %1, %cst {dimension_numbers = #tpu.dot_dimension_numbers<[1], [0], [0], [1], [0, 0, 1, 1], [], []>} : vector<2x32xf32>, vector<32x32xf32>, vector<2x32xf32> -> vector<2x32xf32>
    %c0_3 = arith.constant 0 : index
    %c0_4 = arith.constant 0 : index
    %3 = vector.load %arg1[%c0_3, %c0_4] : memref<2x160xf32, #tpu.memory_space<vmem>>, vector<2x160xf32>
    %c0_5 = arith.constant 0 : index
    %c0_6 = arith.constant 0 : index
    %4 = vector.load %arg4[%c0_5, %c0_6] : memref<160x32xf32, #tpu.memory_space<vmem>>, vector<160x32xf32>
    %cst_7 = arith.constant dense<0.000000e+00> : vector<2x32xf32>
    %5 = tpu.matmul %3, %4, %cst_7 {dimension_numbers = #tpu.dot_dimension_numbers<[1], [0], [0], [1], [0, 0, 1, 1], [], []>} : vector<2x160xf32>, vector<160x32xf32>, vector<2x32xf32> -> vector<2x32xf32>
    %6 = arith.addf %2, %5 : vector<2x32xf32>
    %c0_8 = arith.constant 0 : index
    %c0_9 = arith.constant 0 : index
    %7 = vector.load %arg5[%c0_8, %c0_9] : memref<1x32xf32, #tpu.memory_space<vmem>>, vector<1x32xf32>
    %8 = vector.broadcast %7 : vector<1x32xf32> to vector<2x32xf32>
    %9 = arith.addf %6, %8 : vector<2x32xf32>
    %cst_10 = arith.constant 0.000000e+00 : f32
    %10 = vector.broadcast %cst_10 : f32 to vector<2x32xf32>
    %11 = arith.maximumf %9, %10 : vector<2x32xf32>
    %12 = math.absf %11 : vector<2x32xf32>
    %13 = vector.shape_cast %12 : vector<2x32xf32> to vector<1x2x32xf32>
    %cst_11 = arith.constant dense<0.000000e+00> : vector<1xf32>
    %14 = vector.multi_reduction <add>, %13, %cst_11 [1, 2] : vector<1x2x32xf32> to vector<1xf32>
    %15 = vector.shape_cast %14 : vector<1xf32> to vector<1x1x1xf32>
    %16 = vector.extract %15[0, 0, 0] : f32 from vector<1x1x1xf32>
    %17 = vector.broadcast %16 : f32 to vector<1x1xf32>
    %cst_12 = arith.constant 6.400000e+01 : f32
    %18 = vector.broadcast %cst_12 : f32 to vector<1x1xf32>
    %19 = arith.divf %17, %18 : vector<1x1xf32>
    %c0_13 = arith.constant 0 : index
    %c0_14 = arith.constant 0 : index
    %20 = vector.load %arg2[%c0_13, %c0_14] : memref<2x32xf32, #tpu.memory_space<vmem>>, vector<2x32xf32>
    %21 = vector.broadcast %19 : vector<1x1xf32> to vector<2x32xf32>
    %22 = arith.mulf %21, %20 : vector<2x32xf32>
    %23 = arith.addf %11, %22 : vector<2x32xf32>
    %c0_15 = arith.constant 0 : index
    %c0_16 = arith.constant 0 : index
    %24 = vector.load %arg6[%c0_15, %c0_16] : memref<32x32xf32, #tpu.memory_space<vmem>>, vector<32x32xf32>
    %cst_17 = arith.constant dense<0.000000e+00> : vector<2x32xf32>
    %25 = tpu.matmul %23, %24, %cst_17 {dimension_numbers = #tpu.dot_dimension_numbers<[1], [0], [0], [1], [0, 0, 1, 1], [], []>} : vector<2x32xf32>, vector<32x32xf32>, vector<2x32xf32> -> vector<2x32xf32>
    %c0_18 = arith.constant 0 : index
    %c0_19 = arith.constant 0 : index
    %26 = vector.load %arg7[%c0_18, %c0_19] : memref<1x32xf32, #tpu.memory_space<vmem>>, vector<1x32xf32>
    %27 = vector.broadcast %26 : vector<1x32xf32> to vector<2x32xf32>
    %28 = arith.addf %25, %27 : vector<2x32xf32>
    %cst_20 = arith.constant 0.000000e+00 : f32
    %29 = vector.broadcast %cst_20 : f32 to vector<2x32xf32>
    %30 = arith.maximumf %28, %29 : vector<2x32xf32>
    %c0_21 = arith.constant 0 : index
    %c0_22 = arith.constant 0 : index
    %31 = vector.load %arg8[%c0_21, %c0_22] : memref<32x8xf32, #tpu.memory_space<vmem>>, vector<32x8xf32>
    %cst_23 = arith.constant dense<0.000000e+00> : vector<2x8xf32>
    %32 = tpu.matmul %30, %31, %cst_23 {dimension_numbers = #tpu.dot_dimension_numbers<[1], [0], [0], [1], [0, 0, 1, 1], [], []>} : vector<2x32xf32>, vector<32x8xf32>, vector<2x8xf32> -> vector<2x8xf32>
    %c0_24 = arith.constant 0 : index
    %c0_25 = arith.constant 0 : index
    %33 = vector.load %arg9[%c0_24, %c0_25] : memref<1x8xf32, #tpu.memory_space<vmem>>, vector<1x8xf32>
    %34 = vector.broadcast %33 : vector<1x8xf32> to vector<2x8xf32>
    %35 = arith.addf %32, %34 : vector<2x8xf32>
    %c0_26 = arith.constant 0 : index
    %c0_27 = arith.constant 0 : index
    %36 = vector.load %arg10[%c0_26, %c0_27] : memref<2x8xf32, #tpu.memory_space<vmem>>, vector<2x8xf32>
    tpu.vector_store %arg10[%c0_26, %c0_27], %35 {strides = array<i32>} : memref<2x8xf32, #tpu.memory_space<vmem>>, vector<2x8xf32>,
    return
  }
}

</mosaic_0001>

<bundles_post_ra>
// kernel: mm_student_forward.5
= control target key start
LH: loop header
LB: loop body
LE: loop exit
PB: predicated region body
PF: predicated region fallthrough
CT: control target
= control target key end

     0   :  { %s6100_s12 = smov 0   ;;  %s6102_s13 = smov 0   ;;  %s8306_s0 = inlined_call_operand.vmem [shape: f32[8,512,81], index: 0, kind: input, shape index: {}]   ;;  %s8307_s1 = inlined_call_operand.vmem [shape: f32[81,32], index: 1, kind: input, shape index: {}]   ;;  %s8308_s2 = inlined_call_operand.vmem [shape: f32[1,32], index: 2, kind: input, shape index: {}]   ;;  %s8309_s3 = inlined_call_operand.vmem [shape: f32[512,32], index: 3, kind: output, shape index: {}]  }
   0x1   :  { %s6104_s14 = smov 0  }
   0x2 LB: > { %s4465_s15 = sadd.s32 4294967295, %s6078_s14   ;;  %s6117_s16 = sadd.s32 1, %s6078_s14   ;;  %s6078_s14 = sphi %s6104_s14, %s8522_s14   ;;  %s6074_s13 = sphi %s6102_s13, %s8521_s13   ;;  %s6070_s12 = sphi %s6100_s12, %s8520_s12  }
   0x3   : > { %s17_s17 = ssub.s32 %s6078_s14, %s6117_s16  ;;  %s20_s18 = sadd.s32 1, %s6074_s13 }
   0x4   : > { %p18_p0 = scmp.eq.s32.totalorder %s17_s17, 0  ;;  %p27_p1 = scmp.ne.s32.totalorder %s6074_s13, %s6070_s12 }
   0x5   : > { %p28_p2 = scmp.eq.s32.totalorder %s6078_s14, 0  ;;  %p4468_p4 = scmp.ge.s32.totalorder %s6078_s14, 2 }
   0x6   : > { %s6126_s19 = scalar_select %p18_p0, %s6074_s13, %s20_s18  }
   0x7   : > { %p29_p3 = por %p28_p2, %p27_p1  ;;  %127 = sbr.rel (%p4468_p4) target bundleno = 146 (0x92), region = 24 }
   0xe   : > { %130 = sbr.rel (!%p29_p3) target bundleno = 146 (0x92), region = 28  ;;  %s132_s20 = sand.u32 (%p29_p3), 1, %s6074_s13  }
   0xf   : > { %s4967_s21 = sshll.u32 (%p29_p3), %s6078_s14, 8  ;;  %s4469_s22 = sshll.u32 (%p29_p3), %s132_s20, 11 }
  0x10   : > { %s6134_s25 = scalar_lea.vmem (%p29_p3), %s8306_s0, %s4967_s21  ;;  %s6139_s26 = scalar_lea.vmem (%p29_p3), [#allocation2], %s4469_s22 }
  0x11   : > { %v675_v0 = vld [vmem:[%s6134_s25] sm:$0xff] (%p29_p3)  ;;  %v677_v1 = vld [vmem:[%s6134_s25 + $0x8] sm:$0xff] (%p29_p3)  ;;  %v679_v2 = vld [vmem:[%s6134_s25 + $0x10] sm:$0xff] (%p29_p3) }
  0x12   : > { %676 = vst [vmem:[%s6139_s26] sm:$0xff] (%p29_p3), %v675_v0  ;;  %678 = vst [vmem:[%s6139_s26 + $0x8] sm:$0xff] (%p29_p3), %v677_v1  ;;  %v681_v3 = vld [vmem:[%s6134_s25 + $0x18] sm:$0xff] (%p29_p3)  ;;  %v683_v4 = vld [vmem:[%s6134_s25 + $0x20] sm:$0xff] (%p29_p3) }
  0x13   : > { %680 = vst [vmem:[%s6139_s26 + $0x10] sm:$0xff] (%p29_p3), %v679_v2  ;;  %v685_v5 = vld [vmem:[%s6134_s25 + $0x28] sm:$0xff] (%p29_p3)  ;;  %682 = vst [vmem:[%s6139_s26 + $0x18] sm:$0xff] (%p29_p3), %v681_v3  ;;  %v687_v6 = vld [vmem:[%s6134_s25 + $0x30] sm:$0xff] (%p29_p3) }
  0x14   : > { %684 = vst [vmem:[%s6139_s26 + $0x20] sm:$0xff] (%p29_p3), %v683_v4  ;;  %686 = vst [vmem:[%s6139_s26 + $0x28] sm:$0xff] (%p29_p3), %v685_v5  ;;  %v689_v7 = vld [vmem:[%s6134_s25 + $0x38] sm:$0xff] (%p29_p3)  ;;  %v691_v8 = vld [vmem:[%s6134_s25 + $0x40] sm:$0xff] (%p29_p3) }
  0x15   : > { %688 = vst [vmem:[%s6139_s26 + $0x30] sm:$0xff] %v687_v6  ;;  %690 = vst [vmem:[%s6139_s26 + $0x38] sm:$0xff] %v689_v7  ;;  %v693_v9 = vld [vmem:[%s6134_s25 + $0x48] sm:$0xff]  ;;  %v695_v10 = vld [vmem:[%s6134_s25 + $0x50] sm:$0xff] }
  0x16   : > { %692 = vst [vmem:[%s6139_s26 + $0x40] sm:$0xff] %v691_v8  ;;  %v697_v11 = vld [vmem:[%s6134_s25 + $0x58] sm:$0xff]  ;;  %694 = vst [vmem:[%s6139_s26 + $0x48] sm:$0xff] %v693_v9  ;;  %v699_v12 = vld [vmem:[%s6134_s25 + $0x60] sm:$0xff] }
  0x17   : > { %696 = vst [vmem:[%s6139_s26 + $0x50] sm:$0xff] %v695_v10  ;;  %698 = vst [vmem:[%s6139_s26 + $0x58] sm:$0xff] %v697_v11  ;;  %v701_v13 = vld [vmem:[%s6134_s25 + $0x68] sm:$0xff]  ;;  %v703_v14 = vld [vmem:[%s6134_s25 + $0x70] sm:$0xff] }
  0x18   : > { %700 = vst [vmem:[%s6139_s26 + $0x60] sm:$0xff] %v699_v12  ;;  %702 = vst [vmem:[%s6139_s26 + $0x68] sm:$0xff] %v701_v13  ;;  %v705_v15 = vld [vmem:[%s6134_s25 + $0x78] sm:$0xff]  ;;  %v707_v16 = vld [vmem:[%s6134_s25 + $0x80] sm:$0xff] }
  0x19   : > { %704 = vst [vmem:[%s6139_s26 + $0x70] sm:$0xff] %v703_v14  ;;  %v709_v17 = vld [vmem:[%s6134_s25 + $0x88] sm:$0xff]  ;;  %706 = vst [vmem:[%s6139_s26 + $0x78] sm:$0xff] %v705_v15  ;;  %v711_v18 = vld [vmem:[%s6134_s25 + $0x90] sm:$0xff] }
  0x1a   : > { %708 = vst [vmem:[%s6139_s26 + $0x80] sm:$0xff] %v707_v16  ;;  %710 = vst [vmem:[%s6139_s26 + $0x88] sm:$0xff] %v709_v17  ;;  %v713_v19 = vld [vmem:[%s6134_s25 + $0x98] sm:$0xff]  ;;  %v715_v20 = vld [vmem:[%s6134_s25 + $0xa0] sm:$0xff] }
  0x1b   : > { %712 = vst [vmem:[%s6139_s26 + $0x90] sm:$0xff] %v711_v18  ;;  %714 = vst [vmem:[%s6139_s26 + $0x98] sm:$0xff] %v713_v19  ;;  %v717_v21 = vld [vmem:[%s6134_s25 + $0xa8] sm:$0xff]  ;;  %v719_v22 = vld [vmem:[%s6134_s25 + $0xb0] sm:$0xff] }
  0x1c   : > { %716 = vst [vmem:[%s6139_s26 + $0xa0] sm:$0xff] %v715_v20  ;;  %v721_v23 = vld [vmem:[%s6134_s25 + $0xb8] sm:$0xff]  ;;  %718 = vst [vmem:[%s6139_s26 + $0xa8] sm:$0xff] %v717_v21  ;;  %v723_v24 = vld [vmem:[%s6134_s25 + $0xc0] sm:$0xff] }
  0x1d   : > { %720 = vst [vmem:[%s6139_s26 + $0xb0] sm:$0xff] %v719_v22  ;;  %722 = vst [vmem:[%s6139_s26 + $0xb8] sm:$0xff] %v721_v23  ;;  %v725_v25 = vld [vmem:[%s6134_s25 + $0xc8] sm:$0xff]  ;;  %v727_v26 = vld [vmem:[%s6134_s25 + $0xd0] sm:$0xff] }
  0x1e   : > { %724 = vst [vmem:[%s6139_s26 + $0xc0] sm:$0xff] %v723_v24  ;;  %726 = vst [vmem:[%s6139_s26 + $0xc8] sm:$0xff] %v725_v25  ;;  %v729_v27 = vld [vmem:[%s6134_s25 + $0xd8] sm:$0xff]  ;;  %v731_v28 = vld [vmem:[%s6134_s25 + $0xe0] sm:$0xff] }
  0x1f   : > { %728 = vst [vmem:[%s6139_s26 + $0xd0] sm:$0xff] %v727_v26  ;;  %v733_v29 = vld [vmem:[%s6134_s25 + $0xe8] sm:$0xff]  ;;  %730 = vst [vmem:[%s6139_s26 + $0xd8] sm:$0xff] %v729_v27  ;;  %v735_v30 = vld [vmem:[%s6134_s25 + $0xf0] sm:$0xff] }
  0x20   : > { %732 = vst [vmem:[%s6139_s26 + $0xe0] sm:$0xff] %v731_v28  ;;  %734 = vst [vmem:[%s6139_s26 + $0xe8] sm:$0xff] %v733_v29  ;;  %v737_v31 = vld [vmem:[%s6134_s25 + $0xf8] sm:$0xff]  ;;  %v739_v32 = vld [vmem:[%s6134_s25 + $0x200] sm:$0xff] }
  0x21   : > { %736 = vst [vmem:[%s6139_s26 + $0xf0] sm:$0xff] %v735_v30  ;;  %738 = vst [vmem:[%s6139_s26 + $0xf8] sm:$0xff] %v737_v31  ;;  %v741_v33 = vld [vmem:[%s6134_s25 + $0x208] sm:$0xff]  ;;  %v743_v34 = vld [vmem:[%s6134_s25 + $0x210] sm:$0xff] }
  0x22   : > { %740 = vst [vmem:[%s6139_s26 + $0x100] sm:$0xff] %v739_v32  ;;  %v745_v35 = vld [vmem:[%s6134_s25 + $0x218] sm:$0xff]  ;;  %742 = vst [vmem:[%s6139_s26 + $0x108] sm:$0xff] %v741_v33  ;;  %v747_v36 = vld [vmem:[%s6134_s25 + $0x220] sm:$0xff] }
  0x23   : > { %744 = vst [vmem:[%s6139_s26 + $0x110] sm:$0xff] %v743_v34  ;;  %746 = vst [vmem:[%s6139_s26 + $0x118] sm:$0xff] %v745_v35  ;;  %v749_v37 = vld [vmem:[%s6134_s25 + $0x228] sm:$0xff]  ;;  %v751_v38 = vld [vmem:[%s6134_s25 + $0x230] sm:$0xff] }
  0x24   : > { %748 = vst [vmem:[%s6139_s26 + $0x120] sm:$0xff] %v747_v36  ;;  %750 = vst [vmem:[%s6139_s26 + $0x128] sm:$0xff] %v749_v37  ;;  %v753_v39 = vld [vmem:[%s6134_s25 + $0x238] sm:$0xff]  ;;  %v755_v40 = vld [vmem:[%s6134_s25 + $0x240] sm:$0xff] }
  0x25   : > { %752 = vst [vmem:[%s6139_s26 + $0x130] sm:$0xff] %v751_v38  ;;  %v757_v41 = vld [vmem:[%s6134_s25 + $0x248] sm:$0xff]  ;;  %754 = vst [vmem:[%s6139_s26 + $0x138] sm:$0xff] %v753_v39  ;;  %v759_v42 = vld [vmem:[%s6134_s25 + $0x250] sm:$0xff] }
  0x26   : > { %756 = vst [vmem:[%s6139_s26 + $0x140] sm:$0xff] %v755_v40  ;;  %758 = vst [vmem:[%s6139_s26 + $0x148] sm:$0xff] %v757_v41  ;;  %v761_v43 = vld [vmem:[%s6134_s25 + $0x258] sm:$0xff]  ;;  %v763_v44 = vld [vmem:[%s6134_s25 + $0x260] sm:$0xff] }
  0x27   : > { %760 = vst [vmem:[%s6139_s26 + $0x150] sm:$0xff] %v759_v42  ;;  %762 = vst [vmem:[%s6139_s26 + $0x158] sm:$0xff] %v761_v43  ;;  %v765_v45 = vld [vmem:[%s6134_s25 + $0x268] sm:$0xff]  ;;  %v767_v46 = vld [vmem:[%s6134_s25 + $0x270] sm:$0xff] }
  0x28   : > { %764 = vst [vmem:[%s6139_s26 + $0x160] sm:$0xff] %v763_v44  ;;  %v769_v47 = vld [vmem:[%s6134_s25 + $0x278] sm:$0xff]  ;;  %766 = vst [vmem:[%s6139_s26 + $0x168] sm:$0xff] %v765_v45  ;;  %v771_v48 = vld [vmem:[%s6134_s25 + $0x280] sm:$0xff] }
  0x29   : > { %768 = vst [vmem:[%s6139_s26 + $0x170] sm:$0xff] %v767_v46  ;;  %770 = vst [vmem:[%s6139_s26 + $0x178] sm:$0xff] %v769_v47  ;;  %v773_v49 = vld [vmem:[%s6134_s25 + $0x288] sm:$0xff]  ;;  %v775_v50 = vld [vmem:[%s6134_s25 + $0x290] sm:$0xff] }
  0x2a   : > { %772 = vst [vmem:[%s6139_s26 + $0x180] sm:$0xff] %v771_v48  ;;  %774 = vst [vmem:[%s6139_s26 + $0x188] sm:$0xff] %v773_v49  ;;  %v777_v51 = vld [vmem:[%s6134_s25 + $0x298] sm:$0xff]  ;;  %v779_v52 = vld [vmem:[%s6134_s25 + $0x2a0] sm:$0xff] }
  0x2b   : > { %776 = vst [vmem:[%s6139_s26 + $0x190] sm:$0xff] %v775_v50  ;;  %v781_v53 = vld [vmem:[%s6134_s25 + $0x2a8] sm:$0xff]  ;;  %778 = vst [vmem:[%s6139_s26 + $0x198] sm:$0xff] %v777_v51  ;;  %v783_v54 = vld [vmem:[%s6134_s25 + $0x2b0] sm:$0xff] }
  0x2c   : > { %780 = vst [vmem:[%s6139_s26 + $0x1a0] sm:$0xff] %v779_v52  ;;  %782 = vst [vmem:[%s6139_s26 + $0x1a8] sm:$0xff] %v781_v53  ;;  %v785_v55 = vld [vmem:[%s6134_s25 + $0x2b8] sm:$0xff]  ;;  %v787_v56 = vld [vmem:[%s6134_s25 + $0x2c0] sm:$0xff] }
  0x2d   : > { %784 = vst [vmem:[%s6139_s26 + $0x1b0] sm:$0xff] %v783_v54  ;;  %786 = vst [vmem:[%s6139_s26 + $0x1b8] sm:$0xff] %v785_v55  ;;  %v789_v57 = vld [vmem:[%s6134_s25 + $0x2c8] sm:$0xff]  ;;  %v791_v58 = vld [vmem:[%s6134_s25 + $0x2d0] sm:$0xff] }
  0x2e   : > { %788 = vst [vmem:[%s6139_s26 + $0x1c0] sm:$0xff] %v787_v56  ;;  %v793_v59 = vld [vmem:[%s6134_s25 + $0x2d8] sm:$0xff]  ;;  %790 = vst [vmem:[%s6139_s26 + $0x1c8] sm:$0xff] %v789_v57  ;;  %v795_v60 = vld [vmem:[%s6134_s25 + $0x2e0] sm:$0xff] }
  0x2f   : > { %792 = vst [vmem:[%s6139_s26 + $0x1d0] sm:$0xff] %v791_v58  ;;  %794 = vst [vmem:[%s6139_s26 + $0x1d8] sm:$0xff] %v793_v59  ;;  %v797_v61 = vld [vmem:[%s6134_s25 + $0x2e8] sm:$0xff]  ;;  %v799_v62 = vld [vmem:[%s6134_s25 + $0x2f0] sm:$0xff] }
  0x30   : > { %796 = vst [vmem:[%s6139_s26 + $0x1e0] sm:$0xff] %v795_v60  ;;  %798 = vst [vmem:[%s6139_s26 + $0x1e8] sm:$0xff] %v797_v61  ;;  %v801_v63 = vld [vmem:[%s6134_s25 + $0x2f8] sm:$0xff]  ;;  %v803_v0 = vld [vmem:[%s6134_s25 + $0x400] sm:$0xff] }
  0x31   : > { %800 = vst [vmem:[%s6139_s26 + $0x1f0] sm:$0xff] %v799_v62  ;;  %v805_v1 = vld [vmem:[%s6134_s25 + $0x408] sm:$0xff]  ;;  %802 = vst [vmem:[%s6139_s26 + $0x1f8] sm:$0xff] %v801_v63  ;;  %v807_v2 = vld [vmem:[%s6134_s25 + $0x410] sm:$0xff] }
  0x32   : > { %804 = vst [vmem:[%s6139_s26 + $0x200] sm:$0xff] %v803_v0  ;;  %806 = vst [vmem:[%s6139_s26 + $0x208] sm:$0xff] %v805_v1  ;;  %v809_v3 = vld [vmem:[%s6134_s25 + $0x418] sm:$0xff]  ;;  %v811_v4 = vld [vmem:[%s6134_s25 + $0x420] sm:$0xff] }
  0x33   : > { %808 = vst [vmem:[%s6139_s26 + $0x210] sm:$0xff] %v807_v2  ;;  %810 = vst [vmem:[%s6139_s26 + $0x218] sm:$0xff] %v809_v3  ;;  %v813_v5 = vld [vmem:[%s6134_s25 + $0x428] sm:$0xff]  ;;  %v815_v6 = vld [vmem:[%s6134_s25 + $0x430] sm:$0xff] }
  0x34   : > { %812 = vst [vmem:[%s6139_s26 + $0x220] sm:$0xff] %v811_v4  ;;  %v817_v7 = vld [vmem:[%s6134_s25 + $0x438] sm:$0xff]  ;;  %814 = vst [vmem:[%s6139_s26 + $0x228] sm:$0xff] %v813_v5  ;;  %v819_v8 = vld [vmem:[%s6134_s25 + $0x440] sm:$0xff] }
  0x35   : > { %816 = vst [vmem:[%s6139_s26 + $0x230] sm:$0xff] %v815_v6  ;;  %818 = vst [vmem:[%s6139_s26 + $0x238] sm:$0xff] %v817_v7  ;;  %v821_v9 = vld [vmem:[%s6134_s25 + $0x448] sm:$0xff]  ;;  %v823_v10 = vld [vmem:[%s6134_s25 + $0x450] sm:$0xff] }
  0x36   : > { %820 = vst [vmem:[%s6139_s26 + $0x240] sm:$0xff] %v819_v8  ;;  %822 = vst [vmem:[%s6139_s26 + $0x248] sm:$0xff] %v821_v9  ;;  %v825_v11 = vld [vmem:[%s6134_s25 + $0x458] sm:$0xff]  ;;  %v827_v12 = vld [vmem:[%s6134_s25 + $0x460] sm:$0xff] }
  0x37   : > { %824 = vst [vmem:[%s6139_s26 + $0x250] sm:$0xff] %v823_v10  ;;  %v829_v13 = vld [vmem:[%s6134_s25 + $0x468] sm:$0xff]  ;;  %826 = vst [vmem:[%s6139_s26 + $0x258] sm:$0xff] %v825_v11  ;;  %v831_v14 = vld [vmem:[%s6134_s25 + $0x470] sm:$0xff] }
  0x38   : > { %828 = vst [vmem:[%s6139_s26 + $0x260] sm:$0xff] %v827_v12  ;;  %830 = vst [vmem:[%s6139_s26 + $0x268] sm:$0xff] %v829_v13  ;;  %v833_v15 = vld [vmem:[%s6134_s25 + $0x478] sm:$0xff]  ;;  %v835_v16 = vld [vmem:[%s6134_s25 + $0x480] sm:$0xff] }
  0x39   : > { %832 = vst [vmem:[%s6139_s26 + $0x270] sm:$0xff] %v831_v14  ;;  %834 = vst [vmem:[%s6139_s26 + $0x278] sm:$0xff] %v833_v15  ;;  %v837_v17 = vld [vmem:[%s6134_s25 + $0x488] sm:$0xff]  ;;  %v839_v18 = vld [vmem:[%s6134_s25 + $0x490] sm:$0xff] }
  0x3a   : > { %836 = vst [vmem:[%s6139_s26 + $0x280] sm:$0xff] %v835_v16  ;;  %v841_v19 = vld [vmem:[%s6134_s25 + $0x498] sm:$0xff]  ;;  %838 = vst [vmem:[%s6139_s26 + $0x288] sm:$0xff] %v837_v17  ;;  %v843_v20 = vld [vmem:[%s6134_s25 + $0x4a0] sm:$0xff] }
  0x3b   : > { %840 = vst [vmem:[%s6139_s26 + $0x290] sm:$0xff] %v839_v18  ;;  %842 = vst [vmem:[%s6139_s26 + $0x298] sm:$0xff] %v841_v19  ;;  %v845_v21 = vld [vmem:[%s6134_s25 + $0x4a8] sm:$0xff]  ;;  %v847_v22 = vld [vmem:[%s6134_s25 + $0x4b0] sm:$0xff] }
  0x3c   : > { %844 = vst [vmem:[%s6139_s26 + $0x2a0] sm:$0xff] %v843_v20  ;;  %846 = vst [vmem:[%s6139_s26 + $0x2a8] sm:$0xff] %v845_v21  ;;  %v849_v23 = vld [vmem:[%s6134_s25 + $0x4b8] sm:$0xff]  ;;  %v851_v24 = vld [vmem:[%s6134_s25 + $0x4c0] sm:$0xff] }
  0x3d   : > { %848 = vst [vmem:[%s6139_s26 + $0x2b0] sm:$0xff] %v847_v22  ;;  %v853_v25 = vld [vmem:[%s6134_s25 + $0x4c8] sm:$0xff]  ;;  %850 = vst [vmem:[%s6139_s26 + $0x2b8] sm:$0xff] %v849_v23  ;;  %v855_v26 = vld [vmem:[%s6134_s25 + $0x4d0] sm:$0xff] }
  0x3e   : > { %852 = vst [vmem:[%s6139_s26 + $0x2c0] sm:$0xff] %v851_v24  ;;  %854 = vst [vmem:[%s6139_s26 + $0x2c8] sm:$0xff] %v853_v25  ;;  %v857_v27 = vld [vmem:[%s6134_s25 + $0x4d8] sm:$0xff]  ;;  %v859_v28 = vld [vmem:[%s6134_s25 + $0x4e0] sm:$0xff] }
  0x3f   : > { %856 = vst [vmem:[%s6139_s26 + $0x2d0] sm:$0xff] %v855_v26  ;;  %858 = vst [vmem:[%s6139_s26 + $0x2d8] sm:$0xff] %v857_v27  ;;  %v861_v29 = vld [vmem:[%s6134_s25 + $0x4e8] sm:$0xff]  ;;  %v863_v30 = vld [vmem:[%s6134_s25 + $0x4f0] sm:$0xff] }
  0x40   : > { %860 = vst [vmem:[%s6139_s26 + $0x2e0] sm:$0xff] %v859_v28  ;;  %v865_v31 = vld [vmem:[%s6134_s25 + $0x4f8] sm:$0xff]  ;;  %862 = vst [vmem:[%s6139_s26 + $0x2e8] sm:$0xff] %v861_v29  ;;  %v867_v32 = vld [vmem:[%s6134_s25 + $0x600] sm:$0xff] }
  0x41   : > { %864 = vst [vmem:[%s6139_s26 + $0x2f0] sm:$0xff] %v863_v30  ;;  %866 = vst [vmem:[%s6139_s26 + $0x2f8] sm:$0xff] %v865_v31  ;;  %v869_v33 = vld [vmem:[%s6134_s25 + $0x608] sm:$0xff]  ;;  %v871_v34 = vld [vmem:[%s6134_s25 + $0x610] sm:$0xff] }
  0x42   : > { %868 = vst [vmem:[%s6139_s26 + $0x300] sm:$0xff] %v867_v32  ;;  %870 = vst [vmem:[%s6139_s26 + $0x308] sm:$0xff] %v869_v33  ;;  %v873_v35 = vld [vmem:[%s6134_s25 + $0x618] sm:$0xff]  ;;  %v875_v36 = vld [vmem:[%s6134_s25 + $0x620] sm:$0xff] }
  0x43   : > { %872 = vst [vmem:[%s6139_s26 + $0x310] sm:$0xff] %v871_v34  ;;  %v877_v37 = vld [vmem:[%s6134_s25 + $0x628] sm:$0xff]  ;;  %874 = vst [vmem:[%s6139_s26 + $0x318] sm:$0xff] %v873_v35  ;;  %v879_v38 = vld [vmem:[%s6134_s25 + $0x630] sm:$0xff] }
  0x44   : > { %876 = vst [vmem:[%s6139_s26 + $0x320] sm:$0xff] %v875_v36  ;;  %878 = vst [vmem:[%s6139_s26 + $0x328] sm:$0xff] %v877_v37  ;;  %v881_v39 = vld [vmem:[%s6134_s25 + $0x638] sm:$0xff]  ;;  %v883_v40 = vld [vmem:[%s6134_s25 + $0x640] sm:$0xff] }
  0x45   : > { %880 = vst [vmem:[%s6139_s26 + $0x330] sm:$0xff] %v879_v38  ;;  %882 = vst [vmem:[%s6139_s26 + $0x338] sm:$0xff] %v881_v39  ;;  %v885_v41 = vld [vmem:[%s6134_s25 + $0x648] sm:$0xff]  ;;  %v887_v42 = vld [vmem:[%s6134_s25 + $0x650] sm:$0xff] }
  0x46   : > { %884 = vst [vmem:[%s6139_s26 + $0x340] sm:$0xff] %v883_v40  ;;  %v889_v43 = vld [vmem:[%s6134_s25 + $0x658] sm:$0xff]  ;;  %886 = vst [vmem:[%s6139_s26 + $0x348] sm:$0xff] %v885_v41  ;;  %v891_v44 = vld [vmem:[%s6134_s25 + $0x660] sm:$0xff] }
  0x47   : > { %888 = vst [vmem:[%s6139_s26 + $0x350] sm:$0xff] %v887_v42  ;;  %890 = vst [vmem:[%s6139_s26 + $0x358] sm:$0xff] %v889_v43  ;;  %v893_v45 = vld [vmem:[%s6134_s25 + $0x668] sm:$0xff]  ;;  %v895_v46 = vld [vmem:[%s6134_s25 + $0x670] sm:$0xff] }
  0x48   : > { %892 = vst [vmem:[%s6139_s26 + $0x360] sm:$0xff] %v891_v44  ;;  %894 = vst [vmem:[%s6139_s26 + $0x368] sm:$0xff] %v893_v45  ;;  %v897_v47 = vld [vmem:[%s6134_s25 + $0x678] sm:$0xff]  ;;  %v899_v48 = vld [vmem:[%s6134_s25 + $0x680] sm:$0xff] }
  0x49   : > { %896 = vst [vmem:[%s6139_s26 + $0x370] sm:$0xff] %v895_v46  ;;  %v901_v49 = vld [vmem:[%s6134_s25 + $0x688] sm:$0xff]  ;;  %898 = vst [vmem:[%s6139_s26 + $0x378] sm:$0xff] %v897_v47  ;;  %v903_v50 = vld [vmem:[%s6134_s25 + $0x690] sm:$0xff] }
  0x4a   : > { %900 = vst [vmem:[%s6139_s26 + $0x380] sm:$0xff] %v899_v48  ;;  %902 = vst [vmem:[%s6139_s26 + $0x388] sm:$0xff] %v901_v49  ;;  %v905_v51 = vld [vmem:[%s6134_s25 + $0x698] sm:$0xff]  ;;  %v907_v52 = vld [vmem:[%s6134_s25 + $0x6a0] sm:$0xff] }
  0x4b   : > { %904 = vst [vmem:[%s6139_s26 + $0x390] sm:$0xff] %v903_v50  ;;  %906 = vst [vmem:[%s6139_s26 + $0x398] sm:$0xff] %v905_v51  ;;  %v909_v53 = vld [vmem:[%s6134_s25 + $0x6a8] sm:$0xff]  ;;  %v911_v54 = vld [vmem:[%s6134_s25 + $0x6b0] sm:$0xff] }
  0x4c   : > { %908 = vst [vmem:[%s6139_s26 + $0x3a0] sm:$0xff] %v907_v52  ;;  %v913_v55 = vld [vmem:[%s6134_s25 + $0x6b8] sm:$0xff]  ;;  %910 = vst [vmem:[%s6139_s26 + $0x3a8] sm:$0xff] %v909_v53  ;;  %v915_v56 = vld [vmem:[%s6134_s25 + $0x6c0] sm:$0xff] }
  0x4d   : > { %912 = vst [vmem:[%s6139_s26 + $0x3b0] sm:$0xff] %v911_v54  ;;  %914 = vst [vmem:[%s6139_s26 + $0x3b8] sm:$0xff] %v913_v55  ;;  %v917_v57 = vld [vmem:[%s6134_s25 + $0x6c8] sm:$0xff]  ;;  %v919_v58 = vld [vmem:[%s6134_s25 + $0x6d0] sm:$0xff] }
  0x4e   : > { %916 = vst [vmem:[%s6139_s26 + $0x3c0] sm:$0xff] %v915_v56  ;;  %918 = vst [vmem:[%s6139_s26 + $0x3c8] sm:$0xff] %v917_v57  ;;  %v921_v59 = vld [vmem:[%s6134_s25 + $0x6d8] sm:$0xff]  ;;  %v923_v60 = vld [vmem:[%s6134_s25 + $0x6e0] sm:$0xff] }
  0x4f   : > { %920 = vst [vmem:[%s6139_s26 + $0x3d0] sm:$0xff] %v919_v58  ;;  %v925_v61 = vld [vmem:[%s6134_s25 + $0x6e8] sm:$0xff]  ;;  %922 = vst [vmem:[%s6139_s26 + $0x3d8] sm:$0xff] %v921_v59  ;;  %v927_v62 = vld [vmem:[%s6134_s25 + $0x6f0] sm:$0xff] }
  0x50   : > { %924 = vst [vmem:[%s6139_s26 + $0x3e0] sm:$0xff] %v923_v60  ;;  %926 = vst [vmem:[%s6139_s26 + $0x3e8] sm:$0xff] %v925_v61  ;;  %v929_v63 = vld [vmem:[%s6134_s25 + $0x6f8] sm:$0xff]  ;;  %v931_v0 = vld [vmem:[%s6134_s25 + $0x800] sm:$0xff] }
  0x51   : > { %928 = vst [vmem:[%s6139_s26 + $0x3f0] sm:$0xff] %v927_v62  ;;  %930 = vst [vmem:[%s6139_s26 + $0x3f8] sm:$0xff] %v929_v63  ;;  %v933_v1 = vld [vmem:[%s6134_s25 + $0x808] sm:$0xff]  ;;  %v935_v2 = vld [vmem:[%s6134_s25 + $0x810] sm:$0xff] }
  0x52   : > { %932 = vst [vmem:[%s6139_s26 + $0x400] sm:$0xff] %v931_v0  ;;  %v937_v3 = vld [vmem:[%s6134_s25 + $0x818] sm:$0xff]  ;;  %934 = vst [vmem:[%s6139_s26 + $0x408] sm:$0xff] %v933_v1  ;;  %v939_v4 = vld [vmem:[%s6134_s25 + $0x820] sm:$0xff] }
  0x53   : > { %936 = vst [vmem:[%s6139_s26 + $0x410] sm:$0xff] %v935_v2  ;;  %938 = vst [vmem:[%s6139_s26 + $0x418] sm:$0xff] %v937_v3  ;;  %v941_v5 = vld [vmem:[%s6134_s25 + $0x828] sm:$0xff]  ;;  %v943_v6 = vld [vmem:[%s6134_s25 + $0x830] sm:$0xff] }
  0x54   : > { %940 = vst [vmem:[%s6139_s26 + $0x420] sm:$0xff] %v939_v4  ;;  %942 = vst [vmem:[%s6139_s26 + $0x428] sm:$0xff] %v941_v5  ;;  %v945_v7 = vld [vmem:[%s6134_s25 + $0x838] sm:$0xff]  ;;  %v947_v8 = vld [vmem:[%s6134_s25 + $0x840] sm:$0xff] }
  0x55   : > { %944 = vst [vmem:[%s6139_s26 + $0x430] sm:$0xff] %v943_v6  ;;  %v949_v9 = vld [vmem:[%s6134_s25 + $0x848] sm:$0xff]  ;;  %946 = vst [vmem:[%s6139_s26 + $0x438] sm:$0xff] %v945_v7  ;;  %v951_v10 = vld [vmem:[%s6134_s25 + $0x850] sm:$0xff] }
  0x56   : > { %948 = vst [vmem:[%s6139_s26 + $0x440] sm:$0xff] %v947_v8  ;;  %950 = vst [vmem:[%s6139_s26 + $0x448] sm:$0xff] %v949_v9  ;;  %v953_v11 = vld [vmem:[%s6134_s25 + $0x858] sm:$0xff]  ;;  %v955_v12 = vld [vmem:[%s6134_s25 + $0x860] sm:$0xff] }
  0x57   : > { %952 = vst [vmem:[%s6139_s26 + $0x450] sm:$0xff] %v951_v10  ;;  %954 = vst [vmem:[%s6139_s26 + $0x458] sm:$0xff] %v953_v11  ;;  %v957_v13 = vld [vmem:[%s6134_s25 + $0x868] sm:$0xff]  ;;  %v959_v14 = vld [vmem:[%s6134_s25 + $0x870] sm:$0xff] }
  0x58   : > { %956 = vst [vmem:[%s6139_s26 + $0x460] sm:$0xff] %v955_v12  ;;  %v961_v15 = vld [vmem:[%s6134_s25 + $0x878] sm:$0xff]  ;;  %958 = vst [vmem:[%s6139_s26 + $0x468] sm:$0xff] %v957_v13  ;;  %v963_v16 = vld [vmem:[%s6134_s25 + $0x880] sm:$0xff] }
  0x59   : > { %960 = vst [vmem:[%s6139_s26 + $0x470] sm:$0xff] %v959_v14  ;;  %962 = vst [vmem:[%s6139_s26 + $0x478] sm:$0xff] %v961_v15  ;;  %v965_v17 = vld [vmem:[%s6134_s25 + $0x888] sm:$0xff]  ;;  %v967_v18 = vld [vmem:[%s6134_s25 + $0x890] sm:$0xff] }
  0x5a   : > { %964 = vst [vmem:[%s6139_s26 + $0x480] sm:$0xff] %v963_v16  ;;  %966 = vst [vmem:[%s6139_s26 + $0x488] sm:$0xff] %v965_v17  ;;  %v969_v19 = vld [vmem:[%s6134_s25 + $0x898] sm:$0xff]  ;;  %v971_v20 = vld [vmem:[%s6134_s25 + $0x8a0] sm:$0xff] }
  0x5b   : > { %968 = vst [vmem:[%s6139_s26 + $0x490] sm:$0xff] %v967_v18  ;;  %v973_v21 = vld [vmem:[%s6134_s25 + $0x8a8] sm:$0xff]  ;;  %970 = vst [vmem:[%s6139_s26 + $0x498] sm:$0xff] %v969_v19  ;;  %v975_v22 = vld [vmem:[%s6134_s25 + $0x8b0] sm:$0xff] }
  0x5c   : > { %972 = vst [vmem:[%s6139_s26 + $0x4a0] sm:$0xff] %v971_v20  ;;  %974 = vst [vmem:[%s6139_s26 + $0x4a8] sm:$0xff] %v973_v21  ;;  %v977_v23 = vld [vmem:[%s6134_s25 + $0x8b8] sm:$0xff]  ;;  %v979_v24 = vld [vmem:[%s6134_s25 + $0x8c0] sm:$0xff] }
  0x5d   : > { %976 = vst [vmem:[%s6139_s26 + $0x4b0] sm:$0xff] %v975_v22  ;;  %978 = vst [vmem:[%s6139_s26 + $0x4b8] sm:$0xff] %v977_v23  ;;  %v981_v25 = vld [vmem:[%s6134_s25 + $0x8c8] sm:$0xff]  ;;  %v983_v26 = vld [vmem:[%s6134_s25 + $0x8d0] sm:$0xff] }
  0x5e   : > { %980 = vst [vmem:[%s6139_s26 + $0x4c0] sm:$0xff] %v979_v24  ;;  %v985_v27 = vld [vmem:[%s6134_s25 + $0x8d8] sm:$0xff]  ;;  %982 = vst [vmem:[%s6139_s26 + $0x4c8] sm:$0xff] %v981_v25  ;;  %v987_v28 = vld [vmem:[%s6134_s25 + $0x8e0] sm:$0xff] }
  0x5f   : > { %984 = vst [vmem:[%s6139_s26 + $0x4d0] sm:$0xff] %v983_v26  ;;  %986 = vst [vmem:[%s6139_s26 + $0x4d8] sm:$0xff] %v985_v27  ;;  %v989_v29 = vld [vmem:[%s6134_s25 + $0x8e8] sm:$0xff]  ;;  %v991_v30 = vld [vmem:[%s6134_s25 + $0x8f0] sm:$0xff] }
  0x60   : > { %988 = vst [vmem:[%s6139_s26 + $0x4e0] sm:$0xff] %v987_v28  ;;  %990 = vst [vmem:[%s6139_s26 + $0x4e8] sm:$0xff] %v989_v29  ;;  %v993_v31 = vld [vmem:[%s6134_s25 + $0x8f8] sm:$0xff]  ;;  %v995_v32 = vld [vmem:[%s6134_s25 + $0xa00] sm:$0xff] }
  0x61   : > { %992 = vst [vmem:[%s6139_s26 + $0x4f0] sm:$0xff] %v991_v30  ;;  %v997_v33 = vld [vmem:[%s6134_s25 + $0xa08] sm:$0xff]  ;;  %994 = vst [vmem:[%s6139_s26 + $0x4f8] sm:$0xff] %v993_v31  ;;  %v999_v34 = vld [vmem:[%s6134_s25 + $0xa10] sm:$0xff] }
  0x62   : > { %996 = vst [vmem:[%s6139_s26 + $0x500] sm:$0xff] %v995_v32  ;;  %998 = vst [vmem:[%s6139_s26 + $0x508] sm:$0xff] %v997_v33  ;;  %v1001_v35 = vld [vmem:[%s6134_s25 + $0xa18] sm:$0xff]  ;;  %v1003_v36 = vld [vmem:[%s6134_s25 + $0xa20] sm:$0xff] }
  0x63   : > { %1000 = vst [vmem:[%s6139_s26 + $0x510] sm:$0xff] %v999_v34  ;;  %1002 = vst [vmem:[%s6139_s26 + $0x518] sm:$0xff] %v1001_v35  ;;  %v1005_v37 = vld [vmem:[%s6134_s25 + $0xa28] sm:$0xff]  ;;  %v1007_v38 = vld [vmem:[%s6134_s25 + $0xa30] sm:$0xff] }
  0x64   : > { %1004 = vst [vmem:[%s6139_s26 + $0x520] sm:$0xff] %v1003_v36  ;;  %v1009_v39 = vld [vmem:[%s6134_s25 + $0xa38] sm:$0xff]  ;;  %1006 = vst [vmem:[%s6139_s26 + $0x528] sm:$0xff] %v1005_v37  ;;  %v1011_v40 = vld [vmem:[%s6134_s25 + $0xa40] sm:$0xff] }
  0x65   : > { %1008 = vst [vmem:[%s6139_s26 + $0x530] sm:$0xff] %v1007_v38  ;;  %1010 = vst [vmem:[%s6139_s26 + $0x538] sm:$0xff] %v1009_v39  ;;  %v1013_v41 = vld [vmem:[%s6134_s25 + $0xa48] sm:$0xff]  ;;  %v1015_v42 = vld [vmem:[%s6134_s25 + $0xa50] sm:$0xff] }
  0x66   : > { %1012 = vst [vmem:[%s6139_s26 + $0x540] sm:$0xff] %v1011_v40  ;;  %1014 = vst [vmem:[%s6139_s26 + $0x548] sm:$0xff] %v1013_v41  ;;  %v1017_v43 = vld [vmem:[%s6134_s25 + $0xa58] sm:$0xff]  ;;  %v1019_v44 = vld [vmem:[%s6134_s25 + $0xa60] sm:$0xff] }
  0x67   : > { %1016 = vst [vmem:[%s6139_s26 + $0x550] sm:$0xff] %v1015_v42  ;;  %v1021_v45 = vld [vmem:[%s6134_s25 + $0xa68] sm:$0xff]  ;;  %1018 = vst [vmem:[%s6139_s26 + $0x558] sm:$0xff] %v1017_v43  ;;  %v1023_v46 = vld [vmem:[%s6134_s25 + $0xa70] sm:$0xff] }
  0x68   : > { %1020 = vst [vmem:[%s6139_s26 + $0x560] sm:$0xff] %v1019_v44  ;;  %1022 = vst [vmem:[%s6139_s26 + $0x568] sm:$0xff] %v1021_v45  ;;  %v1025_v47 = vld [vmem:[%s6134_s25 + $0xa78] sm:$0xff]  ;;  %v1027_v48 = vld [vmem:[%s6134_s25 + $0xa80] sm:$0xff] }
  0x69   : > { %1024 = vst [vmem:[%s6139_s26 + $0x570] sm:$0xff] %v1023_v46  ;;  %1026 = vst [vmem:[%s6139_s26 + $0x578] sm:$0xff] %v1025_v47  ;;  %v1029_v49 = vld [vmem:[%s6134_s25 + $0xa88] sm:$0xff]  ;;  %v1031_v50 = vld [vmem:[%s6134_s25 + $0xa90] sm:$0xff] }
  0x6a   : > { %1028 = vst [vmem:[%s6139_s26 + $0x580] sm:$0xff] %v1027_v48  ;;  %v1033_v51 = vld [vmem:[%s6134_s25 + $0xa98] sm:$0xff]  ;;  %1030 = vst [vmem:[%s6139_s26 + $0x588] sm:$0xff] %v1029_v49  ;;  %v1035_v52 = vld [vmem:[%s6134_s25 + $0xaa0] sm:$0xff] }
  0x6b   : > { %1032 = vst [vmem:[%s6139_s26 + $0x590] sm:$0xff] %v1031_v50  ;;  %1034 = vst [vmem:[%s6139_s26 + $0x598] sm:$0xff] %v1033_v51  ;;  %v1037_v53 = vld [vmem:[%s6134_s25 + $0xaa8] sm:$0xff]  ;;  %v1039_v54 = vld [vmem:[%s6134_s25 + $0xab0] sm:$0xff] }
  0x6c   : > { %1036 = vst [vmem:[%s6139_s26 + $0x5a0] sm:$0xff] %v1035_v52  ;;  %1038 = vst [vmem:[%s6139_s26 + $0x5a8] sm:$0xff] %v1037_v53  ;;  %v1041_v55 = vld [vmem:[%s6134_s25 + $0xab8] sm:$0xff]  ;;  %v1043_v56 = vld [vmem:[%s6134_s25 + $0xac0] sm:$0xff] }
  0x6d   : > { %1040 = vst [vmem:[%s6139_s26 + $0x5b0] sm:$0xff] %v1039_v54  ;;  %v1045_v57 = vld [vmem:[%s6134_s25 + $0xac8] sm:$0xff]  ;;  %1042 = vst [vmem:[%s6139_s26 + $0x5b8] sm:$0xff] %v1041_v55  ;;  %v1047_v58 = vld [vmem:[%s6134_s25 + $0xad0] sm:$0xff] }
  0x6e   : > { %1044 = vst [vmem:[%s6139_s26 + $0x5c0] sm:$0xff] %v1043_v56  ;;  %1046 = vst [vmem:[%s6139_s26 + $0x5c8] sm:$0xff] %v1045_v57  ;;  %v1049_v59 = vld [vmem:[%s6134_s25 + $0xad8] sm:$0xff]  ;;  %v1051_v60 = vld [vmem:[%s6134_s25 + $0xae0] sm:$0xff] }
  0x6f   : > { %1048 = vst [vmem:[%s6139_s26 + $0x5d0] sm:$0xff] %v1047_v58  ;;  %1050 = vst [vmem:[%s6139_s26 + $0x5d8] sm:$0xff] %v1049_v59  ;;  %v1053_v61 = vld [vmem:[%s6134_s25 + $0xae8] sm:$0xff]  ;;  %v1055_v62 = vld [vmem:[%s6134_s25 + $0xaf0] sm:$0xff] }
  0x70   : > { %1052 = vst [vmem:[%s6139_s26 + $0x5e0] sm:$0xff] %v1051_v60  ;;  %v1057_v63 = vld [vmem:[%s6134_s25 + $0xaf8] sm:$0xff]  ;;  %1054 = vst [vmem:[%s6139_s26 + $0x5e8] sm:$0xff] %v1053_v61  ;;  %v1059_v0 = vld [vmem:[%s6134_s25 + $0xc00] sm:$0xff] }
  0x71   : > { %1056 = vst [vmem:[%s6139_s26 + $0x5f0] sm:$0xff] %v1055_v62  ;;  %1058 = vst [vmem:[%s6139_s26 + $0x5f8] sm:$0xff] %v1057_v63  ;;  %v1061_v1 = vld [vmem:[%s6134_s25 + $0xc08] sm:$0xff]  ;;  %v1063_v2 = vld [vmem:[%s6134_s25 + $0xc10] sm:$0xff] }
  0x72   : > { %1060 = vst [vmem:[%s6139_s26 + $0x600] sm:$0xff] %v1059_v0  ;;  %1062 = vst [vmem:[%s6139_s26 + $0x608] sm:$0xff] %v1061_v1  ;;  %v1065_v3 = vld [vmem:[%s6134_s25 + $0xc18] sm:$0xff]  ;;  %v1067_v4 = vld [vmem:[%s6134_s25 + $0xc20] sm:$0xff] }
  0x73   : > { %1064 = vst [vmem:[%s6139_s26 + $0x610] sm:$0xff] %v1063_v2  ;;  %v1069_v5 = vld [vmem:[%s6134_s25 + $0xc28] sm:$0xff]  ;;  %1066 = vst [vmem:[%s6139_s26 + $0x618] sm:$0xff] %v1065_v3  ;;  %v1071_v6 = vld [vmem:[%s6134_s25 + $0xc30] sm:$0xff] }
  0x74   : > { %1068 = vst [vmem:[%s6139_s26 + $0x620] sm:$0xff] %v1067_v4  ;;  %1070 = vst [vmem:[%s6139_s26 + $0x628] sm:$0xff] %v1069_v5  ;;  %v1073_v7 = vld [vmem:[%s6134_s25 + $0xc38] sm:$0xff]  ;;  %v1075_v8 = vld [vmem:[%s6134_s25 + $0xc40] sm:$0xff] }
  0x75   : > { %1072 = vst [vmem:[%s6139_s26 + $0x630] sm:$0xff] %v1071_v6  ;;  %1074 = vst [vmem:[%s6139_s26 + $0x638] sm:$0xff] %v1073_v7  ;;  %v1077_v9 = vld [vmem:[%s6134_s25 + $0xc48] sm:$0xff]  ;;  %v1079_v10 = vld [vmem:[%s6134_s25 + $0xc50] sm:$0xff] }
  0x76   : > { %1076 = vst [vmem:[%s6139_s26 + $0x640] sm:$0xff] %v1075_v8  ;;  %v1081_v11 = vld [vmem:[%s6134_s25 + $0xc58] sm:$0xff]  ;;  %1078 = vst [vmem:[%s6139_s26 + $0x648] sm:$0xff] %v1077_v9  ;;  %v1083_v12 = vld [vmem:[%s6134_s25 + $0xc60] sm:$0xff] }
  0x77   : > { %1080 = vst [vmem:[%s6139_s26 + $0x650] sm:$0xff] %v1079_v10  ;;  %1082 = vst [vmem:[%s6139_s26 + $0x658] sm:$0xff] %v1081_v11  ;;  %v1085_v13 = vld [vmem:[%s6134_s25 + $0xc68] sm:$0xff]  ;;  %v1087_v14 = vld [vmem:[%s6134_s25 + $0xc70] sm:$0xff] }
  0x78   : > { %1084 = vst [vmem:[%s6139_s26 + $0x660] sm:$0xff] %v1083_v12  ;;  %1086 = vst [vmem:[%s6139_s26 + $0x668] sm:$0xff] %v1085_v13  ;;  %v1089_v15 = vld [vmem:[%s6134_s25 + $0xc78] sm:$0xff]  ;;  %v1091_v16 = vld [vmem:[%s6134_s25 + $0xc80] sm:$0xff] }
  0x79   : > { %1088 = vst [vmem:[%s6139_s26 + $0x670] sm:$0xff] %v1087_v14  ;;  %v1093_v17 = vld [vmem:[%s6134_s25 + $0xc88] sm:$0xff]  ;;  %1090 = vst [vmem:[%s6139_s26 + $0x678] sm:$0xff] %v1089_v15  ;;  %v1095_v18 = vld [vmem:[%s6134_s25 + $0xc90] sm:$0xff] }
  0x7a   : > { %1092 = vst [vmem:[%s6139_s26 + $0x680] sm:$0xff] %v1091_v16  ;;  %1094 = vst [vmem:[%s6139_s26 + $0x688] sm:$0xff] %v1093_v17  ;;  %v1097_v19 = vld [vmem:[%s6134_s25 + $0xc98] sm:$0xff]  ;;  %v1099_v20 = vld [vmem:[%s6134_s25 + $0xca0] sm:$0xff] }
  0x7b   : > { %1096 = vst [vmem:[%s6139_s26 + $0x690] sm:$0xff] %v1095_v18  ;;  %1098 = vst [vmem:[%s6139_s26 + $0x698] sm:$0xff] %v1097_v19  ;;  %v1101_v21 = vld [vmem:[%s6134_s25 + $0xca8] sm:$0xff]  ;;  %v1103_v22 = vld [vmem:[%s6134_s25 + $0xcb0] sm:$0xff] }
  0x7c   : > { %1100 = vst [vmem:[%s6139_s26 + $0x6a0] sm:$0xff] %v1099_v20  ;;  %v1105_v23 = vld [vmem:[%s6134_s25 + $0xcb8] sm:$0xff]  ;;  %1102 = vst [vmem:[%s6139_s26 + $0x6a8] sm:$0xff] %v1101_v21  ;;  %v1107_v24 = vld [vmem:[%s6134_s25 + $0xcc0] sm:$0xff] }
  0x7d   : > { %1104 = vst [vmem:[%s6139_s26 + $0x6b0] sm:$0xff] %v1103_v22  ;;  %1106 = vst [vmem:[%s6139_s26 + $0x6b8] sm:$0xff] %v1105_v23  ;;  %v1109_v25 = vld [vmem:[%s6134_s25 + $0xcc8] sm:$0xff]  ;;  %v1111_v26 = vld [vmem:[%s6134_s25 + $0xcd0] sm:$0xff] }
  0x7e   : > { %1108 = vst [vmem:[%s6139_s26 + $0x6c0] sm:$0xff] %v1107_v24  ;;  %1110 = vst [vmem:[%s6139_s26 + $0x6c8] sm:$0xff] %v1109_v25  ;;  %v1113_v27 = vld [vmem:[%s6134_s25 + $0xcd8] sm:$0xff]  ;;  %v1115_v28 = vld [vmem:[%s6134_s25 + $0xce0] sm:$0xff] }
  0x7f   : > { %1112 = vst [vmem:[%s6139_s26 + $0x6d0] sm:$0xff] %v1111_v26  ;;  %v1117_v29 = vld [vmem:[%s6134_s25 + $0xce8] sm:$0xff]  ;;  %1114 = vst [vmem:[%s6139_s26 + $0x6d8] sm:$0xff] %v1113_v27  ;;  %v1119_v30 = vld [vmem:[%s6134_s25 + $0xcf0] sm:$0xff] }
  0x80   : > { %1116 = vst [vmem:[%s6139_s26 + $0x6e0] sm:$0xff] %v1115_v28  ;;  %1118 = vst [vmem:[%s6139_s26 + $0x6e8] sm:$0xff] %v1117_v29  ;;  %v1121_v31 = vld [vmem:[%s6134_s25 + $0xcf8] sm:$0xff]  ;;  %v1123_v32 = vld [vmem:[%s6134_s25 + $0xe00] sm:$0xff] }
  0x81   : > { %1120 = vst [vmem:[%s6139_s26 + $0x6f0] sm:$0xff] %v1119_v30  ;;  %1122 = vst [vmem:[%s6139_s26 + $0x6f8] sm:$0xff] %v1121_v31  ;;  %v1125_v33 = vld [vmem:[%s6134_s25 + $0xe08] sm:$0xff]  ;;  %v1127_v34 = vld [vmem:[%s6134_s25 + $0xe10] sm:$0xff] }
  0x82   : > { %1124 = vst [vmem:[%s6139_s26 + $0x700] sm:$0xff] %v1123_v32  ;;  %v1129_v35 = vld [vmem:[%s6134_s25 + $0xe18] sm:$0xff]  ;;  %1126 = vst [vmem:[%s6139_s26 + $0x708] sm:$0xff] %v1125_v33  ;;  %v1131_v36 = vld [vmem:[%s6134_s25 + $0xe20] sm:$0xff] }
  0x83   : > { %1128 = vst [vmem:[%s6139_s26 + $0x710] sm:$0xff] %v1127_v34  ;;  %1130 = vst [vmem:[%s6139_s26 + $0x718] sm:$0xff] %v1129_v35  ;;  %v1133_v37 = vld [vmem:[%s6134_s25 + $0xe28] sm:$0xff]  ;;  %v1135_v38 = vld [vmem:[%s6134_s25 + $0xe30] sm:$0xff] }
  0x84   : > { %1132 = vst [vmem:[%s6139_s26 + $0x720] sm:$0xff] %v1131_v36  ;;  %1134 = vst [vmem:[%s6139_s26 + $0x728] sm:$0xff] %v1133_v37  ;;  %v1137_v39 = vld [vmem:[%s6134_s25 + $0xe38] sm:$0xff]  ;;  %v1139_v40 = vld [vmem:[%s6134_s25 + $0xe40] sm:$0xff] }
  0x85   : > { %1136 = vst [vmem:[%s6139_s26 + $0x730] sm:$0xff] %v1135_v38  ;;  %v1141_v41 = vld [vmem:[%s6134_s25 + $0xe48] sm:$0xff]  ;;  %1138 = vst [vmem:[%s6139_s26 + $0x738] sm:$0xff] %v1137_v39  ;;  %v1143_v42 = vld [vmem:[%s6134_s25 + $0xe50] sm:$0xff] }
  0x86   : > { %1140 = vst [vmem:[%s6139_s26 + $0x740] sm:$0xff] %v1139_v40  ;;  %1142 = vst [vmem:[%s6139_s26 + $0x748] sm:$0xff] %v1141_v41  ;;  %v1145_v43 = vld [vmem:[%s6134_s25 + $0xe58] sm:$0xff]  ;;  %v1147_v44 = vld [vmem:[%s6134_s25 + $0xe60] sm:$0xff] }
  0x87   : > { %1144 = vst [vmem:[%s6139_s26 + $0x750] sm:$0xff] %v1143_v42  ;;  %1146 = vst [vmem:[%s6139_s26 + $0x758] sm:$0xff] %v1145_v43  ;;  %v1149_v45 = vld [vmem:[%s6134_s25 + $0xe68] sm:$0xff]  ;;  %v1151_v46 = vld [vmem:[%s6134_s25 + $0xe70] sm:$0xff] }
  0x88   : > { %1148 = vst [vmem:[%s6139_s26 + $0x760] sm:$0xff] %v1147_v44  ;;  %v1153_v47 = vld [vmem:[%s6134_s25 + $0xe78] sm:$0xff]  ;;  %1150 = vst [vmem:[%s6139_s26 + $0x768] sm:$0xff] %v1149_v45  ;;  %v1155_v48 = vld [vmem:[%s6134_s25 + $0xe80] sm:$0xff] }
  0x89   : > { %1152 = vst [vmem:[%s6139_s26 + $0x770] sm:$0xff] %v1151_v46  ;;  %1154 = vst [vmem:[%s6139_s26 + $0x778] sm:$0xff] %v1153_v47  ;;  %v1157_v49 = vld [vmem:[%s6134_s25 + $0xe88] sm:$0xff]  ;;  %v1159_v50 = vld [vmem:[%s6134_s25 + $0xe90] sm:$0xff] }
  0x8a   : > { %1156 = vst [vmem:[%s6139_s26 + $0x780] sm:$0xff] %v1155_v48  ;;  %1158 = vst [vmem:[%s6139_s26 + $0x788] sm:$0xff] %v1157_v49  ;;  %v1161_v51 = vld [vmem:[%s6134_s25 + $0xe98] sm:$0xff]  ;;  %v1163_v52 = vld [vmem:[%s6134_s25 + $0xea0] sm:$0xff] }
  0x8b   : > { %1160 = vst [vmem:[%s6139_s26 + $0x790] sm:$0xff] %v1159_v50  ;;  %v1165_v53 = vld [vmem:[%s6134_s25 + $0xea8] sm:$0xff]  ;;  %1162 = vst [vmem:[%s6139_s26 + $0x798] sm:$0xff] %v1161_v51  ;;  %v1167_v54 = vld [vmem:[%s6134_s25 + $0xeb0] sm:$0xff] }
  0x8c   : > { %1164 = vst [vmem:[%s6139_s26 + $0x7a0] sm:$0xff] %v1163_v52  ;;  %1166 = vst [vmem:[%s6139_s26 + $0x7a8] sm:$0xff] %v1165_v53  ;;  %v1169_v55 = vld [vmem:[%s6134_s25 + $0xeb8] sm:$0xff]  ;;  %v1171_v56 = vld [vmem:[%s6134_s25 + $0xec0] sm:$0xff] }
  0x8d   : > { %1168 = vst [vmem:[%s6139_s26 + $0x7b0] sm:$0xff] %v1167_v54  ;;  %1170 = vst [vmem:[%s6139_s26 + $0x7b8] sm:$0xff] %v1169_v55  ;;  %v1173_v57 = vld [vmem:[%s6134_s25 + $0xec8] sm:$0xff]  ;;  %v1175_v58 = vld [vmem:[%s6134_s25 + $0xed0] sm:$0xff] }
  0x8e   : > { %1172 = vst [vmem:[%s6139_s26 + $0x7c0] sm:$0xff] %v1171_v56  ;;  %v1177_v59 = vld [vmem:[%s6134_s25 + $0xed8] sm:$0xff]  ;;  %1174 = vst [vmem:[%s6139_s26 + $0x7c8] sm:$0xff] %v1173_v57  ;;  %v1179_v60 = vld [vmem:[%s6134_s25 + $0xee0] sm:$0xff] }
  0x8f   : > { %1176 = vst [vmem:[%s6139_s26 + $0x7d0] sm:$0xff] %v1175_v58  ;;  %1178 = vst [vmem:[%s6139_s26 + $0x7d8] sm:$0xff] %v1177_v59  ;;  %v1181_v61 = vld [vmem:[%s6134_s25 + $0xee8] sm:$0xff]  ;;  %v1183_v62 = vld [vmem:[%s6134_s25 + $0xef0] sm:$0xff] }
  0x90   : > { %1180 = vst [vmem:[%s6139_s26 + $0x7e0] sm:$0xff] %v1179_v60  ;;  %1182 = vst [vmem:[%s6139_s26 + $0x7e8] sm:$0xff] %v1181_v61  ;;  %v1185_v63 = vld [vmem:[%s6134_s25 + $0xef8] sm:$0xff] }
  0x91   : > { %1184 = vst [vmem:[%s6139_s26 + $0x7f0] sm:$0xff] %v1183_v62  ;;  %1186 = vst [vmem:[%s6139_s26 + $0x7f8] sm:$0xff] %v1185_v63 }
  0x92 PF: > { %p4472_p5 = scmp.ge.s32.totalorder %s6078_s14, 1  ;;  %p1191_p6 = scmp.lt.s32.totalorder %s6078_s14, 3 }
  0x94   : > { %p1192_p7 = pnand %p4472_p5, %p1191_p6 }
  0x96   : > { %1195 = sbr.rel (%p1192_p7) target bundleno = 656 (0x290), region = 66 }
  0x9d   : > { %v1228_v0 = vld [vmem:[%s8307_s1] sm:$0xff]  ;;  %v1229_v1 = vld [vmem:[%s8307_s1 + $0x8] sm:$0xff]  ;;  %v1230_v2 = vld [vmem:[%s8307_s1 + $0x10] sm:$0xff]  ;;  %s1198_s6 = sand.u32 1, %s6070_s12   ;;  %vm1271_vm0 = vcmask 662528   ;;  %vm1368_vm1 = vcmask 1040384  }
  0x9e   : > { %v6662_v3 = vpack.c.bf16 %v1229_v1, %v1228_v0  ;;  %v1231_v4 = vld [vmem:[%s8307_s1 + $0x18] sm:$0xff]  ;;  %s4473_s9 = sshll.u32 %s1198_s6, 11  ;;  %v1232_v6 = vld [vmem:[%s8307_s1 + $0x20] sm:$0xff]  ;;  %v1233_v7 = vld [vmem:[%s8307_s1 + $0x28] sm:$0xff]  ;;  %s4474_s30 = sshll.u32 %s4465_s15, 5  ;;  %vm4370_vm2 = vcmask 261120  }
  0x9f   : > { %v6667_v5 = vpack.c.bf16 %v1231_v4, %v1230_v2  ;;  %s6677_s12 = scalar_lea.vmem [#allocation2], %s4473_s9  ;;  %v6685_v10 = vpack.c.bf16 %v1233_v7, %v1232_v6  ;;  %v1234_v11 = vld [vmem:[%s8307_s1 + $0x30] sm:$0xff]  ;;  %v1235_v12 = vld [vmem:[%s8307_s1 + $0x38] sm:$0xff]  ;;  %v1236_v14 = vld [vmem:[%s8307_s1 + $0x40] sm:$0xff]  ;;  %p1223_p8 = scmp.lt.s32.totalorder %s4474_s30, 63 }
  0xa0   : > { %5873 = vmatprep.subr.bf16.mxu0 %v6662_v3  ;;  %5893 = vmatprep.subr.bf16.mxu1 %v6662_v3  ;;  %v1239_v8 = vld [vmem:[%s6677_s12] sm:$0xff]  ;;  %v6699_v13 = vpack.c.bf16 %v1235_v12, %v1234_v11  ;;  %v1237_v15 = vld [vmem:[%s8307_s1 + $0x48] sm:$0xff]  ;;  %v6720_v17 = vld [vmem:[%s8307_s1 + $0x50] sm:$0x1] }
  0xa1   : > { %5875 = vmatpush3.bf16.msra.mxu0 %v6662_v3  ;;  %5895 = vmatpush3.bf16.msra.mxu1 %v6662_v3  ;;  %v4509_v9 = vld [vmem:[%s6677_s12 + $0x100] sm:$0xff]  ;;  %v6711_v16 = vpack.c.bf16 %v1237_v15, %v1236_v14  ;;  %v1240_v18 = vld [vmem:[%s6677_s12 + $0x8] sm:$0xff]  ;;  %v1241_v20 = vld [vmem:[%s6677_s12 + $0x10] sm:$0xff]  ;;  %s8524_s30 = smov (!%p1223_p8, %s4474_s30), 63 }
  0xa2   : > { %5877 = vmatprep.subr.bf16.mxu0 %v6667_v5  ;;  %5897 = vmatprep.subr.bf16.mxu1 %v6667_v5  ;;  %v4510_v19 = vld [vmem:[%s6677_s12 + $0x108] sm:$0xff]  ;;  %v4511_v21 = vld [vmem:[%s6677_s12 + $0x110] sm:$0xff]  ;;  %v1242_v22 = vld [vmem:[%s6677_s12 + $0x18] sm:$0xff]  ;;  %s4475_s4 = sshll.u32 %s8524_s30, 3 }
  0xa3   : > { %5334 = vmatprep.mubr.msk.f32.mxu0 %vm1271_vm0, %v1239_v8  ;;  %5404 = vmatprep.mubr.msk.f32.mxu1 %vm1271_vm0, %v4509_v9  ;;  %v4512_v23 = vld [vmem:[%s6677_s12 + $0x118] sm:$0xff]  ;;  %v1243_v24 = vld [vmem:[%s6677_s12 + $0x20] sm:$0xff]  ;;  %v1244_v26 = vld [vmem:[%s6677_s12 + $0x28] sm:$0xff]  ;;  %s8112_s7 = scalar_lea.vmem %s8309_s3, %s4475_s4 }
  0xa4   : > { %v4513_v25 = vld [vmem:[%s6677_s12 + $0x120] sm:$0xff]  ;;  %v4514_v27 = vld [vmem:[%s6677_s12 + $0x128] sm:$0xff]  ;;  %v1245_v28 = vld [vmem:[%s6677_s12 + $0x30] sm:$0xff] }
  0xa5   : > { %5879 = vmatpush3.bf16.msra.mxu0 %v6667_v5  ;;  %5899 = vmatpush3.bf16.msra.mxu1 %v6667_v5  ;;  %v4515_v29 = vld [vmem:[%s6677_s12 + $0x130] sm:$0xff]  ;;  %v1246_v30 = vld [vmem:[%s6677_s12 + $0x38] sm:$0xff]  ;;  %v1247_v32 = vld [vmem:[%s6677_s12 + $0x40] sm:$0xff] }
  0xa6   : > { %5881 = vmatprep.subr.bf16.mxu0 %v6685_v10  ;;  %5901 = vmatprep.subr.bf16.mxu1 %v6685_v10  ;;  %v4516_v31 = vld [vmem:[%s6677_s12 + $0x138] sm:$0xff]  ;;  %v4517_v33 = vld [vmem:[%s6677_s12 + $0x140] sm:$0xff]  ;;  %v1248_v34 = vld [vmem:[%s6677_s12 + $0x48] sm:$0xff] }
  0xa7   : > { %v4518_v35 = vld [vmem:[%s6677_s12 + $0x148] sm:$0xff]  ;;  %v1249_v36 = vld [vmem:[%s6677_s12 + $0x50] sm:$0xff]  ;;  %v1250_v38 = vld [vmem:[%s6677_s12 + $0x58] sm:$0xff] }
  0xa8   : > { %v4519_v37 = vld [vmem:[%s6677_s12 + $0x150] sm:$0xff]  ;;  %v4520_v39 = vld [vmem:[%s6677_s12 + $0x158] sm:$0xff]  ;;  %v1251_v40 = vld [vmem:[%s6677_s12 + $0x60] sm:$0xff] }
  0xa9   : > { %5883 = vmatpush3.bf16.msra.mxu0 %v6685_v10  ;;  %5903 = vmatpush3.bf16.msra.mxu1 %v6685_v10  ;;  %v4521_v41 = vld [vmem:[%s6677_s12 + $0x160] sm:$0xff]  ;;  %v1252_v42 = vld [vmem:[%s6677_s12 + $0x68] sm:$0xff]  ;;  %v1253_v44 = vld [vmem:[%s6677_s12 + $0x70] sm:$0xff] }
  0xaa   : > { %5885 = vmatprep.subr.bf16.mxu0 %v6699_v13  ;;  %5905 = vmatprep.subr.bf16.mxu1 %v6699_v13  ;;  %v4522_v43 = vld [vmem:[%s6677_s12 + $0x168] sm:$0xff]  ;;  %v4523_v45 = vld [vmem:[%s6677_s12 + $0x170] sm:$0xff]  ;;  %v1254_v46 = vld [vmem:[%s6677_s12 + $0x78] sm:$0xff] }
  0xab   : > { %v4524_v47 = vld [vmem:[%s6677_s12 + $0x178] sm:$0xff]  ;;  %v1255_v48 = vld [vmem:[%s6677_s12 + $0x80] sm:$0xff]  ;;  %v1256_v50 = vld [vmem:[%s6677_s12 + $0x88] sm:$0xff] }
  0xac   : > { %v4525_v49 = vld [vmem:[%s6677_s12 + $0x180] sm:$0xff]  ;;  %v4526_v51 = vld [vmem:[%s6677_s12 + $0x188] sm:$0xff]  ;;  %v1257_v52 = vld [vmem:[%s6677_s12 + $0x90] sm:$0xff] }
  0xad   : > { %5887 = vmatpush3.bf16.msra.mxu0 %v6699_v13  ;;  %5907 = vmatpush3.bf16.msra.mxu1 %v6699_v13  ;;  %v4527_v53 = vld [vmem:[%s6677_s12 + $0x190] sm:$0xff]  ;;  %v1258_v54 = vld [vmem:[%s6677_s12 + $0x98] sm:$0xff]  ;;  %v1259_v56 = vld [vmem:[%s6677_s12 + $0xa0] sm:$0xff] }
  0xae   : > { %5889 = vmatprep.subr.bf16.mxu0 %v6711_v16  ;;  %5909 = vmatprep.subr.bf16.mxu1 %v6711_v16  ;;  %v4528_v55 = vld [vmem:[%s6677_s12 + $0x198] sm:$0xff]  ;;  %v4529_v57 = vld [vmem:[%s6677_s12 + $0x1a0] sm:$0xff]  ;;  %v1260_v58 = vld [vmem:[%s6677_s12 + $0xa8] sm:$0xff] }
  0xaf   : > { %v4530_v59 = vld [vmem:[%s6677_s12 + $0x1a8] sm:$0xff]  ;;  %v1261_v60 = vld [vmem:[%s6677_s12 + $0xb0] sm:$0xff]  ;;  %v1262_v62 = vld [vmem:[%s6677_s12 + $0xb8] sm:$0xff] }
  0xb0   : > { %v4531_v61 = vld [vmem:[%s6677_s12 + $0x1b0] sm:$0xff]  ;;  %v4532_v63 = vld [vmem:[%s6677_s12 + $0x1b8] sm:$0xff]  ;;  %v1263_v0 = vld [vmem:[%s6677_s12 + $0xc0] sm:$0xff] }
  0xb1   : > { %5891 = vmatpush3.bf16.msra.mxu0 %v6711_v16  ;;  %5911 = vmatpush3.bf16.msra.mxu1 %v6711_v16  ;;  %v4533_v1 = vld [vmem:[%s6677_s12 + $0x1c0] sm:$0xff]  ;;  %v1264_v2 = vld [vmem:[%s6677_s12 + $0xc8] sm:$0xff]  ;;  %v1265_v6 = vld [vmem:[%s6677_s12 + $0xd0] sm:$0xff] }
  0xb2   : > { %5332 = vmatprep.subr.msk.mxu0 %vm1368_vm1, %v6720_v17  ;;  %5402 = vmatprep.subr.msk.mxu1 %vm1368_vm1, %v6720_v17  ;;  %v4534_v4 = vld [vmem:[%s6677_s12 + $0x1c8] sm:$0xff]  ;;  %v4535_v7 = vld [vmem:[%s6677_s12 + $0x1d0] sm:$0xff]  ;;  %v1266_v8 = vld [vmem:[%s6677_s12 + $0xd8] sm:$0xff] }
  0xb3   : > { %v4536_v9 = vld [vmem:[%s6677_s12 + $0x1d8] sm:$0xff]  ;;  %v1267_v11 = vld [vmem:[%s6677_s12 + $0xe0] sm:$0xff]  ;;  %v1268_v14 = vld [vmem:[%s6677_s12 + $0xe8] sm:$0xff] }
  0xb4   : > { %v4537_v12 = vld [vmem:[%s6677_s12 + $0x1e0] sm:$0xff]  ;;  %v4538_v15 = vld [vmem:[%s6677_s12 + $0x1e8] sm:$0xff] }
  0xb5   : > { %5333 = vmatpush3.msk.msra.mxu0 %vm1368_vm1, %v6720_v17  ;;  %5403 = vmatpush3.msk.msra.mxu1 %vm1368_vm1, %v6720_v17 }
  0xb6   : > { %5335 = vmatmul.mubr.msk.f32.vlgmr.msra.gmra.mrb[0].mxu0 %vm1271_vm0, %v1240_v18  ;;  %5405 = vmatmul.mubr.msk.f32.vlgmr.msra.gmra.mrb[0].mxu1 %vm1271_vm0, %v4510_v19  ;;  %v1269_v18 = vld [vmem:[%s6677_s12 + $0xf0] sm:$0xff] }
  0xb7   : > { %5913 = vmatprep.subr.bf16.mxu0 %v6662_v3  ;;  %5933 = vmatprep.subr.bf16.mxu1 %v6662_v3  ;;  %v4539_v19 = vld [vmem:[%s6677_s12 + $0x1f0] sm:$0xff] }
  0xb8   : > { %5915 = vmatpush3.bf16.msra.mxu0 %v6662_v3  ;;  %5337 = vmatprep.mubr.msk.f32.mxu0 %vm1271_vm0, %v1241_v20  ;;  %v1270_v20 = vld [vmem:[%s6677_s12 + $0xf8] sm:$0xff] }
  0xb9   : > { %5407 = vmatprep.mubr.msk.f32.mxu1 %vm1271_vm0, %v4511_v21  ;;  %5935 = vmatpush3.bf16.msra.mxu1 %v6662_v3  ;;  %v4540_v21 = vld [vmem:[%s6677_s12 + $0x1f8] sm:$0xff] }
  0xba   : > { %5338 = vmatmul.mubr.msk.f32.gmra.mrb[2].mxu0 %vm1271_vm0, %v1242_v22  ;;  %5408 = vmatmul.mubr.msk.f32.gmra.mrb[2].mxu1 %vm1271_vm0, %v4512_v23  ;;  %v4574_v22 = vld [vmem:[%s6677_s12 + $0x200] sm:$0xff] }
  0xbb   : > { %5340 = vmatprep.mubr.msk.f32.mxu0 %vm1271_vm0, %v1243_v24  ;;  %5410 = vmatprep.mubr.msk.f32.mxu1 %vm1271_vm0, %v4513_v25  ;;  %v4639_v23 = vld [vmem:[%s6677_s12 + $0x300] sm:$0xff]  ;;  %v4575_v24 = vld [vmem:[%s6677_s12 + $0x208] sm:$0xff] }
  0xbc   : > { %5917 = vmatprep.subr.bf16.mxu0 %v6667_v5  ;;  %5937 = vmatprep.subr.bf16.mxu1 %v6667_v5  ;;  %v4640_v25 = vld [vmem:[%s6677_s12 + $0x308] sm:$0xff] }
  0xbd   : > { %5919 = vmatpush3.bf16.msra.mxu0 %v6667_v5  ;;  %5939 = vmatpush3.bf16.msra.mxu1 %v6667_v5 }
  0xbe   : > { %5341 = vmatmul.mubr.msk.f32.gmra.mrb[4].mxu0 %vm1271_vm0, %v1244_v26  ;;  %5411 = vmatmul.mubr.msk.f32.gmra.mrb[4].mxu1 %vm1271_vm0, %v4514_v27  ;;  %v4576_v26 = vld [vmem:[%s6677_s12 + $0x210] sm:$0xff] }
  0xbf   : > { %5343 = vmatprep.mubr.msk.f32.mxu0 %vm1271_vm0, %v1245_v28  ;;  %5413 = vmatprep.mubr.msk.f32.mxu1 %vm1271_vm0, %v4515_v29  ;;  %v4641_v27 = vld [vmem:[%s6677_s12 + $0x310] sm:$0xff]  ;;  %v4577_v28 = vld [vmem:[%s6677_s12 + $0x218] sm:$0xff] }
  0xc0   : > { %5921 = vmatprep.subr.bf16.mxu0 %v6685_v10  ;;  %5941 = vmatprep.subr.bf16.mxu1 %v6685_v10  ;;  %v4642_v29 = vld [vmem:[%s6677_s12 + $0x318] sm:$0xff] }
  0xc1   : > { %5923 = vmatpush3.bf16.msra.mxu0 %v6685_v10  ;;  %5943 = vmatpush3.bf16.msra.mxu1 %v6685_v10 }
  0xc2   : > { %5344 = vmatmul.mubr.msk.f32.gmra.mrb[6].mxu0 %vm1271_vm0, %v1246_v30  ;;  %5414 = vmatmul.mubr.msk.f32.gmra.mrb[6].mxu1 %vm1271_vm0, %v4516_v31  ;;  %v4578_v30 = vld [vmem:[%s6677_s12 + $0x220] sm:$0xff] }
  0xc3   : > { %5346 = vmatprep.mubr.msk.f32.mxu0 %vm1271_vm0, %v1247_v32  ;;  %5416 = vmatprep.mubr.msk.f32.mxu1 %vm1271_vm0, %v4517_v33  ;;  %v4643_v31 = vld [vmem:[%s6677_s12 + $0x320] sm:$0xff]  ;;  %v4579_v32 = vld [vmem:[%s6677_s12 + $0x228] sm:$0xff] }
  0xc4   : > { %5925 = vmatprep.subr.bf16.mxu0 %v6699_v13  ;;  %5945 = vmatprep.subr.bf16.mxu1 %v6699_v13  ;;  %v4644_v33 = vld [vmem:[%s6677_s12 + $0x328] sm:$0xff] }
  0xc5   : > { %5927 = vmatpush3.bf16.msra.mxu0 %v6699_v13  ;;  %5947 = vmatpush3.bf16.msra.mxu1 %v6699_v13 }
  0xc6   : > { %5347 = vmatmul.mubr.msk.f32.gmra.mrb[8].mxu0 %vm1271_vm0, %v1248_v34  ;;  %5417 = vmatmul.mubr.msk.f32.gmra.mrb[8].mxu1 %vm1271_vm0, %v4518_v35  ;;  %v4580_v34 = vld [vmem:[%s6677_s12 + $0x230] sm:$0xff] }
  0xc7   : > { %5349 = vmatprep.mubr.msk.f32.mxu0 %vm1271_vm0, %v1249_v36  ;;  %5419 = vmatprep.mubr.msk.f32.mxu1 %vm1271_vm0, %v4519_v37  ;;  %v4645_v35 = vld [vmem:[%s6677_s12 + $0x330] sm:$0xff]  ;;  %v4581_v36 = vld [vmem:[%s6677_s12 + $0x238] sm:$0xff] }
  0xc8   : > { %5929 = vmatprep.subr.bf16.mxu0 %v6711_v16  ;;  %5949 = vmatprep.subr.bf16.mxu1 %v6711_v16  ;;  %v4646_v37 = vld [vmem:[%s6677_s12 + $0x338] sm:$0xff] }
  0xc9   : > { %5931 = vmatpush3.bf16.msra.mxu0 %v6711_v16  ;;  %5951 = vmatpush3.bf16.msra.mxu1 %v6711_v16 }
  0xca   : > { %5350 = vmatmul.mubr.msk.f32.gmra.mrb[10].mxu0 %vm1271_vm0, %v1250_v38  ;;  %5420 = vmatmul.mubr.msk.f32.gmra.mrb[10].mxu1 %vm1271_vm0, %v4520_v39  ;;  %v4582_v38 = vld [vmem:[%s6677_s12 + $0x240] sm:$0xff] }
  0xcb   : > { %5352 = vmatprep.mubr.msk.f32.mxu0 %vm1271_vm0, %v1251_v40  ;;  %5422 = vmatprep.mubr.msk.f32.mxu1 %vm1271_vm0, %v4521_v41  ;;  %v4647_v39 = vld [vmem:[%s6677_s12 + $0x340] sm:$0xff]  ;;  %v4583_v40 = vld [vmem:[%s6677_s12 + $0x248] sm:$0xff] }
  0xcc   : > { %5472 = vmatprep.subr.msk.mxu0 %vm1368_vm1, %v6720_v17  ;;  %5542 = vmatprep.subr.msk.mxu1 %vm1368_vm1, %v6720_v17  ;;  %v4648_v41 = vld [vmem:[%s6677_s12 + $0x348] sm:$0xff] }
  0xcd   : > { %5473 = vmatpush3.msk.msra.mxu0 %vm1368_vm1, %v6720_v17  ;;  %5543 = vmatpush3.msk.msra.mxu1 %vm1368_vm1, %v6720_v17 }
  0xce   : > { %5353 = vmatmul.mubr.msk.f32.gmra.mrb[12].mxu0 %vm1271_vm0, %v1252_v42  ;;  %5423 = vmatmul.mubr.msk.f32.gmra.mrb[12].mxu1 %vm1271_vm0, %v4522_v43  ;;  %v4584_v42 = vld [vmem:[%s6677_s12 + $0x250] sm:$0xff] }
  0xcf   : > { %5355 = vmatprep.mubr.msk.f32.mxu0 %vm1271_vm0, %v1253_v44  ;;  %5425 = vmatprep.mubr.msk.f32.mxu1 %vm1271_vm0, %v4523_v45  ;;  %v4649_v43 = vld [vmem:[%s6677_s12 + $0x350] sm:$0xff]  ;;  %v4585_v44 = vld [vmem:[%s6677_s12 + $0x258] sm:$0xff] }
  0xd0   : > { %5953 = vmatprep.subr.bf16.mxu0 %v6662_v3  ;;  %5973 = vmatprep.subr.bf16.mxu1 %v6662_v3  ;;  %v4650_v45 = vld [vmem:[%s6677_s12 + $0x358] sm:$0xff] }
  0xd2   : > { %5356 = vmatmul.mubr.msk.f32.gmra.mrb[14].mxu0 %vm1271_vm0, %v1254_v46  ;;  %5426 = vmatmul.mubr.msk.f32.gmra.mrb[14].mxu1 %vm1271_vm0, %v4524_v47  ;;  %v4586_v46 = vld [vmem:[%s6677_s12 + $0x260] sm:$0xff] }
  0xd3   : > { %5358 = vmatprep.mubr.msk.f32.mxu0 %vm1271_vm0, %v1255_v48  ;;  %5428 = vmatprep.mubr.msk.f32.mxu1 %vm1271_vm0, %v4525_v49  ;;  %v4651_v47 = vld [vmem:[%s6677_s12 + $0x360] sm:$0xff]  ;;  %v4587_v48 = vld [vmem:[%s6677_s12 + $0x268] sm:$0xff] }
  0xd4   : > { %v4652_v49 = vld [vmem:[%s6677_s12 + $0x368] sm:$0xff] }
  0xd6   : > { %5359 = vmatmul.mubr.msk.f32.gmra.mrb[16].mxu0 %vm1271_vm0, %v1256_v50  ;;  %5429 = vmatmul.mubr.msk.f32.gmra.mrb[16].mxu1 %vm1271_vm0, %v4526_v51  ;;  %v4588_v50 = vld [vmem:[%s6677_s12 + $0x270] sm:$0xff] }
  0xd7   : > { %5361 = vmatprep.mubr.msk.f32.mxu0 %vm1271_vm0, %v1257_v52  ;;  %5431 = vmatprep.mubr.msk.f32.mxu1 %vm1271_vm0, %v4527_v53  ;;  %v4653_v51 = vld [vmem:[%s6677_s12 + $0x370] sm:$0xff]  ;;  %v4589_v52 = vld [vmem:[%s6677_s12 + $0x278] sm:$0xff] }
  0xd8   : > { %v4654_v53 = vld [vmem:[%s6677_s12 + $0x378] sm:$0xff] }
  0xda   : > { %5362 = vmatmul.mubr.msk.f32.gmra.mrb[18].mxu0 %vm1271_vm0, %v1258_v54  ;;  %5432 = vmatmul.mubr.msk.f32.gmra.mrb[18].mxu1 %vm1271_vm0, %v4528_v55  ;;  %v4590_v54 = vld [vmem:[%s6677_s12 + $0x280] sm:$0xff] }
  0xdb   : > { %5364 = vmatprep.mubr.msk.f32.mxu0 %vm1271_vm0, %v1259_v56  ;;  %5434 = vmatprep.mubr.msk.f32.mxu1 %vm1271_vm0, %v4529_v57  ;;  %v4655_v55 = vld [vmem:[%s6677_s12 + $0x380] sm:$0xff]  ;;  %v4591_v56 = vld [vmem:[%s6677_s12 + $0x288] sm:$0xff] }
  0xdc   : > { %v4656_v57 = vld [vmem:[%s6677_s12 + $0x388] sm:$0xff] }
  0xde   : > { %5365 = vmatmul.mubr.msk.f32.gmra.mrb[20].mxu0 %vm1271_vm0, %v1260_v58  ;;  %5435 = vmatmul.mubr.msk.f32.gmra.mrb[20].mxu1 %vm1271_vm0, %v4530_v59  ;;  %v4592_v58 = vld [vmem:[%s6677_s12 + $0x290] sm:$0xff] }
  0xdf   : > { %5367 = vmatprep.mubr.msk.f32.mxu0 %vm1271_vm0, %v1261_v60  ;;  %5437 = vmatprep.mubr.msk.f32.mxu1 %vm1271_vm0, %v4531_v61  ;;  %v4657_v59 = vld [vmem:[%s6677_s12 + $0x390] sm:$0xff]  ;;  %v4593_v60 = vld [vmem:[%s6677_s12 + $0x298] sm:$0xff] }
  0xe0   : > { %v4658_v61 = vld [vmem:[%s6677_s12 + $0x398] sm:$0xff] }
  0xe2   : > { %5368 = vmatmul.mubr.msk.f32.gmra.mrb[22].mxu0 %vm1271_vm0, %v1262_v62  ;;  %5438 = vmatmul.mubr.msk.f32.gmra.mrb[22].mxu1 %vm1271_vm0, %v4532_v63  ;;  %v4594_v62 = vld [vmem:[%s6677_s12 + $0x2a0] sm:$0xff] }
  0xe3   : > { %5370 = vmatprep.mubr.msk.f32.mxu0 %vm1271_vm0, %v1263_v0  ;;  %5440 = vmatprep.mubr.msk.f32.mxu1 %vm1271_vm0, %v4533_v1  ;;  %v4659_v63 = vld [vmem:[%s6677_s12 + $0x3a0] sm:$0xff]  ;;  %v4595_v0 = vld [vmem:[%s6677_s12 + $0x2a8] sm:$0xff] }
  0xe4   : > { %v4660_v1 = vld [vmem:[%s6677_s12 + $0x3a8] sm:$0xff] }
  0xe6   : > { %5371 = vmatmul.mubr.msk.f32.gmra.mrb[24].mxu0 %vm1271_vm0, %v1264_v2  ;;  %5441 = vmatmul.mubr.msk.f32.gmra.mrb[24].mxu1 %vm1271_vm0, %v4534_v4  ;;  %v4596_v2 = vld [vmem:[%s6677_s12 + $0x2b0] sm:$0xff] }
  0xe7   : > { %5373 = vmatprep.mubr.msk.f32.mxu0 %vm1271_vm0, %v1265_v6  ;;  %5443 = vmatprep.mubr.msk.f32.mxu1 %vm1271_vm0, %v4535_v7  ;;  %v4661_v4 = vld [vmem:[%s6677_s12 + $0x3b0] sm:$0xff]  ;;  %v4597_v6 = vld [vmem:[%s6677_s12 + $0x2b8] sm:$0xff] }
  0xe8   : > { %v4662_v7 = vld [vmem:[%s6677_s12 + $0x3b8] sm:$0xff] }
  0xea   : > { %5374 = vmatmul.mubr.msk.f32.gmra.mrb[26].mxu0 %vm1271_vm0, %v1266_v8  ;;  %5444 = vmatmul.mubr.msk.f32.gmra.mrb[26].mxu1 %vm1271_vm0, %v4536_v9  ;;  %v4598_v8 = vld [vmem:[%s6677_s12 + $0x2c0] sm:$0xff] }
  0xeb   : > { %5376 = vmatprep.mubr.msk.f32.mxu0 %vm1271_vm0, %v1267_v11  ;;  %5446 = vmatprep.mubr.msk.f32.mxu1 %vm1271_vm0, %v4537_v12  ;;  %v4663_v9 = vld [vmem:[%s6677_s12 + $0x3c0] sm:$0xff]  ;;  %v4599_v11 = vld [vmem:[%s6677_s12 + $0x2c8] sm:$0xff] }
  0xec   : > { %v4664_v12 = vld [vmem:[%s6677_s12 + $0x3c8] sm:$0xff] }
  0xee   : > { %5377 = vmatmul.mubr.msk.f32.gmra.mrb[28].mxu0 %vm1271_vm0, %v1268_v14  ;;  %5447 = vmatmul.mubr.msk.f32.gmra.mrb[28].mxu1 %vm1271_vm0, %v4538_v15  ;;  %v4600_v14 = vld [vmem:[%s6677_s12 + $0x2d0] sm:$0xff] }
  0xef   : > { %5379 = vmatprep.mubr.msk.f32.mxu0 %vm1271_vm0, %v1269_v18  ;;  %5449 = vmatprep.mubr.msk.f32.mxu1 %vm1271_vm0, %v4539_v19  ;;  %v4665_v15 = vld [vmem:[%s6677_s12 + $0x3d0] sm:$0xff]  ;;  %v4601_v18 = vld [vmem:[%s6677_s12 + $0x2d8] sm:$0xff] }
  0xf0   : > { %v4666_v19 = vld [vmem:[%s6677_s12 + $0x3d8] sm:$0xff] }
  0xf2   : > { %5380 = vmatmul.mubr.msk.f32.gmra.mrb[30].mxu0 %vm1271_vm0, %v1270_v20  ;;  %5450 = vmatmul.mubr.msk.f32.gmra.mrb[30].mxu1 %vm1271_vm0, %v4540_v21  ;;  %v4602_v20 = vld [vmem:[%s6677_s12 + $0x2e0] sm:$0xff] }
  0xf3   : > { %5474 = vmatprep.mubr.msk.f32.mxu0 %vm1271_vm0, %v4574_v22  ;;  %5544 = vmatprep.mubr.msk.f32.mxu1 %vm1271_vm0, %v4639_v23  ;;  %v4667_v21 = vld [vmem:[%s6677_s12 + $0x3e0] sm:$0xff]  ;;  %v4603_v22 = vld [vmem:[%s6677_s12 + $0x2e8] sm:$0xff] }
  0xf4   : > { %v4668_v23 = vld [vmem:[%s6677_s12 + $0x3e8] sm:$0xff] }
  0xf6   : > { %5475 = vmatmul.mubr.msk.f32.vlgmr.msra.gmra.mrb[32].mxu0 %vm1271_vm0, %v4575_v24  ;;  %5545 = vmatmul.mubr.msk.f32.vlgmr.msra.gmra.mrb[32].mxu1 %vm1271_vm0, %v4640_v25  ;;  %v4604_v24 = vld [vmem:[%s6677_s12 + $0x2f0] sm:$0xff] }
  0xf7   : > { %5955 = vmatpush3.bf16.msra.mxu0 %v6662_v3  ;;  %5477 = vmatprep.mubr.msk.f32.mxu0 %vm1271_vm0, %v4576_v26  ;;  %v4669_v25 = vld [vmem:[%s6677_s12 + $0x3f0] sm:$0xff]  ;;  %v4605_v26 = vld [vmem:[%s6677_s12 + $0x2f8] sm:$0xff] }
  0xf8   : > { %5975 = vmatpush3.bf16.msra.mxu1 %v6662_v3  ;;  %5547 = vmatprep.mubr.msk.f32.mxu1 %vm1271_vm0, %v4641_v27  ;;  %v4670_v27 = vld [vmem:[%s6677_s12 + $0x3f8] sm:$0xff] }
  0xf9   : > { %5957 = vmatprep.subr.bf16.mxu0 %v6667_v5  ;;  %5977 = vmatprep.subr.bf16.mxu1 %v6667_v5 }
  0xfa   : > { %5478 = vmatmul.mubr.msk.f32.gmra.mrb[34].mxu0 %vm1271_vm0, %v4577_v28  ;;  %5548 = vmatmul.mubr.msk.f32.gmra.mrb[34].mxu1 %vm1271_vm0, %v4642_v29  ;;  %v4704_v28 = vld [vmem:[%s6677_s12 + $0x400] sm:$0xff] }
  0xfb   : > { %5480 = vmatprep.mubr.msk.f32.mxu0 %vm1271_vm0, %v4578_v30  ;;  %5550 = vmatprep.mubr.msk.f32.mxu1 %vm1271_vm0, %v4643_v31  ;;  %v4769_v29 = vld [vmem:[%s6677_s12 + $0x500] sm:$0xff]  ;;  %v4705_v30 = vld [vmem:[%s6677_s12 + $0x408] sm:$0xff] }
  0xfc   : > { %5959 = vmatpush3.bf16.msra.mxu0 %v6667_v5  ;;  %5979 = vmatpush3.bf16.msra.mxu1 %v6667_v5  ;;  %v4770_v31 = vld [vmem:[%s6677_s12 + $0x508] sm:$0xff] }
  0xfd   : > { %5961 = vmatprep.subr.bf16.mxu0 %v6685_v10  ;;  %5981 = vmatprep.subr.bf16.mxu1 %v6685_v10 }
  0xfe   : > { %5481 = vmatmul.mubr.msk.f32.gmra.mrb[36].mxu0 %vm1271_vm0, %v4579_v32  ;;  %5551 = vmatmul.mubr.msk.f32.gmra.mrb[36].mxu1 %vm1271_vm0, %v4644_v33  ;;  %v4706_v32 = vld [vmem:[%s6677_s12 + $0x410] sm:$0xff] }
  0xff   : > { %5483 = vmatprep.mubr.msk.f32.mxu0 %vm1271_vm0, %v4580_v34  ;;  %5553 = vmatprep.mubr.msk.f32.mxu1 %vm1271_vm0, %v4645_v35  ;;  %v4771_v33 = vld [vmem:[%s6677_s12 + $0x510] sm:$0xff]  ;;  %v4707_v34 = vld [vmem:[%s6677_s12 + $0x418] sm:$0xff] }
 0x100   : > { %5963 = vmatpush3.bf16.msra.mxu0 %v6685_v10  ;;  %5983 = vmatpush3.bf16.msra.mxu1 %v6685_v10  ;;  %v4772_v35 = vld [vmem:[%s6677_s12 + $0x518] sm:$0xff] }
 0x101   : > { %5965 = vmatprep.subr.bf16.mxu0 %v6699_v13  ;;  %5985 = vmatprep.subr.bf16.mxu1 %v6699_v13 }
 0x102   : > { %5484 = vmatmul.mubr.msk.f32.gmra.mrb[38].mxu0 %vm1271_vm0, %v4581_v36  ;;  %5554 = vmatmul.mubr.msk.f32.gmra.mrb[38].mxu1 %vm1271_vm0, %v4646_v37  ;;  %v4708_v36 = vld [vmem:[%s6677_s12 + $0x420] sm:$0xff] }
 0x103   : > { %5486 = vmatprep.mubr.msk.f32.mxu0 %vm1271_vm0, %v4582_v38  ;;  %5556 = vmatprep.mubr.msk.f32.mxu1 %vm1271_vm0, %v4647_v39  ;;  %v4773_v37 = vld [vmem:[%s6677_s12 + $0x520] sm:$0xff]  ;;  %v4709_v38 = vld [vmem:[%s6677_s12 + $0x428] sm:$0xff]  ;;  %v4710_v39 = vld [vmem:[%s6677_s12 + $0x430] sm:$0xff] }
 0x104   : > { %5967 = vmatpush3.bf16.msra.mxu0 %v6699_v13  ;;  %5987 = vmatpush3.bf16.msra.mxu1 %v6699_v13 }
 0x105   : > { %5969 = vmatprep.subr.bf16.mxu0 %v6711_v16  ;;  %5989 = vmatprep.subr.bf16.mxu1 %v6711_v16 }
 0x106   : > { %5487 = vmatmul.mubr.msk.f32.gmra.mrb[40].mxu0 %vm1271_vm0, %v4583_v40  ;;  %5557 = vmatmul.mubr.msk.f32.gmra.mrb[40].mxu1 %vm1271_vm0, %v4648_v41  ;;  %v4775_v40 = vld [vmem:[%s6677_s12 + $0x530] sm:$0xff]  ;;  %v4711_v41 = vld [vmem:[%s6677_s12 + $0x438] sm:$0xff] }
 0x107   : > { %5489 = vmatprep.mubr.msk.f32.mxu0 %vm1271_vm0, %v4584_v42  ;;  %5559 = vmatprep.mubr.msk.f32.mxu1 %vm1271_vm0, %v4649_v43  ;;  %v4776_v42 = vld [vmem:[%s6677_s12 + $0x538] sm:$0xff]  ;;  %v4712_v43 = vld [vmem:[%s6677_s12 + $0x440] sm:$0xff] }
 0x108   : > { %5971 = vmatpush3.bf16.msra.mxu0 %v6711_v16  ;;  %5991 = vmatpush3.bf16.msra.mxu1 %v6711_v16 }
 0x109   : > { %5612 = vmatprep.subr.msk.mxu0 %vm1368_vm1, %v6720_v17  ;;  %5682 = vmatprep.subr.msk.mxu1 %vm1368_vm1, %v6720_v17 }
 0x10a   : > { %5490 = vmatmul.mubr.msk.f32.gmra.mrb[42].mxu0 %vm1271_vm0, %v4585_v44  ;;  %5560 = vmatmul.mubr.msk.f32.gmra.mrb[42].mxu1 %vm1271_vm0, %v4650_v45  ;;  %v4713_v44 = vld [vmem:[%s6677_s12 + $0x448] sm:$0xff] }
 0x10b   : > { %5492 = vmatprep.mubr.msk.f32.mxu0 %vm1271_vm0, %v4586_v46  ;;  %5562 = vmatprep.mubr.msk.f32.mxu1 %vm1271_vm0, %v4651_v47  ;;  %v4778_v45 = vld [vmem:[%s6677_s12 + $0x548] sm:$0xff]  ;;  %v4714_v46 = vld [vmem:[%s6677_s12 + $0x450] sm:$0xff]  ;;  %v4715_v47 = vld [vmem:[%s6677_s12 + $0x458] sm:$0xff] }
 0x10c   : > { %5613 = vmatpush3.msk.msra.mxu0 %vm1368_vm1, %v6720_v17  ;;  %5683 = vmatpush3.msk.msra.mxu1 %vm1368_vm1, %v6720_v17 }
 0x10d   : > { %5993 = vmatprep.subr.bf16.mxu0 %v6662_v3  ;;  %6013 = vmatprep.subr.bf16.mxu1 %v6662_v3 }
 0x10e   : > { %5493 = vmatmul.mubr.msk.f32.gmra.mrb[44].mxu0 %vm1271_vm0, %v4587_v48  ;;  %5563 = vmatmul.mubr.msk.f32.gmra.mrb[44].mxu1 %vm1271_vm0, %v4652_v49  ;;  %v4780_v48 = vld [vmem:[%s6677_s12 + $0x558] sm:$0xff]  ;;  %v4716_v49 = vld [vmem:[%s6677_s12 + $0x460] sm:$0xff] }
 0x10f   : > { %5495 = vmatprep.mubr.msk.f32.mxu0 %vm1271_vm0, %v4588_v50  ;;  %5565 = vmatprep.mubr.msk.f32.mxu1 %vm1271_vm0, %v4653_v51  ;;  %v4717_v50 = vld [vmem:[%s6677_s12 + $0x468] sm:$0xff]  ;;  %v4718_v51 = vld [vmem:[%s6677_s12 + $0x470] sm:$0xff] }
 0x112   : > { %5496 = vmatmul.mubr.msk.f32.gmra.mrb[46].mxu0 %vm1271_vm0, %v4589_v52  ;;  %5566 = vmatmul.mubr.msk.f32.gmra.mrb[46].mxu1 %vm1271_vm0, %v4654_v53  ;;  %v4783_v52 = vld [vmem:[%s6677_s12 + $0x570] sm:$0xff]  ;;  %v4719_v53 = vld [vmem:[%s6677_s12 + $0x478] sm:$0xff] }
 0x113   : > { %5498 = vmatprep.mubr.msk.f32.mxu0 %vm1271_vm0, %v4590_v54  ;;  %5568 = vmatprep.mubr.msk.f32.mxu1 %vm1271_vm0, %v4655_v55  ;;  %v4784_v54 = vld [vmem:[%s6677_s12 + $0x578] sm:$0xff]  ;;  %v4720_v55 = vld [vmem:[%s6677_s12 + $0x480] sm:$0xff] }
 0x116   : > { %5499 = vmatmul.mubr.msk.f32.gmra.mrb[48].mxu0 %vm1271_vm0, %v4591_v56  ;;  %5569 = vmatmul.mubr.msk.f32.gmra.mrb[48].mxu1 %vm1271_vm0, %v4656_v57  ;;  %v4785_v56 = vld [vmem:[%s6677_s12 + $0x580] sm:$0xff]  ;;  %v4786_v57 = vld [vmem:[%s6677_s12 + $0x588] sm:$0xff] }
 0x117   : > { %5501 = vmatprep.mubr.msk.f32.mxu0 %vm1271_vm0, %v4592_v58  ;;  %5571 = vmatprep.mubr.msk.f32.mxu1 %vm1271_vm0, %v4657_v59  ;;  %v4722_v58 = vld [vmem:[%s6677_s12 + $0x490] sm:$0xff] }
 0x118   : > { %v4787_v59 = vld [vmem:[%s6677_s12 + $0x590] sm:$0xff] }
 0x11a   : > { %5502 = vmatmul.mubr.msk.f32.gmra.mrb[50].mxu0 %vm1271_vm0, %v4593_v60  ;;  %5572 = vmatmul.mubr.msk.f32.gmra.mrb[50].mxu1 %vm1271_vm0, %v4658_v61  ;;  %v4723_v60 = vld [vmem:[%s6677_s12 + $0x498] sm:$0xff] }
 0x11b   : > { %5504 = vmatprep.mubr.msk.f32.mxu0 %vm1271_vm0, %v4594_v62  ;;  %5574 = vmatprep.mubr.msk.f32.mxu1 %vm1271_vm0, %v4659_v63  ;;  %v4788_v61 = vld [vmem:[%s6677_s12 + $0x598] sm:$0xff]  ;;  %v4724_v62 = vld [vmem:[%s6677_s12 + $0x4a0] sm:$0xff] }
 0x11c   : > { %v4789_v63 = vld [vmem:[%s6677_s12 + $0x5a0] sm:$0xff] }
 0x11e   : > { %5505 = vmatmul.mubr.msk.f32.gmra.mrb[52].mxu0 %vm1271_vm0, %v4595_v0  ;;  %5575 = vmatmul.mubr.msk.f32.gmra.mrb[52].mxu1 %vm1271_vm0, %v4660_v1  ;;  %v4725_v0 = vld [vmem:[%s6677_s12 + $0x4a8] sm:$0xff] }
 0x11f   : > { %5507 = vmatprep.mubr.msk.f32.mxu0 %vm1271_vm0, %v4596_v2  ;;  %5577 = vmatprep.mubr.msk.f32.mxu1 %vm1271_vm0, %v4661_v4  ;;  %v4790_v1 = vld [vmem:[%s6677_s12 + $0x5a8] sm:$0xff]  ;;  %v4726_v2 = vld [vmem:[%s6677_s12 + $0x4b0] sm:$0xff] }
 0x120   : > { %v4791_v4 = vld [vmem:[%s6677_s12 + $0x5b0] sm:$0xff] }
 0x122   : > { %5508 = vmatmul.mubr.msk.f32.gmra.mrb[54].mxu0 %vm1271_vm0, %v4597_v6  ;;  %5578 = vmatmul.mubr.msk.f32.gmra.mrb[54].mxu1 %vm1271_vm0, %v4662_v7  ;;  %v4727_v6 = vld [vmem:[%s6677_s12 + $0x4b8] sm:$0xff] }
 0x123   : > { %5510 = vmatprep.mubr.msk.f32.mxu0 %vm1271_vm0, %v4598_v8  ;;  %5580 = vmatprep.mubr.msk.f32.mxu1 %vm1271_vm0, %v4663_v9  ;;  %v4792_v7 = vld [vmem:[%s6677_s12 + $0x5b8] sm:$0xff]  ;;  %v4728_v8 = vld [vmem:[%s6677_s12 + $0x4c0] sm:$0xff] }
 0x124   : > { %v4793_v9 = vld [vmem:[%s6677_s12 + $0x5c0] sm:$0xff] }
 0x126   : > { %5511 = vmatmul.mubr.msk.f32.gmra.mrb[56].mxu0 %vm1271_vm0, %v4599_v11  ;;  %5581 = vmatmul.mubr.msk.f32.gmra.mrb[56].mxu1 %vm1271_vm0, %v4664_v12  ;;  %v4729_v11 = vld [vmem:[%s6677_s12 + $0x4c8] sm:$0xff] }
 0x127   : > { %5513 = vmatprep.mubr.msk.f32.mxu0 %vm1271_vm0, %v4600_v14  ;;  %5583 = vmatprep.mubr.msk.f32.mxu1 %vm1271_vm0, %v4665_v15  ;;  %v4794_v12 = vld [vmem:[%s6677_s12 + $0x5c8] sm:$0xff]  ;;  %v4730_v14 = vld [vmem:[%s6677_s12 + $0x4d0] sm:$0xff] }
 0x128   : > { %v4795_v15 = vld [vmem:[%s6677_s12 + $0x5d0] sm:$0xff] }
 0x12a   : > { %5514 = vmatmul.mubr.msk.f32.gmra.mrb[58].mxu0 %vm1271_vm0, %v4601_v18  ;;  %5584 = vmatmul.mubr.msk.f32.gmra.mrb[58].mxu1 %vm1271_vm0, %v4666_v19  ;;  %v4731_v18 = vld [vmem:[%s6677_s12 + $0x4d8] sm:$0xff] }
 0x12b   : > { %5516 = vmatprep.mubr.msk.f32.mxu0 %vm1271_vm0, %v4602_v20  ;;  %5586 = vmatprep.mubr.msk.f32.mxu1 %vm1271_vm0, %v4667_v21  ;;  %v4796_v19 = vld [vmem:[%s6677_s12 + $0x5d8] sm:$0xff]  ;;  %v4732_v20 = vld [vmem:[%s6677_s12 + $0x4e0] sm:$0xff] }
 0x12c   : > { %v4797_v21 = vld [vmem:[%s6677_s12 + $0x5e0] sm:$0xff] }
 0x12e   : > { %5517 = vmatmul.mubr.msk.f32.gmra.mrb[60].mxu0 %vm1271_vm0, %v4603_v22  ;;  %5587 = vmatmul.mubr.msk.f32.gmra.mrb[60].mxu1 %vm1271_vm0, %v4668_v23  ;;  %v4733_v22 = vld [vmem:[%s6677_s12 + $0x4e8] sm:$0xff] }
 0x12f   : > { %5519 = vmatprep.mubr.msk.f32.mxu0 %vm1271_vm0, %v4604_v24  ;;  %5589 = vmatprep.mubr.msk.f32.mxu1 %vm1271_vm0, %v4669_v25  ;;  %v4798_v23 = vld [vmem:[%s6677_s12 + $0x5e8] sm:$0xff]  ;;  %v4734_v24 = vld [vmem:[%s6677_s12 + $0x4f0] sm:$0xff] }
 0x130   : > { %v4799_v25 = vld [vmem:[%s6677_s12 + $0x5f0] sm:$0xff] }
 0x132   : > { %5520 = vmatmul.mubr.msk.f32.gmra.mrb[62].mxu0 %vm1271_vm0, %v4605_v26  ;;  %5590 = vmatmul.mubr.msk.f32.gmra.mrb[62].mxu1 %vm1271_vm0, %v4670_v27  ;;  %v4735_v26 = vld [vmem:[%s6677_s12 + $0x4f8] sm:$0xff] }
 0x133   : > { %5614 = vmatprep.mubr.msk.f32.mxu0 %vm1271_vm0, %v4704_v28  ;;  %5684 = vmatprep.mubr.msk.f32.mxu1 %vm1271_vm0, %v4769_v29  ;;  %v4800_v27 = vld [vmem:[%s6677_s12 + $0x5f8] sm:$0xff]  ;;  %v4834_v28 = vld [vmem:[%s6677_s12 + $0x600] sm:$0xff] }
 0x134   : > { %v4899_v29 = vld [vmem:[%s6677_s12 + $0x700] sm:$0xff] }
 0x136   : > { %5615 = vmatmul.mubr.msk.f32.vlgmr.msra.gmra.mrb[64].mxu0 %vm1271_vm0, %v4705_v30  ;;  %5685 = vmatmul.mubr.msk.f32.vlgmr.msra.gmra.mrb[64].mxu1 %vm1271_vm0, %v4770_v31  ;;  %v4835_v30 = vld [vmem:[%s6677_s12 + $0x608] sm:$0xff] }
 0x137   : > { %5995 = vmatpush3.bf16.msra.mxu0 %v6662_v3  ;;  %5617 = vmatprep.mubr.msk.f32.mxu0 %vm1271_vm0, %v4706_v32  ;;  %v4900_v31 = vld [vmem:[%s6677_s12 + $0x708] sm:$0xff]  ;;  %v4836_v32 = vld [vmem:[%s6677_s12 + $0x610] sm:$0xff] }
 0x138   : > { %6015 = vmatpush3.bf16.msra.mxu1 %v6662_v3  ;;  %5687 = vmatprep.mubr.msk.f32.mxu1 %vm1271_vm0, %v4771_v33  ;;  %v4774_v3 = vld [vmem:[%s6677_s12 + $0x528] sm:$0xff]  ;;  %v4901_v33 = vld [vmem:[%s6677_s12 + $0x710] sm:$0xff] }
 0x139   : > { %5997 = vmatprep.subr.bf16.mxu0 %v6667_v5  ;;  %6017 = vmatprep.subr.bf16.mxu1 %v6667_v5 }
 0x13a   : > { %5618 = vmatmul.mubr.msk.f32.gmra.mrb[66].mxu0 %vm1271_vm0, %v4707_v34  ;;  %5688 = vmatmul.mubr.msk.f32.gmra.mrb[66].mxu1 %vm1271_vm0, %v4772_v35  ;;  %v4837_v34 = vld [vmem:[%s6677_s12 + $0x618] sm:$0xff] }
 0x13b   : > { %5620 = vmatprep.mubr.msk.f32.mxu0 %vm1271_vm0, %v4708_v36  ;;  %5690 = vmatprep.mubr.msk.f32.mxu1 %vm1271_vm0, %v4773_v37  ;;  %v4902_v35 = vld [vmem:[%s6677_s12 + $0x718] sm:$0xff]  ;;  %v4838_v36 = vld [vmem:[%s6677_s12 + $0x620] sm:$0xff] }
 0x13c   : > { %5999 = vmatpush3.bf16.msra.mxu0 %v6667_v5  ;;  %6019 = vmatpush3.bf16.msra.mxu1 %v6667_v5  ;;  %v4777_v5 = vld [vmem:[%s6677_s12 + $0x540] sm:$0xff] }
 0x13d   : > { %6001 = vmatprep.subr.bf16.mxu0 %v6685_v10  ;;  %6021 = vmatprep.subr.bf16.mxu1 %v6685_v10  ;;  %v4903_v37 = vld [vmem:[%s6677_s12 + $0x720] sm:$0xff] }
 0x13e   : > { %5621 = vmatmul.mubr.msk.f32.gmra.mrb[68].mxu0 %vm1271_vm0, %v4709_v38  ;;  %5691 = vmatmul.mubr.msk.f32.gmra.mrb[68].mxu1 %vm1271_vm0, %v4774_v3  ;;  %v4839_v38 = vld [vmem:[%s6677_s12 + $0x628] sm:$0xff] }
 0x13f   : > { %5623 = vmatprep.mubr.msk.f32.mxu0 %vm1271_vm0, %v4710_v39  ;;  %5693 = vmatprep.mubr.msk.f32.mxu1 %vm1271_vm0, %v4775_v40  ;;  %v4904_v3 = vld [vmem:[%s6677_s12 + $0x728] sm:$0xff]  ;;  %v4840_v39 = vld [vmem:[%s6677_s12 + $0x630] sm:$0xff] }
 0x140   : > { %6003 = vmatpush3.bf16.msra.mxu0 %v6685_v10  ;;  %6023 = vmatpush3.bf16.msra.mxu1 %v6685_v10  ;;  %v4779_v10 = vld [vmem:[%s6677_s12 + $0x550] sm:$0xff] }
 0x141   : > { %6005 = vmatprep.subr.bf16.mxu0 %v6699_v13  ;;  %6025 = vmatprep.subr.bf16.mxu1 %v6699_v13  ;;  %v4905_v40 = vld [vmem:[%s6677_s12 + $0x730] sm:$0xff] }
 0x142   : > { %5624 = vmatmul.mubr.msk.f32.gmra.mrb[70].mxu0 %vm1271_vm0, %v4711_v41  ;;  %5694 = vmatmul.mubr.msk.f32.gmra.mrb[70].mxu1 %vm1271_vm0, %v4776_v42  ;;  %v4841_v41 = vld [vmem:[%s6677_s12 + $0x638] sm:$0xff] }
 0x143   : > { %5626 = vmatprep.mubr.msk.f32.mxu0 %vm1271_vm0, %v4712_v43  ;;  %5696 = vmatprep.mubr.msk.f32.mxu1 %vm1271_vm0, %v4777_v5  ;;  %v4906_v42 = vld [vmem:[%s6677_s12 + $0x738] sm:$0xff]  ;;  %v4842_v43 = vld [vmem:[%s6677_s12 + $0x640] sm:$0xff] }
 0x144   : > { %6007 = vmatpush3.bf16.msra.mxu0 %v6699_v13  ;;  %6027 = vmatpush3.bf16.msra.mxu1 %v6699_v13  ;;  %v4781_v13 = vld [vmem:[%s6677_s12 + $0x560] sm:$0xff] }
 0x145   : > { %6009 = vmatprep.subr.bf16.mxu0 %v6711_v16  ;;  %6029 = vmatprep.subr.bf16.mxu1 %v6711_v16  ;;  %v4907_v5 = vld [vmem:[%s6677_s12 + $0x740] sm:$0xff] }
 0x146   : > { %5627 = vmatmul.mubr.msk.f32.gmra.mrb[72].mxu0 %vm1271_vm0, %v4713_v44  ;;  %5697 = vmatmul.mubr.msk.f32.gmra.mrb[72].mxu1 %vm1271_vm0, %v4778_v45  ;;  %v4843_v44 = vld [vmem:[%s6677_s12 + $0x648] sm:$0xff] }
 0x147   : > { %5629 = vmatprep.mubr.msk.f32.mxu0 %vm1271_vm0, %v4714_v46  ;;  %5699 = vmatprep.mubr.msk.f32.mxu1 %vm1271_vm0, %v4779_v10  ;;  %v4908_v45 = vld [vmem:[%s6677_s12 + $0x748] sm:$0xff]  ;;  %v4844_v46 = vld [vmem:[%s6677_s12 + $0x650] sm:$0xff] }
 0x148   : > { %6011 = vmatpush3.bf16.msra.mxu0 %v6711_v16  ;;  %6031 = vmatpush3.bf16.msra.mxu1 %v6711_v16  ;;  %v4782_v16 = vld [vmem:[%s6677_s12 + $0x568] sm:$0xff]  ;;  %v4909_v10 = vld [vmem:[%s6677_s12 + $0x750] sm:$0xff] }
 0x149   : > { %5752 = vmatprep.subr.msk.mxu0 %vm1368_vm1, %v6720_v17  ;;  %5822 = vmatprep.subr.msk.mxu1 %vm1368_vm1, %v6720_v17 }
 0x14a   : > { %5630 = vmatmul.mubr.msk.f32.gmra.mrb[74].mxu0 %vm1271_vm0, %v4715_v47  ;;  %5700 = vmatmul.mubr.msk.f32.gmra.mrb[74].mxu1 %vm1271_vm0, %v4780_v48  ;;  %v4845_v47 = vld [vmem:[%s6677_s12 + $0x658] sm:$0xff] }
 0x14b   : > { %5632 = vmatprep.mubr.msk.f32.mxu0 %vm1271_vm0, %v4716_v49  ;;  %5702 = vmatprep.mubr.msk.f32.mxu1 %vm1271_vm0, %v4781_v13  ;;  %v4910_v48 = vld [vmem:[%s6677_s12 + $0x758] sm:$0xff]  ;;  %v4846_v49 = vld [vmem:[%s6677_s12 + $0x660] sm:$0xff] }
 0x14c   : > { %5753 = vmatpush3.msk.msra.mxu0 %vm1368_vm1, %v6720_v17  ;;  %5823 = vmatpush3.msk.msra.mxu1 %vm1368_vm1, %v6720_v17  ;;  %v4721_v17 = vld [vmem:[%s6677_s12 + $0x488] sm:$0xff]  ;;  %v4911_v13 = vld [vmem:[%s6677_s12 + $0x760] sm:$0xff] }
 0x14e   : > { %5633 = vmatmul.mubr.msk.f32.gmra.mrb[76].mxu0 %vm1271_vm0, %v4717_v50  ;;  %5703 = vmatmul.mubr.msk.f32.gmra.mrb[76].mxu1 %vm1271_vm0, %v4782_v16 }
 0x14f   : > { %5635 = vmatprep.mubr.msk.f32.mxu0 %vm1271_vm0, %v4718_v51  ;;  %5705 = vmatprep.mubr.msk.f32.mxu1 %vm1271_vm0, %v4783_v52 }
 0x152   : > { %5636 = vmatmul.mubr.msk.f32.gmra.mrb[78].mxu0 %vm1271_vm0, %v4719_v53  ;;  %5706 = vmatmul.mubr.msk.f32.gmra.mrb[78].mxu1 %vm1271_vm0, %v4784_v54 }
 0x153   : > { %5638 = vmatprep.mubr.msk.f32.mxu0 %vm1271_vm0, %v4720_v55  ;;  %5708 = vmatprep.mubr.msk.f32.mxu1 %vm1271_vm0, %v4785_v56  ;;  %v4847_v55 = vld [vmem:[%s6677_s12 + $0x668] sm:$0xff] }
 0x154   : > { %v4912_v56 = vld [vmem:[%s6677_s12 + $0x768] sm:$0xff] }
 0x156   : > { %5639 = vmatmul.mubr.msk.f32.gmra.mrb[80].mxu0 %vm1271_vm0, %v4721_v17  ;;  %5709 = vmatmul.mubr.msk.f32.gmra.mrb[80].mxu1 %vm1271_vm0, %v4786_v57  ;;  %v4848_v17 = vld [vmem:[%s6677_s12 + $0x670] sm:$0xff] }
 0x157   : > { %5641 = vmatprep.mubr.msk.f32.mxu0 %vm1271_vm0, %v4722_v58  ;;  %5711 = vmatprep.mubr.msk.f32.mxu1 %vm1271_vm0, %v4787_v59  ;;  %v4913_v57 = vld [vmem:[%s6677_s12 + $0x770] sm:$0xff] }
 0x15a   : > { %5642 = vmatmul.mubr.msk.f32.gmra.mrb[82].mxu0 %vm1271_vm0, %v4723_v60  ;;  %5712 = vmatmul.mubr.msk.f32.gmra.mrb[82].mxu1 %vm1271_vm0, %v4788_v61 }
 0x15b   : > { %5644 = vmatprep.mubr.msk.f32.mxu0 %vm1271_vm0, %v4724_v62  ;;  %5714 = vmatprep.mubr.msk.f32.mxu1 %vm1271_vm0, %v4789_v63 }
 0x15e   : > { %5645 = vmatmul.mubr.msk.f32.gmra.mrb[84].mxu0 %vm1271_vm0, %v4725_v0  ;;  %5715 = vmatmul.mubr.msk.f32.gmra.mrb[84].mxu1 %vm1271_vm0, %v4790_v1  ;;  %v4849_v0 = vld [vmem:[%s6677_s12 + $0x678] sm:$0xff] }
 0x15f   : > { %5647 = vmatprep.mubr.msk.f32.mxu0 %vm1271_vm0, %v4726_v2  ;;  %5717 = vmatprep.mubr.msk.f32.mxu1 %vm1271_vm0, %v4791_v4  ;;  %v4914_v1 = vld [vmem:[%s6677_s12 + $0x778] sm:$0xff]  ;;  %v4850_v2 = vld [vmem:[%s6677_s12 + $0x680] sm:$0xff] }
 0x160   : > { %v4915_v4 = vld [vmem:[%s6677_s12 + $0x780] sm:$0xff] }
 0x162   : > { %5648 = vmatmul.mubr.msk.f32.gmra.mrb[86].mxu0 %vm1271_vm0, %v4727_v6  ;;  %5718 = vmatmul.mubr.msk.f32.gmra.mrb[86].mxu1 %vm1271_vm0, %v4792_v7 }
 0x163   : > { %5650 = vmatprep.mubr.msk.f32.mxu0 %vm1271_vm0, %v4728_v8  ;;  %5720 = vmatprep.mubr.msk.f32.mxu1 %vm1271_vm0, %v4793_v9 }
 0x166   : > { %5651 = vmatmul.mubr.msk.f32.gmra.mrb[88].mxu0 %vm1271_vm0, %v4729_v11  ;;  %5721 = vmatmul.mubr.msk.f32.gmra.mrb[88].mxu1 %vm1271_vm0, %v4794_v12 }
 0x167   : > { %5653 = vmatprep.mubr.msk.f32.mxu0 %vm1271_vm0, %v4730_v14  ;;  %5723 = vmatprep.mubr.msk.f32.mxu1 %vm1271_vm0, %v4795_v15  ;;  %v4851_v14 = vld [vmem:[%s6677_s12 + $0x688] sm:$0xff] }
 0x168   : > { %v4916_v15 = vld [vmem:[%s6677_s12 + $0x788] sm:$0xff] }
 0x16a   : > { %5654 = vmatmul.mubr.msk.f32.gmra.mrb[90].mxu0 %vm1271_vm0, %v4731_v18  ;;  %5724 = vmatmul.mubr.msk.f32.gmra.mrb[90].mxu1 %vm1271_vm0, %v4796_v19  ;;  %v4852_v18 = vld [vmem:[%s6677_s12 + $0x690] sm:$0xff] }
 0x16b   : > { %5656 = vmatprep.mubr.msk.f32.mxu0 %vm1271_vm0, %v4732_v20  ;;  %5726 = vmatprep.mubr.msk.f32.mxu1 %vm1271_vm0, %v4797_v21  ;;  %v4917_v19 = vld [vmem:[%s6677_s12 + $0x790] sm:$0xff] }
 0x16e   : > { %5657 = vmatmul.mubr.msk.f32.gmra.mrb[92].mxu0 %vm1271_vm0, %v4733_v22  ;;  %5727 = vmatmul.mubr.msk.f32.gmra.mrb[92].mxu1 %vm1271_vm0, %v4798_v23 }
 0x16f   : > { %5659 = vmatprep.mubr.msk.f32.mxu0 %vm1271_vm0, %v4734_v24  ;;  %5729 = vmatprep.mubr.msk.f32.mxu1 %vm1271_vm0, %v4799_v25 }
 0x172   : > { %5660 = vmatmul.mubr.msk.f32.gmra.mrb[94].mxu0 %vm1271_vm0, %v4735_v26  ;;  %5730 = vmatmul.mubr.msk.f32.gmra.mrb[94].mxu1 %vm1271_vm0, %v4800_v27  ;;  %v4853_v26 = vld [vmem:[%s6677_s12 + $0x698] sm:$0xff] }
 0x173   : > { %5754 = vmatprep.mubr.msk.f32.mxu0 %vm1271_vm0, %v4834_v28  ;;  %5824 = vmatprep.mubr.msk.f32.mxu1 %vm1271_vm0, %v4899_v29  ;;  %v4918_v27 = vld [vmem:[%s6677_s12 + $0x798] sm:$0xff]  ;;  %v4854_v28 = vld [vmem:[%s6677_s12 + $0x6a0] sm:$0xff] }
 0x174   : > { %v4919_v29 = vld [vmem:[%s6677_s12 + $0x7a0] sm:$0xff] }
 0x176   : > { %5755 = vmatmul.mubr.msk.f32.vlgmr.msra.gmra.mrb[96].mxu0 %vm1271_vm0, %v4835_v30  ;;  %5825 = vmatmul.mubr.msk.f32.vlgmr.msra.gmra.mrb[96].mxu1 %vm1271_vm0, %v4900_v31 }
 0x177   : > { %5757 = vmatprep.mubr.msk.f32.mxu0 %vm1271_vm0, %v4836_v32  ;;  %5827 = vmatprep.mubr.msk.f32.mxu1 %vm1271_vm0, %v4901_v33 }
 0x17a   : > { %5758 = vmatmul.mubr.msk.f32.gmra.mrb[98].mxu0 %vm1271_vm0, %v4837_v34  ;;  %5828 = vmatmul.mubr.msk.f32.gmra.mrb[98].mxu1 %vm1271_vm0, %v4902_v35 }
 0x17b   : > { %5760 = vmatprep.mubr.msk.f32.mxu0 %vm1271_vm0, %v4838_v36  ;;  %5830 = vmatprep.mubr.msk.f32.mxu1 %vm1271_vm0, %v4903_v37  ;;  %v4855_v36 = vld [vmem:[%s6677_s12 + $0x6a8] sm:$0xff] }
 0x17c   : > { %v4920_v37 = vld [vmem:[%s6677_s12 + $0x7a8] sm:$0xff] }
 0x17e   : > { %5761 = vmatmul.mubr.msk.f32.gmra.mrb[100].mxu0 %vm1271_vm0, %v4839_v38  ;;  %5831 = vmatmul.mubr.msk.f32.gmra.mrb[100].mxu1 %vm1271_vm0, %v4904_v3  ;;  %v4856_v38 = vld [vmem:[%s6677_s12 + $0x6b0] sm:$0xff] }
 0x17f   : > { %5763 = vmatprep.mubr.msk.f32.mxu0 %vm1271_vm0, %v4840_v39  ;;  %5833 = vmatprep.mubr.msk.f32.mxu1 %vm1271_vm0, %v4905_v40  ;;  %v4921_v3 = vld [vmem:[%s6677_s12 + $0x7b0] sm:$0xff] }
 0x182   : > { %5764 = vmatmul.mubr.msk.f32.gmra.mrb[102].mxu0 %vm1271_vm0, %v4841_v41  ;;  %5834 = vmatmul.mubr.msk.f32.gmra.mrb[102].mxu1 %vm1271_vm0, %v4906_v42 }
 0x183   : > { %5766 = vmatprep.mubr.msk.f32.mxu0 %vm1271_vm0, %v4842_v43  ;;  %5836 = vmatprep.mubr.msk.f32.mxu1 %vm1271_vm0, %v4907_v5 }
 0x186   : > { %5767 = vmatmul.mubr.msk.f32.gmra.mrb[104].mxu0 %vm1271_vm0, %v4843_v44  ;;  %5837 = vmatmul.mubr.msk.f32.gmra.mrb[104].mxu1 %vm1271_vm0, %v4908_v45  ;;  %v4857_v44 = vld [vmem:[%s6677_s12 + $0x6b8] sm:$0xff] }
 0x187   : > { %5769 = vmatprep.mubr.msk.f32.mxu0 %vm1271_vm0, %v4844_v46  ;;  %5839 = vmatprep.mubr.msk.f32.mxu1 %vm1271_vm0, %v4909_v10  ;;  %v4922_v45 = vld [vmem:[%s6677_s12 + $0x7b8] sm:$0xff]  ;;  %v4858_v46 = vld [vmem:[%s6677_s12 + $0x6c0] sm:$0xff] }
 0x188   : > { %v4923_v10 = vld [vmem:[%s6677_s12 + $0x7c0] sm:$0xff] }
 0x189   : > { %v7244_v50 = vpop.f32.mrb[0].mxu0  ;;  %v7246_v16 = vpop.f32.mrb[0].mxu1 }
 0x18a   : > { %v7250_v52 = vpop.f32.mrb[1].mxu0  ;;  %v7252_v53 = vpop.f32.mrb[1].mxu1  ;;  %5770 = vmatmul.mubr.msk.f32.gmra.mrb[106].mxu0 %vm1271_vm0, %v4845_v47  ;;  %5840 = vmatmul.mubr.msk.f32.gmra.mrb[106].mxu1 %vm1271_vm0, %v4910_v48  ;;  %v8360_v5 = vmax.f32 %v7244_v50, %v7246_v16 }
 0x18b   : > { %5772 = vmatprep.mubr.msk.f32.mxu0 %vm1271_vm0, %v4846_v49  ;;  %5842 = vmatprep.mubr.msk.f32.mxu1 %vm1271_vm0, %v4911_v13 }
 0x18d   : > { %v7264_v58 = vpop.f32.mrb[2].mxu0  ;;  %v7266_v59 = vpop.f32.mrb[2].mxu1 }
 0x18e   : > { %v7270_v61 = vpop.f32.mrb[3].mxu0  ;;  %v7272_v62 = vpop.f32.mrb[3].mxu1  ;;  %5773 = vmatmul.mubr.msk.f32.gmra.mrb[108].mxu0 %vm1271_vm0, %v4847_v55  ;;  %5843 = vmatmul.mubr.msk.f32.gmra.mrb[108].mxu1 %vm1271_vm0, %v4912_v56  ;;  %v8362_v50 = vmax.f32 %v7264_v58, %v7266_v59 }
 0x18f   : > { %5775 = vmatprep.mubr.msk.f32.mxu0 %vm1271_vm0, %v4848_v17  ;;  %5845 = vmatprep.mubr.msk.f32.mxu1 %vm1271_vm0, %v4913_v57  ;;  %v4859_v17 = vld [vmem:[%s6677_s12 + $0x6c8] sm:$0xff] }
 0x190   : > { %v4924_v57 = vld [vmem:[%s6677_s12 + $0x7c8] sm:$0xff] }
 0x191   : > { %v7284_v6 = vpop.f32.mrb[4].mxu0  ;;  %v7286_v7 = vpop.f32.mrb[4].mxu1 }
 0x192   : > { %v7290_v9 = vpop.f32.mrb[5].mxu0  ;;  %v7292_v11 = vpop.f32.mrb[5].mxu1  ;;  %5776 = vmatmul.mubr.msk.f32.gmra.mrb[110].mxu0 %vm1271_vm0, %v4849_v0  ;;  %5846 = vmatmul.mubr.msk.f32.gmra.mrb[110].mxu1 %vm1271_vm0, %v4914_v1  ;;  %v4860_v0 = vld [vmem:[%s6677_s12 + $0x6d0] sm:$0xff]  ;;  %v8364_v58 = vmax.f32 %v7284_v6, %v7286_v7 }
 0x193   : > { %5778 = vmatprep.mubr.msk.f32.mxu0 %vm1271_vm0, %v4850_v2  ;;  %5848 = vmatprep.mubr.msk.f32.mxu1 %vm1271_vm0, %v4915_v4  ;;  %v4925_v1 = vld [vmem:[%s6677_s12 + $0x7d0] sm:$0xff] }
 0x195   : > { %v7304_v20 = vpop.f32.mrb[6].mxu0  ;;  %v7306_v21 = vpop.f32.mrb[6].mxu1 }
 0x196   : > { %v7310_v23 = vpop.f32.mrb[7].mxu0  ;;  %v7312_v24 = vpop.f32.mrb[7].mxu1  ;;  %5779 = vmatmul.mubr.msk.f32.gmra.mrb[112].mxu0 %vm1271_vm0, %v4851_v14  ;;  %5849 = vmatmul.mubr.msk.f32.gmra.mrb[112].mxu1 %vm1271_vm0, %v4916_v15  ;;  %v8366_v6 = vmax.f32 %v7304_v20, %v7306_v21 }
 0x197   : > { %5781 = vmatprep.mubr.msk.f32.mxu0 %vm1271_vm0, %v4852_v18  ;;  %5851 = vmatprep.mubr.msk.f32.mxu1 %vm1271_vm0, %v4917_v19 }
 0x199   : > { %v7324_v30 = vpop.f32.mrb[8].mxu0  ;;  %v7326_v31 = vpop.f32.mrb[8].mxu1 }
 0x19a   : > { %v7330_v33 = vpop.f32.mrb[9].mxu0  ;;  %v7332_v34 = vpop.f32.mrb[9].mxu1  ;;  %5782 = vmatmul.mubr.msk.f32.gmra.mrb[114].mxu0 %vm1271_vm0, %v4853_v26  ;;  %5852 = vmatmul.mubr.msk.f32.gmra.mrb[114].mxu1 %vm1271_vm0, %v4918_v27  ;;  %v4861_v26 = vld [vmem:[%s6677_s12 + $0x6d8] sm:$0xff]  ;;  %v8368_v20 = vmax.f32 %v7324_v30, %v7326_v31 }
 0x19b   : > { %5784 = vmatprep.mubr.msk.f32.mxu0 %vm1271_vm0, %v4854_v28  ;;  %5854 = vmatprep.mubr.msk.f32.mxu1 %vm1271_vm0, %v4919_v29  ;;  %v4926_v27 = vld [vmem:[%s6677_s12 + $0x7d8] sm:$0xff]  ;;  %v4862_v28 = vld [vmem:[%s6677_s12 + $0x6e0] sm:$0xff] }
 0x19c   : > { %v4927_v29 = vld [vmem:[%s6677_s12 + $0x7e0] sm:$0xff] }
 0x19d   : > { %v7344_v39 = vpop.f32.mrb[10].mxu0  ;;  %v7346_v40 = vpop.f32.mrb[10].mxu1 }
 0x19e   : > { %v7350_v42 = vpop.f32.mrb[11].mxu0  ;;  %v7352_v43 = vpop.f32.mrb[11].mxu1  ;;  %5785 = vmatmul.mubr.msk.f32.gmra.mrb[116].mxu0 %vm1271_vm0, %v4855_v36  ;;  %5855 = vmatmul.mubr.msk.f32.gmra.mrb[116].mxu1 %vm1271_vm0, %v4920_v37  ;;  %v8370_v30 = vmax.f32 %v7344_v39, %v7346_v40 }
 0x19f   : > { %5787 = vmatprep.mubr.msk.f32.mxu0 %vm1271_vm0, %v4856_v38  ;;  %5857 = vmatprep.mubr.msk.f32.mxu1 %vm1271_vm0, %v4921_v3  ;;  %v4930_v38 = vld [vmem:[%s6677_s12 + $0x7f8] sm:$0xff] }
 0x1a1   : > { %v7364_v47 = vpop.f32.mrb[12].mxu0  ;;  %v7366_v48 = vpop.f32.mrb[12].mxu1 }
 0x1a2   : > { %v7370_v13 = vpop.f32.mrb[13].mxu0  ;;  %v7372_v55 = vpop.f32.mrb[13].mxu1  ;;  %5788 = vmatmul.mubr.msk.f32.gmra.mrb[118].mxu0 %vm1271_vm0, %v4857_v44  ;;  %5858 = vmatmul.mubr.msk.f32.gmra.mrb[118].mxu1 %vm1271_vm0, %v4922_v45  ;;  %v8372_v39 = vmax.f32 %v7364_v47, %v7366_v48 }
 0x1a3   : > { %5790 = vmatprep.mubr.msk.f32.mxu0 %vm1271_vm0, %v4858_v46  ;;  %5860 = vmatprep.mubr.msk.f32.mxu1 %vm1271_vm0, %v4923_v10  ;;  %v4863_v46 = vld [vmem:[%s6677_s12 + $0x6e8] sm:$0xff] }
 0x1a4   : > { %v4928_v10 = vld [vmem:[%s6677_s12 + $0x7e8] sm:$0xff] }
 0x1a5   : > { %v7384_v2 = vpop.f32.mrb[14].mxu0  ;;  %v7386_v4 = vpop.f32.mrb[14].mxu1 }
 0x1a6   : > { %v7390_v15 = vpop.f32.mrb[15].mxu0  ;;  %v7392_v18 = vpop.f32.mrb[15].mxu1  ;;  %5791 = vmatmul.mubr.msk.f32.gmra.mrb[120].mxu0 %vm1271_vm0, %v4859_v17  ;;  %5861 = vmatmul.mubr.msk.f32.gmra.mrb[120].mxu1 %vm1271_vm0, %v4924_v57  ;;  %v4864_v17 = vld [vmem:[%s6677_s12 + $0x6f0] sm:$0xff]  ;;  %v8374_v47 = vmax.f32 %v7384_v2, %v7386_v4 }
 0x1a7   : > { %5793 = vmatprep.mubr.msk.f32.mxu0 %vm1271_vm0, %v4860_v0  ;;  %5863 = vmatprep.mubr.msk.f32.mxu1 %vm1271_vm0, %v4925_v1  ;;  %v4929_v57 = vld [vmem:[%s6677_s12 + $0x7f0] sm:$0xff] }
 0x1a9   : > { %v7404_v36 = vpop.f32.mrb[16].mxu0  ;;  %v7406_v37 = vpop.f32.mrb[16].mxu1 }
 0x1aa   : > { %v7410_v3 = vpop.f32.mrb[17].mxu0  ;;  %v7412_v44 = vpop.f32.mrb[17].mxu1  ;;  %5794 = vmatmul.mubr.msk.f32.gmra.mrb[122].mxu0 %vm1271_vm0, %v4861_v26  ;;  %5864 = vmatmul.mubr.msk.f32.gmra.mrb[122].mxu1 %vm1271_vm0, %v4926_v27  ;;  %v8376_v2 = vmax.f32 %v7404_v36, %v7406_v37 }
 0x1ab   : > { %5796 = vmatprep.mubr.msk.f32.mxu0 %vm1271_vm0, %v4862_v28  ;;  %5866 = vmatprep.mubr.msk.f32.mxu1 %vm1271_vm0, %v4927_v29  ;;  %v4865_v29 = vld [vmem:[%s6677_s12 + $0x6f8] sm:$0xff] }
 0x1ad   : > { %v7424_v0 = vpop.f32.mrb[18].mxu0  ;;  %v7426_v1 = vpop.f32.mrb[18].mxu1 }
 0x1ae   : > { %v7430_v27 = vpop.f32.mrb[19].mxu0  ;;  %v7432_v45 = vpop.f32.mrb[19].mxu1  ;;  %5797 = vmatmul.mubr.msk.f32.gmra.mrb[124].mxu0 %vm1271_vm0, %v4863_v46  ;;  %5867 = vmatmul.mubr.msk.f32.gmra.mrb[124].mxu1 %vm1271_vm0, %v4928_v10  ;;  %v8361_v10 = vmax.f32 %v7250_v52, %v7252_v53  ;;  %v8363_v52 = vmax.f32 %v7270_v61, %v7272_v62  ;;  %v8365_v61 = vmax.f32 %v7290_v9, %v7292_v11 }
 0x1af   : > { %5799 = vmatprep.mubr.msk.f32.mxu0 %vm1271_vm0, %v4864_v17  ;;  %5869 = vmatprep.mubr.msk.f32.mxu1 %vm1271_vm0, %v4929_v57  ;;  %v8367_v9 = vmax.f32 %v7310_v23, %v7312_v24  ;;  %v8369_v23 = vmax.f32 %v7330_v33, %v7332_v34  ;;  %v8371_v33 = vmax.f32 %v7350_v42, %v7352_v43 }
 0x1b0   : > { %v8373_v42 = vmax.f32 %v7370_v13, %v7372_v55  ;;  %v8375_v13 = vmax.f32 %v7390_v15, %v7392_v18  ;;  %v8377_v15 = vmax.f32 %v7410_v3, %v7412_v44  ;;  %v8378_v36 = vmax.f32 %v7424_v0, %v7426_v1 }
 0x1b1   : > { %v7442_v19 = vpop.f32.mrb[20].mxu0  ;;  %v7444_v26 = vpop.f32.mrb[20].mxu1  ;;  %v8379_v3 = vmax.f32 %v7430_v27, %v7432_v45 }
 0x1b2   : > { %v7448_v56 = vpop.f32.mrb[21].mxu0  ;;  %v7450_v46 = vpop.f32.mrb[21].mxu1  ;;  %5800 = vmatmul.mubr.msk.f32.gmra.mrb[126].mxu0 %vm1271_vm0, %v4865_v29  ;;  %5870 = vmatmul.mubr.msk.f32.gmra.mrb[126].mxu1 %vm1271_vm0, %v4930_v38  ;;  %v8380_v0 = vmax.f32 %v7442_v19, %v7444_v26 }
 0x1b3   : > { %v8381_v45 = vmax.f32 %v7448_v56, %v7450_v46 }
 0x1b5   : > { %v7456_v17 = vpop.f32.mrb[22].mxu0  ;;  %v7458_v57 = vpop.f32.mrb[22].mxu1 }
 0x1b6   : > { %v7462_v49 = vpop.f32.mrb[23].mxu0  ;;  %v7464_v14 = vpop.f32.mrb[23].mxu1  ;;  %v8382_v19 = vmax.f32 %v7456_v17, %v7458_v57 }
 0x1b7   : > { %v8384_v56 = vmax.f32 %v7462_v49, %v7464_v14 }
 0x1b9   : > { %v7468_v29 = vpop.f32.mrb[24].mxu0  ;;  %v7470_v38 = vpop.f32.mrb[24].mxu1 }
 0x1ba   : > { %v7474_v41 = vpop.f32.mrb[25].mxu0  ;;  %v7476_v35 = vpop.f32.mrb[25].mxu1  ;;  %v8387_v17 = vmax.f32 %v7468_v29, %v7470_v38 }
 0x1bb   : > { %v8390_v49 = vmax.f32 %v7474_v41, %v7476_v35 }
 0x1bd   : > { %v7480_v32 = vpop.f32.mrb[26].mxu0  ;;  %v7482_v25 = vpop.f32.mrb[26].mxu1 }
 0x1be   : > { %8348 = vst [vmem:[#allocation3_spill] sm:$0xff] %v7480_v32  ;;  %8349 = vst [vmem:[#allocation4_spill] sm:$0xff] %v7482_v25  ;;  %v7486_v22 = vpop.f32.mrb[27].mxu0  ;;  %v7488_v12 = vpop.f32.mrb[27].mxu1 }
 0x1bf   : > { %8350 = vst [vmem:[#allocation5_spill] sm:$0xff] %v7486_v22  ;;  %8351 = vst [vmem:[#allocation6_spill] sm:$0xff] %v7488_v12 }
 0x1c1   : > { %v7492_v8 = vpop.f32.mrb[28].mxu0  ;;  %v7494_v63 = vpop.f32.mrb[28].mxu1 }
 0x1c2   : > { %8352 = vst [vmem:[#allocation7_spill] sm:$0xff] %v7492_v8  ;;  %8353 = vst [vmem:[#allocation8_spill] sm:$0xff] %v7494_v63  ;;  %v7498_v60 = vpop.f32.mrb[29].mxu0  ;;  %v7500_v54 = vpop.f32.mrb[29].mxu1 }
 0x1c3   : > { %8354 = vst [vmem:[#allocation9_spill] sm:$0xff] %v7498_v60  ;;  %8355 = vst [vmem:[#allocation10_spill] sm:$0xff] %v7500_v54 }
 0x1c5   : > { %v7504_v51 = vpop.f32.mrb[30].mxu0  ;;  %v7506_v25 = vpop.f32.mrb[30].mxu1  ;;  %v8393_v29 = vld [vmem:[#allocation3_spill] sm:$0xff]  ;;  %v8394_v38 = vld [vmem:[#allocation4_spill] sm:$0xff] }
 0x1c6   : > { %8356 = vst [vmem:[#allocation11_spill] sm:$0xff] %v7504_v51  ;;  %8357 = vst [vmem:[#allocation12_spill] sm:$0xff] %v7506_v25  ;;  %v7510_v12 = vpop.f32.mrb[31].mxu0  ;;  %v7512_v22 = vpop.f32.mrb[31].mxu1  ;;  %v8398_v35 = vld [vmem:[#allocation5_spill] sm:$0xff]  ;;  %v8399_v41 = vld [vmem:[#allocation6_spill] sm:$0xff] }
 0x1c7   : > { %8358 = vst [vmem:[#allocation13_spill] sm:$0xff] %v7510_v12  ;;  %8359 = vst [vmem:[#allocation14_spill] sm:$0xff] %v7512_v22 }
 0x1c9   : > { %v5476_v63 = vpop.f32.mrb[32].mxu0  ;;  %v7516_v8 = vpop.f32.mrb[32].mxu1 }
 0x1ca   : > { %v7521_v54 = vmax.f32 %v8360_v5, %v5476_v63  ;;  %v2178_v60 = vpop.f32.mrb[33].mxu0  ;;  %v7523_v32 = vpop.f32.mrb[33].mxu1 }
 0x1cb   : > { %v7528_v25 = vmax.f32 %v8361_v10, %v2178_v60 }
 0x1cd   : > { %v5479_v22 = vpop.f32.mrb[34].mxu0  ;;  %v7534_v12 = vpop.f32.mrb[34].mxu1 }
 0x1ce   : > { %v7539_v16 = vmax.f32 %v8362_v50, %v5479_v22  ;;  %v2188_v63 = vpop.f32.mrb[35].mxu0  ;;  %v7541_v5 = vpop.f32.mrb[35].mxu1 }
 0x1cf   : > { %v7546_v53 = vmax.f32 %v8363_v52, %v2188_v63 }
 0x1d1   : > { %v5482_v28 = vpop.f32.mrb[36].mxu0  ;;  %v7552_v51 = vpop.f32.mrb[36].mxu1 }
 0x1d2   : > { %v7557_v59 = vmax.f32 %v8364_v58, %v5482_v28  ;;  %v2198_v22 = vpop.f32.mrb[37].mxu0  ;;  %v7559_v50 = vpop.f32.mrb[37].mxu1 }
 0x1d3   : > { %v7564_v62 = vmax.f32 %v8365_v61, %v2198_v22 }
 0x1d5   : > { %v5485_v10 = vpop.f32.mrb[38].mxu0  ;;  %v7570_v60 = vpop.f32.mrb[38].mxu1 }
 0x1d6   : > { %v7575_v7 = vmax.f32 %v8366_v6, %v5485_v10  ;;  %v2208_v28 = vpop.f32.mrb[39].mxu0  ;;  %v7577_v58 = vpop.f32.mrb[39].mxu1 }
 0x1d7   : > { %v7582_v11 = vmax.f32 %v8367_v9, %v2208_v28 }
 0x1d9   : > { %v5488_v52 = vpop.f32.mrb[40].mxu0  ;;  %v7588_v63 = vpop.f32.mrb[40].mxu1 }
 0x1da   : > { %v7593_v21 = vmax.f32 %v8368_v20, %v5488_v52  ;;  %v2218_v10 = vpop.f32.mrb[41].mxu0  ;;  %v7595_v6 = vpop.f32.mrb[41].mxu1 }
 0x1db   : > { %v7600_v24 = vmax.f32 %v8369_v23, %v2218_v10 }
 0x1dd   : > { %v5491_v61 = vpop.f32.mrb[42].mxu0  ;;  %v7606_v22 = vpop.f32.mrb[42].mxu1 }
 0x1de   : > { %v7611_v31 = vmax.f32 %v8370_v30, %v5491_v61  ;;  %v2228_v52 = vpop.f32.mrb[43].mxu0  ;;  %v7613_v20 = vpop.f32.mrb[43].mxu1 }
 0x1df   : > { %v7618_v34 = vmax.f32 %v8371_v33, %v2228_v52 }
 0x1e1   : > { %v5494_v9 = vpop.f32.mrb[44].mxu0  ;;  %v7624_v28 = vpop.f32.mrb[44].mxu1 }
 0x1e2   : > { %v7629_v40 = vmax.f32 %v8372_v39, %v5494_v9  ;;  %v2238_v61 = vpop.f32.mrb[45].mxu0  ;;  %v7631_v30 = vpop.f32.mrb[45].mxu1 }
 0x1e3   : > { %v7636_v43 = vmax.f32 %v8373_v42, %v2238_v61 }
 0x1e5   : > { %v5497_v23 = vpop.f32.mrb[46].mxu0  ;;  %v7642_v10 = vpop.f32.mrb[46].mxu1 }
 0x1e6   : > { %v7647_v48 = vmax.f32 %v8374_v47, %v5497_v23  ;;  %v2248_v9 = vpop.f32.mrb[47].mxu0  ;;  %v7649_v39 = vpop.f32.mrb[47].mxu1 }
 0x1e7   : > { %v7654_v55 = vmax.f32 %v8375_v13, %v2248_v9 }
 0x1e9   : > { %v5500_v33 = vpop.f32.mrb[48].mxu0  ;;  %v7660_v52 = vpop.f32.mrb[48].mxu1 }
 0x1ea   : > { %v7665_v4 = vmax.f32 %v8376_v2, %v5500_v33  ;;  %v2258_v23 = vpop.f32.mrb[49].mxu0  ;;  %v7667_v47 = vpop.f32.mrb[49].mxu1 }
 0x1eb   : > { %v7672_v18 = vmax.f32 %v8377_v15, %v2258_v23 }
 0x1ed   : > { %v5503_v42 = vpop.f32.mrb[50].mxu0  ;;  %v7678_v61 = vpop.f32.mrb[50].mxu1 }
 0x1ee   : > { %v7683_v37 = vmax.f32 %v8378_v36, %v5503_v42  ;;  %v2268_v33 = vpop.f32.mrb[51].mxu0  ;;  %v7685_v2 = vpop.f32.mrb[51].mxu1 }
 0x1ef   : > { %v7690_v44 = vmax.f32 %v8379_v3, %v2268_v33 }
 0x1f1   : > { %v5506_v13 = vpop.f32.mrb[52].mxu0  ;;  %v7696_v9 = vpop.f32.mrb[52].mxu1 }
 0x1f2   : > { %v7701_v1 = vmax.f32 %v8380_v0, %v5506_v13  ;;  %v2278_v42 = vpop.f32.mrb[53].mxu0  ;;  %v7703_v36 = vpop.f32.mrb[53].mxu1 }
 0x1f3   : > { %v7708_v27 = vmax.f32 %v8381_v45, %v2278_v42 }
 0x1f5   : > { %v5509_v15 = vpop.f32.mrb[54].mxu0  ;;  %v7714_v23 = vpop.f32.mrb[54].mxu1 }
 0x1f6   : > { %v7719_v26 = vmax.f32 %v8382_v19, %v5509_v15  ;;  %v2288_v13 = vpop.f32.mrb[55].mxu0  ;;  %v7721_v0 = vpop.f32.mrb[55].mxu1 }
 0x1f7   : > { %8383 = vst [vmem:[#allocation15_spill] sm:$0xff] %v7721_v0  ;;  %v7726_v46 = vmax.f32 %v8384_v56, %v2288_v13 }
 0x1f9   : > { %8385 = vst [vmem:[#allocation16_spill] sm:$0xff] %v7726_v46  ;;  %v5512_v3 = vpop.f32.mrb[56].mxu0  ;;  %v7732_v33 = vpop.f32.mrb[56].mxu1 }
 0x1fa   : > { %8386 = vst [vmem:[#allocation17_spill] sm:$0xff] %v7732_v33  ;;  %v7737_v57 = vmax.f32 %v8387_v17, %v5512_v3  ;;  %v2298_v15 = vpop.f32.mrb[57].mxu0  ;;  %v7739_v19 = vpop.f32.mrb[57].mxu1  ;;  %v8395_v3 = vmax.f32 %v8393_v29, %v8394_v38  ;;  %v8402_v29 = vld [vmem:[#allocation7_spill] sm:$0xff] }
 0x1fb   : > { %8389 = vst [vmem:[#allocation19_spill] sm:$0xff] %v7739_v19  ;;  %v7744_v14 = vmax.f32 %v8390_v49, %v2298_v15  ;;  %v8400_v15 = vmax.f32 %v8398_v35, %v8399_v41  ;;  %v8406_v35 = vld [vmem:[#allocation9_spill] sm:$0xff] }
 0x1fc   : > { %8388 = vst [vmem:[#allocation18_spill] sm:$0xff] %v7737_v57 }
 0x1fd   : > { %8391 = vst [vmem:[#allocation20_spill] sm:$0xff] %v7744_v14  ;;  %v5515_v45 = vpop.f32.mrb[58].mxu0  ;;  %v7750_v42 = vpop.f32.mrb[58].mxu1 }
 0x1fe   : > { %8392 = vst [vmem:[#allocation21_spill] sm:$0xff] %v7750_v42  ;;  %v7755_v17 = vmax.f32 %v8395_v3, %v5515_v45  ;;  %v2308_v0 = vpop.f32.mrb[59].mxu0  ;;  %v7757_v46 = vpop.f32.mrb[59].mxu1  ;;  %v8403_v45 = vld [vmem:[#allocation8_spill] sm:$0xff] }
 0x1ff   : > { %8397 = vst [vmem:[#allocation4_spill] sm:$0xff] %v7757_v46  ;;  %v7762_v49 = vmax.f32 %v8400_v15, %v2308_v0  ;;  %v8404_v38 = vmax.f32 %v8402_v29, %v8403_v45  ;;  %v8407_v0 = vld [vmem:[#allocation10_spill] sm:$0xff]  ;;  %v8410_v29 = vld [vmem:[#allocation11_spill] sm:$0xff] }
 0x200   : > { %8396 = vst [vmem:[#allocation3_spill] sm:$0xff] %v7755_v17  ;;  %v8408_v41 = vmax.f32 %v8406_v35, %v8407_v0  ;;  %v8413_v35 = vld [vmem:[#allocation13_spill] sm:$0xff] }
 0x201   : > { %8401 = vst [vmem:[#allocation5_spill] sm:$0xff] %v7762_v49  ;;  %v5518_v19 = vpop.f32.mrb[60].mxu0  ;;  %v7768_v14 = vpop.f32.mrb[60].mxu1 }
 0x202   : > { %v7773_v3 = vmax.f32 %v8404_v38, %v5518_v19  ;;  %v2318_v33 = vpop.f32.mrb[61].mxu0  ;;  %v7775_v57 = vpop.f32.mrb[61].mxu1  ;;  %v8411_v19 = vld [vmem:[#allocation12_spill] sm:$0xff] }
 0x203   : > { %8405 = vst [vmem:[#allocation6_spill] sm:$0xff] %v7775_v57  ;;  %v7780_v15 = vmax.f32 %v8408_v41, %v2318_v33  ;;  %v8412_v45 = vmax.f32 %v8410_v29, %v8411_v19  ;;  %v8414_v33 = vld [vmem:[#allocation14_spill] sm:$0xff] }
 0x204   : > { %v8415_v0 = vmax.f32 %v8413_v35, %v8414_v33 }
 0x205   : > { %8409 = vst [vmem:[#allocation7_spill] sm:$0xff] %v7780_v15  ;;  %v5521_v46 = vpop.f32.mrb[62].mxu0  ;;  %v7786_v49 = vpop.f32.mrb[62].mxu1 }
 0x206   : > { %v7791_v38 = vmax.f32 %v8412_v45, %v5521_v46  ;;  %v2328_v42 = vpop.f32.mrb[63].mxu0  ;;  %v7793_v17 = vpop.f32.mrb[63].mxu1  ;;  %v8416_v46 = vmax.f32 %v7521_v54, %v7516_v8  ;;  %v8418_v54 = vmax.f32 %v7539_v16, %v7534_v12  ;;  %v8420_v12 = vmax.f32 %v7557_v59, %v7552_v51 }
 0x207   : > { %v7798_v41 = vmax.f32 %v8415_v0, %v2328_v42  ;;  %v8417_v42 = vmax.f32 %v7528_v25, %v7523_v32  ;;  %v8419_v25 = vmax.f32 %v7546_v53, %v7541_v5  ;;  %v8421_v5 = vmax.f32 %v7564_v62, %v7559_v50 }
 0x208   : > { %v8422_v51 = vmax.f32 %v7575_v7, %v7570_v60  ;;  %v8423_v50 = vmax.f32 %v7582_v11, %v7577_v58  ;;  %v8424_v60 = vmax.f32 %v7593_v21, %v7588_v63  ;;  %v8425_v58 = vmax.f32 %v7600_v24, %v7595_v6 }
 0x209   : > { %v5616_v57 = vpop.f32.mrb[64].mxu0  ;;  %v7804_v15 = vpop.f32.mrb[64].mxu1  ;;  %v8426_v63 = vmax.f32 %v7611_v31, %v7606_v22  ;;  %v8427_v6 = vmax.f32 %v7618_v34, %v7613_v20  ;;  %v8428_v22 = vmax.f32 %v7629_v40, %v7624_v28  ;;  %v8429_v20 = vmax.f32 %v7636_v43, %v7631_v30 }
 0x20a   : > { %v7809_v29 = vmax.f32 %v8416_v46, %v5616_v57  ;;  %v2950_v19 = vpop.f32.mrb[65].mxu0  ;;  %v7811_v45 = vpop.f32.mrb[65].mxu1  ;;  %v8430_v28 = vmax.f32 %v7647_v48, %v7642_v10  ;;  %v8431_v30 = vmax.f32 %v7654_v55, %v7649_v39  ;;  %v8432_v10 = vmax.f32 %v7665_v4, %v7660_v52 }
 0x20b   : > { %v7816_v35 = vmax.f32 %v8417_v42, %v2950_v19  ;;  %v8433_v39 = vmax.f32 %v7672_v18, %v7667_v47  ;;  %v8434_v52 = vmax.f32 %v7683_v37, %v7678_v61  ;;  %v8435_v47 = vmax.f32 %v7690_v44, %v7685_v2 }
 0x20c   : > { %v8437_v61 = vmax.f32 %v7701_v1, %v7696_v9  ;;  %v8440_v2 = vmax.f32 %v7708_v27, %v7703_v36  ;;  %v8443_v9 = vmax.f32 %v7719_v26, %v7714_v23  ;;  %v8446_v36 = vld [vmem:[#allocation16_spill] sm:$0xff]  ;;  %v8447_v27 = vld [vmem:[#allocation15_spill] sm:$0xff]  ;;  %v8450_v23 = vld [vmem:[#allocation18_spill] sm:$0xff] }
 0x20d   : > { %v5619_v56 = vpop.f32.mrb[66].mxu0  ;;  %v7822_v13 = vpop.f32.mrb[66].mxu1  ;;  %v8451_v26 = vld [vmem:[#allocation17_spill] sm:$0xff] }
 0x20e   : > { %v7827_v8 = vmax.f32 %v8418_v54, %v5619_v56  ;;  %v2960_v57 = vpop.f32.mrb[67].mxu0  ;;  %v7829_v46 = vpop.f32.mrb[67].mxu1 }
 0x20f   : > { %v7834_v32 = vmax.f32 %v8419_v25, %v2960_v57 }
 0x211   : > { %v5622_v0 = vpop.f32.mrb[68].mxu0  ;;  %v7840_v33 = vpop.f32.mrb[68].mxu1 }
 0x212   : > { %v7845_v16 = vmax.f32 %v8420_v12, %v5622_v0  ;;  %v2970_v56 = vpop.f32.mrb[69].mxu0  ;;  %v7847_v54 = vpop.f32.mrb[69].mxu1 }
 0x213   : > { %v7852_v53 = vmax.f32 %v8421_v5, %v2970_v56 }
 0x215   : > { %v5625_v42 = vpop.f32.mrb[70].mxu0  ;;  %v7858_v19 = vpop.f32.mrb[70].mxu1 }
 0x216   : > { %v7863_v59 = vmax.f32 %v8422_v51, %v5625_v42  ;;  %v2980_v0 = vpop.f32.mrb[71].mxu0  ;;  %v7865_v12 = vpop.f32.mrb[71].mxu1 }
 0x217   : > { %v7870_v62 = vmax.f32 %v8423_v50, %v2980_v0 }
 0x219   : > { %v5628_v25 = vpop.f32.mrb[72].mxu0  ;;  %v7876_v57 = vpop.f32.mrb[72].mxu1 }
 0x21a   : > { %v7881_v7 = vmax.f32 %v8424_v60, %v5628_v25  ;;  %v2990_v42 = vpop.f32.mrb[73].mxu0  ;;  %v7883_v51 = vpop.f32.mrb[73].mxu1 }
 0x21b   : > { %v7888_v11 = vmax.f32 %v8425_v58, %v2990_v42 }
 0x21d   : > { %v5631_v5 = vpop.f32.mrb[74].mxu0  ;;  %v7894_v56 = vpop.f32.mrb[74].mxu1 }
 0x21e   : > { %v7899_v21 = vmax.f32 %v8426_v63, %v5631_v5  ;;  %v3000_v25 = vpop.f32.mrb[75].mxu0  ;;  %v7901_v60 = vpop.f32.mrb[75].mxu1 }
 0x21f   : > { %v7906_v24 = vmax.f32 %v8427_v6, %v3000_v25 }
 0x221   : > { %v5634_v50 = vpop.f32.mrb[76].mxu0  ;;  %v7912_v0 = vpop.f32.mrb[76].mxu1 }
 0x222   : > { %v7917_v31 = vmax.f32 %v8428_v22, %v5634_v50  ;;  %v3010_v5 = vpop.f32.mrb[77].mxu0  ;;  %v7919_v63 = vpop.f32.mrb[77].mxu1 }
 0x223   : > { %v7924_v34 = vmax.f32 %v8429_v20, %v3010_v5 }
 0x225   : > { %v5637_v58 = vpop.f32.mrb[78].mxu0  ;;  %v7930_v42 = vpop.f32.mrb[78].mxu1 }
 0x226   : > { %v7935_v40 = vmax.f32 %v8430_v28, %v5637_v58  ;;  %v3020_v50 = vpop.f32.mrb[79].mxu0  ;;  %v7937_v22 = vpop.f32.mrb[79].mxu1 }
 0x227   : > { %v7942_v43 = vmax.f32 %v8431_v30, %v3020_v50 }
 0x229   : > { %v5640_v6 = vpop.f32.mrb[80].mxu0  ;;  %v7948_v25 = vpop.f32.mrb[80].mxu1 }
 0x22a   : > { %v7953_v48 = vmax.f32 %v8432_v10, %v5640_v6  ;;  %v3030_v58 = vpop.f32.mrb[81].mxu0  ;;  %v7955_v28 = vpop.f32.mrb[81].mxu1 }
 0x22b   : > { %v7960_v55 = vmax.f32 %v8433_v39, %v3030_v58 }
 0x22d   : > { %v5643_v20 = vpop.f32.mrb[82].mxu0  ;;  %v7966_v5 = vpop.f32.mrb[82].mxu1 }
 0x22e   : > { %v7971_v4 = vmax.f32 %v8434_v52, %v5643_v20  ;;  %v3040_v6 = vpop.f32.mrb[83].mxu0  ;;  %v7973_v10 = vpop.f32.mrb[83].mxu1 }
 0x22f   : > { %v7978_v18 = vmax.f32 %v8435_v47, %v3040_v6 }
 0x231   : > { %v5646_v30 = vpop.f32.mrb[84].mxu0  ;;  %v7984_v50 = vpop.f32.mrb[84].mxu1 }
 0x232   : > { %8436 = vst [vmem:[#allocation8_spill] sm:$0xff] %v7984_v50  ;;  %v7989_v37 = vmax.f32 %v8437_v61, %v5646_v30  ;;  %v3050_v20 = vpop.f32.mrb[85].mxu0  ;;  %v7991_v52 = vpop.f32.mrb[85].mxu1 }
 0x233   : > { %8439 = vst [vmem:[#allocation10_spill] sm:$0xff] %v7991_v52  ;;  %v7996_v44 = vmax.f32 %v8440_v2, %v3050_v20  ;;  %v8448_v20 = vmax.f32 %v8446_v36, %v8447_v27  ;;  %v8455_v36 = vld [vmem:[#allocation19_spill] sm:$0xff] }
 0x234   : > { %8438 = vst [vmem:[#allocation9_spill] sm:$0xff] %v7989_v37 }
 0x235   : > { %8441 = vst [vmem:[#allocation11_spill] sm:$0xff] %v7996_v44  ;;  %v5649_v39 = vpop.f32.mrb[86].mxu0  ;;  %v8002_v58 = vpop.f32.mrb[86].mxu1 }
 0x236   : > { %8442 = vst [vmem:[#allocation12_spill] sm:$0xff] %v8002_v58  ;;  %v8007_v1 = vmax.f32 %v8443_v9, %v5649_v39  ;;  %v3060_v30 = vpop.f32.mrb[87].mxu0  ;;  %v8009_v61 = vpop.f32.mrb[87].mxu1  ;;  %v8452_v39 = vmax.f32 %v8450_v23, %v8451_v26  ;;  %v8459_v23 = vld [vmem:[#allocation21_spill] sm:$0xff] }
 0x237   : > { %8445 = vst [vmem:[#allocation14_spill] sm:$0xff] %v8009_v61  ;;  %v8014_v2 = vmax.f32 %v8448_v20, %v3060_v30  ;;  %v8454_v30 = vld [vmem:[#allocation20_spill] sm:$0xff] }
 0x238   : > { %8444 = vst [vmem:[#allocation13_spill] sm:$0xff] %v8007_v1  ;;  %v8456_v27 = vmax.f32 %v8454_v30, %v8455_v36  ;;  %v8462_v30 = vld [vmem:[#allocation5_spill] sm:$0xff] }
 0x239   : > { %8449 = vst [vmem:[#allocation16_spill] sm:$0xff] %v8014_v2  ;;  %v5652_v52 = vpop.f32.mrb[88].mxu0  ;;  %v8020_v44 = vpop.f32.mrb[88].mxu1 }
 0x23a   : > { %v8025_v9 = vmax.f32 %v8452_v39, %v5652_v52  ;;  %v3070_v50 = vpop.f32.mrb[89].mxu0  ;;  %v8027_v37 = vpop.f32.mrb[89].mxu1  ;;  %v8458_v52 = vld [vmem:[#allocation3_spill] sm:$0xff] }
 0x23b   : > { %8453 = vst [vmem:[#allocation15_spill] sm:$0xff] %v8027_v37  ;;  %v8032_v20 = vmax.f32 %v8456_v27, %v3070_v50  ;;  %v8460_v26 = vmax.f32 %v8458_v52, %v8459_v23  ;;  %v8463_v50 = vld [vmem:[#allocation4_spill] sm:$0xff] }
 0x23c   : > { %v8464_v36 = vmax.f32 %v8462_v30, %v8463_v50  ;;  %v8468_v30 = vld [vmem:[#allocation6_spill] sm:$0xff] }
 0x23d   : > { %8457 = vst [vmem:[#allocation18_spill] sm:$0xff] %v8032_v20  ;;  %v5655_v61 = vpop.f32.mrb[90].mxu0  ;;  %v8038_v2 = vpop.f32.mrb[90].mxu1 }
 0x23e   : > { %v8043_v39 = vmax.f32 %v8460_v26, %v5655_v61  ;;  %v3080_v58 = vpop.f32.mrb[91].mxu0  ;;  %v8045_v1 = vpop.f32.mrb[91].mxu1  ;;  %v8466_v61 = vmax.f32 %v7773_v3, %v7768_v14  ;;  %v8470_v14 = vmax.f32 %v7791_v38, %v7786_v49  ;;  %v8474_v49 = vmax.f32 %v7809_v29, %v7804_v15 }
 0x23f   : > { %8461 = vst [vmem:[#allocation17_spill] sm:$0xff] %v8045_v1  ;;  %v8050_v27 = vmax.f32 %v8464_v36, %v3080_v58  ;;  %v8467_v58 = vld [vmem:[#allocation7_spill] sm:$0xff]  ;;  %v8476_v15 = vmax.f32 %v7827_v8, %v7822_v13 }
 0x240   : > { %v8469_v50 = vmax.f32 %v8467_v58, %v8468_v30 }
 0x241   : > { %8465 = vst [vmem:[#allocation20_spill] sm:$0xff] %v8050_v27  ;;  %v5658_v37 = vpop.f32.mrb[92].mxu0  ;;  %v8056_v20 = vpop.f32.mrb[92].mxu1 }
 0x242   : > { %v8063_v52 = vmax.f32 %v8466_v61, %v5658_v37  ;;  %v3090_v23 = vpop.f32.mrb[93].mxu0  ;;  %v8065_v26 = vpop.f32.mrb[93].mxu1 }
 0x243   : > { %v8070_v36 = vmax.f32 %v8469_v50, %v3090_v23  ;;  %v8472_v23 = vmax.f32 %v7798_v41, %v7793_v17  ;;  %v8475_v17 = vmax.f32 %v7816_v35, %v7811_v45  ;;  %v8477_v35 = vmax.f32 %v7834_v32, %v7829_v46 }
 0x244   : > { %v8479_v32 = vmax.f32 %v7852_v53, %v7847_v54  ;;  %v8481_v53 = vmax.f32 %v7870_v62, %v7865_v12  ;;  %v8483_v62 = vmax.f32 %v7888_v11, %v7883_v51  ;;  %v8485_v11 = vmax.f32 %v7906_v24, %v7901_v60 }
 0x245   : > { %v5661_v1 = vpop.f32.mrb[94].mxu0  ;;  %v8076_v27 = vpop.f32.mrb[94].mxu1  ;;  %v8487_v24 = vmax.f32 %v7924_v34, %v7919_v63  ;;  %v8489_v34 = vmax.f32 %v7942_v43, %v7937_v22  ;;  %v8491_v43 = vmax.f32 %v7960_v55, %v7955_v28  ;;  %v8493_v55 = vmax.f32 %v7978_v18, %v7973_v10  ;;  %v8497_v18 = vld [vmem:[#allocation11_spill] sm:$0xff] }
 0x246   : > { %v8081_v3 = vmax.f32 %v8470_v14, %v5661_v1  ;;  %v3100_v37 = vpop.f32.mrb[95].mxu0  ;;  %v8083_v61 = vpop.f32.mrb[95].mxu1 }
 0x247   : > { %8471 = vst [vmem:[#allocation19_spill] sm:$0xff] %v8083_v61  ;;  %v8088_v58 = vmax.f32 %v8472_v23, %v3100_v37  ;;  %v8103_v37 = vld [vmem:[%s8308_s2] ss:$0 sm:$0xff] }
 0x249   : > { %8473 = vst [vmem:[#allocation3_spill] sm:$0xff] %v8088_v58  ;;  %v5756_v47 = vpop.f32.mrb[96].mxu0  ;;  %v5826_v6 = vpop.f32.mrb[96].mxu1 }
 0x24a   : > { %v3882_v38 = vmax.f32 %v8474_v49, %v5756_v47  ;;  %v3722_v1 = vpop.f32.mrb[97].mxu0  ;;  %v4108_v14 = vpop.f32.mrb[97].mxu1 }
 0x24b   : > { %v3881_v41 = vmax.f32 %v8475_v17, %v3722_v1 }
 0x24c   : > { %v4268_v23 = vmax.f32 %v3882_v38, %v5826_v6 }
 0x24d   : > { %v4267_v50 = vmax.f32 %v3881_v41, %v4108_v14  ;;  %v5759_v30 = vpop.f32.mrb[98].mxu0  ;;  %v5829_v61 = vpop.f32.mrb[98].mxu1  ;;  %v8478_v41 = vmax.f32 %v7845_v16, %v7840_v33  ;;  %v8480_v16 = vmax.f32 %v7863_v59, %v7858_v19  ;;  %v8482_v59 = vmax.f32 %v7881_v7, %v7876_v57 }
 0x24e   : > { %v4307_v58 = vadd.f32 %v8103_v37, %v4268_v23  ;;  %v3884_v29 = vmax.f32 %v8476_v15, %v5759_v30  ;;  %v3732_v47 = vpop.f32.mrb[99].mxu0  ;;  %v4118_v49 = vpop.f32.mrb[99].mxu1  ;;  %v8484_v7 = vmax.f32 %v7899_v21, %v7894_v56  ;;  %v8486_v21 = vmax.f32 %v7917_v31, %v7912_v0 }
 0x24f   : > { %v4306_v45 = vadd.f32 %v8103_v37, %v4267_v50  ;;  %v3883_v6 = vmax.f32 %v8477_v35, %v3732_v47  ;;  %v8488_v31 = vmax.f32 %v7935_v40, %v7930_v42  ;;  %v8490_v40 = vmax.f32 %v7953_v48, %v7948_v25 }
 0x250   : > { %v4339_v38 = vmax.f32 %v4307_v58, 0.0  ;;  %v4270_v1 = vmax.f32 %v3884_v29, %v5829_v61  ;;  %v8492_v48 = vmax.f32 %v7971_v4, %v7966_v5  ;;  %v8494_v4 = vld [vmem:[#allocation9_spill] sm:$0xff] }
 0x251   : > { %v4338_v13 = vmax.f32 %v4306_v45, 0.0  ;;  %v4269_v8 = vmax.f32 %v3883_v6, %v4118_v49  ;;  %v5762_v30 = vpop.f32.mrb[100].mxu0  ;;  %v5832_v14 = vpop.f32.mrb[100].mxu1 }
 0x252   : > { %4372 = vst.msk [vmem:[%s8112_s7 + $0x8] sm:$0xff] %vm4370_vm2, %v4339_v38  ;;  %v4309_v17 = vadd.f32 %v8103_v37, %v4270_v1  ;;  %v3886_v23 = vmax.f32 %v8478_v41, %v5762_v30  ;;  %v3742_v50 = vpop.f32.mrb[101].mxu0  ;;  %v4128_v15 = vpop.f32.mrb[101].mxu1 }
 0x253   : > { %4371 = vst.msk [vmem:[%s8112_s7] sm:$0xff] %vm4370_vm2, %v4338_v13  ;;  %v4308_v46 = vadd.f32 %v8103_v37, %v4269_v8  ;;  %v3885_v61 = vmax.f32 %v8479_v32, %v3742_v50 }
 0x254   : > { %v4341_v58 = vmax.f32 %v4309_v17, 0.0  ;;  %v4272_v29 = vmax.f32 %v3886_v23, %v5832_v14 }
 0x255   : > { %v4340_v47 = vmax.f32 %v4308_v46, 0.0  ;;  %v4271_v49 = vmax.f32 %v3885_v61, %v4128_v15  ;;  %v5765_v45 = vpop.f32.mrb[102].mxu0  ;;  %v5835_v35 = vpop.f32.mrb[102].mxu1 }
 0x256   : > { %4374 = vst.msk [vmem:[%s8112_s7 + $0x18] sm:$0xff] %vm4370_vm2, %v4341_v58  ;;  %v4311_v33 = vadd.f32 %v8103_v37, %v4272_v29  ;;  %v3888_v6 = vmax.f32 %v8480_v16, %v5765_v45  ;;  %v3752_v38 = vpop.f32.mrb[103].mxu0  ;;  %v4138_v1 = vpop.f32.mrb[103].mxu1 }
 0x257   : > { %4373 = vst.msk [vmem:[%s8112_s7 + $0x10] sm:$0xff] %vm4370_vm2, %v4340_v47  ;;  %v4310_v54 = vadd.f32 %v8103_v37, %v4271_v49  ;;  %v3887_v13 = vmax.f32 %v8481_v53, %v3752_v38 }
 0x258   : > { %v4343_v8 = vmax.f32 %v4311_v33, 0.0  ;;  %v4274_v30 = vmax.f32 %v3888_v6, %v5835_v35 }
 0x259   : > { %v4342_v14 = vmax.f32 %v4310_v54, 0.0  ;;  %v4273_v17 = vmax.f32 %v3887_v13, %v4138_v1  ;;  %v5768_v41 = vpop.f32.mrb[104].mxu0  ;;  %v5838_v23 = vpop.f32.mrb[104].mxu1 }
 0x25a   : > { %4376 = vst.msk [vmem:[%s8112_s7 + $0x28] sm:$0xff] %vm4370_vm2, %v4343_v8  ;;  %v4313_v19 = vadd.f32 %v8103_v37, %v4274_v30  ;;  %v3890_v50 = vmax.f32 %v8482_v59, %v5768_v41  ;;  %v3762_v15 = vpop.f32.mrb[105].mxu0  ;;  %v4148_v46 = vpop.f32.mrb[105].mxu1 }
 0x25b   : > { %4375 = vst.msk [vmem:[%s8112_s7 + $0x20] sm:$0xff] %vm4370_vm2, %v4342_v14  ;;  %v4312_v12 = vadd.f32 %v8103_v37, %v4273_v17  ;;  %v3889_v32 = vmax.f32 %v8483_v62, %v3762_v15 }
 0x25c   : > { %v4345_v61 = vmax.f32 %v4313_v19, 0.0  ;;  %v4276_v58 = vmax.f32 %v3890_v50, %v5838_v23 }
 0x25d   : > { %v4344_v29 = vmax.f32 %v4312_v12, 0.0  ;;  %v4275_v47 = vmax.f32 %v3889_v32, %v4148_v46  ;;  %v5771_v49 = vpop.f32.mrb[106].mxu0  ;;  %v5841_v45 = vpop.f32.mrb[106].mxu1 }
 0x25e   : > { %4378 = vst.msk [vmem:[%s8112_s7 + $0x38] sm:$0xff] %vm4370_vm2, %v4345_v61  ;;  %v4315_v57 = vadd.f32 %v8103_v37, %v4276_v58  ;;  %v3892_v35 = vmax.f32 %v8484_v7, %v5771_v49  ;;  %v3772_v33 = vpop.f32.mrb[107].mxu0  ;;  %v4158_v16 = vpop.f32.mrb[107].mxu1 }
 0x25f   : > { %4377 = vst.msk [vmem:[%s8112_s7 + $0x30] sm:$0xff] %vm4370_vm2, %v4344_v29  ;;  %v4314_v51 = vadd.f32 %v8103_v37, %v4275_v47  ;;  %v3891_v6 = vmax.f32 %v8485_v11, %v3772_v33 }
 0x260   : > { %v4347_v38 = vmax.f32 %v4315_v57, 0.0  ;;  %v4278_v1 = vmax.f32 %v3892_v35, %v5841_v45 }
 0x261   : > { %v4346_v54 = vmax.f32 %v4314_v51, 0.0  ;;  %v4277_v53 = vmax.f32 %v3891_v6, %v4158_v16  ;;  %v5774_v13 = vpop.f32.mrb[108].mxu0  ;;  %v5844_v8 = vpop.f32.mrb[108].mxu1 }
 0x262   : > { %4380 = vst.msk [vmem:[%s8112_s7 + $0x48] sm:$0xff] %vm4370_vm2, %v4347_v38  ;;  %v4317_v56 = vadd.f32 %v8103_v37, %v4278_v1  ;;  %v3894_v30 = vmax.f32 %v8486_v21, %v5774_v13  ;;  %v3782_v14 = vpop.f32.mrb[109].mxu0  ;;  %v4168_v17 = vpop.f32.mrb[109].mxu1 }
 0x263   : > { %4379 = vst.msk [vmem:[%s8112_s7 + $0x40] sm:$0xff] %vm4370_vm2, %v4346_v54  ;;  %v4316_v60 = vadd.f32 %v8103_v37, %v4277_v53  ;;  %v3893_v41 = vmax.f32 %v8487_v24, %v3782_v14 }
 0x264   : > { %v4349_v23 = vmax.f32 %v4317_v56, 0.0  ;;  %v4280_v19 = vmax.f32 %v3894_v30, %v5844_v8 }
 0x265   : > { %v4348_v59 = vmax.f32 %v4316_v60, 0.0  ;;  %v4279_v50 = vmax.f32 %v3893_v41, %v4168_v17  ;;  %v5777_v15 = vpop.f32.mrb[110].mxu0  ;;  %v5847_v46 = vpop.f32.mrb[110].mxu1  ;;  %v8495_v41 = vld [vmem:[#allocation8_spill] sm:$0xff] }
 0x266   : > { %4382 = vst.msk [vmem:[%s8112_s7 + $0x58] sm:$0xff] %vm4370_vm2, %v4349_v23  ;;  %v4319_v0 = vadd.f32 %v8103_v37, %v4280_v19  ;;  %v3896_v12 = vmax.f32 %v8488_v31, %v5777_v15  ;;  %v3792_v62 = vpop.f32.mrb[111].mxu0  ;;  %v4178_v32 = vpop.f32.mrb[111].mxu1  ;;  %v8496_v23 = vmax.f32 %v8494_v4, %v8495_v41  ;;  %v8498_v15 = vld [vmem:[#allocation10_spill] sm:$0xff] }
 0x267   : > { %4381 = vst.msk [vmem:[%s8112_s7 + $0x50] sm:$0xff] %vm4370_vm2, %v4348_v59  ;;  %v4318_v63 = vadd.f32 %v8103_v37, %v4279_v50  ;;  %v3895_v61 = vmax.f32 %v8489_v34, %v3792_v62 }
 0x268   : > { %v4351_v58 = vmax.f32 %v4319_v0, 0.0  ;;  %v4282_v29 = vmax.f32 %v3896_v12, %v5847_v46  ;;  %v8499_v46 = vmax.f32 %v8497_v18, %v8498_v15 }
 0x269   : > { %v4350_v47 = vmax.f32 %v4318_v63, 0.0  ;;  %v4281_v49 = vmax.f32 %v3895_v61, %v4178_v32  ;;  %v5780_v45 = vpop.f32.mrb[112].mxu0  ;;  %v5850_v57 = vpop.f32.mrb[112].mxu1 }
 0x26a   : > { %4384 = vst.msk [vmem:[%s8112_s7 + $0x68] sm:$0xff] %vm4370_vm2, %v4351_v58  ;;  %v4321_v42 = vadd.f32 %v8103_v37, %v4282_v29  ;;  %v3898_v7 = vmax.f32 %v8490_v40, %v5780_v45  ;;  %v3802_v35 = vpop.f32.mrb[113].mxu0  ;;  %v4188_v33 = vpop.f32.mrb[113].mxu1  ;;  %v8500_v58 = vld [vmem:[#allocation13_spill] sm:$0xff]  ;;  %v8501_v29 = vld [vmem:[#allocation12_spill] sm:$0xff] }
 0x26b   : > { %4383 = vst.msk [vmem:[%s8112_s7 + $0x60] sm:$0xff] %vm4370_vm2, %v4350_v47  ;;  %v4320_v22 = vadd.f32 %v8103_v37, %v4281_v49  ;;  %v3897_v16 = vmax.f32 %v8491_v43, %v3802_v35  ;;  %v8502_v47 = vmax.f32 %v8500_v58, %v8501_v29  ;;  %v8503_v40 = vld [vmem:[#allocation16_spill] sm:$0xff] }
 0x26c   : > { %v4353_v51 = vmax.f32 %v4321_v42, 0.0  ;;  %v4284_v11 = vmax.f32 %v3898_v7, %v5850_v57  ;;  %v8504_v7 = vld [vmem:[#allocation14_spill] sm:$0xff] }
 0x26d   : > { %v4352_v6 = vmax.f32 %v4320_v22, 0.0  ;;  %v4283_v38 = vmax.f32 %v3897_v16, %v4188_v33  ;;  %v5783_v1 = vpop.f32.mrb[114].mxu0  ;;  %v5853_v54 = vpop.f32.mrb[114].mxu1  ;;  %v8505_v35 = vmax.f32 %v8503_v40, %v8504_v7  ;;  %v8517_v7 = vld [vmem:[#allocation3_spill] sm:$0xff] }
 0x26e   : > { %4386 = vst.msk [vmem:[%s8112_s7 + $0x78] sm:$0xff] %vm4370_vm2, %v4353_v51  ;;  %v4323_v25 = vadd.f32 %v8103_v37, %v4284_v11  ;;  %v3900_v53 = vmax.f32 %v8492_v48, %v5783_v1  ;;  %v3812_v13 = vpop.f32.mrb[115].mxu0  ;;  %v4198_v8 = vpop.f32.mrb[115].mxu1  ;;  %v8506_v1 = vmax.f32 %v8025_v9, %v8020_v44  ;;  %v8510_v9 = vmax.f32 %v8043_v39, %v8038_v2 }
 0x26f   : > { %4385 = vst.msk [vmem:[%s8112_s7 + $0x70] sm:$0xff] %vm4370_vm2, %v4352_v6  ;;  %v4322_v28 = vadd.f32 %v8103_v37, %v4283_v38  ;;  %v3899_v56 = vmax.f32 %v8493_v55, %v3812_v13  ;;  %v8507_v13 = vld [vmem:[#allocation18_spill] sm:$0xff]  ;;  %v8514_v39 = vmax.f32 %v8063_v52, %v8056_v20 }
 0x270   : > { %v4355_v21 = vmax.f32 %v4323_v25, 0.0  ;;  %v4286_v30 = vmax.f32 %v3900_v53, %v5853_v54 }
 0x271   : > { %v4354_v14 = vmax.f32 %v4322_v28, 0.0  ;;  %v4285_v17 = vmax.f32 %v3899_v56, %v4198_v8  ;;  %v5786_v60 = vpop.f32.mrb[116].mxu0  ;;  %v5856_v24 = vpop.f32.mrb[116].mxu1  ;;  %v8508_v8 = vld [vmem:[#allocation15_spill] sm:$0xff] }
 0x272   : > { %4388 = vst.msk [vmem:[%s8112_s7 + $0x88] sm:$0xff] %vm4370_vm2, %v4355_v21  ;;  %v4325_v5 = vadd.f32 %v8103_v37, %v4286_v30  ;;  %v3902_v19 = vmax.f32 %v8496_v23, %v5786_v60  ;;  %v3822_v59 = vpop.f32.mrb[117].mxu0  ;;  %v4208_v50 = vpop.f32.mrb[117].mxu1  ;;  %v8509_v28 = vmax.f32 %v8507_v13, %v8508_v8  ;;  %v8511_v23 = vld [vmem:[#allocation20_spill] sm:$0xff] }
 0x273   : > { %4387 = vst.msk [vmem:[%s8112_s7 + $0x80] sm:$0xff] %vm4370_vm2, %v4354_v14  ;;  %v4324_v10 = vadd.f32 %v8103_v37, %v4285_v17  ;;  %v3901_v0 = vmax.f32 %v8499_v46, %v3822_v59 }
 0x274   : > { %v4357_v31 = vmax.f32 %v4325_v5, 0.0  ;;  %v4288_v12 = vmax.f32 %v3902_v19, %v5856_v24  ;;  %v8512_v19 = vld [vmem:[#allocation17_spill] sm:$0xff] }
 0x275   : > { %v4356_v62 = vmax.f32 %v4324_v10, 0.0  ;;  %v4287_v32 = vmax.f32 %v3901_v0, %v4208_v50  ;;  %v5789_v63 = vpop.f32.mrb[118].mxu0  ;;  %v5859_v34 = vpop.f32.mrb[118].mxu1  ;;  %v8513_v59 = vmax.f32 %v8511_v23, %v8512_v19 }
 0x276   : > { %4390 = vst.msk [vmem:[%s8112_s7 + $0x98] sm:$0xff] %vm4370_vm2, %v4357_v31  ;;  %v4327_v61 = vadd.f32 %v8103_v37, %v4288_v12  ;;  %v3904_v49 = vmax.f32 %v8502_v47, %v5789_v63  ;;  %v3832_v45 = vpop.f32.mrb[119].mxu0  ;;  %v4218_v57 = vpop.f32.mrb[119].mxu1 }
 0x277   : > { %4389 = vst.msk [vmem:[%s8112_s7 + $0x90] sm:$0xff] %vm4370_vm2, %v4356_v62  ;;  %v4326_v42 = vadd.f32 %v8103_v37, %v4287_v32  ;;  %v3903_v33 = vmax.f32 %v8505_v35, %v3832_v45  ;;  %v8518_v35 = vld [vmem:[#allocation19_spill] sm:$0xff] }
 0x278   : > { %v4359_v22 = vmax.f32 %v4327_v61, 0.0  ;;  %v4290_v43 = vmax.f32 %v3904_v49, %v5859_v34  ;;  %v8515_v34 = vmax.f32 %v8070_v36, %v8065_v26 }
 0x279   : > { %v4358_v16 = vmax.f32 %v4326_v42, 0.0  ;;  %v4289_v51 = vmax.f32 %v3903_v33, %v4218_v57  ;;  %v5792_v11 = vpop.f32.mrb[120].mxu0  ;;  %v5862_v6 = vpop.f32.mrb[120].mxu1  ;;  %v8516_v57 = vmax.f32 %v8081_v3, %v8076_v27  ;;  %v8519_v33 = vmax.f32 %v8517_v7, %v8518_v35 }
 0x27a   : > { %4392 = vst.msk [vmem:[%s8112_s7 + $0xa8] sm:$0xff] %vm4370_vm2, %v4359_v22  ;;  %v4329_v38 = vadd.f32 %v8103_v37, %v4290_v43  ;;  %v3906_v54 = vmax.f32 %v8506_v1, %v5792_v11  ;;  %v3842_v25 = vpop.f32.mrb[121].mxu0  ;;  %v4228_v48 = vpop.f32.mrb[121].mxu1 }
 0x27b   : > { %4391 = vst.msk [vmem:[%s8112_s7 + $0xa0] sm:$0xff] %vm4370_vm2, %v4358_v16  ;;  %v4328_v53 = vadd.f32 %v8103_v37, %v4289_v51  ;;  %v3905_v55 = vmax.f32 %v8509_v28, %v3842_v25 }
 0x27c   : > { %v4361_v56 = vmax.f32 %v4329_v38, 0.0  ;;  %v4292_v21 = vmax.f32 %v3906_v54, %v5862_v6 }
 0x27d   : > { %v4360_v30 = vmax.f32 %v4328_v53, 0.0  ;;  %v4291_v14 = vmax.f32 %v3905_v55, %v4228_v48  ;;  %v5795_v17 = vpop.f32.mrb[122].mxu0  ;;  %v5865_v60 = vpop.f32.mrb[122].mxu1 }
 0x27e   : > { %4394 = vst.msk [vmem:[%s8112_s7 + $0xb8] sm:$0xff] %vm4370_vm2, %v4361_v56  ;;  %v4331_v44 = vadd.f32 %v8103_v37, %v4292_v21  ;;  %v3908_v24 = vmax.f32 %v8510_v9, %v5795_v17  ;;  %v3852_v5 = vpop.f32.mrb[123].mxu0  ;;  %v4238_v4 = vpop.f32.mrb[123].mxu1 }
 0x27f   : > { %4393 = vst.msk [vmem:[%s8112_s7 + $0xb0] sm:$0xff] %vm4370_vm2, %v4360_v30  ;;  %v4330_v41 = vadd.f32 %v8103_v37, %v4291_v14  ;;  %v3907_v50 = vmax.f32 %v8513_v59, %v3852_v5 }
 0x280   : > { %v4363_v10 = vmax.f32 %v4331_v44, 0.0  ;;  %v4294_v18 = vmax.f32 %v3908_v24, %v5865_v60 }
 0x281   : > { %v4362_v15 = vmax.f32 %v4330_v41, 0.0  ;;  %v4293_v46 = vmax.f32 %v3907_v50, %v4238_v4  ;;  %v5798_v0 = vpop.f32.mrb[124].mxu0  ;;  %v5868_v31 = vpop.f32.mrb[124].mxu1 }
 0x282   : > { %4396 = vst.msk [vmem:[%s8112_s7 + $0xc8] sm:$0xff] %vm4370_vm2, %v4363_v10  ;;  %v4333_v2 = vadd.f32 %v8103_v37, %v4294_v18  ;;  %v3910_v12 = vmax.f32 %v8514_v39, %v5798_v0  ;;  %v3862_v62 = vpop.f32.mrb[125].mxu0  ;;  %v4248_v32 = vpop.f32.mrb[125].mxu1 }
 0x283   : > { %4395 = vst.msk [vmem:[%s8112_s7 + $0xc0] sm:$0xff] %vm4370_vm2, %v4362_v15  ;;  %v4332_v63 = vadd.f32 %v8103_v37, %v4293_v46  ;;  %v3909_v61 = vmax.f32 %v8515_v34, %v3862_v62 }
 0x284   : > { %v4365_v58 = vmax.f32 %v4333_v2, 0.0  ;;  %v4296_v29 = vmax.f32 %v3910_v12, %v5868_v31 }
 0x285   : > { %v4364_v47 = vmax.f32 %v4332_v63, 0.0  ;;  %v4295_v49 = vmax.f32 %v3909_v61, %v4248_v32  ;;  %v5801_v45 = vpop.f32.mrb[126].mxu0  ;;  %v5871_v20 = vpop.f32.mrb[126].mxu1 }
 0x286   : > { %4398 = vst.msk [vmem:[%s8112_s7 + $0xd8] sm:$0xff] %vm4370_vm2, %v4365_v58  ;;  %v4335_v52 = vadd.f32 %v8103_v37, %v4296_v29  ;;  %v3912_v42 = vmax.f32 %v8516_v57, %v5801_v45  ;;  %v3872_v40 = vpop.f32.mrb[127].mxu0  ;;  %v4258_v26 = vpop.f32.mrb[127].mxu1 }
 0x287   : > { %4397 = vst.msk [vmem:[%s8112_s7 + $0xd0] sm:$0xff] %vm4370_vm2, %v4364_v47  ;;  %v4334_v36 = vadd.f32 %v8103_v37, %v4295_v49  ;;  %v3911_v22 = vmax.f32 %v8519_v33, %v3872_v40 }
 0x288   : > { %v4367_v43 = vmax.f32 %v4335_v52, 0.0  ;;  %v4298_v16 = vmax.f32 %v3912_v42, %v5871_v20 }
 0x289   : > { %v4366_v51 = vmax.f32 %v4334_v36, 0.0  ;;  %v4297_v11 = vmax.f32 %v3911_v22, %v4258_v26 }
 0x28a   : > { %4400 = vst.msk [vmem:[%s8112_s7 + $0xe8] sm:$0xff] %vm4370_vm2, %v4367_v43  ;;  %v4337_v27 = vadd.f32 %v8103_v37, %v4298_v16 }
 0x28b   : > { %4399 = vst.msk [vmem:[%s8112_s7 + $0xe0] sm:$0xff] %vm4370_vm2, %v4366_v51  ;;  %v4336_v3 = vadd.f32 %v8103_v37, %v4297_v11 }
 0x28c   : > { %v4369_v6 = vmax.f32 %v4337_v27, 0.0 }
 0x28d   : > { %v4368_v38 = vmax.f32 %v4336_v3, 0.0 }
 0x28e   : > { %4402 = vst.msk [vmem:[%s8112_s7 + $0xf8] sm:$0xff] %vm4370_vm2, %v4369_v6 }
 0x28f   : > { %4401 = vst.msk [vmem:[%s8112_s7 + $0xf0] sm:$0xff] %vm4370_vm2, %v4368_v38 }
 0x290 PF: > { %p10_p9 = scmp.ge.s32.totalorder %s6117_s16, 4   ;;  %s8520_s12 = smov %s6074_s13 }
 0x291   : > { %s8521_s13 = smov %s6126_s19  ;;  %s8522_s14 = smov %s6117_s16 }
 0x292   :  { %12 = sbr.rel (!%p10_p9) target bundleno = 2 (0x2), region = 112 }

// kernel: mm_student_forward.6
= control target key start
LH: loop header
LB: loop body
LE: loop exit
PB: predicated region body
PF: predicated region fallthrough
CT: control target
= control target key end

     0   :  { %vm178_vm0 = vcmask 785408   ;;  %vm4209_vm1 = vcmask 523264   ;;  %s10212_s1 = inlined_call_operand.vmem [shape: f32[864,64], index: 1, kind: input, shape index: {}]   ;;  %s10213_s0 = inlined_call_operand.vmem [shape: f32[8,64,864], index: 0, kind: input, shape index: {}]   ;;  %s10214_s2 = inlined_call_operand.vmem [shape: f32[1,64], index: 2, kind: input, shape index: {}]   ;;  %s10215_s3 = inlined_call_operand.vmem [shape: f32[64,64], index: 3, kind: output, shape index: {}]  }
   0x1   :  { %v30_v0 = vld [vmem:[%s10212_s1 + $0x80] sm:$0xff]  ;;  %v31_v1 = vld [vmem:[%s10212_s1 + $0x88] sm:$0xff]  ;;  %v32_v11 = vld [vmem:[%s10212_s1 + $0x90] sm:$0xff] }
   0x2   :  { %v62_v2 = vld [vmem:[%s10212_s1 + $0x180] sm:$0xff]  ;;  %v7460_v3 = vpack.c.bf16 %v31_v1, %v30_v0  ;;  %v63_v4 = vld [vmem:[%s10212_s1 + $0x188] sm:$0xff]  ;;  %v33_v13 = vld [vmem:[%s10212_s1 + $0x98] sm:$0xff] }
   0x3   :  { %v14_v5 = vld [vmem:[%s10212_s1] sm:$0xff]  ;;  %v15_v6 = vld [vmem:[%s10212_s1 + $0x8] sm:$0xff]  ;;  %v7471_v7 = vpack.c.bf16 %v63_v4, %v62_v2  ;;  %v64_v14 = vld [vmem:[%s10212_s1 + $0x190] sm:$0xff]  ;;  %v7498_v16 = vpack.c.bf16 %v33_v13, %v32_v11 }
   0x4   :  { %10274 = vst [vmem:[#allocation2_spill] sm:$0xff] %v7460_v3  ;;  %v7473_v8 = vpack.c.bf16 %v15_v6, %v14_v5  ;;  %v46_v9 = vld [vmem:[%s10212_s1 + $0x100] sm:$0xff]  ;;  %v47_v10 = vld [vmem:[%s10212_s1 + $0x108] sm:$0xff]  ;;  %6472 = vmatprep.subr.bf16.mxu0 %v7460_v3  ;;  %v65_v15 = vld [vmem:[%s10212_s1 + $0x198] sm:$0xff] }
   0x5   :  { %10275 = vst [vmem:[#allocation3_spill] sm:$0xff] %v7471_v7  ;;  %v7485_v12 = vpack.c.bf16 %v47_v10, %v46_v9  ;;  %6504 = vmatprep.subr.bf16.mxu1 %v7471_v7  ;;  %v7500_v17 = vpack.c.bf16 %v65_v15, %v64_v14  ;;  %v16_v18 = vld [vmem:[%s10212_s1 + $0x10] sm:$0xff]  ;;  %v17_v19 = vld [vmem:[%s10212_s1 + $0x18] sm:$0xff]  ;;  %v34_v23 = vld [vmem:[%s10212_s1 + $0xa0] sm:$0xff] }
   0x6   :  { %6474 = vmatpush3.bf16.msra.mxu0 %v7473_v8  ;;  %v48_v20 = vld [vmem:[%s10212_s1 + $0x110] sm:$0xff]  ;;  %v7512_v21 = vpack.c.bf16 %v17_v19, %v16_v18  ;;  %v49_v22 = vld [vmem:[%s10212_s1 + $0x118] sm:$0xff]  ;;  %v35_v24 = vld [vmem:[%s10212_s1 + $0xa8] sm:$0xff] }
   0x7   :  { %10276 = vst [vmem:[#allocation4_spill] sm:$0xff] %v7500_v17  ;;  %6506 = vmatpush3.bf16.msra.mxu1 %v7485_v12  ;;  %6476 = vmatprep.subr.bf16.mxu0 %v7498_v16  ;;  %v7525_v25 = vpack.c.bf16 %v49_v22, %v48_v20  ;;  %v7527_v26 = vpack.c.bf16 %v35_v24, %v34_v23  ;;  %v66_v27 = vld [vmem:[%s10212_s1 + $0x1a0] sm:$0xff]  ;;  %v67_v28 = vld [vmem:[%s10212_s1 + $0x1a8] sm:$0xff]  ;;  %v36_v35 = vld [vmem:[%s10212_s1 + $0xb0] sm:$0xff] }
   0x8   :  { %10277 = vst [vmem:[#allocation5_spill] sm:$0xff] %v7512_v21  ;;  %6508 = vmatprep.subr.bf16.mxu1 %v7500_v17  ;;  %v18_v29 = vld [vmem:[%s10212_s1 + $0x20] sm:$0xff]  ;;  %v7538_v30 = vpack.c.bf16 %v67_v28, %v66_v27  ;;  %v19_v31 = vld [vmem:[%s10212_s1 + $0x28] sm:$0xff]  ;;  %v37_v36 = vld [vmem:[%s10212_s1 + $0xb8] sm:$0xff] }
   0x9   :  { %10278 = vst [vmem:[#allocation6_spill] sm:$0xff] %v7525_v25  ;;  %10279 = vst [vmem:[#allocation7_spill] sm:$0xff] %v7527_v26  ;;  %v50_v32 = vld [vmem:[%s10212_s1 + $0x120] sm:$0xff]  ;;  %v51_v33 = vld [vmem:[%s10212_s1 + $0x128] sm:$0xff]  ;;  %v7550_v34 = vpack.c.bf16 %v19_v31, %v18_v29  ;;  %v7565_v39 = vpack.c.bf16 %v37_v36, %v36_v35 }
   0xa   :  { %10280 = vst [vmem:[#allocation8_spill] sm:$0xff] %v7538_v30  ;;  %6478 = vmatpush3.bf16.msra.mxu0 %v7512_v21  ;;  %v68_v37 = vld [vmem:[%s10212_s1 + $0x1b0] sm:$0xff]  ;;  %v7563_v38 = vpack.c.bf16 %v51_v33, %v50_v32  ;;  %v69_v40 = vld [vmem:[%s10212_s1 + $0x1b8] sm:$0xff]  ;;  %v38_v46 = vld [vmem:[%s10212_s1 + $0xc0] sm:$0xff] }
   0xb   :  { %10281 = vst [vmem:[#allocation9_spill] sm:$0xff] %v7550_v34  ;;  %6510 = vmatpush3.bf16.msra.mxu1 %v7525_v25  ;;  %6480 = vmatprep.subr.bf16.mxu0 %v7527_v26  ;;  %10283 = vst [vmem:[#allocation11_spill] sm:$0xff] %v7565_v39  ;;  %v20_v41 = vld [vmem:[%s10212_s1 + $0x30] sm:$0xff]  ;;  %v21_v42 = vld [vmem:[%s10212_s1 + $0x38] sm:$0xff]  ;;  %v7577_v43 = vpack.c.bf16 %v69_v40, %v68_v37 }
   0xc   :  { %10282 = vst [vmem:[#allocation10_spill] sm:$0xff] %v7563_v38  ;;  %6512 = vmatprep.subr.bf16.mxu1 %v7538_v30  ;;  %v52_v44 = vld [vmem:[%s10212_s1 + $0x130] sm:$0xff]  ;;  %v53_v45 = vld [vmem:[%s10212_s1 + $0x138] sm:$0xff]  ;;  %v39_v47 = vld [vmem:[%s10212_s1 + $0xc8] sm:$0xff]  ;;  %v7598_v50 = vpack.c.bf16 %v21_v42, %v20_v41 }
   0xd   :  { %10284 = vst [vmem:[#allocation12_spill] sm:$0xff] %v7577_v43  ;;  %v70_v48 = vld [vmem:[%s10212_s1 + $0x1c0] sm:$0xff]  ;;  %v71_v49 = vld [vmem:[%s10212_s1 + $0x1c8] sm:$0xff]  ;;  %v7602_v51 = vpack.c.bf16 %v53_v45, %v52_v44  ;;  %v7604_v52 = vpack.c.bf16 %v39_v47, %v38_v46  ;;  %v40_v58 = vld [vmem:[%s10212_s1 + $0xd0] sm:$0xff] }
   0xe   :  { %6482 = vmatpush3.bf16.msra.mxu0 %v7550_v34  ;;  %10285 = vst [vmem:[#allocation13_spill] sm:$0xff] %v7598_v50  ;;  %v22_v53 = vld [vmem:[%s10212_s1 + $0x40] sm:$0xff]  ;;  %v23_v54 = vld [vmem:[%s10212_s1 + $0x48] sm:$0xff]  ;;  %v7616_v56 = vpack.c.bf16 %v71_v49, %v70_v48  ;;  %v41_v59 = vld [vmem:[%s10212_s1 + $0xd8] sm:$0xff] }
   0xf   :  { %6514 = vmatpush3.bf16.msra.mxu1 %v7563_v38  ;;  %6484 = vmatprep.subr.bf16.mxu0 %v7565_v39  ;;  %10286 = vst [vmem:[#allocation14_spill] sm:$0xff] %v7602_v51  ;;  %10287 = vst [vmem:[#allocation15_spill] sm:$0xff] %v7604_v52  ;;  %v54_v55 = vld [vmem:[%s10212_s1 + $0x140] sm:$0xff]  ;;  %v55_v57 = vld [vmem:[%s10212_s1 + $0x148] sm:$0xff]  ;;  %v7634_v62 = vpack.c.bf16 %v23_v54, %v22_v53  ;;  %v7640_v0 = vpack.c.bf16 %v41_v59, %v40_v58 }
  0x10   :  { %6516 = vmatprep.subr.bf16.mxu1 %v7577_v43  ;;  %v72_v60 = vld [vmem:[%s10212_s1 + $0x1d0] sm:$0xff]  ;;  %v73_v61 = vld [vmem:[%s10212_s1 + $0x1d8] sm:$0xff]  ;;  %v7638_v63 = vpack.c.bf16 %v55_v57, %v54_v55  ;;  %v42_v9 = vld [vmem:[%s10212_s1 + $0xe0] sm:$0xff] }
  0x11   :  { %v24_v1 = vld [vmem:[%s10212_s1 + $0x50] sm:$0xff]  ;;  %v25_v2 = vld [vmem:[%s10212_s1 + $0x58] sm:$0xff]  ;;  %v7652_v5 = vpack.c.bf16 %v73_v61, %v72_v60  ;;  %v43_v10 = vld [vmem:[%s10212_s1 + $0xe8] sm:$0xff] }
  0x12   :  { %6486 = vmatpush3.bf16.msra.mxu0 %v7598_v50  ;;  %v56_v4 = vld [vmem:[%s10212_s1 + $0x150] sm:$0xff]  ;;  %v57_v6 = vld [vmem:[%s10212_s1 + $0x158] sm:$0xff]  ;;  %v74_v11 = vld [vmem:[%s10212_s1 + $0x1e0] sm:$0xff]  ;;  %v7670_v14 = vpack.c.bf16 %v25_v2, %v24_v1  ;;  %v7682_v20 = vpack.c.bf16 %v43_v10, %v42_v9 }
  0x13   :  { %6518 = vmatpush3.bf16.msra.mxu1 %v7602_v51  ;;  %6488 = vmatprep.subr.bf16.mxu0 %v7604_v52  ;;  %v75_v13 = vld [vmem:[%s10212_s1 + $0x1e8] sm:$0xff]  ;;  %v26_v15 = vld [vmem:[%s10212_s1 + $0x60] sm:$0xff]  ;;  %v7680_v19 = vpack.c.bf16 %v57_v6, %v56_v4  ;;  %v125_v24 = vld [vmem:[%s10213_s0 + $0x18] sm:$0xff] }
  0x14   :  { %6520 = vmatprep.subr.bf16.mxu1 %v7616_v56  ;;  %v27_v18 = vld [vmem:[%s10212_s1 + $0x68] sm:$0xff]  ;;  %10288 = vst [vmem:[#allocation16_spill] sm:$0xff] %v7682_v20  ;;  %v58_v22 = vld [vmem:[%s10212_s1 + $0x160] sm:$0xff]  ;;  %v7694_v27 = vpack.c.bf16 %v75_v13, %v74_v11  ;;  %v44_v29 = vld [vmem:[%s10212_s1 + $0xf0] sm:$0xff]  ;;  %372 = vmatprep.mubr.f32.mxu1 %v125_v24 }
  0x15   :  { %v123_v23 = vld [vmem:[%s10213_s0 + $0x8] sm:$0xff]  ;;  %v45_v31 = vld [vmem:[%s10212_s1 + $0xf8] sm:$0xff]  ;;  %v76_v32 = vld [vmem:[%s10212_s1 + $0x1f0] sm:$0xff]  ;;  %v7712_v35 = vpack.c.bf16 %v27_v18, %v26_v15 }
  0x16   :  { %6490 = vmatpush3.bf16.msra.mxu0 %v7634_v62  ;;  %10289 = vst [vmem:[#allocation17_spill] sm:$0xff] %v7694_v27  ;;  %v59_v28 = vld [vmem:[%s10212_s1 + $0x168] sm:$0xff]  ;;  %267 = vmatprep.mubr.f32.mxu0 %v123_v23  ;;  %v77_v33 = vld [vmem:[%s10212_s1 + $0x1f8] sm:$0xff]  ;;  %v7718_v37 = vpack.c.bf16 %v45_v31, %v44_v29  ;;  %v28_v40 = vld [vmem:[%s10212_s1 + $0x70] sm:$0xff] }
  0x17   :  { %6522 = vmatpush3.bf16.msra.mxu1 %v7638_v63  ;;  %6492 = vmatprep.subr.bf16.mxu0 %v7640_v0  ;;  %10290 = vst [vmem:[#allocation18_spill] sm:$0xff] %v7712_v35  ;;  %v7716_v36 = vpack.c.bf16 %v59_v28, %v58_v22  ;;  %v29_v41 = vld [vmem:[%s10212_s1 + $0x78] sm:$0xff]  ;;  %v60_v42 = vld [vmem:[%s10212_s1 + $0x170] sm:$0xff]  ;;  %v7730_v44 = vpack.c.bf16 %v77_v33, %v76_v32  ;;  %v94_v46 = vld [vmem:[%s10212_s1 + $0x280] sm:$0xff] }
  0x18   :  { %6524 = vmatprep.subr.bf16.mxu1 %v7652_v5  ;;  %10292 = vst [vmem:[#allocation20_spill] sm:$0xff] %v7718_v37  ;;  %v61_v45 = vld [vmem:[%s10212_s1 + $0x178] sm:$0xff]  ;;  %v95_v47 = vld [vmem:[%s10212_s1 + $0x288] sm:$0xff]  ;;  %v7742_v48 = vpack.c.bf16 %v29_v41, %v28_v40  ;;  %v110_v49 = vld [vmem:[%s10212_s1 + $0x300] sm:$0xff] }
  0x19   :  { %10291 = vst [vmem:[#allocation19_spill] sm:$0xff] %v7716_v36  ;;  %10293 = vst [vmem:[#allocation21_spill] sm:$0xff] %v7730_v44  ;;  %v7749_v53 = vpack.c.bf16 %v61_v45, %v60_v42  ;;  %v7751_v54 = vpack.c.bf16 %v95_v47, %v94_v46  ;;  %v78_v55 = vld [vmem:[%s10212_s1 + $0x200] sm:$0xff]  ;;  %v79_v57 = vld [vmem:[%s10212_s1 + $0x208] sm:$0xff] }
  0x1a   :  { %6494 = vmatpush3.bf16.msra.mxu0 %v7670_v14  ;;  %10294 = vst [vmem:[#allocation22_spill] sm:$0xff] %v7742_v48  ;;  %v111_v58 = vld [vmem:[%s10212_s1 + $0x308] sm:$0xff]  ;;  %v96_v60 = vld [vmem:[%s10212_s1 + $0x290] sm:$0xff]  ;;  %v97_v61 = vld [vmem:[%s10212_s1 + $0x298] sm:$0xff]  ;;  %v7775_v2 = vpack.c.bf16 %v79_v57, %v78_v55 }
  0x1b   :  { %6526 = vmatpush3.bf16.msra.mxu1 %v7680_v19  ;;  %6496 = vmatprep.subr.bf16.mxu0 %v7682_v20  ;;  %10295 = vst [vmem:[#allocation23_spill] sm:$0xff] %v7749_v53  ;;  %10296 = vst [vmem:[#allocation24_spill] sm:$0xff] %v7751_v54  ;;  %v7763_v59 = vpack.c.bf16 %v111_v58, %v110_v49  ;;  %v122_v1 = vld [vmem:[%s10213_s0] sm:$0xff]  ;;  %v112_v4 = vld [vmem:[%s10212_s1 + $0x310] sm:$0xff]  ;;  %v7800_v18 = vpack.c.bf16 %v97_v61, %v96_v60 }
  0x1c   :  { %6528 = vmatprep.subr.bf16.mxu1 %v7694_v27  ;;  %v113_v6 = vld [vmem:[%s10212_s1 + $0x318] sm:$0xff]  ;;  %v124_v9 = vld [vmem:[%s10213_s0 + $0x10] sm:$0xff]  ;;  %v130_v13 = vld [vmem:[%s10213_s0 + $0x40] sm:$0xff] }
  0x1d   :  { %v80_v10 = vld [vmem:[%s10212_s1 + $0x210] sm:$0xff]  ;;  %v81_v11 = vld [vmem:[%s10212_s1 + $0x218] sm:$0xff]  ;;  %10297 = vst [vmem:[#allocation25_spill] sm:$0xff] %v7800_v18  ;;  %v98_v22 = vld [vmem:[%s10212_s1 + $0x2a0] sm:$0xff]  ;;  %v7809_v24 = vpack.c.bf16 %v113_v6, %v112_v4 }
  0x1e   :  { %6498 = vmatpush3.bf16.msra.mxu0 %v7712_v35  ;;  %v132_v15 = vld [vmem:[%s10213_s0 + $0x50] sm:$0xff]  ;;  %v99_v23 = vld [vmem:[%s10212_s1 + $0x2a8] sm:$0xff]  ;;  %v129_v28 = vld [vmem:[%s10213_s0 + $0x38] sm:$0xff]  ;;  %v7815_v29 = vpack.c.bf16 %v81_v11, %v80_v10 }
  0x1f   :  { %6530 = vmatpush3.bf16.msra.mxu1 %v7716_v36  ;;  %6500 = vmatprep.subr.bf16.mxu0 %v7718_v37  ;;  %v114_v31 = vld [vmem:[%s10212_s1 + $0x320] sm:$0xff]  ;;  %v115_v32 = vld [vmem:[%s10212_s1 + $0x328] sm:$0xff]  ;;  %v137_v42 = vld [vmem:[%s10213_s0 + $0x78] sm:$0xff]  ;;  %v7839_v46 = vpack.c.bf16 %v99_v23, %v98_v22 }
  0x20   :  { %6532 = vmatprep.subr.bf16.mxu1 %v7730_v44  ;;  %v131_v33 = vld [vmem:[%s10213_s0 + $0x48] sm:$0xff]  ;;  %v82_v40 = vld [vmem:[%s10212_s1 + $0x220] sm:$0xff]  ;;  %v100_v47 = vld [vmem:[%s10212_s1 + $0x2b0] sm:$0xff]  ;;  %v7849_v55 = vpack.c.bf16 %v115_v32, %v114_v31 }
  0x21   :  { %v83_v41 = vld [vmem:[%s10212_s1 + $0x228] sm:$0xff]  ;;  %v101_v49 = vld [vmem:[%s10212_s1 + $0x2b8] sm:$0xff]  ;;  %v136_v57 = vld [vmem:[%s10213_s0 + $0x70] sm:$0xff] }
  0x22   :  { %6502 = vmatpush3.bf16.msra.mxu0 %v7742_v48  ;;  %v139_v45 = vld [vmem:[%s10213_s0 + $0x88] sm:$0xff]  ;;  %v7855_v58 = vpack.c.bf16 %v83_v41, %v82_v40  ;;  %v116_v60 = vld [vmem:[%s10212_s1 + $0x330] sm:$0xff]  ;;  %v117_v61 = vld [vmem:[%s10212_s1 + $0x338] sm:$0xff]  ;;  %v7879_v11 = vpack.c.bf16 %v101_v49, %v100_v47 }
  0x23   :  { %6534 = vmatpush3.bf16.msra.mxu1 %v7749_v53  ;;  %6536 = vmatprep.subr.bf16.mxu0 %v7751_v54  ;;  %v84_v4 = vld [vmem:[%s10212_s1 + $0x230] sm:$0xff]  ;;  %v85_v6 = vld [vmem:[%s10212_s1 + $0x238] sm:$0xff]  ;;  %v146_v10 = vld [vmem:[%s10213_s0 + $0xc0] sm:$0xff]  ;;  %v7889_v22 = vpack.c.bf16 %v117_v61, %v116_v60 }
  0x24   :  { %6568 = vmatprep.subr.bf16.mxu1 %v7763_v59  ;;  %v143_v23 = vld [vmem:[%s10213_s0 + $0xa8] sm:$0xff]  ;;  %v118_v31 = vld [vmem:[%s10212_s1 + $0x340] sm:$0xff]  ;;  %v104_v49 = vld [vmem:[%s10212_s1 + $0x2d0] sm:$0xff] }
  0x25   :  { %268 = vmatmul.mubr.f32.vlgmr.msra.gmra.mrb[0].mxu0 %v122_v1  ;;  %v138_v1 = vld [vmem:[%s10213_s0 + $0x80] sm:$0xff]  ;;  %v119_v32 = vld [vmem:[%s10212_s1 + $0x348] sm:$0xff] }
  0x26   :  { %373 = vmatmul.mubr.f32.vlgmr.msra.gmra.mrb[0].mxu1 %v124_v9  ;;  %6538 = vmatpush3.bf16.msra.mxu0 %v7775_v2  ;;  %v144_v9 = vld [vmem:[%s10213_s0 + $0xb0] sm:$0xff]  ;;  %v86_v40 = vld [vmem:[%s10212_s1 + $0x240] sm:$0xff]  ;;  %v87_v41 = vld [vmem:[%s10212_s1 + $0x248] sm:$0xff]  ;;  %v7929_v60 = vpack.c.bf16 %v119_v32, %v118_v31 }
  0x27   :  { %272 = vmatprep.mubr.f32.mxu0 %v130_v13  ;;  %377 = vmatprep.mubr.f32.mxu1 %v132_v15  ;;  %v102_v13 = vld [vmem:[%s10212_s1 + $0x2c0] sm:$0xff]  ;;  %v103_v15 = vld [vmem:[%s10212_s1 + $0x2c8] sm:$0xff] }
  0x28   :  { %6540 = vmatprep.subr.bf16.mxu0 %v7800_v18  ;;  %6570 = vmatpush3.bf16.msra.mxu1 %v7763_v59  ;;  %v7919_v47 = vpack.c.bf16 %v103_v15, %v102_v13  ;;  %10298 = vst [vmem:[#allocation26_spill] sm:$0xff] %v7929_v60  ;;  %v150_v61 = vld [vmem:[%s10213_s0 + $0xe0] sm:$0xff]  ;;  %v89_v13 = vld [vmem:[%s10212_s1 + $0x258] sm:$0xff] }
  0x29   :  { %273 = vmatmul.mubr.f32.gmra.mrb[2].mxu0 %v129_v28  ;;  %6572 = vmatprep.subr.bf16.mxu1 %v7809_v24  ;;  %v7895_v28 = vpack.c.bf16 %v85_v6, %v84_v4  ;;  %v120_v4 = vld [vmem:[%s10212_s1 + $0x350] sm:$0xff]  ;;  %v121_v6 = vld [vmem:[%s10212_s1 + $0x358] sm:$0xff]  ;;  %v158_v15 = vld [vmem:[%s10213_s0 + $0x120] sm:$0xff] }
  0x2a   :  { %378 = vmatmul.mubr.f32.gmra.mrb[2].mxu1 %v131_v33  ;;  %6542 = vmatpush3.bf16.msra.mxu0 %v7815_v29  ;;  %v145_v33 = vld [vmem:[%s10213_s0 + $0xb8] sm:$0xff]  ;;  %v106_v32 = vld [vmem:[%s10212_s1 + $0x2e0] sm:$0xff] }
  0x2b   :  { %277 = vmatprep.mubr.f32.mxu0 %v137_v42  ;;  %382 = vmatprep.mubr.f32.mxu1 %v139_v45  ;;  %v151_v42 = vld [vmem:[%s10213_s0 + $0xe8] sm:$0xff]  ;;  %v153_v45 = vld [vmem:[%s10213_s0 + $0xf8] sm:$0xff] }
  0x2c   :  { %6544 = vmatprep.subr.bf16.mxu0 %v7839_v46  ;;  %6574 = vmatpush3.bf16.msra.mxu1 %v7809_v24 }
  0x2d   :  { %278 = vmatmul.mubr.f32.gmra.mrb[4].mxu0 %v136_v57  ;;  %6576 = vmatprep.subr.bf16.mxu1 %v7849_v55  ;;  %v105_v57 = vld [vmem:[%s10212_s1 + $0x2d8] sm:$0xff] }
  0x2e   :  { %383 = vmatmul.mubr.f32.gmra.mrb[4].mxu1 %v138_v1  ;;  %6546 = vmatpush3.bf16.msra.mxu0 %v7855_v58  ;;  %v7935_v1 = vpack.c.bf16 %v87_v41, %v86_v40  ;;  %v7959_v31 = vpack.c.bf16 %v105_v57, %v104_v49  ;;  %v7969_v40 = vpack.c.bf16 %v121_v6, %v120_v4  ;;  %v157_v41 = vld [vmem:[%s10213_s0 + $0x118] sm:$0xff]  ;;  %v90_v49 = vld [vmem:[%s10212_s1 + $0x260] sm:$0xff]  ;;  %v91_v57 = vld [vmem:[%s10212_s1 + $0x268] sm:$0xff] }
  0x2f   :  { %282 = vmatprep.mubr.f32.mxu0 %v144_v9  ;;  %387 = vmatprep.mubr.f32.mxu1 %v146_v10  ;;  %v152_v9 = vld [vmem:[%s10213_s0 + $0xf0] sm:$0xff]  ;;  %v167_v4 = vld [vmem:[%s10213_s0 + $0x168] sm:$0xff] }
  0x30   :  { %6548 = vmatprep.subr.bf16.mxu0 %v7879_v11  ;;  %6578 = vmatpush3.bf16.msra.mxu1 %v7849_v55  ;;  %10299 = vst [vmem:[#allocation27_spill] sm:$0xff] %v7935_v1  ;;  %v88_v10 = vld [vmem:[%s10212_s1 + $0x250] sm:$0xff]  ;;  %10300 = vst [vmem:[#allocation28_spill] sm:$0xff] %v7959_v31 }
  0x31   :  { %283 = vmatmul.mubr.f32.gmra.mrb[6].mxu0 %v143_v23  ;;  %6580 = vmatprep.subr.bf16.mxu1 %v7889_v22  ;;  %v160_v23 = vld [vmem:[%s10213_s0 + $0x130] sm:$0xff] }
  0x32   :  { %388 = vmatmul.mubr.f32.gmra.mrb[6].mxu1 %v145_v33  ;;  %6550 = vmatpush3.bf16.msra.mxu0 %v7895_v28  ;;  %v107_v33 = vld [vmem:[%s10212_s1 + $0x2e8] sm:$0xff] }
  0x33   :  { %287 = vmatprep.mubr.f32.mxu0 %v151_v42  ;;  %392 = vmatprep.mubr.f32.mxu1 %v153_v45  ;;  %v7975_v42 = vpack.c.bf16 %v89_v13, %v88_v10  ;;  %v159_v45 = vld [vmem:[%s10213_s0 + $0x128] sm:$0xff]  ;;  %v7993_v6 = vpack.c.bf16 %v107_v33, %v106_v32  ;;  %v109_v10 = vld [vmem:[%s10212_s1 + $0x2f8] sm:$0xff]  ;;  %v164_v13 = vld [vmem:[%s10213_s0 + $0x150] sm:$0xff] }
  0x34   :  { %6552 = vmatprep.subr.bf16.mxu0 %v7919_v47  ;;  %6582 = vmatpush3.bf16.msra.mxu1 %v7889_v22  ;;  %v92_v32 = vld [vmem:[%s10212_s1 + $0x270] sm:$0xff]  ;;  %v93_v33 = vld [vmem:[%s10212_s1 + $0x278] sm:$0xff] }
  0x35   :  { %288 = vmatmul.mubr.f32.gmra.mrb[8].mxu0 %v150_v61  ;;  %6584 = vmatprep.subr.bf16.mxu1 %v7929_v60  ;;  %v165_v61 = vld [vmem:[%s10213_s0 + $0x158] sm:$0xff]  ;;  %10301 = vst [vmem:[#allocation29_spill] sm:$0xff] %v7993_v6 }
  0x36   :  { %393 = vmatmul.mubr.f32.gmra.mrb[8].mxu1 %v152_v9  ;;  %6554 = vmatpush3.bf16.msra.mxu0 %v7935_v1  ;;  %v108_v9 = vld [vmem:[%s10212_s1 + $0x2f0] sm:$0xff] }
  0x37   :  { %292 = vmatprep.mubr.f32.mxu0 %v158_v15  ;;  %397 = vmatprep.mubr.f32.mxu1 %v160_v23  ;;  %v8007_v15 = vpack.c.bf16 %v91_v57, %v90_v49  ;;  %v166_v23 = vld [vmem:[%s10213_s0 + $0x160] sm:$0xff]  ;;  %v8025_v49 = vpack.c.bf16 %v109_v10, %v108_v9  ;;  %v171_v57 = vld [vmem:[%s10213_s0 + $0x188] sm:$0xff]  ;;  %v128_v10 = vld [vmem:[%s10213_s0 + $0x30] sm:$0xff] }
  0x38   :  { %6556 = vmatprep.subr.bf16.mxu0 %v7959_v31  ;;  %6586 = vmatpush3.bf16.msra.mxu1 %v7929_v60  ;;  %v127_v9 = vld [vmem:[%s10213_s0 + $0x28] sm:$0xff] }
  0x39   :  { %293 = vmatmul.mubr.f32.gmra.mrb[10].mxu0 %v157_v41  ;;  %6588 = vmatprep.subr.bf16.mxu1 %v7969_v40  ;;  %10302 = vst [vmem:[#allocation30_spill] sm:$0xff] %v8007_v15  ;;  %v172_v41 = vld [vmem:[%s10213_s0 + $0x190] sm:$0xff]  ;;  %10303 = vst [vmem:[#allocation31_spill] sm:$0xff] %v8025_v49 }
  0x3a   :  { %398 = vmatmul.mubr.f32.gmra.mrb[10].mxu1 %v159_v45  ;;  %6558 = vmatpush3.bf16.msra.mxu0 %v7975_v42  ;;  %v174_v45 = vld [vmem:[%s10213_s0 + $0x1a0] sm:$0xff] }
  0x3b   :  { %297 = vmatprep.mubr.f32.mxu0 %v165_v61  ;;  %402 = vmatprep.mubr.f32.mxu1 %v167_v4  ;;  %v8033_v61 = vpack.c.bf16 %v93_v33, %v92_v32  ;;  %v173_v4 = vld [vmem:[%s10213_s0 + $0x198] sm:$0xff]  ;;  %v134_v32 = vld [vmem:[%s10213_s0 + $0x60] sm:$0xff] }
  0x3c   :  { %6560 = vmatprep.subr.bf16.mxu0 %v7993_v6  ;;  %6590 = vmatpush3.bf16.msra.mxu1 %v7969_v40  ;;  %v133_v33 = vld [vmem:[%s10213_s0 + $0x58] sm:$0xff] }
  0x3d   :  { %298 = vmatmul.mubr.f32.gmra.mrb[12].mxu0 %v164_v13  ;;  %6624 = vmatprep.subr.bf16.mxu1 %v7471_v7  ;;  %v126_v13 = vld [vmem:[%s10213_s0 + $0x20] sm:$0xff] }
  0x3e   :  { %403 = vmatmul.mubr.f32.gmra.mrb[12].mxu1 %v166_v23  ;;  %6562 = vmatpush3.bf16.msra.mxu0 %v8007_v15  ;;  %v135_v23 = vld [vmem:[%s10213_s0 + $0x68] sm:$0xff] }
  0x3f   :  { %302 = vmatprep.mubr.f32.mxu0 %v172_v41  ;;  %407 = vmatprep.mubr.f32.mxu1 %v174_v45  ;;  %v142_v41 = vld [vmem:[%s10213_s0 + $0xa0] sm:$0xff]  ;;  %v141_v45 = vld [vmem:[%s10213_s0 + $0x98] sm:$0xff] }
  0x40   :  { %6564 = vmatprep.subr.bf16.mxu0 %v8025_v49 }
  0x41   :  { %303 = vmatmul.mubr.f32.gmra.mrb[14].mxu0 %v171_v57  ;;  %v149_v57 = vld [vmem:[%s10213_s0 + $0xd8] sm:$0xff] }
  0x42   :  { %408 = vmatmul.mubr.f32.gmra.mrb[14].mxu1 %v173_v4  ;;  %6566 = vmatpush3.bf16.msra.mxu0 %v8033_v61  ;;  %v140_v4 = vld [vmem:[%s10213_s0 + $0x90] sm:$0xff] }
  0x43   :  { %477 = vmatprep.mubr.f32.mxu0 %v127_v9  ;;  %6207 = vmatprep.mubr.msk.f32.mxu1 %vm178_vm0, %v128_v10  ;;  %v156_v9 = vld [vmem:[%s10213_s0 + $0x110] sm:$0xff] }
  0x44   :  { %6592 = vmatprep.subr.bf16.mxu0 %v7460_v3  ;;  %v148_v10 = vld [vmem:[%s10213_s0 + $0xd0] sm:$0xff] }
  0x45   :  { %478 = vmatmul.mubr.f32.vlgmr.msra.gmra.mrb[16].mxu0 %v126_v13  ;;  %v163_v13 = vld [vmem:[%s10213_s0 + $0x148] sm:$0xff] }
  0x46   :  { %6208 = vmatmul.mubr.msk.f32.vlgmr.msra.gmra.mrb[16].mxu1 %vm178_vm0, %v135_v23  ;;  %6594 = vmatpush3.bf16.msra.mxu0 %v7473_v8  ;;  %v147_v23 = vld [vmem:[%s10213_s0 + $0xc8] sm:$0xff] }
  0x47   :  { %6626 = vmatpush3.bf16.msra.mxu1 %v7485_v12  ;;  %482 = vmatprep.mubr.f32.mxu0 %v134_v32  ;;  %v170_v32 = vld [vmem:[%s10213_s0 + $0x180] sm:$0xff] }
  0x48   :  { %6596 = vmatprep.subr.bf16.mxu0 %v7498_v16  ;;  %6628 = vmatprep.subr.bf16.mxu1 %v7500_v17 }
  0x49   :  { %483 = vmatmul.mubr.f32.gmra.mrb[18].mxu0 %v133_v33  ;;  %6210 = vmatprep.mubr.msk.f32.mxu1 %vm178_vm0, %v142_v41  ;;  %v155_v33 = vld [vmem:[%s10213_s0 + $0x108] sm:$0xff]  ;;  %v177_v41 = vld [vmem:[%s10213_s0 + $0x1b8] sm:$0xff] }
  0x4a   :  { %6598 = vmatpush3.bf16.msra.mxu0 %v7512_v21  ;;  %487 = vmatprep.mubr.f32.mxu0 %v141_v45  ;;  %v154_v45 = vld [vmem:[%s10213_s0 + $0x100] sm:$0xff] }
  0x4b   :  { %6630 = vmatpush3.bf16.msra.mxu1 %v7525_v25  ;;  %6600 = vmatprep.subr.bf16.mxu0 %v7527_v26 }
  0x4c   :  { %6632 = vmatprep.subr.bf16.mxu1 %v7538_v30  ;;  %6211 = vmatmul.mubr.msk.f32.gmra.mrb[18].mxu1 %vm178_vm0, %v149_v57  ;;  %v4233_v57 = vld [vmem:[%s10213_s0 + $0x1d8] sm:$0xff] }
  0x4d   :  { %488 = vmatmul.mubr.f32.gmra.mrb[20].mxu0 %v140_v4  ;;  %6213 = vmatprep.mubr.msk.f32.mxu1 %vm178_vm0, %v156_v9  ;;  %v162_v4 = vld [vmem:[%s10213_s0 + $0x140] sm:$0xff]  ;;  %v161_v9 = vld [vmem:[%s10213_s0 + $0x138] sm:$0xff] }
  0x4e   :  { %6602 = vmatpush3.bf16.msra.mxu0 %v7550_v34  ;;  %492 = vmatprep.mubr.f32.mxu0 %v148_v10  ;;  %v169_v10 = vld [vmem:[%s10213_s0 + $0x178] sm:$0xff] }
  0x4f   :  { %6634 = vmatpush3.bf16.msra.mxu1 %v7563_v38  ;;  %6604 = vmatprep.subr.bf16.mxu0 %v7565_v39 }
  0x50   :  { %6636 = vmatprep.subr.bf16.mxu1 %v7577_v43  ;;  %6214 = vmatmul.mubr.msk.f32.gmra.mrb[20].mxu1 %vm178_vm0, %v163_v13  ;;  %v168_v13 = vld [vmem:[%s10213_s0 + $0x170] sm:$0xff] }
  0x51   :  { %493 = vmatmul.mubr.f32.gmra.mrb[22].mxu0 %v147_v23  ;;  %6216 = vmatprep.mubr.msk.f32.mxu1 %vm178_vm0, %v170_v32  ;;  %v176_v23 = vld [vmem:[%s10213_s0 + $0x1b0] sm:$0xff]  ;;  %v175_v32 = vld [vmem:[%s10213_s0 + $0x1a8] sm:$0xff] }
  0x52   :  { %6606 = vmatpush3.bf16.msra.mxu0 %v7598_v50  ;;  %497 = vmatprep.mubr.f32.mxu0 %v155_v33  ;;  %v4231_v33 = vld [vmem:[%s10213_s0 + $0x1c8] sm:$0xff] }
  0x53   :  { %6638 = vmatpush3.bf16.msra.mxu1 %v7602_v51  ;;  %6608 = vmatprep.subr.bf16.mxu0 %v7604_v52 }
  0x54   :  { %6640 = vmatprep.subr.bf16.mxu1 %v7616_v56  ;;  %6217 = vmatmul.mubr.msk.f32.gmra.mrb[22].mxu1 %vm178_vm0, %v177_v41  ;;  %v4230_v41 = vld [vmem:[%s10213_s0 + $0x1c0] sm:$0xff] }
  0x55   :  { %498 = vmatmul.mubr.f32.gmra.mrb[24].mxu0 %v154_v45  ;;  %873 = vmatprep.mubr.f32.mxu1 %v4233_v57  ;;  %v4232_v45 = vld [vmem:[%s10213_s0 + $0x1d0] sm:$0xff]  ;;  %v4238_v57 = vld [vmem:[%s10213_s0 + $0x200] sm:$0xff] }
  0x56   :  { %6610 = vmatpush3.bf16.msra.mxu0 %v7634_v62  ;;  %502 = vmatprep.mubr.f32.mxu0 %v162_v4  ;;  %v4240_v4 = vld [vmem:[%s10213_s0 + $0x210] sm:$0xff] }
  0x57   :  { %6642 = vmatpush3.bf16.msra.mxu1 %v7638_v63  ;;  %6612 = vmatprep.subr.bf16.mxu0 %v7640_v0 }
  0x58   :  { %6644 = vmatprep.subr.bf16.mxu1 %v7652_v5 }
  0x59   :  { %503 = vmatmul.mubr.f32.gmra.mrb[26].mxu0 %v161_v9  ;;  %v4237_v9 = vld [vmem:[%s10213_s0 + $0x1f8] sm:$0xff] }
  0x5a   :  { %6614 = vmatpush3.bf16.msra.mxu0 %v7670_v14  ;;  %507 = vmatprep.mubr.f32.mxu0 %v169_v10  ;;  %v4239_v10 = vld [vmem:[%s10213_s0 + $0x208] sm:$0xff] }
  0x5b   :  { %6646 = vmatpush3.bf16.msra.mxu1 %v7680_v19  ;;  %6616 = vmatprep.subr.bf16.mxu0 %v7682_v20 }
  0x5c   :  { %6648 = vmatprep.subr.bf16.mxu1 %v7694_v27 }
  0x5d   :  { %508 = vmatmul.mubr.f32.gmra.mrb[28].mxu0 %v168_v13  ;;  %v4245_v13 = vld [vmem:[%s10213_s0 + $0x238] sm:$0xff] }
  0x5e   :  { %6618 = vmatpush3.bf16.msra.mxu0 %v7712_v35  ;;  %512 = vmatprep.mubr.f32.mxu0 %v176_v23  ;;  %v4247_v23 = vld [vmem:[%s10213_s0 + $0x248] sm:$0xff] }
  0x5f   :  { %6650 = vmatpush3.bf16.msra.mxu1 %v7716_v36  ;;  %6620 = vmatprep.subr.bf16.mxu0 %v7718_v37 }
  0x60   :  { %6652 = vmatprep.subr.bf16.mxu1 %v7730_v44 }
  0x61   :  { %513 = vmatmul.mubr.f32.gmra.mrb[30].mxu0 %v175_v32  ;;  %v4244_v32 = vld [vmem:[%s10213_s0 + $0x230] sm:$0xff] }
  0x62   :  { %6622 = vmatpush3.bf16.msra.mxu0 %v7742_v48  ;;  %768 = vmatprep.mubr.f32.mxu0 %v4231_v33  ;;  %v4246_v33 = vld [vmem:[%s10213_s0 + $0x240] sm:$0xff] }
  0x63   :  { %6654 = vmatpush3.bf16.msra.mxu1 %v7749_v53  ;;  %6656 = vmatprep.subr.bf16.mxu0 %v7751_v54 }
  0x64   :  { %6688 = vmatprep.subr.bf16.mxu1 %v7763_v59 }
  0x65   :  { %769 = vmatmul.mubr.f32.vlgmr.msra.gmra.mrb[32].mxu0 %v4230_v41  ;;  %v4252_v41 = vld [vmem:[%s10213_s0 + $0x270] sm:$0xff] }
  0x66   :  { %874 = vmatmul.mubr.f32.vlgmr.msra.gmra.mrb[24].mxu1 %v4232_v45  ;;  %6658 = vmatpush3.bf16.msra.mxu0 %v7775_v2  ;;  %v4254_v45 = vld [vmem:[%s10213_s0 + $0x280] sm:$0xff] }
  0x67   :  { %773 = vmatprep.mubr.f32.mxu0 %v4238_v57  ;;  %878 = vmatprep.mubr.f32.mxu1 %v4240_v4  ;;  %v4251_v57 = vld [vmem:[%s10213_s0 + $0x268] sm:$0xff]  ;;  %v4253_v4 = vld [vmem:[%s10213_s0 + $0x278] sm:$0xff] }
  0x68   :  { %6660 = vmatprep.subr.bf16.mxu0 %v7800_v18  ;;  %6690 = vmatpush3.bf16.msra.mxu1 %v7763_v59 }
  0x69   :  { %774 = vmatmul.mubr.f32.gmra.mrb[34].mxu0 %v4237_v9  ;;  %6692 = vmatprep.subr.bf16.mxu1 %v7809_v24  ;;  %v4259_v9 = vld [vmem:[%s10213_s0 + $0x2a8] sm:$0xff] }
  0x6a   :  { %879 = vmatmul.mubr.f32.gmra.mrb[26].mxu1 %v4239_v10  ;;  %6662 = vmatpush3.bf16.msra.mxu0 %v7815_v29  ;;  %v4261_v10 = vld [vmem:[%s10213_s0 + $0x2b8] sm:$0xff] }
  0x6b   :  { %778 = vmatprep.mubr.f32.mxu0 %v4245_v13  ;;  %883 = vmatprep.mubr.f32.mxu1 %v4247_v23  ;;  %v4258_v13 = vld [vmem:[%s10213_s0 + $0x2a0] sm:$0xff]  ;;  %v4260_v23 = vld [vmem:[%s10213_s0 + $0x2b0] sm:$0xff] }
  0x6c   :  { %6664 = vmatprep.subr.bf16.mxu0 %v7839_v46  ;;  %6694 = vmatpush3.bf16.msra.mxu1 %v7809_v24 }
  0x6d   :  { %779 = vmatmul.mubr.f32.gmra.mrb[36].mxu0 %v4244_v32  ;;  %6696 = vmatprep.subr.bf16.mxu1 %v7849_v55  ;;  %v4266_v32 = vld [vmem:[%s10213_s0 + $0x2e0] sm:$0xff] }
  0x6e   :  { %884 = vmatmul.mubr.f32.gmra.mrb[28].mxu1 %v4246_v33  ;;  %6666 = vmatpush3.bf16.msra.mxu0 %v7855_v58  ;;  %v4268_v33 = vld [vmem:[%s10213_s0 + $0x2f0] sm:$0xff] }
  0x6f   :  { %783 = vmatprep.mubr.f32.mxu0 %v4252_v41  ;;  %888 = vmatprep.mubr.f32.mxu1 %v4254_v45  ;;  %v4265_v41 = vld [vmem:[%s10213_s0 + $0x2d8] sm:$0xff]  ;;  %v4267_v45 = vld [vmem:[%s10213_s0 + $0x2e8] sm:$0xff] }
  0x70   :  { %6668 = vmatprep.subr.bf16.mxu0 %v7879_v11  ;;  %6698 = vmatpush3.bf16.msra.mxu1 %v7849_v55 }
  0x71   :  { %784 = vmatmul.mubr.f32.gmra.mrb[38].mxu0 %v4251_v57  ;;  %6700 = vmatprep.subr.bf16.mxu1 %v7889_v22  ;;  %v4273_v57 = vld [vmem:[%s10213_s0 + $0x318] sm:$0xff] }
  0x72   :  { %889 = vmatmul.mubr.f32.gmra.mrb[30].mxu1 %v4253_v4  ;;  %6670 = vmatpush3.bf16.msra.mxu0 %v7895_v28  ;;  %v4275_v4 = vld [vmem:[%s10213_s0 + $0x328] sm:$0xff] }
  0x73   :  { %788 = vmatprep.mubr.f32.mxu0 %v4259_v9  ;;  %893 = vmatprep.mubr.f32.mxu1 %v4261_v10  ;;  %v4272_v9 = vld [vmem:[%s10213_s0 + $0x310] sm:$0xff]  ;;  %v4274_v10 = vld [vmem:[%s10213_s0 + $0x320] sm:$0xff] }
  0x74   :  { %6672 = vmatprep.subr.bf16.mxu0 %v7919_v47  ;;  %6702 = vmatpush3.bf16.msra.mxu1 %v7889_v22 }
  0x75   :  { %789 = vmatmul.mubr.f32.gmra.mrb[40].mxu0 %v4258_v13  ;;  %6704 = vmatprep.subr.bf16.mxu1 %v7929_v60  ;;  %v4280_v13 = vld [vmem:[%s10213_s0 + $0x350] sm:$0xff] }
  0x76   :  { %894 = vmatmul.mubr.f32.gmra.mrb[32].mxu1 %v4260_v23  ;;  %6674 = vmatpush3.bf16.msra.mxu0 %v7935_v1  ;;  %v4282_v23 = vld [vmem:[%s10213_s0 + $0x360] sm:$0xff] }
  0x77   :  { %793 = vmatprep.mubr.f32.mxu0 %v4266_v32  ;;  %898 = vmatprep.mubr.f32.mxu1 %v4268_v33  ;;  %v4279_v32 = vld [vmem:[%s10213_s0 + $0x348] sm:$0xff]  ;;  %v4281_v33 = vld [vmem:[%s10213_s0 + $0x358] sm:$0xff] }
  0x78   :  { %6676 = vmatprep.subr.bf16.mxu0 %v7959_v31  ;;  %6706 = vmatpush3.bf16.msra.mxu1 %v7929_v60 }
  0x79   :  { %794 = vmatmul.mubr.f32.gmra.mrb[42].mxu0 %v4265_v41  ;;  %6708 = vmatprep.subr.bf16.mxu1 %v7969_v40  ;;  %v4235_v41 = vld [vmem:[%s10213_s0 + $0x1e8] sm:$0xff] }
  0x7a   :  { %899 = vmatmul.mubr.f32.gmra.mrb[34].mxu1 %v4267_v45  ;;  %6678 = vmatpush3.bf16.msra.mxu0 %v7975_v42  ;;  %v4236_v45 = vld [vmem:[%s10213_s0 + $0x1f0] sm:$0xff] }
  0x7b   :  { %798 = vmatprep.mubr.f32.mxu0 %v4273_v57  ;;  %903 = vmatprep.mubr.f32.mxu1 %v4275_v4  ;;  %v4234_v57 = vld [vmem:[%s10213_s0 + $0x1e0] sm:$0xff]  ;;  %v4243_v4 = vld [vmem:[%s10213_s0 + $0x228] sm:$0xff] }
  0x7c   :  { %6680 = vmatprep.subr.bf16.mxu0 %v7993_v6  ;;  %6710 = vmatpush3.bf16.msra.mxu1 %v7969_v40 }
  0x7d   :  { %799 = vmatmul.mubr.f32.gmra.mrb[44].mxu0 %v4272_v9  ;;  %6744 = vmatprep.subr.bf16.mxu1 %v7471_v7  ;;  %v4242_v9 = vld [vmem:[%s10213_s0 + $0x220] sm:$0xff] }
  0x7e   :  { %904 = vmatmul.mubr.f32.gmra.mrb[36].mxu1 %v4274_v10  ;;  %6682 = vmatpush3.bf16.msra.mxu0 %v8007_v15  ;;  %v4241_v10 = vld [vmem:[%s10213_s0 + $0x218] sm:$0xff] }
  0x7f   :  { %803 = vmatprep.mubr.f32.mxu0 %v4280_v13  ;;  %908 = vmatprep.mubr.f32.mxu1 %v4282_v23  ;;  %v4250_v13 = vld [vmem:[%s10213_s0 + $0x260] sm:$0xff]  ;;  %v4249_v23 = vld [vmem:[%s10213_s0 + $0x258] sm:$0xff] }
  0x80   :  { %6684 = vmatprep.subr.bf16.mxu0 %v8025_v49 }
  0x81   :  { %804 = vmatmul.mubr.f32.gmra.mrb[46].mxu0 %v4279_v32  ;;  %v4257_v32 = vld [vmem:[%s10213_s0 + $0x298] sm:$0xff] }
  0x82   :  { %909 = vmatmul.mubr.f32.gmra.mrb[38].mxu1 %v4281_v33  ;;  %6686 = vmatpush3.bf16.msra.mxu0 %v8033_v61  ;;  %v4248_v33 = vld [vmem:[%s10213_s0 + $0x250] sm:$0xff] }
  0x83   :  { %978 = vmatprep.mubr.f32.mxu0 %v4235_v41  ;;  %6243 = vmatprep.mubr.msk.f32.mxu1 %vm178_vm0, %v4236_v45  ;;  %v4264_v41 = vld [vmem:[%s10213_s0 + $0x2d0] sm:$0xff] }
  0x84   :  { %6712 = vmatprep.subr.bf16.mxu0 %v7460_v3  ;;  %v4256_v45 = vld [vmem:[%s10213_s0 + $0x290] sm:$0xff] }
  0x85   :  { %979 = vmatmul.mubr.f32.vlgmr.msra.gmra.mrb[48].mxu0 %v4234_v57  ;;  %v4271_v57 = vld [vmem:[%s10213_s0 + $0x308] sm:$0xff] }
  0x86   :  { %6244 = vmatmul.mubr.msk.f32.vlgmr.msra.gmra.mrb[40].mxu1 %vm178_vm0, %v4243_v4  ;;  %6714 = vmatpush3.bf16.msra.mxu0 %v7473_v8  ;;  %v4255_v4 = vld [vmem:[%s10213_s0 + $0x288] sm:$0xff] }
  0x87   :  { %6746 = vmatpush3.bf16.msra.mxu1 %v7485_v12  ;;  %983 = vmatprep.mubr.f32.mxu0 %v4242_v9  ;;  %v4278_v9 = vld [vmem:[%s10213_s0 + $0x340] sm:$0xff] }
  0x88   :  { %6716 = vmatprep.subr.bf16.mxu0 %v7498_v16  ;;  %6748 = vmatprep.subr.bf16.mxu1 %v7500_v17 }
  0x89   :  { %984 = vmatmul.mubr.f32.gmra.mrb[50].mxu0 %v4241_v10  ;;  %6246 = vmatprep.mubr.msk.f32.mxu1 %vm178_vm0, %v4250_v13  ;;  %v4263_v10 = vld [vmem:[%s10213_s0 + $0x2c8] sm:$0xff]  ;;  %v4285_v13 = vld [vmem:[%s10213_s0 + $0x378] sm:$0xff] }
  0x8a   :  { %6718 = vmatpush3.bf16.msra.mxu0 %v7512_v21  ;;  %988 = vmatprep.mubr.f32.mxu0 %v4249_v23  ;;  %v4262_v23 = vld [vmem:[%s10213_s0 + $0x2c0] sm:$0xff] }
  0x8b   :  { %6750 = vmatpush3.bf16.msra.mxu1 %v7525_v25  ;;  %6720 = vmatprep.subr.bf16.mxu0 %v7527_v26 }
  0x8c   :  { %6752 = vmatprep.subr.bf16.mxu1 %v7538_v30  ;;  %6247 = vmatmul.mubr.msk.f32.gmra.mrb[42].mxu1 %vm178_vm0, %v4257_v32  ;;  %v4297_v32 = vld [vmem:[%s10213_s0 + $0x398] sm:$0xff] }
  0x8d   :  { %989 = vmatmul.mubr.f32.gmra.mrb[52].mxu0 %v4248_v33  ;;  %6249 = vmatprep.mubr.msk.f32.mxu1 %vm178_vm0, %v4264_v41  ;;  %v4270_v33 = vld [vmem:[%s10213_s0 + $0x300] sm:$0xff]  ;;  %v4269_v41 = vld [vmem:[%s10213_s0 + $0x2f8] sm:$0xff] }
  0x8e   :  { %6722 = vmatpush3.bf16.msra.mxu0 %v7550_v34  ;;  %993 = vmatprep.mubr.f32.mxu0 %v4256_v45  ;;  %v4277_v45 = vld [vmem:[%s10213_s0 + $0x338] sm:$0xff] }
  0x8f   :  { %6754 = vmatpush3.bf16.msra.mxu1 %v7563_v38  ;;  %6724 = vmatprep.subr.bf16.mxu0 %v7565_v39 }
  0x90   :  { %6756 = vmatprep.subr.bf16.mxu1 %v7577_v43  ;;  %6250 = vmatmul.mubr.msk.f32.gmra.mrb[44].mxu1 %vm178_vm0, %v4271_v57  ;;  %v4276_v57 = vld [vmem:[%s10213_s0 + $0x330] sm:$0xff] }
  0x91   :  { %994 = vmatmul.mubr.f32.gmra.mrb[54].mxu0 %v4255_v4  ;;  %6252 = vmatprep.mubr.msk.f32.mxu1 %vm178_vm0, %v4278_v9  ;;  %v4284_v4 = vld [vmem:[%s10213_s0 + $0x370] sm:$0xff]  ;;  %v4283_v9 = vld [vmem:[%s10213_s0 + $0x368] sm:$0xff] }
  0x92   :  { %6726 = vmatpush3.bf16.msra.mxu0 %v7598_v50  ;;  %998 = vmatprep.mubr.f32.mxu0 %v4263_v10  ;;  %v4295_v10 = vld [vmem:[%s10213_s0 + $0x388] sm:$0xff] }
  0x93   :  { %6758 = vmatpush3.bf16.msra.mxu1 %v7602_v51  ;;  %6728 = vmatprep.subr.bf16.mxu0 %v7604_v52 }
  0x94   :  { %6760 = vmatprep.subr.bf16.mxu1 %v7616_v56  ;;  %6253 = vmatmul.mubr.msk.f32.gmra.mrb[46].mxu1 %vm178_vm0, %v4285_v13  ;;  %v4294_v13 = vld [vmem:[%s10213_s0 + $0x380] sm:$0xff] }
  0x95   :  { %999 = vmatmul.mubr.f32.gmra.mrb[56].mxu0 %v4262_v23  ;;  %1382 = vmatprep.mubr.f32.mxu1 %v4297_v32  ;;  %v4296_v23 = vld [vmem:[%s10213_s0 + $0x390] sm:$0xff]  ;;  %v4302_v32 = vld [vmem:[%s10213_s0 + $0x3c0] sm:$0xff] }
  0x96   :  { %6730 = vmatpush3.bf16.msra.mxu0 %v7634_v62  ;;  %1003 = vmatprep.mubr.f32.mxu0 %v4270_v33  ;;  %v4304_v33 = vld [vmem:[%s10213_s0 + $0x3d0] sm:$0xff] }
  0x97   :  { %6762 = vmatpush3.bf16.msra.mxu1 %v7638_v63  ;;  %6732 = vmatprep.subr.bf16.mxu0 %v7640_v0 }
  0x98   :  { %6764 = vmatprep.subr.bf16.mxu1 %v7652_v5 }
  0x99   :  { %1004 = vmatmul.mubr.f32.gmra.mrb[58].mxu0 %v4269_v41  ;;  %v4301_v41 = vld [vmem:[%s10213_s0 + $0x3b8] sm:$0xff] }
  0x9a   :  { %6734 = vmatpush3.bf16.msra.mxu0 %v7670_v14  ;;  %1008 = vmatprep.mubr.f32.mxu0 %v4277_v45  ;;  %v4303_v45 = vld [vmem:[%s10213_s0 + $0x3c8] sm:$0xff] }
  0x9b   :  { %6766 = vmatpush3.bf16.msra.mxu1 %v7680_v19  ;;  %6736 = vmatprep.subr.bf16.mxu0 %v7682_v20 }
  0x9c   :  { %6768 = vmatprep.subr.bf16.mxu1 %v7694_v27 }
  0x9d   :  { %1009 = vmatmul.mubr.f32.gmra.mrb[60].mxu0 %v4276_v57  ;;  %v4309_v57 = vld [vmem:[%s10213_s0 + $0x3f8] sm:$0xff] }
  0x9e   :  { %6738 = vmatpush3.bf16.msra.mxu0 %v7712_v35  ;;  %1013 = vmatprep.mubr.f32.mxu0 %v4284_v4  ;;  %v4311_v4 = vld [vmem:[%s10213_s0 + $0x408] sm:$0xff] }
  0x9f   :  { %6770 = vmatpush3.bf16.msra.mxu1 %v7716_v36  ;;  %6740 = vmatprep.subr.bf16.mxu0 %v7718_v37 }
  0xa0   :  { %6772 = vmatprep.subr.bf16.mxu1 %v7730_v44 }
  0xa1   :  { %1014 = vmatmul.mubr.f32.gmra.mrb[62].mxu0 %v4283_v9  ;;  %v4308_v9 = vld [vmem:[%s10213_s0 + $0x3f0] sm:$0xff] }
  0xa2   :  { %6742 = vmatpush3.bf16.msra.mxu0 %v7742_v48  ;;  %1277 = vmatprep.mubr.f32.mxu0 %v4295_v10  ;;  %v4310_v10 = vld [vmem:[%s10213_s0 + $0x400] sm:$0xff] }
  0xa3   :  { %6774 = vmatpush3.bf16.msra.mxu1 %v7749_v53  ;;  %6776 = vmatprep.subr.bf16.mxu0 %v7751_v54 }
  0xa4   :  { %6808 = vmatprep.subr.bf16.mxu1 %v7763_v59 }
  0xa5   :  { %1278 = vmatmul.mubr.f32.vlgmr.msra.gmra.mrb[64].mxu0 %v4294_v13  ;;  %v4316_v13 = vld [vmem:[%s10213_s0 + $0x430] sm:$0xff] }
  0xa6   :  { %1383 = vmatmul.mubr.f32.vlgmr.msra.gmra.mrb[48].mxu1 %v4296_v23  ;;  %6778 = vmatpush3.bf16.msra.mxu0 %v7775_v2  ;;  %v4318_v23 = vld [vmem:[%s10213_s0 + $0x440] sm:$0xff] }
  0xa7   :  { %1282 = vmatprep.mubr.f32.mxu0 %v4302_v32  ;;  %1387 = vmatprep.mubr.f32.mxu1 %v4304_v33  ;;  %v4315_v32 = vld [vmem:[%s10213_s0 + $0x428] sm:$0xff]  ;;  %v4317_v33 = vld [vmem:[%s10213_s0 + $0x438] sm:$0xff] }
  0xa8   :  { %6780 = vmatprep.subr.bf16.mxu0 %v7800_v18  ;;  %6810 = vmatpush3.bf16.msra.mxu1 %v7763_v59 }
  0xa9   :  { %1283 = vmatmul.mubr.f32.gmra.mrb[66].mxu0 %v4301_v41  ;;  %6812 = vmatprep.subr.bf16.mxu1 %v7809_v24  ;;  %v4323_v41 = vld [vmem:[%s10213_s0 + $0x468] sm:$0xff] }
  0xaa   :  { %1388 = vmatmul.mubr.f32.gmra.mrb[50].mxu1 %v4303_v45  ;;  %6782 = vmatpush3.bf16.msra.mxu0 %v7815_v29  ;;  %v4325_v45 = vld [vmem:[%s10213_s0 + $0x478] sm:$0xff] }
  0xab   :  { %1287 = vmatprep.mubr.f32.mxu0 %v4309_v57  ;;  %1392 = vmatprep.mubr.f32.mxu1 %v4311_v4  ;;  %v4322_v57 = vld [vmem:[%s10213_s0 + $0x460] sm:$0xff]  ;;  %v4324_v4 = vld [vmem:[%s10213_s0 + $0x470] sm:$0xff] }
  0xac   :  { %6784 = vmatprep.subr.bf16.mxu0 %v7839_v46  ;;  %6814 = vmatpush3.bf16.msra.mxu1 %v7809_v24 }
  0xad   :  { %1288 = vmatmul.mubr.f32.gmra.mrb[68].mxu0 %v4308_v9  ;;  %6816 = vmatprep.subr.bf16.mxu1 %v7849_v55  ;;  %v4330_v9 = vld [vmem:[%s10213_s0 + $0x4a0] sm:$0xff] }
  0xae   :  { %1393 = vmatmul.mubr.f32.gmra.mrb[52].mxu1 %v4310_v10  ;;  %6786 = vmatpush3.bf16.msra.mxu0 %v7855_v58  ;;  %v4332_v10 = vld [vmem:[%s10213_s0 + $0x4b0] sm:$0xff] }
  0xaf   :  { %1292 = vmatprep.mubr.f32.mxu0 %v4316_v13  ;;  %1397 = vmatprep.mubr.f32.mxu1 %v4318_v23  ;;  %v4329_v13 = vld [vmem:[%s10213_s0 + $0x498] sm:$0xff]  ;;  %v4331_v23 = vld [vmem:[%s10213_s0 + $0x4a8] sm:$0xff] }
  0xb0   :  { %6788 = vmatprep.subr.bf16.mxu0 %v7879_v11  ;;  %6818 = vmatpush3.bf16.msra.mxu1 %v7849_v55 }
  0xb1   :  { %1293 = vmatmul.mubr.f32.gmra.mrb[70].mxu0 %v4315_v32  ;;  %6820 = vmatprep.subr.bf16.mxu1 %v7889_v22  ;;  %v4337_v32 = vld [vmem:[%s10213_s0 + $0x4d8] sm:$0xff] }
  0xb2   :  { %1398 = vmatmul.mubr.f32.gmra.mrb[54].mxu1 %v4317_v33  ;;  %6790 = vmatpush3.bf16.msra.mxu0 %v7895_v28  ;;  %v4339_v33 = vld [vmem:[%s10213_s0 + $0x4e8] sm:$0xff] }
  0xb3   :  { %1297 = vmatprep.mubr.f32.mxu0 %v4323_v41  ;;  %1402 = vmatprep.mubr.f32.mxu1 %v4325_v45  ;;  %v4336_v41 = vld [vmem:[%s10213_s0 + $0x4d0] sm:$0xff]  ;;  %v4338_v45 = vld [vmem:[%s10213_s0 + $0x4e0] sm:$0xff] }
  0xb4   :  { %6792 = vmatprep.subr.bf16.mxu0 %v7919_v47  ;;  %6822 = vmatpush3.bf16.msra.mxu1 %v7889_v22 }
  0xb5   :  { %1298 = vmatmul.mubr.f32.gmra.mrb[72].mxu0 %v4322_v57  ;;  %6824 = vmatprep.subr.bf16.mxu1 %v7929_v60  ;;  %v4344_v57 = vld [vmem:[%s10213_s0 + $0x510] sm:$0xff] }
  0xb6   :  { %1403 = vmatmul.mubr.f32.gmra.mrb[56].mxu1 %v4324_v4  ;;  %6794 = vmatpush3.bf16.msra.mxu0 %v7935_v1  ;;  %v4346_v4 = vld [vmem:[%s10213_s0 + $0x520] sm:$0xff] }
  0xb7   :  { %1302 = vmatprep.mubr.f32.mxu0 %v4330_v9  ;;  %1407 = vmatprep.mubr.f32.mxu1 %v4332_v10  ;;  %v4343_v9 = vld [vmem:[%s10213_s0 + $0x508] sm:$0xff]  ;;  %v4345_v10 = vld [vmem:[%s10213_s0 + $0x518] sm:$0xff] }
  0xb8   :  { %6796 = vmatprep.subr.bf16.mxu0 %v7959_v31  ;;  %6826 = vmatpush3.bf16.msra.mxu1 %v7929_v60 }
  0xb9   :  { %1303 = vmatmul.mubr.f32.gmra.mrb[74].mxu0 %v4329_v13  ;;  %6828 = vmatprep.subr.bf16.mxu1 %v7969_v40  ;;  %v4299_v13 = vld [vmem:[%s10213_s0 + $0x3a8] sm:$0xff] }
  0xba   :  { %1408 = vmatmul.mubr.f32.gmra.mrb[58].mxu1 %v4331_v23  ;;  %6798 = vmatpush3.bf16.msra.mxu0 %v7975_v42  ;;  %v4300_v23 = vld [vmem:[%s10213_s0 + $0x3b0] sm:$0xff] }
  0xbb   :  { %1307 = vmatprep.mubr.f32.mxu0 %v4337_v32  ;;  %1412 = vmatprep.mubr.f32.mxu1 %v4339_v33  ;;  %v4298_v32 = vld [vmem:[%s10213_s0 + $0x3a0] sm:$0xff]  ;;  %v4307_v33 = vld [vmem:[%s10213_s0 + $0x3e8] sm:$0xff] }
  0xbc   :  { %6800 = vmatprep.subr.bf16.mxu0 %v7993_v6  ;;  %6830 = vmatpush3.bf16.msra.mxu1 %v7969_v40 }
  0xbd   :  { %1308 = vmatmul.mubr.f32.gmra.mrb[76].mxu0 %v4336_v41  ;;  %6864 = vmatprep.subr.bf16.mxu1 %v7471_v7  ;;  %v4306_v41 = vld [vmem:[%s10213_s0 + $0x3e0] sm:$0xff] }
  0xbe   :  { %1413 = vmatmul.mubr.f32.gmra.mrb[60].mxu1 %v4338_v45  ;;  %6802 = vmatpush3.bf16.msra.mxu0 %v8007_v15  ;;  %v4305_v45 = vld [vmem:[%s10213_s0 + $0x3d8] sm:$0xff] }
  0xbf   :  { %1312 = vmatprep.mubr.f32.mxu0 %v4344_v57  ;;  %1417 = vmatprep.mubr.f32.mxu1 %v4346_v4  ;;  %v4314_v57 = vld [vmem:[%s10213_s0 + $0x420] sm:$0xff]  ;;  %v4313_v4 = vld [vmem:[%s10213_s0 + $0x418] sm:$0xff] }
  0xc0   :  { %6804 = vmatprep.subr.bf16.mxu0 %v8025_v49 }
  0xc1   :  { %1313 = vmatmul.mubr.f32.gmra.mrb[78].mxu0 %v4343_v9  ;;  %v4321_v9 = vld [vmem:[%s10213_s0 + $0x458] sm:$0xff] }
  0xc2   :  { %1418 = vmatmul.mubr.f32.gmra.mrb[62].mxu1 %v4345_v10  ;;  %6806 = vmatpush3.bf16.msra.mxu0 %v8033_v61  ;;  %v4312_v10 = vld [vmem:[%s10213_s0 + $0x410] sm:$0xff] }
  0xc3   :  { %1487 = vmatprep.mubr.f32.mxu0 %v4299_v13  ;;  %6279 = vmatprep.mubr.msk.f32.mxu1 %vm178_vm0, %v4300_v23  ;;  %v4328_v13 = vld [vmem:[%s10213_s0 + $0x490] sm:$0xff] }
  0xc4   :  { %6832 = vmatprep.subr.bf16.mxu0 %v7460_v3  ;;  %v4320_v23 = vld [vmem:[%s10213_s0 + $0x450] sm:$0xff] }
  0xc5   :  { %1488 = vmatmul.mubr.f32.vlgmr.msra.gmra.mrb[80].mxu0 %v4298_v32  ;;  %v4335_v32 = vld [vmem:[%s10213_s0 + $0x4c8] sm:$0xff] }
  0xc6   :  { %6280 = vmatmul.mubr.msk.f32.vlgmr.msra.gmra.mrb[64].mxu1 %vm178_vm0, %v4307_v33  ;;  %6834 = vmatpush3.bf16.msra.mxu0 %v7473_v8  ;;  %v4319_v33 = vld [vmem:[%s10213_s0 + $0x448] sm:$0xff] }
  0xc7   :  { %6866 = vmatpush3.bf16.msra.mxu1 %v7485_v12  ;;  %1492 = vmatprep.mubr.f32.mxu0 %v4306_v41  ;;  %v4342_v41 = vld [vmem:[%s10213_s0 + $0x500] sm:$0xff] }
  0xc8   :  { %6836 = vmatprep.subr.bf16.mxu0 %v7498_v16  ;;  %6868 = vmatprep.subr.bf16.mxu1 %v7500_v17 }
  0xc9   :  { %1493 = vmatmul.mubr.f32.gmra.mrb[82].mxu0 %v4305_v45  ;;  %6282 = vmatprep.mubr.msk.f32.mxu1 %vm178_vm0, %v4314_v57  ;;  %v4327_v45 = vld [vmem:[%s10213_s0 + $0x488] sm:$0xff]  ;;  %v4349_v57 = vld [vmem:[%s10213_s0 + $0x538] sm:$0xff] }
  0xca   :  { %6838 = vmatpush3.bf16.msra.mxu0 %v7512_v21  ;;  %1497 = vmatprep.mubr.f32.mxu0 %v4313_v4  ;;  %v4326_v4 = vld [vmem:[%s10213_s0 + $0x480] sm:$0xff] }
  0xcb   :  { %6870 = vmatpush3.bf16.msra.mxu1 %v7525_v25  ;;  %6840 = vmatprep.subr.bf16.mxu0 %v7527_v26 }
  0xcc   :  { %6872 = vmatprep.subr.bf16.mxu1 %v7538_v30  ;;  %6283 = vmatmul.mubr.msk.f32.gmra.mrb[66].mxu1 %vm178_vm0, %v4321_v9  ;;  %v4361_v9 = vld [vmem:[%s10213_s0 + $0x558] sm:$0xff] }
  0xcd   :  { %1498 = vmatmul.mubr.f32.gmra.mrb[84].mxu0 %v4312_v10  ;;  %6285 = vmatprep.mubr.msk.f32.mxu1 %vm178_vm0, %v4328_v13  ;;  %v4334_v10 = vld [vmem:[%s10213_s0 + $0x4c0] sm:$0xff]  ;;  %v4333_v13 = vld [vmem:[%s10213_s0 + $0x4b8] sm:$0xff] }
  0xce   :  { %6842 = vmatpush3.bf16.msra.mxu0 %v7550_v34  ;;  %1502 = vmatprep.mubr.f32.mxu0 %v4320_v23  ;;  %v4341_v23 = vld [vmem:[%s10213_s0 + $0x4f8] sm:$0xff] }
  0xcf   :  { %6874 = vmatpush3.bf16.msra.mxu1 %v7563_v38  ;;  %6844 = vmatprep.subr.bf16.mxu0 %v7565_v39 }
  0xd0   :  { %6876 = vmatprep.subr.bf16.mxu1 %v7577_v43  ;;  %6286 = vmatmul.mubr.msk.f32.gmra.mrb[68].mxu1 %vm178_vm0, %v4335_v32  ;;  %v4340_v32 = vld [vmem:[%s10213_s0 + $0x4f0] sm:$0xff] }
  0xd1   :  { %1503 = vmatmul.mubr.f32.gmra.mrb[86].mxu0 %v4319_v33  ;;  %6288 = vmatprep.mubr.msk.f32.mxu1 %vm178_vm0, %v4342_v41  ;;  %v4348_v33 = vld [vmem:[%s10213_s0 + $0x530] sm:$0xff]  ;;  %v4347_v41 = vld [vmem:[%s10213_s0 + $0x528] sm:$0xff] }
  0xd2   :  { %6846 = vmatpush3.bf16.msra.mxu0 %v7598_v50  ;;  %1507 = vmatprep.mubr.f32.mxu0 %v4327_v45  ;;  %v4359_v45 = vld [vmem:[%s10213_s0 + $0x548] sm:$0xff] }
  0xd3   :  { %6878 = vmatpush3.bf16.msra.mxu1 %v7602_v51  ;;  %6848 = vmatprep.subr.bf16.mxu0 %v7604_v52 }
  0xd4   :  { %6880 = vmatprep.subr.bf16.mxu1 %v7616_v56  ;;  %6289 = vmatmul.mubr.msk.f32.gmra.mrb[70].mxu1 %vm178_vm0, %v4349_v57  ;;  %v4358_v57 = vld [vmem:[%s10213_s0 + $0x540] sm:$0xff] }
  0xd5   :  { %1508 = vmatmul.mubr.f32.gmra.mrb[88].mxu0 %v4326_v4  ;;  %1891 = vmatprep.mubr.f32.mxu1 %v4361_v9  ;;  %v4360_v4 = vld [vmem:[%s10213_s0 + $0x550] sm:$0xff]  ;;  %v4366_v9 = vld [vmem:[%s10213_s0 + $0x580] sm:$0xff] }
  0xd6   :  { %6850 = vmatpush3.bf16.msra.mxu0 %v7634_v62  ;;  %1512 = vmatprep.mubr.f32.mxu0 %v4334_v10  ;;  %v4368_v10 = vld [vmem:[%s10213_s0 + $0x590] sm:$0xff] }
  0xd7   :  { %6882 = vmatpush3.bf16.msra.mxu1 %v7638_v63  ;;  %6852 = vmatprep.subr.bf16.mxu0 %v7640_v0 }
  0xd8   :  { %6884 = vmatprep.subr.bf16.mxu1 %v7652_v5 }
  0xd9   :  { %1513 = vmatmul.mubr.f32.gmra.mrb[90].mxu0 %v4333_v13  ;;  %v4365_v13 = vld [vmem:[%s10213_s0 + $0x578] sm:$0xff] }
  0xda   :  { %6854 = vmatpush3.bf16.msra.mxu0 %v7670_v14  ;;  %1517 = vmatprep.mubr.f32.mxu0 %v4341_v23  ;;  %v4367_v23 = vld [vmem:[%s10213_s0 + $0x588] sm:$0xff] }
  0xdb   :  { %6886 = vmatpush3.bf16.msra.mxu1 %v7680_v19  ;;  %6856 = vmatprep.subr.bf16.mxu0 %v7682_v20 }
  0xdc   :  { %6888 = vmatprep.subr.bf16.mxu1 %v7694_v27 }
  0xdd   :  { %1518 = vmatmul.mubr.f32.gmra.mrb[92].mxu0 %v4340_v32  ;;  %v4373_v32 = vld [vmem:[%s10213_s0 + $0x5b8] sm:$0xff] }
  0xde   :  { %6858 = vmatpush3.bf16.msra.mxu0 %v7712_v35  ;;  %1522 = vmatprep.mubr.f32.mxu0 %v4348_v33  ;;  %v4375_v33 = vld [vmem:[%s10213_s0 + $0x5c8] sm:$0xff] }
  0xdf   :  { %6890 = vmatpush3.bf16.msra.mxu1 %v7716_v36  ;;  %6860 = vmatprep.subr.bf16.mxu0 %v7718_v37 }
  0xe0   :  { %6892 = vmatprep.subr.bf16.mxu1 %v7730_v44 }
  0xe1   :  { %1523 = vmatmul.mubr.f32.gmra.mrb[94].mxu0 %v4347_v41  ;;  %v4372_v41 = vld [vmem:[%s10213_s0 + $0x5b0] sm:$0xff] }
  0xe2   :  { %6862 = vmatpush3.bf16.msra.mxu0 %v7742_v48  ;;  %1786 = vmatprep.mubr.f32.mxu0 %v4359_v45  ;;  %v4374_v45 = vld [vmem:[%s10213_s0 + $0x5c0] sm:$0xff] }
  0xe3   :  { %6894 = vmatpush3.bf16.msra.mxu1 %v7749_v53  ;;  %6896 = vmatprep.subr.bf16.mxu0 %v7751_v54 }
  0xe4   :  { %6928 = vmatprep.subr.bf16.mxu1 %v7763_v59 }
  0xe5   :  { %1787 = vmatmul.mubr.f32.vlgmr.msra.gmra.mrb[96].mxu0 %v4358_v57  ;;  %v4380_v57 = vld [vmem:[%s10213_s0 + $0x5f0] sm:$0xff] }
  0xe6   :  { %1892 = vmatmul.mubr.f32.vlgmr.msra.gmra.mrb[72].mxu1 %v4360_v4  ;;  %6898 = vmatpush3.bf16.msra.mxu0 %v7775_v2  ;;  %v4382_v4 = vld [vmem:[%s10213_s0 + $0x600] sm:$0xff] }
  0xe7   :  { %1791 = vmatprep.mubr.f32.mxu0 %v4366_v9  ;;  %1896 = vmatprep.mubr.f32.mxu1 %v4368_v10  ;;  %v4379_v9 = vld [vmem:[%s10213_s0 + $0x5e8] sm:$0xff]  ;;  %v4381_v10 = vld [vmem:[%s10213_s0 + $0x5f8] sm:$0xff] }
  0xe8   :  { %6900 = vmatprep.subr.bf16.mxu0 %v7800_v18  ;;  %6930 = vmatpush3.bf16.msra.mxu1 %v7763_v59 }
  0xe9   :  { %1792 = vmatmul.mubr.f32.gmra.mrb[98].mxu0 %v4365_v13  ;;  %6932 = vmatprep.subr.bf16.mxu1 %v7809_v24  ;;  %v4387_v13 = vld [vmem:[%s10213_s0 + $0x628] sm:$0xff] }
  0xea   :  { %1897 = vmatmul.mubr.f32.gmra.mrb[74].mxu1 %v4367_v23  ;;  %6902 = vmatpush3.bf16.msra.mxu0 %v7815_v29  ;;  %v4389_v23 = vld [vmem:[%s10213_s0 + $0x638] sm:$0xff] }
  0xeb   :  { %1796 = vmatprep.mubr.f32.mxu0 %v4373_v32  ;;  %1901 = vmatprep.mubr.f32.mxu1 %v4375_v33  ;;  %v4386_v32 = vld [vmem:[%s10213_s0 + $0x620] sm:$0xff]  ;;  %v4388_v33 = vld [vmem:[%s10213_s0 + $0x630] sm:$0xff] }
  0xec   :  { %6904 = vmatprep.subr.bf16.mxu0 %v7839_v46  ;;  %6934 = vmatpush3.bf16.msra.mxu1 %v7809_v24 }
  0xed   :  { %1797 = vmatmul.mubr.f32.gmra.mrb[100].mxu0 %v4372_v41  ;;  %6936 = vmatprep.subr.bf16.mxu1 %v7849_v55  ;;  %v4394_v41 = vld [vmem:[%s10213_s0 + $0x660] sm:$0xff] }
  0xee   :  { %1902 = vmatmul.mubr.f32.gmra.mrb[76].mxu1 %v4374_v45  ;;  %6906 = vmatpush3.bf16.msra.mxu0 %v7855_v58  ;;  %v4396_v45 = vld [vmem:[%s10213_s0 + $0x670] sm:$0xff] }
  0xef   :  { %1801 = vmatprep.mubr.f32.mxu0 %v4380_v57  ;;  %1906 = vmatprep.mubr.f32.mxu1 %v4382_v4  ;;  %v4393_v57 = vld [vmem:[%s10213_s0 + $0x658] sm:$0xff]  ;;  %v4395_v4 = vld [vmem:[%s10213_s0 + $0x668] sm:$0xff] }
  0xf0   :  { %6908 = vmatprep.subr.bf16.mxu0 %v7879_v11  ;;  %6938 = vmatpush3.bf16.msra.mxu1 %v7849_v55 }
  0xf1   :  { %1802 = vmatmul.mubr.f32.gmra.mrb[102].mxu0 %v4379_v9  ;;  %6940 = vmatprep.subr.bf16.mxu1 %v7889_v22 }
  0xf2   :  { %1907 = vmatmul.mubr.f32.gmra.mrb[78].mxu1 %v4381_v10  ;;  %6910 = vmatpush3.bf16.msra.mxu0 %v7895_v28  ;;  %v4401_v10 = vld [vmem:[%s10213_s0 + $0x698] sm:$0xff] }
  0xf3   :  { %1806 = vmatprep.mubr.f32.mxu0 %v4387_v13  ;;  %1911 = vmatprep.mubr.f32.mxu1 %v4389_v23  ;;  %v4403_v13 = vld [vmem:[%s10213_s0 + $0x6a8] sm:$0xff] }
  0xf4   :  { %6912 = vmatprep.subr.bf16.mxu0 %v7919_v47  ;;  %6942 = vmatpush3.bf16.msra.mxu1 %v7889_v22 }
  0xf5   :  { %1807 = vmatmul.mubr.f32.gmra.mrb[104].mxu0 %v4386_v32  ;;  %6944 = vmatprep.subr.bf16.mxu1 %v7929_v60 }
  0xf6   :  { %1912 = vmatmul.mubr.f32.gmra.mrb[80].mxu1 %v4388_v33  ;;  %6914 = vmatpush3.bf16.msra.mxu0 %v7935_v1  ;;  %v4402_v1 = vld [vmem:[%s10213_s0 + $0x6a0] sm:$0xff] }
  0xf7   :  { %1811 = vmatprep.mubr.f32.mxu0 %v4394_v41  ;;  %1916 = vmatprep.mubr.f32.mxu1 %v4396_v45  ;;  %v4400_v45 = vld [vmem:[%s10213_s0 + $0x690] sm:$0xff] }
  0xf8   :  { %v4711_v9 = vpop.f32.mrb[0].mxu0  ;;  %6916 = vmatprep.subr.bf16.mxu0 %v7959_v31  ;;  %6946 = vmatpush3.bf16.msra.mxu1 %v7929_v60 }
  0xf9   :  { %v4767_v23 = vpop.f32.mrb[0].mxu1  ;;  %v4712_v32 = vpop.f32.mrb[1].mxu0  ;;  %1812 = vmatmul.mubr.f32.gmra.mrb[106].mxu0 %v4393_v57  ;;  %6948 = vmatprep.subr.bf16.mxu1 %v7969_v40  ;;  %v4408_v57 = vld [vmem:[%s10213_s0 + $0x6d0] sm:$0xff] }
  0xfa   :  { %v4713_v33 = vadd.f32 %v4712_v32, %v4711_v9  ;;  %v4768_v41 = vpop.f32.mrb[1].mxu1  ;;  %1917 = vmatmul.mubr.f32.gmra.mrb[82].mxu1 %v4395_v4  ;;  %6918 = vmatpush3.bf16.msra.mxu0 %v7975_v42  ;;  %v4410_v4 = vld [vmem:[%s10213_s0 + $0x6e0] sm:$0xff] }
  0xfb   :  { %v4769_v31 = vadd.f32 %v4768_v41, %v4767_v23  ;;  %1816 = vmatprep.mubr.f32.mxu0 %v4401_v10  ;;  %1921 = vmatprep.mubr.f32.mxu1 %v4403_v13  ;;  %v4407_v41 = vld [vmem:[%s10213_s0 + $0x6c8] sm:$0xff] }
  0xfc   :  { %v4714_v60 = vpop.f32.mrb[2].mxu0  ;;  %6920 = vmatprep.subr.bf16.mxu0 %v7993_v6  ;;  %6950 = vmatpush3.bf16.msra.mxu1 %v7969_v40 }
  0xfd   :  { %v8738_v9 = vadd.f32 %v4769_v31, %v4713_v33  ;;  %v4770_v10 = vpop.f32.mrb[2].mxu1  ;;  %v4715_v13 = vpop.f32.mrb[3].mxu0  ;;  %1817 = vmatmul.mubr.f32.gmra.mrb[108].mxu0 %v4400_v45  ;;  %6984 = vmatprep.subr.bf16.mxu1 %v7471_v7  ;;  %v4409_v31 = vld [vmem:[%s10213_s0 + $0x6d8] sm:$0xff] }
  0xfe   :  { %v4716_v23 = vadd.f32 %v4715_v13, %v4714_v60  ;;  %v4771_v32 = vpop.f32.mrb[3].mxu1  ;;  %1922 = vmatmul.mubr.f32.gmra.mrb[84].mxu1 %v4402_v1  ;;  %6922 = vmatpush3.bf16.msra.mxu0 %v8007_v15  ;;  %v4363_v60 = vld [vmem:[%s10213_s0 + $0x568] sm:$0xff]  ;;  %v4364_v1 = vld [vmem:[%s10213_s0 + $0x570] sm:$0xff] }
  0xff   :  { %v4772_v6 = vadd.f32 %v4771_v32, %v4770_v10  ;;  %1821 = vmatprep.mubr.f32.mxu0 %v4408_v57  ;;  %1926 = vmatprep.mubr.f32.mxu1 %v4410_v4  ;;  %v4362_v32 = vld [vmem:[%s10213_s0 + $0x560] sm:$0xff] }
 0x100   :  { %v4717_v33 = vpop.f32.mrb[4].mxu0  ;;  %6924 = vmatprep.subr.bf16.mxu0 %v8025_v49 }
 0x101   :  { %v8755_v45 = vadd.f32 %v4772_v6, %v4716_v23  ;;  %v4773_v10 = vpop.f32.mrb[4].mxu1  ;;  %v4718_v57 = vpop.f32.mrb[5].mxu0  ;;  %1822 = vmatmul.mubr.f32.gmra.mrb[110].mxu0 %v4407_v41  ;;  %v4371_v6 = vld [vmem:[%s10213_s0 + $0x5a8] sm:$0xff]  ;;  %v4370_v41 = vld [vmem:[%s10213_s0 + $0x5a0] sm:$0xff] }
 0x102   :  { %v4719_v4 = vadd.f32 %v4718_v57, %v4717_v33  ;;  %v4774_v13 = vpop.f32.mrb[5].mxu1  ;;  %1927 = vmatmul.mubr.f32.gmra.mrb[86].mxu1 %v4409_v31  ;;  %6926 = vmatpush3.bf16.msra.mxu0 %v8033_v61 }
 0x103   :  { %v4775_v49 = vadd.f32 %v4774_v13, %v4773_v10  ;;  %1996 = vmatprep.mubr.f32.mxu0 %v4363_v60  ;;  %6315 = vmatprep.mubr.msk.f32.mxu1 %vm178_vm0, %v4364_v1  ;;  %v4369_v1 = vld [vmem:[%s10213_s0 + $0x598] sm:$0xff]  ;;  %v4378_v13 = vld [vmem:[%s10213_s0 + $0x5e0] sm:$0xff] }
 0x104   :  { %v4720_v23 = vpop.f32.mrb[6].mxu0  ;;  %6952 = vmatprep.subr.bf16.mxu0 %v7460_v3 }
 0x105   :  { %v8769_v31 = vadd.f32 %v4775_v49, %v4719_v4  ;;  %v4776_v33 = vpop.f32.mrb[6].mxu1  ;;  %v4721_v57 = vpop.f32.mrb[7].mxu0  ;;  %1997 = vmatmul.mubr.f32.vlgmr.msra.gmra.mrb[112].mxu0 %v4362_v32  ;;  %v4377_v49 = vld [vmem:[%s10213_s0 + $0x5d8] sm:$0xff] }
 0x106   :  { %v4722_v10 = vadd.f32 %v4721_v57, %v4720_v23  ;;  %v4777_v60 = vpop.f32.mrb[7].mxu1  ;;  %6316 = vmatmul.mubr.msk.f32.vlgmr.msra.gmra.mrb[88].mxu1 %vm178_vm0, %v4371_v6  ;;  %6954 = vmatpush3.bf16.msra.mxu0 %v7473_v8 }
 0x107   :  { %v4778_v3 = vadd.f32 %v4777_v60, %v4776_v33  ;;  %6986 = vmatpush3.bf16.msra.mxu1 %v7485_v12  ;;  %2001 = vmatprep.mubr.f32.mxu0 %v4370_v41  ;;  %v4385_v41 = vld [vmem:[%s10213_s0 + $0x618] sm:$0xff]  ;;  %v4376_v60 = vld [vmem:[%s10213_s0 + $0x5d0] sm:$0xff] }
 0x108   :  { %v4723_v4 = vpop.f32.mrb[8].mxu0  ;;  %6956 = vmatprep.subr.bf16.mxu0 %v7498_v16  ;;  %6988 = vmatprep.subr.bf16.mxu1 %v7500_v17 }
 0x109   :  { %v8785_v32 = vadd.f32 %v4778_v3, %v4722_v10  ;;  %v4779_v6 = vpop.f32.mrb[8].mxu1  ;;  %v4724_v23 = vpop.f32.mrb[9].mxu0  ;;  %2002 = vmatmul.mubr.f32.gmra.mrb[114].mxu0 %v4369_v1  ;;  %6318 = vmatprep.mubr.msk.f32.mxu1 %vm178_vm0, %v4378_v13  ;;  %v4392_v3 = vld [vmem:[%s10213_s0 + $0x650] sm:$0xff] }
 0x10a   :  { %v4725_v33 = vadd.f32 %v4724_v23, %v4723_v4  ;;  %v4780_v57 = vpop.f32.mrb[9].mxu1  ;;  %6958 = vmatpush3.bf16.msra.mxu0 %v7512_v21  ;;  %2006 = vmatprep.mubr.f32.mxu0 %v4377_v49  ;;  %v4384_v1 = vld [vmem:[%s10213_s0 + $0x610] sm:$0xff] }
 0x10b   :  { %v4781_v10 = vadd.f32 %v4780_v57, %v4779_v6  ;;  %6990 = vmatpush3.bf16.msra.mxu1 %v7525_v25  ;;  %6960 = vmatprep.subr.bf16.mxu0 %v7527_v26  ;;  %v4399_v6 = vld [vmem:[%s10213_s0 + $0x688] sm:$0xff] }
 0x10c   :  { %v4726_v13 = vpop.f32.mrb[10].mxu0  ;;  %6992 = vmatprep.subr.bf16.mxu1 %v7538_v30  ;;  %6319 = vmatmul.mubr.msk.f32.gmra.mrb[90].mxu1 %vm178_vm0, %v4385_v41  ;;  %v4383_v41 = vld [vmem:[%s10213_s0 + $0x608] sm:$0xff] }
 0x10d   :  { %v8805_v49 = vadd.f32 %v4781_v10, %v4725_v33  ;;  %v4782_v4 = vpop.f32.mrb[10].mxu1  ;;  %v4727_v23 = vpop.f32.mrb[11].mxu0  ;;  %2007 = vmatmul.mubr.f32.gmra.mrb[116].mxu0 %v4376_v60  ;;  %6321 = vmatprep.mubr.msk.f32.mxu1 %vm178_vm0, %v4392_v3  ;;  %v4406_v33 = vld [vmem:[%s10213_s0 + $0x6c0] sm:$0xff]  ;;  %v4391_v3 = vld [vmem:[%s10213_s0 + $0x648] sm:$0xff] }
 0x10e   :  { %v4728_v57 = vadd.f32 %v4727_v23, %v4726_v13  ;;  %v4783_v26 = vpop.f32.mrb[11].mxu1  ;;  %6962 = vmatpush3.bf16.msra.mxu0 %v7550_v34  ;;  %2011 = vmatprep.mubr.f32.mxu0 %v4384_v1 }
 0x10f   :  { %v4784_v60 = vadd.f32 %v4783_v26, %v4782_v4  ;;  %6994 = vmatpush3.bf16.msra.mxu1 %v7563_v38  ;;  %6964 = vmatprep.subr.bf16.mxu0 %v7565_v39  ;;  %v4413_v26 = vld [vmem:[%s10213_s0 + $0x6f8] sm:$0xff] }
 0x110   :  { %v4729_v10 = vpop.f32.mrb[12].mxu0  ;;  %6996 = vmatprep.subr.bf16.mxu1 %v7577_v43  ;;  %6322 = vmatmul.mubr.msk.f32.gmra.mrb[92].mxu1 %vm178_vm0, %v4399_v6  ;;  %v4390_v6 = vld [vmem:[%s10213_s0 + $0x640] sm:$0xff] }
 0x111   :  { %v8825_v1 = vadd.f32 %v4784_v60, %v4728_v57  ;;  %v4785_v13 = vpop.f32.mrb[12].mxu1  ;;  %v4730_v23 = vpop.f32.mrb[13].mxu0  ;;  %2012 = vmatmul.mubr.f32.gmra.mrb[118].mxu0 %v4383_v41  ;;  %6324 = vmatprep.mubr.msk.f32.mxu1 %vm178_vm0, %v4406_v33  ;;  %v4425_v57 = vld [vmem:[%s10213_s0 + $0x718] sm:$0xff]  ;;  %v4398_v33 = vld [vmem:[%s10213_s0 + $0x680] sm:$0xff] }
 0x112   :  { %v4731_v4 = vadd.f32 %v4730_v23, %v4729_v10  ;;  %v4786_v39 = vpop.f32.mrb[13].mxu1  ;;  %6966 = vmatpush3.bf16.msra.mxu0 %v7598_v50  ;;  %2016 = vmatprep.mubr.f32.mxu0 %v4391_v3 }
 0x113   :  { %v4787_v41 = vadd.f32 %v4786_v39, %v4785_v13  ;;  %6998 = vmatpush3.bf16.msra.mxu1 %v7602_v51  ;;  %6968 = vmatprep.subr.bf16.mxu0 %v7604_v52  ;;  %v4397_v52 = vld [vmem:[%s10213_s0 + $0x678] sm:$0xff] }
 0x114   :  { %v4732_v60 = vpop.f32.mrb[14].mxu0  ;;  %7000 = vmatprep.subr.bf16.mxu1 %v7616_v56  ;;  %6325 = vmatmul.mubr.msk.f32.gmra.mrb[94].mxu1 %vm178_vm0, %v4413_v26  ;;  %v4405_v26 = vld [vmem:[%s10213_s0 + $0x6b8] sm:$0xff] }
 0x115   :  { %v8845_v3 = vadd.f32 %v4787_v41, %v4731_v4  ;;  %v4788_v10 = vpop.f32.mrb[14].mxu1  ;;  %v4733_v23 = vpop.f32.mrb[15].mxu0  ;;  %2017 = vmatmul.mubr.f32.gmra.mrb[120].mxu0 %v4390_v6  ;;  %2400 = vmatprep.mubr.f32.mxu1 %v4425_v57 }
 0x116   :  { %v4734_v39 = vadd.f32 %v4733_v23, %v4732_v60  ;;  %v4789_v13 = vpop.f32.mrb[15].mxu1  ;;  %6970 = vmatpush3.bf16.msra.mxu0 %v7634_v62  ;;  %2021 = vmatprep.mubr.f32.mxu0 %v4398_v33 }
 0x117   :  { %v4790_v51 = vadd.f32 %v4789_v13, %v4788_v10  ;;  %7002 = vmatpush3.bf16.msra.mxu1 %v7638_v63  ;;  %6972 = vmatprep.subr.bf16.mxu0 %v7640_v0  ;;  %v4404_v10 = vld [vmem:[%s10213_s0 + $0x6b0] sm:$0xff] }
 0x118   :  { %v4823_v4 = vpop.f32.mrb[16].mxu0  ;;  %7004 = vmatprep.subr.bf16.mxu1 %v7652_v5 }
 0x119   :  { %v8857_v6 = vadd.f32 %v4790_v51, %v4734_v39  ;;  %v4824_v57 = vpop.f32.mrb[17].mxu0  ;;  %2022 = vmatmul.mubr.f32.gmra.mrb[122].mxu0 %v4397_v52  ;;  %v6209_v41 = vpop.f32.mrb[16].mxu1  ;;  %v4412_v51 = vld [vmem:[%s10213_s0 + $0x6f0] sm:$0xff] }
 0x11a   :  { %v4825_v33 = vadd.f32 %v4824_v57, %v4823_v4  ;;  %6974 = vmatpush3.bf16.msra.mxu0 %v7670_v14  ;;  %2026 = vmatprep.mubr.f32.mxu0 %v4405_v26  ;;  %v584_v60 = vpop.f32.mrb[17].mxu1  ;;  %v4411_v4 = vld [vmem:[%s10213_s0 + $0x6e8] sm:$0xff] }
 0x11b   :  { %7006 = vmatpush3.bf16.msra.mxu1 %v7680_v19  ;;  %6976 = vmatprep.subr.bf16.mxu0 %v7682_v20 }
 0x11c   :  { %v4826_v23 = vpop.f32.mrb[18].mxu0  ;;  %v480_v52 = vadd.f32 %v4825_v33, %v8738_v9  ;;  %7008 = vmatprep.subr.bf16.mxu1 %v7694_v27  ;;  %v4423_v9 = vld [vmem:[%s10213_s0 + $0x708] sm:$0xff] }
 0x11d   :  { %v4827_v39 = vpop.f32.mrb[19].mxu0  ;;  %2027 = vmatmul.mubr.f32.gmra.mrb[124].mxu0 %v4404_v10 }
 0x11e   :  { %v4828_v13 = vadd.f32 %v4827_v39, %v4826_v23  ;;  %v8870_v26 = vadd.f32 %v584_v60, %v480_v52  ;;  %6978 = vmatpush3.bf16.msra.mxu0 %v7712_v35  ;;  %2031 = vmatprep.mubr.f32.mxu0 %v4412_v51  ;;  %v4422_v39 = vld [vmem:[%s10213_s0 + $0x700] sm:$0xff] }
 0x11f   :  { %7010 = vmatpush3.bf16.msra.mxu1 %v7716_v36  ;;  %6980 = vmatprep.subr.bf16.mxu0 %v7718_v37  ;;  %v6212_v57 = vpop.f32.mrb[18].mxu1 }
 0x120   :  { %v485_v33 = vadd.f32 %v4828_v13, %v8755_v45  ;;  %v4829_v60 = vpop.f32.mrb[20].mxu0  ;;  %7012 = vmatprep.subr.bf16.mxu1 %v7730_v44  ;;  %v594_v10 = vpop.f32.mrb[19].mxu1  ;;  %v4424_v45 = vld [vmem:[%s10213_s0 + $0x710] sm:$0xff] }
 0x121   :  { %v4830_v51 = vpop.f32.mrb[21].mxu0  ;;  %2032 = vmatmul.mubr.f32.gmra.mrb[126].mxu0 %v4411_v4 }
 0x122   :  { %v8883_v23 = vadd.f32 %v6209_v41, %v485_v33  ;;  %v4831_v52 = vadd.f32 %v4830_v51, %v4829_v60  ;;  %6982 = vmatpush3.bf16.msra.mxu0 %v7742_v48  ;;  %2295 = vmatprep.mubr.f32.mxu0 %v4423_v9  ;;  %v4430_v9 = vld [vmem:[%s10213_s0 + $0x740] sm:$0xff]  ;;  %v4432_v33 = vld [vmem:[%s10213_s0 + $0x750] sm:$0xff] }
 0x123   :  { %7014 = vmatpush3.bf16.msra.mxu1 %v7749_v53  ;;  %7016 = vmatprep.subr.bf16.mxu0 %v7751_v54  ;;  %v6215_v13 = vpop.f32.mrb[20].mxu1 }
 0x124   :  { %10304 = vst [vmem:[#allocation32_spill] sm:$0xff] %v8883_v23  ;;  %v4832_v4 = vpop.f32.mrb[22].mxu0  ;;  %v490_v41 = vadd.f32 %v4831_v52, %v8769_v31  ;;  %v604_v60 = vpop.f32.mrb[21].mxu1  ;;  %7048 = vmatprep.subr.bf16.mxu1 %v7763_v59  ;;  %v4429_v31 = vld [vmem:[%s10213_s0 + $0x738] sm:$0xff]  ;;  %v4431_v52 = vld [vmem:[%s10213_s0 + $0x748] sm:$0xff] }
 0x125   :  { %v4833_v51 = vpop.f32.mrb[23].mxu0  ;;  %2296 = vmatmul.mubr.f32.vlgmr.msra.gmra.mrb[128].mxu0 %v4422_v39 }
 0x126   :  { %v4834_v23 = vadd.f32 %v4833_v51, %v4832_v4  ;;  %v8902_v53 = vadd.f32 %v594_v10, %v490_v41  ;;  %2401 = vmatmul.mubr.f32.vlgmr.msra.gmra.mrb[96].mxu1 %v4424_v45  ;;  %7018 = vmatpush3.bf16.msra.mxu0 %v7775_v2  ;;  %v4437_v10 = vld [vmem:[%s10213_s0 + $0x778] sm:$0xff]  ;;  %v4439_v45 = vld [vmem:[%s10213_s0 + $0x788] sm:$0xff]  ;;  %v4438_v51 = vld [vmem:[%s10213_s0 + $0x780] sm:$0xff] }
 0x127   :  { %2300 = vmatprep.mubr.f32.mxu0 %v4430_v9  ;;  %2405 = vmatprep.mubr.f32.mxu1 %v4432_v33  ;;  %v8911_v54 = vpop.f32.mrb[22].mxu1 }
 0x128   :  { %v495_v39 = vadd.f32 %v4834_v23, %v8785_v32  ;;  %v4835_v4 = vpop.f32.mrb[24].mxu0  ;;  %7020 = vmatprep.subr.bf16.mxu0 %v7800_v18  ;;  %7050 = vmatpush3.bf16.msra.mxu1 %v7763_v59  ;;  %v614_v41 = vpop.f32.mrb[23].mxu1  ;;  %v4436_v23 = vld [vmem:[%s10213_s0 + $0x770] sm:$0xff] }
 0x129   :  { %v4836_v9 = vpop.f32.mrb[25].mxu0  ;;  %2301 = vmatmul.mubr.f32.gmra.mrb[130].mxu0 %v4429_v31  ;;  %7052 = vmatprep.subr.bf16.mxu1 %v7809_v24 }
 0x12a   :  { %v8923_v33 = vadd.f32 %v6212_v57, %v495_v39  ;;  %v4837_v32 = vadd.f32 %v4836_v9, %v4835_v4  ;;  %2406 = vmatmul.mubr.f32.gmra.mrb[98].mxu1 %v4431_v52  ;;  %7022 = vmatpush3.bf16.msra.mxu0 %v7815_v29  ;;  %v4444_v57 = vld [vmem:[%s10213_s0 + $0x7b0] sm:$0xff]  ;;  %v4446_v52 = vld [vmem:[%s10213_s0 + $0x7c0] sm:$0xff] }
 0x12b   :  { %2305 = vmatprep.mubr.f32.mxu0 %v4437_v10  ;;  %2410 = vmatprep.mubr.f32.mxu1 %v4439_v45  ;;  %v4445_v45 = vld [vmem:[%s10213_s0 + $0x7b8] sm:$0xff] }
 0x12c   :  { %v4838_v18 = vpop.f32.mrb[26].mxu0  ;;  %v500_v31 = vadd.f32 %v4837_v32, %v8805_v49  ;;  %7024 = vmatprep.subr.bf16.mxu0 %v7839_v46  ;;  %7054 = vmatpush3.bf16.msra.mxu1 %v7809_v24  ;;  %v4443_v49 = vld [vmem:[%s10213_s0 + $0x7a8] sm:$0xff] }
 0x12d   :  { %v4839_v39 = vpop.f32.mrb[27].mxu0  ;;  %2306 = vmatmul.mubr.f32.gmra.mrb[132].mxu0 %v4436_v23  ;;  %7056 = vmatprep.subr.bf16.mxu1 %v7849_v55 }
 0x12e   :  { %v4840_v4 = vadd.f32 %v4839_v39, %v4838_v18  ;;  %v8942_v10 = vadd.f32 %v604_v60, %v500_v31  ;;  %2411 = vmatmul.mubr.f32.gmra.mrb[100].mxu1 %v4438_v51  ;;  %7026 = vmatpush3.bf16.msra.mxu0 %v7855_v58  ;;  %v4451_v18 = vld [vmem:[%s10213_s0 + $0x7e8] sm:$0xff]  ;;  %v4453_v60 = vld [vmem:[%s10213_s0 + $0x7f8] sm:$0xff]  ;;  %v4450_v31 = vld [vmem:[%s10213_s0 + $0x7e0] sm:$0xff] }
 0x12f   :  { %2310 = vmatprep.mubr.f32.mxu0 %v4444_v57  ;;  %2415 = vmatprep.mubr.f32.mxu1 %v4446_v52  ;;  %v4452_v57 = vld [vmem:[%s10213_s0 + $0x7f0] sm:$0xff] }
 0x130   :  { %v505_v9 = vadd.f32 %v4840_v4, %v8825_v1  ;;  %v4841_v32 = vpop.f32.mrb[28].mxu0  ;;  %7028 = vmatprep.subr.bf16.mxu0 %v7879_v11  ;;  %7058 = vmatpush3.bf16.msra.mxu1 %v7849_v55  ;;  %v4460_v4 = vld [vmem:[%s10213_s0 + $0x830] sm:$0xff] }
 0x131   :  { %v4842_v23 = vpop.f32.mrb[29].mxu0  ;;  %2311 = vmatmul.mubr.f32.gmra.mrb[134].mxu0 %v4443_v49  ;;  %7060 = vmatprep.subr.bf16.mxu1 %v7889_v22 }
 0x132   :  { %v8961_v51 = vadd.f32 %v6215_v13, %v505_v9  ;;  %v4843_v1 = vadd.f32 %v4842_v23, %v4841_v32  ;;  %2416 = vmatmul.mubr.f32.gmra.mrb[102].mxu1 %v4445_v45  ;;  %7030 = vmatpush3.bf16.msra.mxu0 %v7895_v28  ;;  %v4458_v13 = vld [vmem:[%s10213_s0 + $0x820] sm:$0xff] }
 0x133   :  { %2315 = vmatprep.mubr.f32.mxu0 %v4451_v18  ;;  %2420 = vmatprep.mubr.f32.mxu1 %v4453_v60  ;;  %v10305_v45 = vld [vmem:[#allocation26_spill] sm:$0xff]  ;;  %v4457_v18 = vld [vmem:[%s10213_s0 + $0x818] sm:$0xff]  ;;  %v4459_v60 = vld [vmem:[%s10213_s0 + $0x828] sm:$0xff] }
 0x134   :  { %v4844_v52 = vpop.f32.mrb[30].mxu0  ;;  %v510_v39 = vadd.f32 %v4843_v1, %v8845_v3  ;;  %7032 = vmatprep.subr.bf16.mxu0 %v7919_v47  ;;  %7062 = vmatpush3.bf16.msra.mxu1 %v7889_v22  ;;  %v10307_v3 = vld [vmem:[#allocation27_spill] sm:$0xff] }
 0x135   :  { %v4845_v49 = vpop.f32.mrb[31].mxu0  ;;  %2316 = vmatmul.mubr.f32.gmra.mrb[136].mxu0 %v4450_v31  ;;  %7064 = vmatprep.subr.bf16.mxu1 %v10305_v45  ;;  %v10308_v31 = vld [vmem:[#allocation28_spill] sm:$0xff] }
 0x136   :  { %v4846_v9 = vadd.f32 %v4845_v49, %v4844_v52  ;;  %v8980_v32 = vadd.f32 %v614_v41, %v510_v39  ;;  %2421 = vmatmul.mubr.f32.gmra.mrb[104].mxu1 %v4452_v57  ;;  %7034 = vmatpush3.bf16.msra.mxu0 %v10307_v3  ;;  %v4465_v41 = vld [vmem:[%s10213_s0 + $0x858] sm:$0xff]  ;;  %v4467_v57 = vld [vmem:[%s10213_s0 + $0x868] sm:$0xff]  ;;  %v4464_v49 = vld [vmem:[%s10213_s0 + $0x850] sm:$0xff] }
 0x137   :  { %2320 = vmatprep.mubr.f32.mxu0 %v4458_v13  ;;  %2425 = vmatprep.mubr.f32.mxu1 %v4460_v4 }
 0x138   :  { %10306 = vst [vmem:[#allocation26_spill] sm:$0xff] %v8980_v32  ;;  %v515_v23 = vadd.f32 %v4846_v9, %v8857_v6  ;;  %v4899_v1 = vpop.f32.mrb[32].mxu0  ;;  %7036 = vmatprep.subr.bf16.mxu0 %v10308_v31  ;;  %7066 = vmatpush3.bf16.msra.mxu1 %v10305_v45  ;;  %v10309_v32 = vld [vmem:[#allocation29_spill] sm:$0xff] }
 0x139   :  { %v4955_v52 = vpop.f32.mrb[24].mxu1  ;;  %v4900_v39 = vpop.f32.mrb[33].mxu0  ;;  %2321 = vmatmul.mubr.f32.gmra.mrb[138].mxu0 %v4457_v18  ;;  %7068 = vmatprep.subr.bf16.mxu1 %v7969_v40  ;;  %v4466_v18 = vld [vmem:[%s10213_s0 + $0x860] sm:$0xff] }
 0x13a   :  { %v9000_v6 = vadd.f32 %v8911_v54, %v515_v23  ;;  %v4901_v13 = vadd.f32 %v4900_v39, %v4899_v1  ;;  %v4956_v4 = vpop.f32.mrb[25].mxu1  ;;  %2426 = vmatmul.mubr.f32.gmra.mrb[106].mxu1 %v4459_v60  ;;  %7038 = vmatpush3.bf16.msra.mxu0 %v7975_v42  ;;  %v4472_v54 = vld [vmem:[%s10213_s0 + $0x890] sm:$0xff]  ;;  %v4474_v60 = vld [vmem:[%s10213_s0 + $0x8a0] sm:$0xff]  ;;  %v4471_v39 = vld [vmem:[%s10213_s0 + $0x888] sm:$0xff] }
 0x13b   :  { %v4957_v9 = vadd.f32 %v4956_v4, %v4955_v52  ;;  %2325 = vmatprep.mubr.f32.mxu0 %v4465_v41  ;;  %2430 = vmatprep.mubr.f32.mxu1 %v4467_v57 }
 0x13c   :  { %v4902_v31 = vpop.f32.mrb[34].mxu0  ;;  %7040 = vmatprep.subr.bf16.mxu0 %v10309_v32  ;;  %7070 = vmatpush3.bf16.msra.mxu1 %v7969_v40 }
 0x13d   :  { %v9017_v23 = vadd.f32 %v4957_v9, %v4901_v13  ;;  %v4958_v1 = vpop.f32.mrb[26].mxu1  ;;  %v4903_v41 = vpop.f32.mrb[35].mxu0  ;;  %2326 = vmatmul.mubr.f32.gmra.mrb[140].mxu0 %v4464_v49  ;;  %7104 = vmatprep.subr.bf16.mxu1 %v7471_v7  ;;  %v4473_v13 = vld [vmem:[%s10213_s0 + $0x898] sm:$0xff]  ;;  %v10310_v49 = vld [vmem:[#allocation31_spill] sm:$0xff]  ;;  %v10311_v7 = vld [vmem:[#allocation2_spill] sm:$0xff] }
 0x13e   :  { %v4904_v57 = vadd.f32 %v4903_v41, %v4902_v31  ;;  %v4959_v52 = vpop.f32.mrb[27].mxu1  ;;  %2431 = vmatmul.mubr.f32.gmra.mrb[108].mxu1 %v4466_v18  ;;  %7042 = vmatpush3.bf16.msra.mxu0 %v8007_v15  ;;  %v4427_v31 = vld [vmem:[%s10213_s0 + $0x728] sm:$0xff]  ;;  %v4428_v18 = vld [vmem:[%s10213_s0 + $0x730] sm:$0xff] }
 0x13f   :  { %v4960_v4 = vadd.f32 %v4959_v52, %v4958_v1  ;;  %2330 = vmatprep.mubr.f32.mxu0 %v4472_v54  ;;  %2435 = vmatprep.mubr.f32.mxu1 %v4474_v60 }
 0x140   :  { %v4905_v9 = vpop.f32.mrb[36].mxu0  ;;  %7044 = vmatprep.subr.bf16.mxu0 %v10310_v49  ;;  %v4426_v49 = vld [vmem:[%s10213_s0 + $0x720] sm:$0xff] }
 0x141   :  { %v9034_v41 = vadd.f32 %v4960_v4, %v4904_v57  ;;  %v4961_v1 = vpop.f32.mrb[28].mxu1  ;;  %v4906_v54 = vpop.f32.mrb[37].mxu0  ;;  %2331 = vmatmul.mubr.f32.gmra.mrb[142].mxu0 %v4471_v39  ;;  %v4435_v57 = vld [vmem:[%s10213_s0 + $0x768] sm:$0xff]  ;;  %v4434_v39 = vld [vmem:[%s10213_s0 + $0x760] sm:$0xff] }
 0x142   :  { %v4907_v60 = vadd.f32 %v4906_v54, %v4905_v9  ;;  %v4962_v52 = vpop.f32.mrb[29].mxu1  ;;  %2436 = vmatmul.mubr.f32.gmra.mrb[110].mxu1 %v4473_v13  ;;  %7046 = vmatpush3.bf16.msra.mxu0 %v8033_v61 }
 0x143   :  { %v4963_v15 = vadd.f32 %v4962_v52, %v4961_v1  ;;  %2505 = vmatprep.mubr.f32.mxu0 %v4427_v31  ;;  %6351 = vmatprep.mubr.msk.f32.mxu1 %vm178_vm0, %v4428_v18  ;;  %v4433_v18 = vld [vmem:[%s10213_s0 + $0x758] sm:$0xff]  ;;  %v4442_v52 = vld [vmem:[%s10213_s0 + $0x7a0] sm:$0xff] }
 0x144   :  { %v4908_v4 = vpop.f32.mrb[38].mxu0  ;;  %7072 = vmatprep.subr.bf16.mxu0 %v10311_v7 }
 0x145   :  { %v9048_v13 = vadd.f32 %v4963_v15, %v4907_v60  ;;  %v4964_v9 = vpop.f32.mrb[30].mxu1  ;;  %v4909_v54 = vpop.f32.mrb[39].mxu0  ;;  %2506 = vmatmul.mubr.f32.vlgmr.msra.gmra.mrb[144].mxu0 %v4426_v49  ;;  %v4441_v15 = vld [vmem:[%s10213_s0 + $0x798] sm:$0xff] }
 0x146   :  { %v4910_v1 = vadd.f32 %v4909_v54, %v4908_v4  ;;  %v4965_v31 = vpop.f32.mrb[31].mxu1  ;;  %6352 = vmatmul.mubr.msk.f32.vlgmr.msra.gmra.mrb[112].mxu1 %vm178_vm0, %v4435_v57  ;;  %7074 = vmatpush3.bf16.msra.mxu0 %v7473_v8 }
 0x147   :  { %v4966_v7 = vadd.f32 %v4965_v31, %v4964_v9  ;;  %7106 = vmatpush3.bf16.msra.mxu1 %v7485_v12  ;;  %2510 = vmatprep.mubr.f32.mxu0 %v4434_v39  ;;  %v4449_v39 = vld [vmem:[%s10213_s0 + $0x7d8] sm:$0xff]  ;;  %v4440_v31 = vld [vmem:[%s10213_s0 + $0x790] sm:$0xff] }
 0x148   :  { %v4911_v49 = vpop.f32.mrb[40].mxu0  ;;  %7076 = vmatprep.subr.bf16.mxu0 %v7498_v16  ;;  %7108 = vmatprep.subr.bf16.mxu1 %v7500_v17 }
 0x149   :  { %v9064_v60 = vadd.f32 %v4966_v7, %v4910_v1  ;;  %v4967_v57 = vpop.f32.mrb[32].mxu1  ;;  %v4912_v4 = vpop.f32.mrb[41].mxu0  ;;  %2511 = vmatmul.mubr.f32.gmra.mrb[146].mxu0 %v4433_v18  ;;  %6354 = vmatprep.mubr.msk.f32.mxu1 %vm178_vm0, %v4442_v52  ;;  %v4456_v7 = vld [vmem:[%s10213_s0 + $0x810] sm:$0xff]  ;;  %v10312_v18 = vld [vmem:[#allocation7_spill] sm:$0xff] }
 0x14a   :  { %v4913_v9 = vadd.f32 %v4912_v4, %v4911_v49  ;;  %v4968_v54 = vpop.f32.mrb[33].mxu1  ;;  %7078 = vmatpush3.bf16.msra.mxu0 %v7512_v21  ;;  %2515 = vmatprep.mubr.f32.mxu0 %v4441_v15  ;;  %v4448_v52 = vld [vmem:[%s10213_s0 + $0x7d0] sm:$0xff] }
 0x14b   :  { %v4969_v1 = vadd.f32 %v4968_v54, %v4967_v57  ;;  %7110 = vmatpush3.bf16.msra.mxu1 %v7525_v25  ;;  %7080 = vmatprep.subr.bf16.mxu0 %v10312_v18  ;;  %v4463_v57 = vld [vmem:[%s10213_s0 + $0x848] sm:$0xff] }
 0x14c   :  { %v4914_v49 = vpop.f32.mrb[42].mxu0  ;;  %7112 = vmatprep.subr.bf16.mxu1 %v7538_v30  ;;  %6355 = vmatmul.mubr.msk.f32.gmra.mrb[114].mxu1 %vm178_vm0, %v4449_v39  ;;  %v4447_v39 = vld [vmem:[%s10213_s0 + $0x7c8] sm:$0xff] }
 0x14d   :  { %v9084_v15 = vadd.f32 %v4969_v1, %v4913_v9  ;;  %v4970_v4 = vpop.f32.mrb[34].mxu1  ;;  %v4915_v21 = vpop.f32.mrb[43].mxu0  ;;  %2516 = vmatmul.mubr.f32.gmra.mrb[148].mxu0 %v4440_v31  ;;  %6357 = vmatprep.mubr.msk.f32.mxu1 %vm178_vm0, %v4456_v7  ;;  %v4470_v9 = vld [vmem:[%s10213_s0 + $0x880] sm:$0xff]  ;;  %v10313_v7 = vld [vmem:[#allocation11_spill] sm:$0xff] }
 0x14e   :  { %v4916_v54 = vadd.f32 %v4915_v21, %v4914_v49  ;;  %v4971_v18 = vpop.f32.mrb[35].mxu1  ;;  %7082 = vmatpush3.bf16.msra.mxu0 %v7550_v34  ;;  %2520 = vmatprep.mubr.f32.mxu0 %v4448_v52  ;;  %v4455_v21 = vld [vmem:[%s10213_s0 + $0x808] sm:$0xff] }
 0x14f   :  { %v4972_v31 = vadd.f32 %v4971_v18, %v4970_v4  ;;  %7114 = vmatpush3.bf16.msra.mxu1 %v7563_v38  ;;  %7084 = vmatprep.subr.bf16.mxu0 %v10313_v7  ;;  %v4477_v18 = vld [vmem:[%s10213_s0 + $0x8b8] sm:$0xff] }
 0x150   :  { %v4917_v1 = vpop.f32.mrb[44].mxu0  ;;  %7116 = vmatprep.subr.bf16.mxu1 %v7577_v43  ;;  %6358 = vmatmul.mubr.msk.f32.gmra.mrb[116].mxu1 %vm178_vm0, %v4463_v57  ;;  %v4454_v57 = vld [vmem:[%s10213_s0 + $0x800] sm:$0xff] }
 0x151   :  { %v9104_v52 = vadd.f32 %v4972_v31, %v4916_v54  ;;  %v4973_v49 = vpop.f32.mrb[36].mxu1  ;;  %v4918_v34 = vpop.f32.mrb[45].mxu0  ;;  %2521 = vmatmul.mubr.f32.gmra.mrb[150].mxu0 %v4447_v39  ;;  %6360 = vmatprep.mubr.msk.f32.mxu1 %vm178_vm0, %v4470_v9  ;;  %v4489_v54 = vld [vmem:[%s10213_s0 + $0x8d8] sm:$0xff]  ;;  %v10314_v31 = vld [vmem:[#allocation14_spill] sm:$0xff]  ;;  %v10315_v9 = vld [vmem:[#allocation15_spill] sm:$0xff] }
 0x152   :  { %v4919_v4 = vadd.f32 %v4918_v34, %v4917_v1  ;;  %v4974_v7 = vpop.f32.mrb[37].mxu1  ;;  %7086 = vmatpush3.bf16.msra.mxu0 %v7598_v50  ;;  %2525 = vmatprep.mubr.f32.mxu0 %v4455_v21  ;;  %v4462_v34 = vld [vmem:[%s10213_s0 + $0x840] sm:$0xff] }
 0x153   :  { %v4975_v39 = vadd.f32 %v4974_v7, %v4973_v49  ;;  %7118 = vmatpush3.bf16.msra.mxu1 %v10314_v31  ;;  %7088 = vmatprep.subr.bf16.mxu0 %v10315_v9  ;;  %v4461_v9 = vld [vmem:[%s10213_s0 + $0x838] sm:$0xff] }
 0x154   :  { %v4920_v1 = vpop.f32.mrb[46].mxu0  ;;  %7120 = vmatprep.subr.bf16.mxu1 %v7616_v56  ;;  %6361 = vmatmul.mubr.msk.f32.gmra.mrb[118].mxu1 %vm178_vm0, %v4477_v18  ;;  %v4469_v18 = vld [vmem:[%s10213_s0 + $0x878] sm:$0xff] }
 0x155   :  { %v9124_v21 = vadd.f32 %v4975_v39, %v4919_v4  ;;  %v4976_v50 = vpop.f32.mrb[38].mxu1  ;;  %v4921_v43 = vpop.f32.mrb[47].mxu0  ;;  %2526 = vmatmul.mubr.f32.gmra.mrb[152].mxu0 %v4454_v57  ;;  %2909 = vmatprep.mubr.f32.mxu1 %v4489_v54 }
 0x156   :  { %v4922_v7 = vadd.f32 %v4921_v43, %v4920_v1  ;;  %v4977_v49 = vpop.f32.mrb[39].mxu1  ;;  %7090 = vmatpush3.bf16.msra.mxu0 %v7634_v62  ;;  %2530 = vmatprep.mubr.f32.mxu0 %v4462_v34  ;;  %v4468_v34 = vld [vmem:[%s10213_s0 + $0x870] sm:$0xff] }
 0x157   :  { %v4978_v31 = vadd.f32 %v4977_v49, %v4976_v50  ;;  %7122 = vmatpush3.bf16.msra.mxu1 %v7638_v63  ;;  %7092 = vmatprep.subr.bf16.mxu0 %v7640_v0 }
 0x158   :  { %v5011_v4 = vpop.f32.mrb[48].mxu0  ;;  %7124 = vmatprep.subr.bf16.mxu1 %v7652_v5 }
 0x159   :  { %v9136_v43 = vadd.f32 %v4978_v31, %v4922_v7  ;;  %v5012_v57 = vpop.f32.mrb[49].mxu0  ;;  %2531 = vmatmul.mubr.f32.gmra.mrb[154].mxu0 %v4461_v9  ;;  %v6245_v54 = vpop.f32.mrb[40].mxu1  ;;  %v4476_v31 = vld [vmem:[%s10213_s0 + $0x8b0] sm:$0xff] }
 0x15a   :  { %v5013_v39 = vadd.f32 %v5012_v57, %v5011_v4  ;;  %7094 = vmatpush3.bf16.msra.mxu0 %v7670_v14  ;;  %2535 = vmatprep.mubr.f32.mxu0 %v4469_v18  ;;  %v1085_v50 = vpop.f32.mrb[41].mxu1  ;;  %v4475_v4 = vld [vmem:[%s10213_s0 + $0x8a8] sm:$0xff] }
 0x15b   :  { %7126 = vmatpush3.bf16.msra.mxu1 %v7680_v19  ;;  %7096 = vmatprep.subr.bf16.mxu0 %v7682_v20 }
 0x15c   :  { %v5014_v1 = vpop.f32.mrb[50].mxu0  ;;  %v981_v9 = vadd.f32 %v5013_v39, %v9017_v23  ;;  %7128 = vmatprep.subr.bf16.mxu1 %v7694_v27  ;;  %v4487_v23 = vld [vmem:[%s10213_s0 + $0x8c8] sm:$0xff] }
 0x15d   :  { %v5015_v7 = vpop.f32.mrb[51].mxu0  ;;  %2536 = vmatmul.mubr.f32.gmra.mrb[156].mxu0 %v4468_v34 }
 0x15e   :  { %v5016_v49 = vadd.f32 %v5015_v7, %v5014_v1  ;;  %v9149_v18 = vadd.f32 %v1085_v50, %v981_v9  ;;  %7098 = vmatpush3.bf16.msra.mxu0 %v7712_v35  ;;  %2540 = vmatprep.mubr.f32.mxu0 %v4476_v31  ;;  %v10318_v50 = vld [vmem:[#allocation24_spill] sm:$0xff] }
 0x15f   :  { %7130 = vmatpush3.bf16.msra.mxu1 %v7716_v36  ;;  %7100 = vmatprep.subr.bf16.mxu0 %v7718_v37  ;;  %v6248_v57 = vpop.f32.mrb[42].mxu1  ;;  %v4486_v37 = vld [vmem:[%s10213_s0 + $0x8c0] sm:$0xff] }
 0x160   :  { %10316 = vst [vmem:[#allocation27_spill] sm:$0xff] %v9149_v18  ;;  %v986_v39 = vadd.f32 %v5016_v49, %v9034_v41  ;;  %v5017_v34 = vpop.f32.mrb[52].mxu0  ;;  %7132 = vmatprep.subr.bf16.mxu1 %v7730_v44  ;;  %v1095_v31 = vpop.f32.mrb[43].mxu1  ;;  %v10317_v41 = vld [vmem:[#allocation23_spill] sm:$0xff]  ;;  %v4488_v49 = vld [vmem:[%s10213_s0 + $0x8d0] sm:$0xff] }
 0x161   :  { %v5018_v1 = vpop.f32.mrb[53].mxu0  ;;  %2541 = vmatmul.mubr.f32.gmra.mrb[158].mxu0 %v4475_v4 }
 0x162   :  { %v9164_v9 = vadd.f32 %v6245_v54, %v986_v39  ;;  %v5019_v7 = vadd.f32 %v5018_v1, %v5017_v34  ;;  %7102 = vmatpush3.bf16.msra.mxu0 %v7742_v48  ;;  %2804 = vmatprep.mubr.f32.mxu0 %v4487_v23  ;;  %v10319_v54 = vld [vmem:[#allocation32_spill] sm:$0xff]  ;;  %v4494_v34 = vld [vmem:[%s10213_s0 + $0x900] sm:$0xff] }
 0x163   :  { %7134 = vmatpush3.bf16.msra.mxu1 %v10317_v41  ;;  %7136 = vmatprep.subr.bf16.mxu0 %v10318_v50  ;;  %v9175_v44 = vpop.f32.mrb[44].mxu1  ;;  %v4496_v1 = vld [vmem:[%s10213_s0 + $0x910] sm:$0xff] }
 0x164   :  { %v5020_v39 = vpop.f32.mrb[54].mxu0  ;;  %v991_v23 = vadd.f32 %v5019_v7, %v9048_v13  ;;  %v1105_v41 = vpop.f32.mrb[45].mxu1  ;;  %7168 = vmatprep.subr.bf16.mxu1 %v7763_v59  ;;  %v4493_v13 = vld [vmem:[%s10213_s0 + $0x8f8] sm:$0xff]  ;;  %v4495_v7 = vld [vmem:[%s10213_s0 + $0x908] sm:$0xff] }
 0x165   :  { %v5021_v50 = vpop.f32.mrb[55].mxu0  ;;  %2805 = vmatmul.mubr.f32.vlgmr.msra.gmra.mrb[160].mxu0 %v4486_v37 }
 0x166   :  { %v5022_v48 = vadd.f32 %v5021_v50, %v5020_v39  ;;  %v9187_v18 = vadd.f32 %v1095_v31, %v991_v23  ;;  %2910 = vmatmul.mubr.f32.vlgmr.msra.gmra.mrb[120].mxu1 %v4488_v49  ;;  %7138 = vmatpush3.bf16.msra.mxu0 %v7775_v2  ;;  %v10321_v49 = vld [vmem:[#allocation25_spill] sm:$0xff]  ;;  %v4503_v23 = vld [vmem:[%s10213_s0 + $0x948] sm:$0xff]  ;;  %v4500_v50 = vld [vmem:[%s10213_s0 + $0x930] sm:$0xff] }
 0x167   :  { %2809 = vmatprep.mubr.f32.mxu0 %v4494_v34  ;;  %2914 = vmatprep.mubr.f32.mxu1 %v4496_v1  ;;  %v9196_v4 = vpop.f32.mrb[46].mxu1  ;;  %v4501_v39 = vld [vmem:[%s10213_s0 + $0x938] sm:$0xff] }
 0x168   :  { %10320 = vst [vmem:[#allocation32_spill] sm:$0xff] %v9187_v18  ;;  %v996_v37 = vadd.f32 %v5022_v48, %v9064_v60  ;;  %v5023_v31 = vpop.f32.mrb[56].mxu0  ;;  %7140 = vmatprep.subr.bf16.mxu0 %v10321_v49  ;;  %7170 = vmatpush3.bf16.msra.mxu1 %v7763_v59  ;;  %v1115_v34 = vpop.f32.mrb[47].mxu1  ;;  %v4502_v49 = vld [vmem:[%s10213_s0 + $0x940] sm:$0xff] }
 0x169   :  { %v5024_v1 = vpop.f32.mrb[57].mxu0  ;;  %2810 = vmatmul.mubr.f32.gmra.mrb[162].mxu0 %v4493_v13  ;;  %7172 = vmatprep.subr.bf16.mxu1 %v7809_v24  ;;  %v10326_v13 = vld [vmem:[#allocation30_spill] sm:$0xff] }
 0x16a   :  { %v9210_v48 = vadd.f32 %v6248_v57, %v996_v37  ;;  %v5025_v60 = vadd.f32 %v5024_v1, %v5023_v31  ;;  %2915 = vmatmul.mubr.f32.gmra.mrb[122].mxu1 %v4495_v7  ;;  %7142 = vmatpush3.bf16.msra.mxu0 %v7815_v29  ;;  %v4508_v7 = vld [vmem:[%s10213_s0 + $0x970] sm:$0xff]  ;;  %v4510_v37 = vld [vmem:[%s10213_s0 + $0x980] sm:$0xff]  ;;  %v4509_v1 = vld [vmem:[%s10213_s0 + $0x978] sm:$0xff] }
 0x16b   :  { %2814 = vmatprep.mubr.f32.mxu0 %v4501_v39  ;;  %2919 = vmatprep.mubr.f32.mxu1 %v4503_v23 }
 0x16c   :  { %v5026_v18 = vpop.f32.mrb[58].mxu0  ;;  %v1001_v57 = vadd.f32 %v5025_v60, %v9084_v15  ;;  %7144 = vmatprep.subr.bf16.mxu0 %v7839_v46  ;;  %7174 = vmatpush3.bf16.msra.mxu1 %v7809_v24  ;;  %v4507_v15 = vld [vmem:[%s10213_s0 + $0x968] sm:$0xff]  ;;  %v4517_v60 = vld [vmem:[%s10213_s0 + $0x9b8] sm:$0xff] }
 0x16d   :  { %v5027_v31 = vpop.f32.mrb[59].mxu0  ;;  %2815 = vmatmul.mubr.f32.gmra.mrb[164].mxu0 %v4500_v50  ;;  %7176 = vmatprep.subr.bf16.mxu1 %v7849_v55 }
 0x16e   :  { %v5028_v39 = vadd.f32 %v5027_v31, %v5026_v18  ;;  %v9231_v23 = vadd.f32 %v1105_v41, %v1001_v57  ;;  %2920 = vmatmul.mubr.f32.gmra.mrb[124].mxu1 %v4502_v49  ;;  %7146 = vmatpush3.bf16.msra.mxu0 %v7855_v58  ;;  %v4515_v49 = vld [vmem:[%s10213_s0 + $0x9a8] sm:$0xff]  ;;  %v4516_v31 = vld [vmem:[%s10213_s0 + $0x9b0] sm:$0xff] }
 0x16f   :  { %2819 = vmatprep.mubr.f32.mxu0 %v4508_v7  ;;  %2924 = vmatprep.mubr.f32.mxu1 %v4510_v37  ;;  %v4514_v37 = vld [vmem:[%s10213_s0 + $0x9a0] sm:$0xff] }
 0x170   :  { %v1006_v50 = vadd.f32 %v5028_v39, %v9104_v52  ;;  %v5029_v41 = vpop.f32.mrb[60].mxu0  ;;  %7148 = vmatprep.subr.bf16.mxu0 %v7879_v11  ;;  %7178 = vmatpush3.bf16.msra.mxu1 %v7849_v55  ;;  %v4528_v39 = vld [vmem:[%s10213_s0 + $0xa10] sm:$0xff] }
 0x171   :  { %v5030_v57 = vpop.f32.mrb[61].mxu0  ;;  %2820 = vmatmul.mubr.f32.gmra.mrb[166].mxu0 %v4507_v15  ;;  %7180 = vmatprep.subr.bf16.mxu1 %v7889_v22 }
 0x172   :  { %v9253_v52 = vadd.f32 %v9175_v44, %v1006_v50  ;;  %v5031_v7 = vadd.f32 %v5030_v57, %v5029_v41  ;;  %2925 = vmatmul.mubr.f32.gmra.mrb[126].mxu1 %v4509_v1  ;;  %7150 = vmatpush3.bf16.msra.mxu0 %v7895_v28  ;;  %v4522_v1 = vld [vmem:[%s10213_s0 + $0x9e0] sm:$0xff]  ;;  %v4524_v50 = vld [vmem:[%s10213_s0 + $0x9f0] sm:$0xff]  ;;  %v4523_v57 = vld [vmem:[%s10213_s0 + $0x9e8] sm:$0xff] }
 0x173   :  { %2824 = vmatprep.mubr.f32.mxu0 %v4515_v49  ;;  %2929 = vmatprep.mubr.f32.mxu1 %v4517_v60 }
 0x174   :  { %v5032_v15 = vpop.f32.mrb[62].mxu0  ;;  %v1011_v44 = vadd.f32 %v5031_v7, %v9124_v21  ;;  %7152 = vmatprep.subr.bf16.mxu0 %v7919_v47  ;;  %7182 = vmatpush3.bf16.msra.mxu1 %v7889_v22  ;;  %v4521_v21 = vld [vmem:[%s10213_s0 + $0x9d8] sm:$0xff] }
 0x175   :  { %v5033_v41 = vpop.f32.mrb[63].mxu0  ;;  %2825 = vmatmul.mubr.f32.gmra.mrb[168].mxu0 %v4514_v37  ;;  %7184 = vmatprep.subr.bf16.mxu1 %v10305_v45  ;;  %v10322_v37 = vld [vmem:[#allocation26_spill] sm:$0xff] }
 0x176   :  { %v5034_v49 = vadd.f32 %v5033_v41, %v5032_v15  ;;  %v9274_v60 = vadd.f32 %v1115_v34, %v1011_v44  ;;  %2930 = vmatmul.mubr.f32.gmra.mrb[128].mxu1 %v4516_v31  ;;  %7154 = vmatpush3.bf16.msra.mxu0 %v10307_v3  ;;  %v10323_v44 = vld [vmem:[#allocation28_spill] sm:$0xff]  ;;  %v4529_v31 = vld [vmem:[%s10213_s0 + $0xa18] sm:$0xff] }
 0x177   :  { %2829 = vmatprep.mubr.f32.mxu0 %v4522_v1  ;;  %2934 = vmatprep.mubr.f32.mxu1 %v4524_v50  ;;  %v4531_v1 = vld [vmem:[%s10213_s0 + $0xa28] sm:$0xff] }
 0x178   :  { %v1016_v7 = vadd.f32 %v5034_v49, %v9136_v43  ;;  %v5087_v34 = vpop.f32.mrb[64].mxu0  ;;  %7156 = vmatprep.subr.bf16.mxu0 %v10323_v44  ;;  %7186 = vmatpush3.bf16.msra.mxu1 %v10305_v45 }
 0x179   :  { %v5143_v50 = vpop.f32.mrb[48].mxu1  ;;  %v5088_v41 = vpop.f32.mrb[65].mxu0  ;;  %2830 = vmatmul.mubr.f32.gmra.mrb[170].mxu0 %v4521_v21  ;;  %7188 = vmatprep.subr.bf16.mxu1 %v7969_v40  ;;  %v4530_v21 = vld [vmem:[%s10213_s0 + $0xa20] sm:$0xff] }
 0x17a   :  { %v9296_v43 = vadd.f32 %v9196_v4, %v1016_v7  ;;  %v5089_v49 = vadd.f32 %v5088_v41, %v5087_v34  ;;  %v5144_v15 = vpop.f32.mrb[49].mxu1  ;;  %2935 = vmatmul.mubr.f32.gmra.mrb[130].mxu1 %v4523_v57  ;;  %7158 = vmatpush3.bf16.msra.mxu0 %v7975_v42  ;;  %v4536_v57 = vld [vmem:[%s10213_s0 + $0xa50] sm:$0xff] }
 0x17b   :  { %v5145_v18 = vadd.f32 %v5144_v15, %v5143_v50  ;;  %2834 = vmatprep.mubr.f32.mxu0 %v4529_v31  ;;  %2939 = vmatprep.mubr.f32.mxu1 %v4531_v1  ;;  %v4538_v15 = vld [vmem:[%s10213_s0 + $0xa60] sm:$0xff]  ;;  %v10325_v50 = vld [vmem:[#allocation3_spill] sm:$0xff] }
 0x17c   :  { %10324 = vst [vmem:[#allocation26_spill] sm:$0xff] %v9296_v43  ;;  %v5090_v7 = vpop.f32.mrb[66].mxu0  ;;  %7160 = vmatprep.subr.bf16.mxu0 %v10309_v32  ;;  %7190 = vmatpush3.bf16.msra.mxu1 %v7969_v40  ;;  %v4535_v32 = vld [vmem:[%s10213_s0 + $0xa48] sm:$0xff] }
 0x17d   :  { %v9315_v34 = vadd.f32 %v5145_v18, %v5089_v49  ;;  %v5146_v31 = vpop.f32.mrb[50].mxu1  ;;  %v5091_v1 = vpop.f32.mrb[67].mxu0  ;;  %2835 = vmatmul.mubr.f32.gmra.mrb[172].mxu0 %v4528_v39  ;;  %7224 = vmatprep.subr.bf16.mxu1 %v10325_v50  ;;  %v4537_v18 = vld [vmem:[%s10213_s0 + $0xa58] sm:$0xff]  ;;  %v10327_v39 = vld [vmem:[#allocation31_spill] sm:$0xff]  ;;  %v10328_v50 = vld [vmem:[#allocation2_spill] sm:$0xff] }
 0x17e   :  { %v5092_v41 = vadd.f32 %v5091_v1, %v5090_v7  ;;  %v5147_v4 = vpop.f32.mrb[51].mxu1  ;;  %2940 = vmatmul.mubr.f32.gmra.mrb[132].mxu1 %v4530_v21  ;;  %7162 = vmatpush3.bf16.msra.mxu0 %v10326_v13  ;;  %v4491_v21 = vld [vmem:[%s10213_s0 + $0x8e8] sm:$0xff]  ;;  %v4492_v7 = vld [vmem:[%s10213_s0 + $0x8f0] sm:$0xff] }
 0x17f   :  { %v5148_v43 = vadd.f32 %v5147_v4, %v5146_v31  ;;  %2839 = vmatprep.mubr.f32.mxu0 %v4536_v57  ;;  %2944 = vmatprep.mubr.f32.mxu1 %v4538_v15 }
 0x180   :  { %v5093_v49 = vpop.f32.mrb[68].mxu0  ;;  %7164 = vmatprep.subr.bf16.mxu0 %v10327_v39  ;;  %v4490_v39 = vld [vmem:[%s10213_s0 + $0x8e0] sm:$0xff] }
 0x181   :  { %v9332_v1 = vadd.f32 %v5148_v43, %v5092_v41  ;;  %v5149_v4 = vpop.f32.mrb[52].mxu1  ;;  %v5094_v57 = vpop.f32.mrb[69].mxu0  ;;  %2840 = vmatmul.mubr.f32.gmra.mrb[174].mxu0 %v4535_v32  ;;  %v4499_v43 = vld [vmem:[%s10213_s0 + $0x928] sm:$0xff]  ;;  %v4498_v32 = vld [vmem:[%s10213_s0 + $0x920] sm:$0xff] }
 0x182   :  { %v5095_v15 = vadd.f32 %v5094_v57, %v5093_v49  ;;  %v5150_v31 = vpop.f32.mrb[53].mxu1  ;;  %2945 = vmatmul.mubr.f32.gmra.mrb[134].mxu1 %v4537_v18  ;;  %7166 = vmatpush3.bf16.msra.mxu0 %v8033_v61 }
 0x183   :  { %v5151_v13 = vadd.f32 %v5150_v31, %v5149_v4  ;;  %3014 = vmatprep.mubr.f32.mxu0 %v4491_v21  ;;  %6387 = vmatprep.mubr.msk.f32.mxu1 %vm178_vm0, %v4492_v7  ;;  %v4497_v7 = vld [vmem:[%s10213_s0 + $0x918] sm:$0xff]  ;;  %v4506_v31 = vld [vmem:[%s10213_s0 + $0x960] sm:$0xff] }
 0x184   :  { %v5096_v41 = vpop.f32.mrb[70].mxu0  ;;  %7192 = vmatprep.subr.bf16.mxu0 %v10328_v50 }
 0x185   :  { %v9346_v18 = vadd.f32 %v5151_v13, %v5095_v15  ;;  %v5152_v49 = vpop.f32.mrb[54].mxu1  ;;  %v5097_v57 = vpop.f32.mrb[71].mxu0  ;;  %3015 = vmatmul.mubr.f32.vlgmr.msra.gmra.mrb[176].mxu0 %v4490_v39  ;;  %v4505_v13 = vld [vmem:[%s10213_s0 + $0x958] sm:$0xff] }
 0x186   :  { %v5098_v4 = vadd.f32 %v5097_v57, %v5096_v41  ;;  %v5153_v21 = vpop.f32.mrb[55].mxu1  ;;  %6388 = vmatmul.mubr.msk.f32.vlgmr.msra.gmra.mrb[136].mxu1 %vm178_vm0, %v4499_v43  ;;  %7194 = vmatpush3.bf16.msra.mxu0 %v7473_v8 }
 0x187   :  { %v5154_v50 = vadd.f32 %v5153_v21, %v5152_v49  ;;  %7226 = vmatpush3.bf16.msra.mxu1 %v7485_v12  ;;  %3019 = vmatprep.mubr.f32.mxu0 %v4498_v32  ;;  %v4513_v32 = vld [vmem:[%s10213_s0 + $0x998] sm:$0xff] }
 0x188   :  { %v5099_v39 = vpop.f32.mrb[72].mxu0  ;;  %7196 = vmatprep.subr.bf16.mxu0 %v7498_v16  ;;  %7228 = vmatprep.subr.bf16.mxu1 %v7500_v17  ;;  %v10329_v21 = vld [vmem:[#allocation5_spill] sm:$0xff]  ;;  %v4504_v17 = vld [vmem:[%s10213_s0 + $0x950] sm:$0xff] }
 0x189   :  { %v9362_v15 = vadd.f32 %v5154_v50, %v5098_v4  ;;  %v5155_v43 = vpop.f32.mrb[56].mxu1  ;;  %v5100_v41 = vpop.f32.mrb[73].mxu0  ;;  %3020 = vmatmul.mubr.f32.gmra.mrb[178].mxu0 %v4497_v7  ;;  %6390 = vmatprep.mubr.msk.f32.mxu1 %vm178_vm0, %v4506_v31  ;;  %v4520_v50 = vld [vmem:[%s10213_s0 + $0x9d0] sm:$0xff]  ;;  %v10330_v7 = vld [vmem:[#allocation7_spill] sm:$0xff] }
 0x18a   :  { %v5101_v49 = vadd.f32 %v5100_v41, %v5099_v39  ;;  %v5156_v57 = vpop.f32.mrb[57].mxu1  ;;  %7198 = vmatpush3.bf16.msra.mxu0 %v10329_v21  ;;  %3024 = vmatprep.mubr.f32.mxu0 %v4505_v13  ;;  %v4512_v31 = vld [vmem:[%s10213_s0 + $0x990] sm:$0xff] }
 0x18b   :  { %v5157_v4 = vadd.f32 %v5156_v57, %v5155_v43  ;;  %7230 = vmatpush3.bf16.msra.mxu1 %v7525_v25  ;;  %7200 = vmatprep.subr.bf16.mxu0 %v10330_v7  ;;  %v4527_v43 = vld [vmem:[%s10213_s0 + $0xa08] sm:$0xff]  ;;  %v10331_v25 = vld [vmem:[#allocation9_spill] sm:$0xff] }
 0x18c   :  { %v5102_v39 = vpop.f32.mrb[74].mxu0  ;;  %7232 = vmatprep.subr.bf16.mxu1 %v7538_v30  ;;  %6391 = vmatmul.mubr.msk.f32.gmra.mrb[138].mxu1 %vm178_vm0, %v4513_v32  ;;  %v4511_v32 = vld [vmem:[%s10213_s0 + $0x988] sm:$0xff] }
 0x18d   :  { %v9382_v13 = vadd.f32 %v5157_v4, %v5101_v49  ;;  %v5158_v41 = vpop.f32.mrb[58].mxu1  ;;  %v5103_v21 = vpop.f32.mrb[75].mxu0  ;;  %3025 = vmatmul.mubr.f32.gmra.mrb[180].mxu0 %v4504_v17  ;;  %6393 = vmatprep.mubr.msk.f32.mxu1 %vm178_vm0, %v4520_v50  ;;  %v4534_v49 = vld [vmem:[%s10213_s0 + $0xa40] sm:$0xff]  ;;  %v10332_v50 = vld [vmem:[#allocation11_spill] sm:$0xff] }
 0x18e   :  { %v5104_v57 = vadd.f32 %v5103_v21, %v5102_v39  ;;  %v5159_v7 = vpop.f32.mrb[59].mxu1  ;;  %7202 = vmatpush3.bf16.msra.mxu0 %v10331_v25  ;;  %3029 = vmatprep.mubr.f32.mxu0 %v4512_v31  ;;  %v4519_v21 = vld [vmem:[%s10213_s0 + $0x9c8] sm:$0xff]  ;;  %v10333_v39 = vld [vmem:[#allocation12_spill] sm:$0xff] }
 0x18f   :  { %v5160_v17 = vadd.f32 %v5159_v7, %v5158_v41  ;;  %7234 = vmatpush3.bf16.msra.mxu1 %v7563_v38  ;;  %7204 = vmatprep.subr.bf16.mxu0 %v10332_v50  ;;  %v4541_v7 = vld [vmem:[%s10213_s0 + $0xa78] sm:$0xff] }
 0x190   :  { %v5105_v4 = vpop.f32.mrb[76].mxu0  ;;  %7236 = vmatprep.subr.bf16.mxu1 %v10333_v39  ;;  %6394 = vmatmul.mubr.msk.f32.gmra.mrb[140].mxu1 %vm178_vm0, %v4527_v43  ;;  %v10334_v38 = vld [vmem:[#allocation13_spill] sm:$0xff]  ;;  %v4518_v43 = vld [vmem:[%s10213_s0 + $0x9c0] sm:$0xff] }
 0x191   :  { %v9402_v31 = vadd.f32 %v5160_v17, %v5104_v57  ;;  %v5161_v25 = vpop.f32.mrb[60].mxu1  ;;  %v5106_v30 = vpop.f32.mrb[77].mxu0  ;;  %3030 = vmatmul.mubr.f32.gmra.mrb[182].mxu0 %v4511_v32  ;;  %6396 = vmatprep.mubr.msk.f32.mxu1 %vm178_vm0, %v4534_v49  ;;  %v4553_v57 = vld [vmem:[%s10213_s0 + $0xa98] sm:$0xff]  ;;  %v10335_v17 = vld [vmem:[#allocation14_spill] sm:$0xff]  ;;  %v10336_v49 = vld [vmem:[#allocation15_spill] sm:$0xff] }
 0x192   :  { %v5107_v41 = vadd.f32 %v5106_v30, %v5105_v4  ;;  %v5162_v50 = vpop.f32.mrb[61].mxu1  ;;  %7206 = vmatpush3.bf16.msra.mxu0 %v10334_v38  ;;  %3034 = vmatprep.mubr.f32.mxu0 %v4519_v21  ;;  %v4526_v30 = vld [vmem:[%s10213_s0 + $0xa00] sm:$0xff] }
 0x193   :  { %v5163_v32 = vadd.f32 %v5162_v50, %v5161_v25  ;;  %7238 = vmatpush3.bf16.msra.mxu1 %v10335_v17  ;;  %7208 = vmatprep.subr.bf16.mxu0 %v10336_v49  ;;  %v4525_v49 = vld [vmem:[%s10213_s0 + $0x9f8] sm:$0xff] }
 0x194   :  { %v5108_v4 = vpop.f32.mrb[78].mxu0  ;;  %7240 = vmatprep.subr.bf16.mxu1 %v7616_v56  ;;  %6397 = vmatmul.mubr.msk.f32.gmra.mrb[142].mxu1 %vm178_vm0, %v4541_v7  ;;  %v4533_v7 = vld [vmem:[%s10213_s0 + $0xa38] sm:$0xff] }
 0x195   :  { %v9422_v21 = vadd.f32 %v5163_v32, %v5107_v41  ;;  %v5164_v38 = vpop.f32.mrb[62].mxu1  ;;  %v5109_v39 = vpop.f32.mrb[79].mxu0  ;;  %3035 = vmatmul.mubr.f32.gmra.mrb[184].mxu0 %v4518_v43  ;;  %3418 = vmatprep.mubr.f32.mxu1 %v4553_v57 }
 0x196   :  { %v5110_v25 = vadd.f32 %v5109_v39, %v5108_v4  ;;  %v5165_v50 = vpop.f32.mrb[63].mxu1  ;;  %7210 = vmatpush3.bf16.msra.mxu0 %v7634_v62  ;;  %3039 = vmatprep.mubr.f32.mxu0 %v4526_v30  ;;  %v4532_v30 = vld [vmem:[%s10213_s0 + $0xa30] sm:$0xff] }
 0x197   :  { %v5166_v17 = vadd.f32 %v5165_v50, %v5164_v38  ;;  %7242 = vmatpush3.bf16.msra.mxu1 %v7638_v63  ;;  %7212 = vmatprep.subr.bf16.mxu0 %v7640_v0 }
 0x198   :  { %v5199_v41 = vpop.f32.mrb[80].mxu0  ;;  %7244 = vmatprep.subr.bf16.mxu1 %v7652_v5 }
 0x199   :  { %v9434_v39 = vadd.f32 %v5166_v17, %v5110_v25  ;;  %v5200_v43 = vpop.f32.mrb[81].mxu0  ;;  %3040 = vmatmul.mubr.f32.gmra.mrb[186].mxu0 %v4525_v49  ;;  %v6281_v57 = vpop.f32.mrb[64].mxu1  ;;  %v4540_v17 = vld [vmem:[%s10213_s0 + $0xa70] sm:$0xff] }
 0x19a   :  { %v5201_v32 = vadd.f32 %v5200_v43, %v5199_v41  ;;  %7214 = vmatpush3.bf16.msra.mxu0 %v7670_v14  ;;  %3044 = vmatprep.mubr.f32.mxu0 %v4533_v7  ;;  %v1594_v38 = vpop.f32.mrb[65].mxu1  ;;  %v4539_v41 = vld [vmem:[%s10213_s0 + $0xa68] sm:$0xff]  ;;  %v10337_v43 = vld [vmem:[#allocation20_spill] sm:$0xff] }
 0x19b   :  { %7246 = vmatpush3.bf16.msra.mxu1 %v7680_v19  ;;  %7216 = vmatprep.subr.bf16.mxu0 %v7682_v20 }
 0x19c   :  { %v5202_v4 = vpop.f32.mrb[82].mxu0  ;;  %v1490_v49 = vadd.f32 %v5201_v32, %v9315_v34  ;;  %7248 = vmatprep.subr.bf16.mxu1 %v7694_v27  ;;  %v4551_v34 = vld [vmem:[%s10213_s0 + $0xa88] sm:$0xff]  ;;  %v10341_v27 = vld [vmem:[#allocation22_spill] sm:$0xff] }
 0x19d   :  { %v5203_v25 = vpop.f32.mrb[83].mxu0  ;;  %3045 = vmatmul.mubr.f32.gmra.mrb[188].mxu0 %v4532_v30 }
 0x19e   :  { %v5204_v50 = vadd.f32 %v5203_v25, %v5202_v4  ;;  %v1595_v7 = vadd.f32 %v1594_v38, %v1490_v49  ;;  %7218 = vmatpush3.bf16.msra.mxu0 %v7712_v35  ;;  %3049 = vmatprep.mubr.f32.mxu0 %v4540_v17  ;;  %v10338_v38 = vld [vmem:[#allocation27_spill] sm:$0xff]  ;;  %v10340_v49 = vld [vmem:[#allocation21_spill] sm:$0xff] }
 0x19f   :  { %7250 = vmatpush3.bf16.msra.mxu1 %v7716_v36  ;;  %7220 = vmatprep.subr.bf16.mxu0 %v10337_v43  ;;  %v6284_v20 = vpop.f32.mrb[66].mxu1  ;;  %v10339_v30 = vmax.f32 %v8870_v26, %v10338_v38  ;;  %v4552_v26 = vld [vmem:[%s10213_s0 + $0xa90] sm:$0xff] }
 0x1a0   :  { %v1495_v32 = vadd.f32 %v5204_v50, %v9332_v1  ;;  %v5205_v17 = vpop.f32.mrb[84].mxu0  ;;  %7252 = vmatprep.subr.bf16.mxu1 %v10340_v49  ;;  %v1604_v25 = vpop.f32.mrb[67].mxu1  ;;  %v4550_v1 = vld [vmem:[%s10213_s0 + $0xa80] sm:$0xff]  ;;  %v10342_v50 = vld [vmem:[#allocation23_spill] sm:$0xff] }
 0x1a1   :  { %v9460_v4 = vmax.f32 %v10339_v30, %v1595_v7  ;;  %v5206_v35 = vpop.f32.mrb[85].mxu0  ;;  %3050 = vmatmul.mubr.f32.gmra.mrb[190].mxu0 %v4539_v41  ;;  %v10343_v7 = vld [vmem:[#allocation24_spill] sm:$0xff] }
 0x1a2   :  { %v1600_v36 = vadd.f32 %v6281_v57, %v1495_v32  ;;  %v5207_v43 = vadd.f32 %v5206_v35, %v5205_v17  ;;  %7222 = vmatpush3.bf16.msra.mxu0 %v10341_v27  ;;  %3313 = vmatprep.mubr.f32.mxu0 %v4551_v34  ;;  %v10344_v35 = vmax.f32 %v10319_v54, %v9164_v9  ;;  %v4558_v32 = vld [vmem:[%s10213_s0 + $0xac0] sm:$0xff]  ;;  %v4560_v30 = vld [vmem:[%s10213_s0 + $0xad0] sm:$0xff]  ;;  %v4559_v54 = vld [vmem:[%s10213_s0 + $0xac8] sm:$0xff] }
 0x1a3   :  { %7254 = vmatpush3.bf16.msra.mxu1 %v10342_v50  ;;  %7256 = vmatprep.subr.bf16.mxu0 %v10343_v7  ;;  %v9472_v38 = vpop.f32.mrb[68].mxu1 }
 0x1a4   :  { %v9477_v57 = vmax.f32 %v10344_v35, %v1600_v36  ;;  %v5208_v41 = vpop.f32.mrb[86].mxu0  ;;  %v1500_v34 = vadd.f32 %v5207_v43, %v9346_v18  ;;  %v1614_v17 = vpop.f32.mrb[69].mxu1  ;;  %7288 = vmatprep.subr.bf16.mxu1 %v7763_v59  ;;  %v4557_v36 = vld [vmem:[%s10213_s0 + $0xab8] sm:$0xff] }
 0x1a5   :  { %v5209_v7 = vpop.f32.mrb[87].mxu0  ;;  %3314 = vmatmul.mubr.f32.vlgmr.msra.gmra.mrb[192].mxu0 %v4550_v1  ;;  %v10345_v1 = vld [vmem:[#allocation32_spill] sm:$0xff]  ;;  %v10347_v35 = vld [vmem:[#allocation25_spill] sm:$0xff] }
 0x1a6   :  { %v5210_v50 = vadd.f32 %v5209_v7, %v5208_v41  ;;  %v1605_v9 = vadd.f32 %v1604_v25, %v1500_v34  ;;  %3419 = vmatmul.mubr.f32.vlgmr.msra.gmra.mrb[144].mxu1 %v4552_v26  ;;  %7258 = vmatpush3.bf16.msra.mxu0 %v7775_v2  ;;  %v10346_v25 = vmax.f32 %v8902_v53, %v10345_v1  ;;  %v4565_v41 = vld [vmem:[%s10213_s0 + $0xaf8] sm:$0xff]  ;;  %v4567_v34 = vld [vmem:[%s10213_s0 + $0xb08] sm:$0xff] }
 0x1a7   :  { %3318 = vmatprep.mubr.f32.mxu0 %v4558_v32  ;;  %3423 = vmatprep.mubr.f32.mxu1 %v4560_v30  ;;  %v9494_v18 = vpop.f32.mrb[70].mxu1  ;;  %v4564_v30 = vld [vmem:[%s10213_s0 + $0xaf0] sm:$0xff] }
 0x1a8   :  { %v1505_v43 = vadd.f32 %v5210_v50, %v9362_v15  ;;  %v9500_v26 = vmax.f32 %v10346_v25, %v1605_v9  ;;  %v5211_v7 = vpop.f32.mrb[88].mxu0  ;;  %7260 = vmatprep.subr.bf16.mxu0 %v10347_v35  ;;  %7290 = vmatpush3.bf16.msra.mxu1 %v7763_v59  ;;  %v1624_v32 = vpop.f32.mrb[71].mxu1  ;;  %v4566_v9 = vld [vmem:[%s10213_s0 + $0xb00] sm:$0xff] }
 0x1a9   :  { %v5212_v15 = vpop.f32.mrb[89].mxu0  ;;  %3319 = vmatmul.mubr.f32.gmra.mrb[194].mxu0 %v4557_v36  ;;  %7292 = vmatprep.subr.bf16.mxu1 %v7809_v24  ;;  %v10348_v36 = vmax.f32 %v8923_v33, %v9210_v48  ;;  %v4574_v25 = vld [vmem:[%s10213_s0 + $0xb40] sm:$0xff] }
 0x1aa   :  { %v1610_v53 = vadd.f32 %v6284_v20, %v1505_v43  ;;  %v5213_v50 = vadd.f32 %v5212_v15, %v5211_v7  ;;  %3424 = vmatmul.mubr.f32.gmra.mrb[146].mxu1 %v4559_v54  ;;  %7262 = vmatpush3.bf16.msra.mxu0 %v7815_v29  ;;  %v4572_v43 = vld [vmem:[%s10213_s0 + $0xb30] sm:$0xff]  ;;  %v10349_v15 = vmax.f32 %v8942_v10, %v9231_v23 }
 0x1ab   :  { %3323 = vmatprep.mubr.f32.mxu0 %v4565_v41  ;;  %3428 = vmatprep.mubr.f32.mxu1 %v4567_v34  ;;  %v4573_v41 = vld [vmem:[%s10213_s0 + $0xb38] sm:$0xff] }
 0x1ac   :  { %v9521_v1 = vmax.f32 %v10348_v36, %v1610_v53  ;;  %v5214_v20 = vpop.f32.mrb[90].mxu0  ;;  %v1510_v54 = vadd.f32 %v5213_v50, %v9382_v13  ;;  %7264 = vmatprep.subr.bf16.mxu0 %v7839_v46  ;;  %7294 = vmatpush3.bf16.msra.mxu1 %v7809_v24  ;;  %v4571_v13 = vld [vmem:[%s10213_s0 + $0xb28] sm:$0xff]  ;;  %v4580_v36 = vld [vmem:[%s10213_s0 + $0xb70] sm:$0xff] }
 0x1ad   :  { %v5215_v7 = vpop.f32.mrb[91].mxu0  ;;  %3324 = vmatmul.mubr.f32.gmra.mrb[196].mxu0 %v4564_v30  ;;  %7296 = vmatprep.subr.bf16.mxu1 %v7849_v55  ;;  %v4579_v50 = vld [vmem:[%s10213_s0 + $0xb68] sm:$0xff]  ;;  %v4581_v30 = vld [vmem:[%s10213_s0 + $0xb78] sm:$0xff] }
 0x1ae   :  { %v5216_v33 = vadd.f32 %v5215_v7, %v5214_v20  ;;  %v1615_v48 = vadd.f32 %v1614_v17, %v1510_v54  ;;  %3429 = vmatmul.mubr.f32.gmra.mrb[148].mxu1 %v4566_v9  ;;  %7266 = vmatpush3.bf16.msra.mxu0 %v7855_v58  ;;  %v10350_v20 = vmax.f32 %v8961_v51, %v9253_v52  ;;  %v4588_v7 = vld [vmem:[%s10213_s0 + $0xbb0] sm:$0xff] }
 0x1af   :  { %3328 = vmatprep.mubr.f32.mxu0 %v4572_v43  ;;  %3433 = vmatprep.mubr.f32.mxu1 %v4574_v25  ;;  %v4586_v25 = vld [vmem:[%s10213_s0 + $0xba0] sm:$0xff] }
 0x1b0   :  { %v1515_v34 = vadd.f32 %v5216_v33, %v9402_v31  ;;  %v9544_v53 = vmax.f32 %v10349_v15, %v1615_v48  ;;  %v5217_v17 = vpop.f32.mrb[92].mxu0  ;;  %7268 = vmatprep.subr.bf16.mxu0 %v7879_v11  ;;  %7298 = vmatpush3.bf16.msra.mxu1 %v7849_v55  ;;  %v4578_v31 = vld [vmem:[%s10213_s0 + $0xb60] sm:$0xff]  ;;  %v4587_v48 = vld [vmem:[%s10213_s0 + $0xba8] sm:$0xff]  ;;  %v4593_v15 = vld [vmem:[%s10213_s0 + $0xbd8] sm:$0xff] }
 0x1b1   :  { %v5218_v9 = vpop.f32.mrb[93].mxu0  ;;  %3329 = vmatmul.mubr.f32.gmra.mrb[198].mxu0 %v4571_v13  ;;  %7300 = vmatprep.subr.bf16.mxu1 %v7889_v22 }
 0x1b2   :  { %v1620_v10 = vadd.f32 %v9472_v38, %v1515_v34  ;;  %v5219_v23 = vadd.f32 %v5218_v9, %v5217_v17  ;;  %3434 = vmatmul.mubr.f32.gmra.mrb[150].mxu1 %v4573_v41  ;;  %7270 = vmatpush3.bf16.msra.mxu0 %v7895_v28  ;;  %v10351_v41 = vmax.f32 %v10322_v37, %v9274_v60  ;;  %v4595_v17 = vld [vmem:[%s10213_s0 + $0xbe8] sm:$0xff]  ;;  %v4592_v9 = vld [vmem:[%s10213_s0 + $0xbd0] sm:$0xff] }
 0x1b3   :  { %3333 = vmatprep.mubr.f32.mxu0 %v4579_v50  ;;  %3438 = vmatprep.mubr.f32.mxu1 %v4581_v30 }
 0x1b4   :  { %v9566_v54 = vmax.f32 %v10350_v20, %v1620_v10  ;;  %v5220_v38 = vpop.f32.mrb[94].mxu0  ;;  %v1520_v43 = vadd.f32 %v5219_v23, %v9422_v21  ;;  %7272 = vmatprep.subr.bf16.mxu0 %v7919_v47  ;;  %7302 = vmatpush3.bf16.msra.mxu1 %v7889_v22  ;;  %v4585_v21 = vld [vmem:[%s10213_s0 + $0xb98] sm:$0xff]  ;;  %v4594_v23 = vld [vmem:[%s10213_s0 + $0xbe0] sm:$0xff] }
 0x1b5   :  { %v5221_v33 = vpop.f32.mrb[95].mxu0  ;;  %3334 = vmatmul.mubr.f32.gmra.mrb[200].mxu0 %v4578_v31  ;;  %7304 = vmatprep.subr.bf16.mxu1 %v10305_v45  ;;  %v10352_v31 = vld [vmem:[#allocation26_spill] sm:$0xff] }
 0x1b6   :  { %v5222_v51 = vadd.f32 %v5221_v33, %v5220_v38  ;;  %v1625_v52 = vadd.f32 %v1624_v32, %v1520_v43  ;;  %3439 = vmatmul.mubr.f32.gmra.mrb[152].mxu1 %v4580_v36  ;;  %7274 = vmatpush3.bf16.msra.mxu0 %v10307_v3  ;;  %v10353_v36 = vmax.f32 %v9000_v6, %v10352_v31  ;;  %v10354_v38 = vld [vmem:[#allocation29_spill] sm:$0xff]  ;;  %v4600_v43 = vld [vmem:[%s10213_s0 + $0xc10] sm:$0xff]  ;;  %v10355_v6 = vld [vmem:[#allocation3_spill] sm:$0xff] }
 0x1b7   :  { %3338 = vmatprep.mubr.f32.mxu0 %v4586_v25  ;;  %3443 = vmatprep.mubr.f32.mxu1 %v4588_v7  ;;  %v4602_v25 = vld [vmem:[%s10213_s0 + $0xc20] sm:$0xff] }
 0x1b8   :  { %v1525_v13 = vadd.f32 %v5222_v51, %v9434_v39  ;;  %v9589_v34 = vmax.f32 %v10351_v41, %v1625_v52  ;;  %v5275_v32 = vpop.f32.mrb[96].mxu0  ;;  %7276 = vmatprep.subr.bf16.mxu0 %v10323_v44  ;;  %7306 = vmatpush3.bf16.msra.mxu1 %v10305_v45 }
 0x1b9   :  { %v5331_v50 = vpop.f32.mrb[72].mxu1  ;;  %v5276_v39 = vpop.f32.mrb[97].mxu0  ;;  %3339 = vmatmul.mubr.f32.gmra.mrb[202].mxu0 %v4585_v21  ;;  %7308 = vmatprep.subr.bf16.mxu1 %v7969_v40 }
 0x1ba   :  { %v1630_v60 = vadd.f32 %v9494_v18, %v1525_v13  ;;  %v5277_v37 = vadd.f32 %v5276_v39, %v5275_v32  ;;  %v5332_v30 = vpop.f32.mrb[73].mxu1  ;;  %3444 = vmatmul.mubr.f32.gmra.mrb[154].mxu1 %v4587_v48  ;;  %7278 = vmatpush3.bf16.msra.mxu0 %v7975_v42  ;;  %v10356_v48 = vld [vmem:[#allocation30_spill] sm:$0xff]  ;;  %v4599_v13 = vld [vmem:[%s10213_s0 + $0xc08] sm:$0xff]  ;;  %v4601_v32 = vld [vmem:[%s10213_s0 + $0xc18] sm:$0xff] }
 0x1bb   :  { %v5333_v10 = vadd.f32 %v5332_v30, %v5331_v50  ;;  %3343 = vmatprep.mubr.f32.mxu0 %v4593_v15  ;;  %3448 = vmatprep.mubr.f32.mxu1 %v4595_v17  ;;  %v10357_v17 = vld [vmem:[#allocation31_spill] sm:$0xff]  ;;  %v4556_v39 = vld [vmem:[%s10213_s0 + $0xab0] sm:$0xff] }
 0x1bc   :  { %v9611_v18 = vmax.f32 %v10353_v36, %v1630_v60  ;;  %v5278_v20 = vpop.f32.mrb[98].mxu0  ;;  %7280 = vmatprep.subr.bf16.mxu0 %v10354_v38  ;;  %7310 = vmatpush3.bf16.msra.mxu1 %v7969_v40  ;;  %v4555_v50 = vld [vmem:[%s10213_s0 + $0xaa8] sm:$0xff] }
 0x1bd   :  { %v9621_v7 = vadd.f32 %v5333_v10, %v5277_v37  ;;  %v5334_v33 = vpop.f32.mrb[74].mxu1  ;;  %v5279_v51 = vpop.f32.mrb[99].mxu0  ;;  %3344 = vmatmul.mubr.f32.gmra.mrb[204].mxu0 %v4592_v9  ;;  %7344 = vmatprep.subr.bf16.mxu1 %v10355_v6  ;;  %v4563_v36 = vld [vmem:[%s10213_s0 + $0xae8] sm:$0xff] }
 0x1be   :  { %v5280_v52 = vadd.f32 %v5279_v51, %v5278_v20  ;;  %v5335_v21 = vpop.f32.mrb[75].mxu1  ;;  %3449 = vmatmul.mubr.f32.gmra.mrb[156].mxu1 %v4594_v23  ;;  %7282 = vmatpush3.bf16.msra.mxu0 %v10356_v48  ;;  %v4554_v23 = vld [vmem:[%s10213_s0 + $0xaa0] sm:$0xff] }
 0x1bf   :  { %v5336_v41 = vadd.f32 %v5335_v21, %v5334_v33  ;;  %3348 = vmatprep.mubr.f32.mxu0 %v4600_v43  ;;  %3453 = vmatprep.mubr.f32.mxu1 %v4602_v25  ;;  %v10358_v43 = vld [vmem:[#allocation2_spill] sm:$0xff] }
 0x1c0   :  { %v5281_v15 = vpop.f32.mrb[100].mxu0  ;;  %7284 = vmatprep.subr.bf16.mxu0 %v10357_v17  ;;  %v4562_v25 = vld [vmem:[%s10213_s0 + $0xae0] sm:$0xff] }
 0x1c1   :  { %v9638_v60 = vadd.f32 %v5336_v41, %v5280_v52  ;;  %v5337_v37 = vpop.f32.mrb[76].mxu1  ;;  %v5282_v30 = vpop.f32.mrb[101].mxu0  ;;  %3349 = vmatmul.mubr.f32.gmra.mrb[206].mxu0 %v4599_v13  ;;  %v4561_v13 = vld [vmem:[%s10213_s0 + $0xad8] sm:$0xff]  ;;  %v4570_v41 = vld [vmem:[%s10213_s0 + $0xb20] sm:$0xff] }
 0x1c2   :  { %v5283_v9 = vadd.f32 %v5282_v30, %v5281_v15  ;;  %v5338_v10 = vpop.f32.mrb[77].mxu1  ;;  %3454 = vmatmul.mubr.f32.gmra.mrb[158].mxu1 %v4601_v32  ;;  %7286 = vmatpush3.bf16.msra.mxu0 %v8033_v61  ;;  %v4569_v15 = vld [vmem:[%s10213_s0 + $0xb18] sm:$0xff] }
 0x1c3   :  { %v5339_v31 = vadd.f32 %v5338_v10, %v5337_v37  ;;  %3523 = vmatprep.mubr.f32.mxu0 %v4555_v50  ;;  %6423 = vmatprep.mubr.msk.f32.mxu1 %vm178_vm0, %v4556_v39 }
 0x1c4   :  { %v5284_v20 = vpop.f32.mrb[102].mxu0  ;;  %7312 = vmatprep.subr.bf16.mxu0 %v10358_v43  ;;  %v10362_v43 = vld [vmem:[#allocation7_spill] sm:$0xff] }
 0x1c5   :  { %v9652_v33 = vadd.f32 %v5339_v31, %v5283_v9  ;;  %v5340_v51 = vpop.f32.mrb[78].mxu1  ;;  %v5285_v6 = vpop.f32.mrb[103].mxu0  ;;  %3524 = vmatmul.mubr.f32.vlgmr.msra.gmra.mrb[208].mxu0 %v4554_v23  ;;  %v10360_v23 = vld [vmem:[#allocation5_spill] sm:$0xff]  ;;  %v4584_v31 = vld [vmem:[%s10213_s0 + $0xb90] sm:$0xff] }
 0x1c6   :  { %v5286_v52 = vadd.f32 %v5285_v6, %v5284_v20  ;;  %v5341_v21 = vpop.f32.mrb[79].mxu1  ;;  %6424 = vmatmul.mubr.msk.f32.vlgmr.msra.gmra.mrb[160].mxu1 %vm178_vm0, %v4563_v36  ;;  %7314 = vmatpush3.bf16.msra.mxu0 %v7473_v8  ;;  %v10359_v8 = vld [vmem:[#allocation4_spill] sm:$0xff]  ;;  %v10361_v20 = vld [vmem:[#allocation6_spill] sm:$0xff] }
 0x1c7   :  { %v5342_v32 = vadd.f32 %v5341_v21, %v5340_v51  ;;  %7346 = vmatpush3.bf16.msra.mxu1 %v7485_v12  ;;  %3528 = vmatprep.mubr.f32.mxu0 %v4562_v25  ;;  %v4577_v12 = vld [vmem:[%s10213_s0 + $0xb58] sm:$0xff]  ;;  %v4576_v25 = vld [vmem:[%s10213_s0 + $0xb50] sm:$0xff] }
 0x1c8   :  { %v5287_v50 = vpop.f32.mrb[104].mxu0  ;;  %7316 = vmatprep.subr.bf16.mxu0 %v7498_v16  ;;  %7348 = vmatprep.subr.bf16.mxu1 %v10359_v8  ;;  %v4568_v16 = vld [vmem:[%s10213_s0 + $0xb10] sm:$0xff]  ;;  %v4575_v8 = vld [vmem:[%s10213_s0 + $0xb48] sm:$0xff] }
 0x1c9   :  { %v9668_v39 = vadd.f32 %v5342_v32, %v5286_v52  ;;  %v5343_v37 = vpop.f32.mrb[80].mxu1  ;;  %v5288_v30 = vpop.f32.mrb[105].mxu0  ;;  %3529 = vmatmul.mubr.f32.gmra.mrb[210].mxu0 %v4561_v13  ;;  %6426 = vmatprep.mubr.msk.f32.mxu1 %vm178_vm0, %v4570_v41  ;;  %v10363_v6 = vld [vmem:[#allocation8_spill] sm:$0xff]  ;;  %v4591_v41 = vld [vmem:[%s10213_s0 + $0xbc8] sm:$0xff] }
 0x1ca   :  { %v5289_v9 = vadd.f32 %v5288_v30, %v5287_v50  ;;  %v5344_v10 = vpop.f32.mrb[81].mxu1  ;;  %7318 = vmatpush3.bf16.msra.mxu0 %v10360_v23  ;;  %3533 = vmatprep.mubr.f32.mxu0 %v4569_v15  ;;  %v10364_v50 = vld [vmem:[#allocation9_spill] sm:$0xff] }
 0x1cb   :  { %v5345_v36 = vadd.f32 %v5344_v10, %v5343_v37  ;;  %7350 = vmatpush3.bf16.msra.mxu1 %v10361_v20  ;;  %7320 = vmatprep.subr.bf16.mxu0 %v10362_v43  ;;  %v4598_v37 = vld [vmem:[%s10213_s0 + $0xc00] sm:$0xff]  ;;  %v4583_v10 = vld [vmem:[%s10213_s0 + $0xb88] sm:$0xff]  ;;  %v4605_v43 = vld [vmem:[%s10213_s0 + $0xc38] sm:$0xff] }
 0x1cc   :  { %v5290_v51 = vpop.f32.mrb[106].mxu0  ;;  %7352 = vmatprep.subr.bf16.mxu1 %v10363_v6  ;;  %6427 = vmatmul.mubr.msk.f32.gmra.mrb[162].mxu1 %vm178_vm0, %v4577_v12  ;;  %v10365_v12 = vld [vmem:[#allocation10_spill] sm:$0xff]  ;;  %v10368_v6 = vld [vmem:[#allocation13_spill] sm:$0xff] }
 0x1cd   :  { %v9688_v52 = vadd.f32 %v5345_v36, %v5289_v9  ;;  %v5346_v21 = vpop.f32.mrb[82].mxu1  ;;  %v5291_v13 = vpop.f32.mrb[107].mxu0  ;;  %3534 = vmatmul.mubr.f32.gmra.mrb[212].mxu0 %v4568_v16  ;;  %6429 = vmatprep.mubr.msk.f32.mxu1 %vm178_vm0, %v4584_v31  ;;  %v10366_v9 = vld [vmem:[#allocation11_spill] sm:$0xff]  ;;  %v10367_v16 = vld [vmem:[#allocation12_spill] sm:$0xff] }
 0x1ce   :  { %v5292_v32 = vadd.f32 %v5291_v13, %v5290_v51  ;;  %v5347_v15 = vpop.f32.mrb[83].mxu1  ;;  %7322 = vmatpush3.bf16.msra.mxu0 %v10364_v50  ;;  %3538 = vmatprep.mubr.f32.mxu0 %v4576_v25  ;;  %v4617_v13 = vld [vmem:[%s10213_s0 + $0xc58] sm:$0xff]  ;;  %v4590_v50 = vld [vmem:[%s10213_s0 + $0xbc0] sm:$0xff] }
 0x1cf   :  { %v5348_v30 = vadd.f32 %v5347_v15, %v5346_v21  ;;  %7354 = vmatpush3.bf16.msra.mxu1 %v10365_v12  ;;  %7324 = vmatprep.subr.bf16.mxu0 %v10366_v9  ;;  %v4582_v21 = vld [vmem:[%s10213_s0 + $0xb80] sm:$0xff]  ;;  %v10370_v15 = vld [vmem:[#allocation15_spill] sm:$0xff] }
 0x1d0   :  { %v5293_v23 = vpop.f32.mrb[108].mxu0  ;;  %7356 = vmatprep.subr.bf16.mxu1 %v10367_v16  ;;  %6430 = vmatmul.mubr.msk.f32.gmra.mrb[164].mxu1 %vm178_vm0, %v4591_v41 }
 0x1d1   :  { %v9708_v31 = vadd.f32 %v5348_v30, %v5292_v32  ;;  %v5349_v36 = vpop.f32.mrb[84].mxu1  ;;  %v5294_v20 = vpop.f32.mrb[109].mxu0  ;;  %3539 = vmatmul.mubr.f32.gmra.mrb[214].mxu0 %v4575_v8  ;;  %6432 = vmatprep.mubr.msk.f32.mxu1 %vm178_vm0, %v4598_v37  ;;  %v10369_v32 = vld [vmem:[#allocation14_spill] sm:$0xff] }
 0x1d2   :  { %v5295_v25 = vadd.f32 %v5294_v20, %v5293_v23  ;;  %v5350_v51 = vpop.f32.mrb[85].mxu1  ;;  %7326 = vmatpush3.bf16.msra.mxu0 %v10368_v6  ;;  %3543 = vmatprep.mubr.f32.mxu0 %v4583_v10  ;;  %v4589_v23 = vld [vmem:[%s10213_s0 + $0xbb8] sm:$0xff] }
 0x1d3   :  { %v5351_v41 = vadd.f32 %v5350_v51, %v5349_v36  ;;  %7358 = vmatpush3.bf16.msra.mxu1 %v10369_v32  ;;  %7328 = vmatprep.subr.bf16.mxu0 %v10370_v15  ;;  %v10373_v15 = vld [vmem:[#allocation18_spill] sm:$0xff] }
 0x1d4   :  { %v5296_v8 = vpop.f32.mrb[110].mxu0  ;;  %7360 = vmatprep.subr.bf16.mxu1 %v7616_v56  ;;  %6433 = vmatmul.mubr.msk.f32.gmra.mrb[166].mxu1 %vm178_vm0, %v4605_v43  ;;  %v4597_v56 = vld [vmem:[%s10213_s0 + $0xbf8] sm:$0xff] }
 0x1d5   :  { %v9728_v37 = vadd.f32 %v5351_v41, %v5295_v25  ;;  %v5352_v30 = vpop.f32.mrb[86].mxu1  ;;  %v5297_v12 = vpop.f32.mrb[111].mxu0  ;;  %3544 = vmatmul.mubr.f32.gmra.mrb[216].mxu0 %v4582_v21  ;;  %3927 = vmatprep.mubr.f32.mxu1 %v4617_v13  ;;  %v10372_v13 = vld [vmem:[#allocation17_spill] sm:$0xff] }
 0x1d6   :  { %v5298_v9 = vadd.f32 %v5297_v12, %v5296_v8  ;;  %v5353_v10 = vpop.f32.mrb[87].mxu1  ;;  %7330 = vmatpush3.bf16.msra.mxu0 %v7634_v62  ;;  %3548 = vmatprep.mubr.f32.mxu0 %v4590_v50  ;;  %v10374_v50 = vld [vmem:[#allocation19_spill] sm:$0xff]  ;;  %v10375_v8 = vld [vmem:[#allocation20_spill] sm:$0xff] }
 0x1d7   :  { %v5354_v16 = vadd.f32 %v5353_v10, %v5352_v30  ;;  %7362 = vmatpush3.bf16.msra.mxu1 %v7638_v63  ;;  %7332 = vmatprep.subr.bf16.mxu0 %v7640_v0  ;;  %v4596_v63 = vld [vmem:[%s10213_s0 + $0xbf0] sm:$0xff] }
 0x1d8   :  { %v5387_v36 = vpop.f32.mrb[112].mxu0  ;;  %7364 = vmatprep.subr.bf16.mxu1 %v7652_v5  ;;  %v10371_v0 = vld [vmem:[#allocation16_spill] sm:$0xff] }
 0x1d9   :  { %v9740_v20 = vadd.f32 %v5354_v16, %v5298_v9  ;;  %v5388_v62 = vpop.f32.mrb[113].mxu0  ;;  %3549 = vmatmul.mubr.f32.gmra.mrb[218].mxu0 %v4589_v23  ;;  %v6317_v43 = vpop.f32.mrb[88].mxu1  ;;  %v4604_v5 = vld [vmem:[%s10213_s0 + $0xc30] sm:$0xff] }
 0x1da   :  { %v5389_v25 = vadd.f32 %v5388_v62, %v5387_v36  ;;  %7334 = vmatpush3.bf16.msra.mxu0 %v7670_v14  ;;  %3553 = vmatprep.mubr.f32.mxu0 %v4597_v56  ;;  %v2103_v51 = vpop.f32.mrb[89].mxu1  ;;  %v4614_v62 = vld [vmem:[%s10213_s0 + $0xc40] sm:$0xff] }
 0x1db   :  { %7366 = vmatpush3.bf16.msra.mxu1 %v7680_v19  ;;  %7336 = vmatprep.subr.bf16.mxu0 %v10371_v0  ;;  %v4603_v19 = vld [vmem:[%s10213_s0 + $0xc28] sm:$0xff]  ;;  %v4622_v0 = vld [vmem:[%s10213_s0 + $0xc80] sm:$0xff] }
 0x1dc   :  { %v5390_v6 = vpop.f32.mrb[114].mxu0  ;;  %v1999_v21 = vadd.f32 %v5389_v25, %v9621_v7  ;;  %7368 = vmatprep.subr.bf16.mxu1 %v10372_v13  ;;  %v4615_v7 = vld [vmem:[%s10213_s0 + $0xc48] sm:$0xff]  ;;  %v4616_v25 = vld [vmem:[%s10213_s0 + $0xc50] sm:$0xff] }
 0x1dd   :  { %v5391_v14 = vpop.f32.mrb[115].mxu0  ;;  %3554 = vmatmul.mubr.f32.gmra.mrb[220].mxu0 %v4596_v63 }
 0x1de   :  { %v5392_v41 = vadd.f32 %v5391_v14, %v5390_v6  ;;  %v9753_v32 = vadd.f32 %v2103_v51, %v1999_v21  ;;  %7338 = vmatpush3.bf16.msra.mxu0 %v10373_v15  ;;  %3558 = vmatprep.mubr.f32.mxu0 %v4604_v5  ;;  %v4624_v5 = vld [vmem:[%s10213_s0 + $0xc90] sm:$0xff] }
 0x1df   :  { %7370 = vmatpush3.bf16.msra.mxu1 %v10374_v50  ;;  %7340 = vmatprep.subr.bf16.mxu0 %v10375_v8  ;;  %v6320_v30 = vpop.f32.mrb[90].mxu1 }
 0x1e0   :  { %v2004_v12 = vadd.f32 %v5392_v41, %v9638_v60  ;;  %v2142_v9 = vmax.f32 %v9460_v4, %v9753_v32  ;;  %v5393_v10 = vpop.f32.mrb[116].mxu0  ;;  %7372 = vmatprep.subr.bf16.mxu1 %v10340_v49  ;;  %v2113_v23 = vpop.f32.mrb[91].mxu1  ;;  %v10376_v60 = vld [vmem:[#allocation23_spill] sm:$0xff]  ;;  %v10377_v49 = vld [vmem:[#allocation24_spill] sm:$0xff] }
 0x1e1   :  { %v5394_v16 = vpop.f32.mrb[117].mxu0  ;;  %3559 = vmatmul.mubr.f32.gmra.mrb[222].mxu0 %v4603_v19  ;;  %v4623_v41 = vld [vmem:[%s10213_s0 + $0xc88] sm:$0xff] }
 0x1e2   :  { %v9768_v56 = vadd.f32 %v6317_v43, %v2004_v12  ;;  %v5395_v36 = vadd.f32 %v5394_v16, %v5393_v10  ;;  %7342 = vmatpush3.bf16.msra.mxu0 %v10341_v27  ;;  %3822 = vmatprep.mubr.f32.mxu0 %v4615_v7  ;;  %v4631_v7 = vld [vmem:[%s10213_s0 + $0xcc8] sm:$0xff] }
 0x1e3   :  { %7374 = vmatpush3.bf16.msra.mxu1 %v10376_v60  ;;  %7376 = vmatprep.subr.bf16.mxu0 %v10377_v49  ;;  %v9779_v51 = vpop.f32.mrb[92].mxu1 }
 0x1e4   :  { %v2143_v43 = vmax.f32 %v9477_v57, %v9768_v56  ;;  %v5396_v63 = vpop.f32.mrb[118].mxu0  ;;  %v2009_v27 = vadd.f32 %v5395_v36, %v9652_v33  ;;  %v2123_v6 = vpop.f32.mrb[93].mxu1  ;;  %7408 = vmatprep.subr.bf16.mxu1 %v7763_v59  ;;  %v4621_v33 = vld [vmem:[%s10213_s0 + $0xc78] sm:$0xff] }
 0x1e5   :  { %v5397_v21 = vpop.f32.mrb[119].mxu0  ;;  %3823 = vmatmul.mubr.f32.vlgmr.msra.gmra.mrb[224].mxu0 %v4614_v62  ;;  %v4638_v62 = vld [vmem:[%s10213_s0 + $0xd00] sm:$0xff] }
 0x1e6   :  { %v5398_v13 = vadd.f32 %v5397_v21, %v5396_v63  ;;  %v9791_v14 = vadd.f32 %v2113_v23, %v2009_v27  ;;  %3928 = vmatmul.mubr.f32.vlgmr.msra.gmra.mrb[168].mxu1 %v4616_v25  ;;  %7378 = vmatpush3.bf16.msra.mxu0 %v7775_v2  ;;  %v4629_v2 = vld [vmem:[%s10213_s0 + $0xcb8] sm:$0xff] }
 0x1e7   :  { %3827 = vmatprep.mubr.f32.mxu0 %v4622_v0  ;;  %3932 = vmatprep.mubr.f32.mxu1 %v4624_v5  ;;  %v9800_v15 = vpop.f32.mrb[94].mxu1  ;;  %v4645_v0 = vld [vmem:[%s10213_s0 + $0xd38] sm:$0xff] }
 0x1e8   :  { %v2014_v19 = vadd.f32 %v5398_v13, %v9668_v39  ;;  %v2144_v50 = vmax.f32 %v9500_v26, %v9791_v14  ;;  %v5399_v8 = vpop.f32.mrb[120].mxu0  ;;  %7380 = vmatprep.subr.bf16.mxu0 %v10347_v35  ;;  %7410 = vmatpush3.bf16.msra.mxu1 %v7763_v59  ;;  %v2133_v12 = vpop.f32.mrb[95].mxu1  ;;  %v4628_v35 = vld [vmem:[%s10213_s0 + $0xcb0] sm:$0xff]  ;;  %v4630_v59 = vld [vmem:[%s10213_s0 + $0xcc0] sm:$0xff] }
 0x1e9   :  { %v5400_v10 = vpop.f32.mrb[121].mxu0  ;;  %3828 = vmatmul.mubr.f32.gmra.mrb[226].mxu0 %v4621_v33  ;;  %7412 = vmatprep.subr.bf16.mxu1 %v7809_v24  ;;  %v4652_v33 = vld [vmem:[%s10213_s0 + $0xd70] sm:$0xff] }
 0x1ea   :  { %v9814_v39 = vadd.f32 %v6320_v30, %v2014_v19  ;;  %v5401_v23 = vadd.f32 %v5400_v10, %v5399_v8  ;;  %3933 = vmatmul.mubr.f32.gmra.mrb[170].mxu1 %v4623_v41  ;;  %7382 = vmatpush3.bf16.msra.mxu0 %v7815_v29  ;;  %v4636_v29 = vld [vmem:[%s10213_s0 + $0xcf0] sm:$0xff] }
 0x1eb   :  { %3832 = vmatprep.mubr.f32.mxu0 %v4629_v2  ;;  %3937 = vmatprep.mubr.f32.mxu1 %v4631_v7 }
 0x1ec   :  { %v2145_v16 = vmax.f32 %v9521_v1, %v9814_v39  ;;  %v5402_v36 = vpop.f32.mrb[122].mxu0  ;;  %v2019_v30 = vadd.f32 %v5401_v23, %v9688_v52  ;;  %7384 = vmatprep.subr.bf16.mxu0 %v7839_v46  ;;  %7414 = vmatpush3.bf16.msra.mxu1 %v7809_v24  ;;  %v4635_v46 = vld [vmem:[%s10213_s0 + $0xce8] sm:$0xff]  ;;  %v4637_v24 = vld [vmem:[%s10213_s0 + $0xcf8] sm:$0xff] }
 0x1ed   :  { %v5403_v60 = vpop.f32.mrb[123].mxu0  ;;  %3833 = vmatmul.mubr.f32.gmra.mrb[228].mxu0 %v4628_v35  ;;  %7416 = vmatprep.subr.bf16.mxu1 %v7849_v55 }
 0x1ee   :  { %v5404_v25 = vadd.f32 %v5403_v60, %v5402_v36  ;;  %v9835_v49 = vadd.f32 %v2123_v6, %v2019_v30  ;;  %3938 = vmatmul.mubr.f32.gmra.mrb[172].mxu1 %v4630_v59  ;;  %7386 = vmatpush3.bf16.msra.mxu0 %v7855_v58  ;;  %v4643_v58 = vld [vmem:[%s10213_s0 + $0xd28] sm:$0xff]  ;;  %v4656_v59 = vld [vmem:[%s10213_s0 + $0xd90] sm:$0xff] }
 0x1ef   :  { %3837 = vmatprep.mubr.f32.mxu0 %v4636_v29  ;;  %3942 = vmatprep.mubr.f32.mxu1 %v4638_v62  ;;  %v4666_v29 = vld [vmem:[%s10213_s0 + $0xde0] sm:$0xff] }
 0x1f0   :  { %v2024_v52 = vadd.f32 %v5404_v25, %v9708_v31  ;;  %v2146_v63 = vmax.f32 %v9544_v53, %v9835_v49  ;;  %v5405_v27 = vpop.f32.mrb[124].mxu0  ;;  %7388 = vmatprep.subr.bf16.mxu0 %v7879_v11  ;;  %7418 = vmatpush3.bf16.msra.mxu1 %v7849_v55  ;;  %v4642_v11 = vld [vmem:[%s10213_s0 + $0xd20] sm:$0xff]  ;;  %v4644_v55 = vld [vmem:[%s10213_s0 + $0xd30] sm:$0xff] }
 0x1f1   :  { %v5406_v5 = vpop.f32.mrb[125].mxu0  ;;  %3838 = vmatmul.mubr.f32.gmra.mrb[230].mxu0 %v4635_v46  ;;  %7420 = vmatprep.subr.bf16.mxu1 %v7889_v22 }
 0x1f2   :  { %v9857_v31 = vadd.f32 %v9779_v51, %v2024_v52  ;;  %v5407_v6 = vadd.f32 %v5406_v5, %v5405_v27  ;;  %3943 = vmatmul.mubr.f32.gmra.mrb[174].mxu1 %v4637_v24  ;;  %7390 = vmatpush3.bf16.msra.mxu0 %v7895_v28  ;;  %v4650_v28 = vld [vmem:[%s10213_s0 + $0xd60] sm:$0xff] }
 0x1f3   :  { %3842 = vmatprep.mubr.f32.mxu0 %v4643_v58  ;;  %3947 = vmatprep.mubr.f32.mxu1 %v4645_v0  ;;  %v4619_v58 = vld [vmem:[%s10213_s0 + $0xc68] sm:$0xff] }
 0x1f4   :  { %v2147_v21 = vmax.f32 %v9566_v54, %v9857_v31  ;;  %v5408_v13 = vpop.f32.mrb[126].mxu0  ;;  %v2029_v51 = vadd.f32 %v5407_v6, %v9728_v37  ;;  %7392 = vmatprep.subr.bf16.mxu0 %v7919_v47  ;;  %7422 = vmatpush3.bf16.msra.mxu1 %v7889_v22  ;;  %v4649_v47 = vld [vmem:[%s10213_s0 + $0xd58] sm:$0xff]  ;;  %v4651_v22 = vld [vmem:[%s10213_s0 + $0xd68] sm:$0xff] }
 0x1f5   :  { %v5409_v41 = vpop.f32.mrb[127].mxu0  ;;  %3843 = vmatmul.mubr.f32.gmra.mrb[232].mxu0 %v4642_v11  ;;  %7424 = vmatprep.subr.bf16.mxu1 %v10305_v45 }
 0x1f6   :  { %v5410_v19 = vadd.f32 %v5409_v41, %v5408_v13  ;;  %v9878_v8 = vadd.f32 %v2133_v12, %v2029_v51  ;;  %3948 = vmatmul.mubr.f32.gmra.mrb[176].mxu1 %v4644_v55  ;;  %7394 = vmatpush3.bf16.msra.mxu0 %v10307_v3  ;;  %v4657_v3 = vld [vmem:[%s10213_s0 + $0xd98] sm:$0xff]  ;;  %v4659_v12 = vld [vmem:[%s10213_s0 + $0xda8] sm:$0xff]  ;;  %v4626_v51 = vld [vmem:[%s10213_s0 + $0xca0] sm:$0xff] }
 0x1f7   :  { %3847 = vmatprep.mubr.f32.mxu0 %v4650_v28  ;;  %3952 = vmatprep.mubr.f32.mxu1 %v4652_v33  ;;  %v4627_v28 = vld [vmem:[%s10213_s0 + $0xca8] sm:$0xff] }
 0x1f8   :  { %v2034_v37 = vadd.f32 %v5410_v19, %v9740_v20  ;;  %v2148_v2 = vmax.f32 %v9589_v34, %v9878_v8  ;;  %v5463_v7 = vpop.f32.mrb[128].mxu0  ;;  %7396 = vmatprep.subr.bf16.mxu0 %v10323_v44  ;;  %7426 = vmatpush3.bf16.msra.mxu1 %v10305_v45  ;;  %v4658_v45 = vld [vmem:[%s10213_s0 + $0xda0] sm:$0xff] }
 0x1f9   :  { %v5519_v10 = vpop.f32.mrb[96].mxu1  ;;  %v5464_v23 = vpop.f32.mrb[129].mxu0  ;;  %3848 = vmatmul.mubr.f32.gmra.mrb[234].mxu0 %v4649_v47  ;;  %7428 = vmatprep.subr.bf16.mxu1 %v7969_v40 }
 0x1fa   :  { %v9900_v20 = vadd.f32 %v9800_v15, %v2034_v37  ;;  %v5465_v35 = vadd.f32 %v5464_v23, %v5463_v7  ;;  %v5520_v44 = vpop.f32.mrb[97].mxu1  ;;  %3953 = vmatmul.mubr.f32.gmra.mrb[178].mxu1 %v4651_v22  ;;  %7398 = vmatpush3.bf16.msra.mxu0 %v7975_v42  ;;  %v4664_v42 = vld [vmem:[%s10213_s0 + $0xdd0] sm:$0xff]  ;;  %v4625_v7 = vld [vmem:[%s10213_s0 + $0xc98] sm:$0xff] }
 0x1fb   :  { %v5521_v36 = vadd.f32 %v5520_v44, %v5519_v10  ;;  %3852 = vmatprep.mubr.f32.mxu0 %v4657_v3  ;;  %3957 = vmatprep.mubr.f32.mxu1 %v4659_v12  ;;  %v4633_v12 = vld [vmem:[%s10213_s0 + $0xcd8] sm:$0xff] }
 0x1fc   :  { %v2149_v15 = vmax.f32 %v9611_v18, %v9900_v20  ;;  %v5466_v30 = vpop.f32.mrb[130].mxu0  ;;  %7400 = vmatprep.subr.bf16.mxu0 %v10354_v38  ;;  %7430 = vmatpush3.bf16.msra.mxu1 %v7969_v40  ;;  %v4663_v38 = vld [vmem:[%s10213_s0 + $0xdc8] sm:$0xff]  ;;  %v4665_v40 = vld [vmem:[%s10213_s0 + $0xdd8] sm:$0xff] }
 0x1fd   :  { %v9919_v62 = vadd.f32 %v5521_v36, %v5465_v35  ;;  %v5522_v60 = vpop.f32.mrb[98].mxu1  ;;  %v5467_v25 = vpop.f32.mrb[131].mxu0  ;;  %3853 = vmatmul.mubr.f32.gmra.mrb[236].mxu0 %v4656_v59  ;;  %v4641_v10 = vld [vmem:[%s10213_s0 + $0xd18] sm:$0xff]  ;;  %v4648_v35 = vld [vmem:[%s10213_s0 + $0xd50] sm:$0xff] }
 0x1fe   :  { %v5468_v46 = vadd.f32 %v5467_v25, %v5466_v30  ;;  %v5523_v24 = vpop.f32.mrb[99].mxu1  ;;  %3958 = vmatmul.mubr.f32.gmra.mrb[180].mxu1 %v4658_v45  ;;  %7402 = vmatpush3.bf16.msra.mxu0 %v10356_v48  ;;  %v4620_v48 = vld [vmem:[%s10213_s0 + $0xc70] sm:$0xff]  ;;  %v4655_v25 = vld [vmem:[%s10213_s0 + $0xd88] sm:$0xff] }
 0x1ff   :  { %v5524_v52 = vadd.f32 %v5523_v24, %v5522_v60  ;;  %3857 = vmatprep.mubr.f32.mxu0 %v4664_v42  ;;  %3962 = vmatprep.mubr.f32.mxu1 %v4666_v29  ;;  %v4632_v42 = vld [vmem:[%s10213_s0 + $0xcd0] sm:$0xff]  ;;  %v4662_v24 = vld [vmem:[%s10213_s0 + $0xdc0] sm:$0xff] }
 0x200   :  { %v5469_v27 = vpop.f32.mrb[132].mxu0  ;;  %7404 = vmatprep.subr.bf16.mxu0 %v10357_v17  ;;  %v4618_v17 = vld [vmem:[%s10213_s0 + $0xc60] sm:$0xff]  ;;  %v4640_v60 = vld [vmem:[%s10213_s0 + $0xd10] sm:$0xff] }
 0x201   :  { %v9935_v0 = vadd.f32 %v5524_v52, %v5468_v46  ;;  %v5525_v5 = vpop.f32.mrb[100].mxu1  ;;  %v5470_v6 = vpop.f32.mrb[133].mxu0  ;;  %3858 = vmatmul.mubr.f32.gmra.mrb[238].mxu0 %v4663_v38 }
 0x202   :  { %v5471_v11 = vadd.f32 %v5470_v6, %v5469_v27  ;;  %v5526_v55 = vpop.f32.mrb[101].mxu1  ;;  %3963 = vmatmul.mubr.f32.gmra.mrb[182].mxu1 %v4665_v40  ;;  %7406 = vmatpush3.bf16.msra.mxu0 %v8033_v61  ;;  %v4634_v61 = vld [vmem:[%s10213_s0 + $0xce0] sm:$0xff]  ;;  %v4647_v6 = vld [vmem:[%s10213_s0 + $0xd48] sm:$0xff] }
 0x203   :  { %v5527_v13 = vadd.f32 %v5526_v55, %v5525_v5  ;;  %4032 = vmatprep.mubr.f32.mxu0 %v4619_v58  ;;  %6459 = vmatprep.mubr.msk.f32.mxu1 %vm178_vm0, %v4620_v48  ;;  %v4639_v48 = vld [vmem:[%s10213_s0 + $0xd08] sm:$0xff] }
 0x204   :  { %v5472_v33 = vpop.f32.mrb[134].mxu0 }
 0x205   :  { %v9951_v41 = vadd.f32 %v5527_v13, %v5471_v11  ;;  %v5528_v19 = vpop.f32.mrb[102].mxu1  ;;  %v5473_v47 = vpop.f32.mrb[135].mxu0  ;;  %4033 = vmatmul.mubr.f32.vlgmr.msra.gmra.mrb[240].mxu0 %v4618_v17  ;;  %v4669_v11 = vld [vmem:[%s10213_s0 + $0xdf8] sm:$0xff] }
 0x206   :  { %v5474_v22 = vadd.f32 %v5473_v47, %v5472_v33  ;;  %v5529_v37 = vpop.f32.mrb[103].mxu1  ;;  %4037 = vmatprep.mubr.f32.mxu0 %v4626_v51  ;;  %6460 = vmatmul.mubr.msk.f32.vlgmr.msra.gmra.mrb[184].mxu1 %vm178_vm0, %v4627_v28  ;;  %v4654_v47 = vld [vmem:[%s10213_s0 + $0xd80] sm:$0xff] }
 0x207   :  { %v5530_v3 = vadd.f32 %v5529_v37, %v5528_v19  ;;  %6462 = vmatprep.mubr.msk.f32.mxu1 %vm178_vm0, %v4634_v61  ;;  %v4646_v61 = vld [vmem:[%s10213_s0 + $0xd40] sm:$0xff] }
 0x208   :  { %v5475_v23 = vpop.f32.mrb[136].mxu0 }
 0x209   :  { %v9967_v44 = vadd.f32 %v5530_v3, %v5474_v22  ;;  %v5531_v59 = vpop.f32.mrb[104].mxu1  ;;  %v5476_v36 = vpop.f32.mrb[137].mxu0  ;;  %4038 = vmatmul.mubr.f32.gmra.mrb[242].mxu0 %v4625_v7 }
 0x20a   :  { %v5477_v45 = vadd.f32 %v5476_v36, %v5475_v23  ;;  %v5532_v30 = vpop.f32.mrb[105].mxu1  ;;  %4042 = vmatprep.mubr.f32.mxu0 %v4633_v12  ;;  %6463 = vmatmul.mubr.msk.f32.gmra.mrb[186].mxu1 %vm178_vm0, %v4641_v10  ;;  %v4653_v23 = vld [vmem:[%s10213_s0 + $0xd78] sm:$0xff] }
 0x20b   :  { %v5533_v29 = vadd.f32 %v5532_v30, %v5531_v59  ;;  %6465 = vmatprep.mubr.msk.f32.mxu1 %vm178_vm0, %v4648_v35  ;;  %v4661_v59 = vld [vmem:[%s10213_s0 + $0xdb8] sm:$0xff] }
 0x20c   :  { %v5478_v46 = vpop.f32.mrb[138].mxu0 }
 0x20d   :  { %v9983_v38 = vadd.f32 %v5533_v29, %v5477_v45  ;;  %v5534_v52 = vpop.f32.mrb[106].mxu1  ;;  %v5479_v40 = vpop.f32.mrb[139].mxu0  ;;  %4043 = vmatmul.mubr.f32.gmra.mrb[244].mxu0 %v4632_v42 }
 0x20e   :  { %v5480_v27 = vadd.f32 %v5479_v40, %v5478_v46  ;;  %v5535_v58 = vpop.f32.mrb[107].mxu1  ;;  %4047 = vmatprep.mubr.f32.mxu0 %v4640_v60  ;;  %6466 = vmatmul.mubr.msk.f32.gmra.mrb[188].mxu1 %vm178_vm0, %v4655_v25  ;;  %v4660_v25 = vld [vmem:[%s10213_s0 + $0xdb0] sm:$0xff] }
 0x20f   :  { %v5536_v5 = vadd.f32 %v5535_v58, %v5534_v52  ;;  %6468 = vmatprep.mubr.msk.f32.mxu1 %vm178_vm0, %v4662_v24  ;;  %v4668_v46 = vld [vmem:[%s10213_s0 + $0xdf0] sm:$0xff] }
 0x210   :  { %v5481_v55 = vpop.f32.mrb[140].mxu0 }
 0x211   :  { %v9996_v17 = vadd.f32 %v5536_v5, %v5480_v27  ;;  %v5537_v13 = vpop.f32.mrb[108].mxu1  ;;  %v5482_v51 = vpop.f32.mrb[141].mxu0  ;;  %4048 = vmatmul.mubr.f32.gmra.mrb[246].mxu0 %v4639_v48  ;;  %v4667_v48 = vld [vmem:[%s10213_s0 + $0xde8] sm:$0xff] }
 0x212   :  { %v5483_v28 = vadd.f32 %v5482_v51, %v5481_v55  ;;  %v5538_v33 = vpop.f32.mrb[109].mxu1  ;;  %4052 = vmatprep.mubr.f32.mxu0 %v4647_v6  ;;  %6469 = vmatmul.mubr.msk.f32.gmra.mrb[190].mxu1 %vm178_vm0, %v4669_v11 }
 0x213   :  { %v5539_v19 = vadd.f32 %v5538_v33, %v5537_v13 }
 0x214   :  { %v5484_v22 = vpop.f32.mrb[142].mxu0 }
 0x215   :  { %v10005_v37 = vadd.f32 %v5539_v19, %v5483_v28  ;;  %v5540_v7 = vpop.f32.mrb[110].mxu1  ;;  %v5485_v3 = vpop.f32.mrb[143].mxu0  ;;  %4053 = vmatmul.mubr.f32.gmra.mrb[248].mxu0 %v4646_v61 }
 0x216   :  { %v5486_v12 = vadd.f32 %v5485_v3, %v5484_v22  ;;  %v5541_v10 = vpop.f32.mrb[111].mxu1  ;;  %4057 = vmatprep.mubr.f32.mxu0 %v4654_v47 }
 0x217   :  { %v5542_v35 = vadd.f32 %v5541_v10, %v5540_v7 }
 0x218   :  { %v5575_v36 = vpop.f32.mrb[144].mxu0 }
 0x219   :  { %v2438_v45 = vadd.f32 %v5542_v35, %v5486_v12  ;;  %v5576_v30 = vpop.f32.mrb[145].mxu0  ;;  %4058 = vmatmul.mubr.f32.gmra.mrb[250].mxu0 %v4653_v23  ;;  %v6353_v42 = vpop.f32.mrb[112].mxu1 }
 0x21a   :  { %v5577_v29 = vadd.f32 %v5576_v30, %v5575_v36  ;;  %4062 = vmatprep.mubr.f32.mxu0 %v4661_v59  ;;  %v2612_v60 = vpop.f32.mrb[113].mxu1 }
 0x21c   :  { %v5578_v24 = vpop.f32.mrb[146].mxu0  ;;  %v2508_v52 = vadd.f32 %v5577_v29, %v9919_v62 }
 0x21d   :  { %v5579_v40 = vpop.f32.mrb[147].mxu0  ;;  %4063 = vmatmul.mubr.f32.gmra.mrb[252].mxu0 %v4660_v25 }
 0x21e   :  { %v5580_v27 = vadd.f32 %v5579_v40, %v5578_v24  ;;  %v2613_v58 = vadd.f32 %v2612_v60, %v2508_v52  ;;  %4067 = vmatprep.mubr.f32.mxu0 %v4668_v46 }
 0x21f   :  { %v6356_v5 = vpop.f32.mrb[114].mxu1 }
 0x220   :  { %v2513_v6 = vadd.f32 %v5580_v27, %v9935_v0  ;;  %v10027_v11 = vmax.f32 %v2142_v9, %v2613_v58  ;;  %v5581_v55 = vpop.f32.mrb[148].mxu0  ;;  %v2622_v13 = vpop.f32.mrb[115].mxu1 }
 0x221   :  { %v5582_v62 = vpop.f32.mrb[149].mxu0  ;;  %4068 = vmatmul.mubr.f32.gmra.mrb[254].mxu0 %v4667_v48 }
 0x222   :  { %v2618_v51 = vadd.f32 %v6353_v42, %v2513_v6  ;;  %v5583_v28 = vadd.f32 %v5582_v62, %v5581_v55 }
 0x223   :  { %v6359_v33 = vpop.f32.mrb[116].mxu1 }
 0x224   :  { %v10032_v61 = vmax.f32 %v2143_v43, %v2618_v51  ;;  %v5584_v19 = vpop.f32.mrb[150].mxu0  ;;  %v2518_v0 = vadd.f32 %v5583_v28, %v9951_v41  ;;  %v2632_v47 = vpop.f32.mrb[117].mxu1 }
 0x225   :  { %v5585_v22 = vpop.f32.mrb[151].mxu0 }
 0x226   :  { %v5586_v4 = vadd.f32 %v5585_v22, %v5584_v19  ;;  %v2623_v32 = vadd.f32 %v2622_v13, %v2518_v0 }
 0x227   :  { %v6362_v9 = vpop.f32.mrb[118].mxu1 }
 0x228   :  { %v2523_v7 = vadd.f32 %v5586_v4, %v9967_v44  ;;  %v10039_v3 = vmax.f32 %v2144_v50, %v2623_v32  ;;  %v5587_v12 = vpop.f32.mrb[152].mxu0  ;;  %v2642_v10 = vpop.f32.mrb[119].mxu1 }
 0x229   :  { %v5588_v57 = vpop.f32.mrb[153].mxu0 }
 0x22a   :  { %v2628_v56 = vadd.f32 %v6356_v5, %v2523_v7  ;;  %v5589_v43 = vadd.f32 %v5588_v57, %v5587_v12 }
 0x22c   :  { %v10044_v41 = vmax.f32 %v2145_v16, %v2628_v56  ;;  %v5590_v23 = vpop.f32.mrb[154].mxu0  ;;  %v2528_v35 = vadd.f32 %v5589_v43, %v9983_v38 }
 0x22d   :  { %v5591_v59 = vpop.f32.mrb[155].mxu0 }
 0x22e   :  { %v5592_v44 = vadd.f32 %v5591_v59, %v5590_v23  ;;  %v2633_v36 = vadd.f32 %v2632_v47, %v2528_v35 }
 0x230   :  { %v2533_v26 = vadd.f32 %v5592_v44, %v9996_v17  ;;  %v10051_v14 = vmax.f32 %v2146_v63, %v2633_v36  ;;  %v5593_v50 = vpop.f32.mrb[156].mxu0 }
 0x231   :  { %v5594_v30 = vpop.f32.mrb[157].mxu0 }
 0x232   :  { %v2638_v42 = vadd.f32 %v6359_v33, %v2533_v26  ;;  %v5595_v29 = vadd.f32 %v5594_v30, %v5593_v50 }
 0x234   :  { %v10056_v1 = vmax.f32 %v2147_v21, %v2638_v42  ;;  %v5596_v39 = vpop.f32.mrb[158].mxu0  ;;  %v2538_v16 = vadd.f32 %v5595_v29, %v10005_v37 }
 0x235   :  { %v5597_v38 = vpop.f32.mrb[159].mxu0 }
 0x236   :  { %v5598_v60 = vadd.f32 %v5597_v38, %v5596_v39  ;;  %v2643_v17 = vadd.f32 %v2642_v10, %v2538_v16 }
 0x238   :  { %v2543_v25 = vadd.f32 %v5598_v60, %v2438_v45  ;;  %v10062_v53 = vmax.f32 %v2148_v2, %v2643_v17  ;;  %v5651_v49 = vpop.f32.mrb[160].mxu0 }
 0x239   :  { %v5707_v63 = vpop.f32.mrb[120].mxu1  ;;  %v5652_v46 = vpop.f32.mrb[161].mxu0 }
 0x23a   :  { %v2648_v24 = vadd.f32 %v6362_v9, %v2543_v25  ;;  %v5653_v52 = vadd.f32 %v5652_v46, %v5651_v49  ;;  %v5708_v54 = vpop.f32.mrb[121].mxu1 }
 0x23b   :  { %v5709_v31 = vadd.f32 %v5708_v54, %v5707_v63 }
 0x23c   :  { %v10067_v21 = vmax.f32 %v2149_v15, %v2648_v24  ;;  %v5654_v37 = vpop.f32.mrb[162].mxu0 }
 0x23d   :  { %v2912_v40 = vadd.f32 %v5709_v31, %v5653_v52  ;;  %v5710_v45 = vpop.f32.mrb[122].mxu1  ;;  %v5655_v27 = vpop.f32.mrb[163].mxu0 }
 0x23e   :  { %v5656_v58 = vadd.f32 %v5655_v27, %v5654_v37  ;;  %v5711_v34 = vpop.f32.mrb[123].mxu1 }
 0x23f   :  { %v5712_v8 = vadd.f32 %v5711_v34, %v5710_v45 }
 0x240   :  { %v5657_v2 = vpop.f32.mrb[164].mxu0 }
 0x241   :  { %v2917_v48 = vadd.f32 %v5712_v8, %v5656_v58  ;;  %v5713_v5 = vpop.f32.mrb[124].mxu1  ;;  %v5658_v6 = vpop.f32.mrb[165].mxu0 }
 0x242   :  { %v5659_v55 = vadd.f32 %v5658_v6, %v5657_v2  ;;  %v5714_v13 = vpop.f32.mrb[125].mxu1 }
 0x243   :  { %v5715_v62 = vadd.f32 %v5714_v13, %v5713_v5 }
 0x244   :  { %v5660_v51 = vpop.f32.mrb[166].mxu0 }
 0x245   :  { %v2922_v28 = vadd.f32 %v5715_v62, %v5659_v55  ;;  %v5716_v33 = vpop.f32.mrb[126].mxu1  ;;  %v5661_v18 = vpop.f32.mrb[167].mxu0 }
 0x246   :  { %v5662_v20 = vadd.f32 %v5661_v18, %v5660_v51  ;;  %v5717_v15 = vpop.f32.mrb[127].mxu1 }
 0x247   :  { %v5718_v19 = vadd.f32 %v5717_v15, %v5716_v33 }
 0x248   :  { %v5663_v0 = vpop.f32.mrb[168].mxu0 }
 0x249   :  { %v2927_v47 = vadd.f32 %v5718_v19, %v5662_v20  ;;  %v5719_v22 = vpop.f32.mrb[128].mxu1  ;;  %v5664_v4 = vpop.f32.mrb[169].mxu0 }
 0x24a   :  { %v5665_v32 = vadd.f32 %v5664_v4, %v5663_v0  ;;  %v5720_v9 = vpop.f32.mrb[129].mxu1 }
 0x24b   :  { %v5721_v7 = vadd.f32 %v5720_v9, %v5719_v22 }
 0x24c   :  { %v5666_v12 = vpop.f32.mrb[170].mxu0 }
 0x24d   :  { %v2932_v10 = vadd.f32 %v5721_v7, %v5665_v32  ;;  %v5722_v57 = vpop.f32.mrb[130].mxu1  ;;  %v5667_v56 = vpop.f32.mrb[171].mxu0 }
 0x24e   :  { %v5668_v43 = vadd.f32 %v5667_v56, %v5666_v12  ;;  %v5723_v23 = vpop.f32.mrb[131].mxu1 }
 0x24f   :  { %v5724_v35 = vadd.f32 %v5723_v23, %v5722_v57 }
 0x250   :  { %v5669_v59 = vpop.f32.mrb[172].mxu0 }
 0x251   :  { %v2937_v44 = vadd.f32 %v5724_v35, %v5668_v43  ;;  %v5725_v36 = vpop.f32.mrb[132].mxu1  ;;  %v5670_v26 = vpop.f32.mrb[173].mxu0 }
 0x252   :  { %v5671_v50 = vadd.f32 %v5670_v26, %v5669_v59  ;;  %v5726_v30 = vpop.f32.mrb[133].mxu1 }
 0x253   :  { %v5727_v42 = vadd.f32 %v5726_v30, %v5725_v36 }
 0x254   :  { %v5672_v29 = vpop.f32.mrb[174].mxu0 }
 0x255   :  { %v2942_v39 = vadd.f32 %v5727_v42, %v5671_v50  ;;  %v5728_v16 = vpop.f32.mrb[134].mxu1  ;;  %v5673_v38 = vpop.f32.mrb[175].mxu0 }
 0x256   :  { %v5674_v60 = vadd.f32 %v5673_v38, %v5672_v29  ;;  %v5729_v17 = vpop.f32.mrb[135].mxu1 }
 0x257   :  { %v5730_v25 = vadd.f32 %v5729_v17, %v5728_v16 }
 0x258   :  { %v5763_v49 = vpop.f32.mrb[176].mxu0 }
 0x259   :  { %v2947_v63 = vadd.f32 %v5730_v25, %v5674_v60  ;;  %v5764_v46 = vpop.f32.mrb[177].mxu0  ;;  %v6389_v24 = vpop.f32.mrb[136].mxu1 }
 0x25a   :  { %v5765_v52 = vadd.f32 %v5764_v46, %v5763_v49  ;;  %v3121_v54 = vpop.f32.mrb[137].mxu1 }
 0x25c   :  { %v5766_v31 = vpop.f32.mrb[178].mxu0  ;;  %v3017_v37 = vadd.f32 %v5765_v52, %v2912_v40 }
 0x25d   :  { %v5767_v45 = vpop.f32.mrb[179].mxu0 }
 0x25e   :  { %v5768_v27 = vadd.f32 %v5767_v45, %v5766_v31  ;;  %v10069_v58 = vadd.f32 %v3121_v54, %v3017_v37 }
 0x25f   :  { %v6392_v34 = vpop.f32.mrb[138].mxu1 }
 0x260   :  { %v3022_v8 = vadd.f32 %v5768_v27, %v2917_v48  ;;  %v3160_v2 = vmax.f32 %v10027_v11, %v10069_v58  ;;  %v5769_v5 = vpop.f32.mrb[180].mxu0  ;;  %v3131_v6 = vpop.f32.mrb[139].mxu1 }
 0x261   :  { %v5770_v55 = vpop.f32.mrb[181].mxu0 }
 0x262   :  { %v10073_v13 = vadd.f32 %v6389_v24, %v3022_v8  ;;  %v5771_v62 = vadd.f32 %v5770_v55, %v5769_v5 }
 0x263   :  { %v6395_v51 = vpop.f32.mrb[140].mxu1 }
 0x264   :  { %v3161_v33 = vmax.f32 %v10032_v61, %v10073_v13  ;;  %v5772_v40 = vpop.f32.mrb[182].mxu0  ;;  %v3027_v18 = vadd.f32 %v5771_v62, %v2922_v28  ;;  %v3141_v20 = vpop.f32.mrb[141].mxu1 }
 0x265   :  { %v5773_v15 = vpop.f32.mrb[183].mxu0 }
 0x266   :  { %v5774_v19 = vadd.f32 %v5773_v15, %v5772_v40  ;;  %v10077_v0 = vadd.f32 %v3131_v6, %v3027_v18 }
 0x267   :  { %v6398_v48 = vpop.f32.mrb[142].mxu1 }
 0x268   :  { %v3032_v22 = vadd.f32 %v5774_v19, %v2927_v47  ;;  %v3162_v4 = vmax.f32 %v10039_v3, %v10077_v0  ;;  %v5775_v32 = vpop.f32.mrb[184].mxu0  ;;  %v3151_v9 = vpop.f32.mrb[143].mxu1 }
 0x269   :  { %v5776_v7 = vpop.f32.mrb[185].mxu0 }
 0x26a   :  { %v10081_v12 = vadd.f32 %v6392_v34, %v3032_v22  ;;  %v5777_v57 = vadd.f32 %v5776_v7, %v5775_v32 }
 0x26c   :  { %v3163_v56 = vmax.f32 %v10044_v41, %v10081_v12  ;;  %v5778_v28 = vpop.f32.mrb[186].mxu0  ;;  %v3037_v43 = vadd.f32 %v5777_v57, %v2932_v10 }
 0x26d   :  { %v5779_v23 = vpop.f32.mrb[187].mxu0 }
 0x26e   :  { %v5780_v35 = vadd.f32 %v5779_v23, %v5778_v28  ;;  %v10085_v59 = vadd.f32 %v3141_v20, %v3037_v43 }
 0x270   :  { %v3042_v36 = vadd.f32 %v5780_v35, %v2937_v44  ;;  %v3164_v47 = vmax.f32 %v10051_v14, %v10085_v59  ;;  %v5781_v26 = vpop.f32.mrb[188].mxu0 }
 0x271   :  { %v5782_v50 = vpop.f32.mrb[189].mxu0 }
 0x272   :  { %v10089_v30 = vadd.f32 %v6395_v51, %v3042_v36  ;;  %v5783_v42 = vadd.f32 %v5782_v50, %v5781_v26 }
 0x274   :  { %v3165_v29 = vmax.f32 %v10056_v1, %v10089_v30  ;;  %v5784_v16 = vpop.f32.mrb[190].mxu0  ;;  %v3047_v38 = vadd.f32 %v5783_v42, %v2942_v39 }
 0x275   :  { %v5785_v60 = vpop.f32.mrb[191].mxu0 }
 0x276   :  { %v5786_v10 = vadd.f32 %v5785_v60, %v5784_v16  ;;  %v10093_v17 = vadd.f32 %v3151_v9, %v3047_v38 }
 0x278   :  { %v3052_v25 = vadd.f32 %v5786_v10, %v2947_v63  ;;  %v3166_v44 = vmax.f32 %v10062_v53, %v10093_v17  ;;  %v5839_v49 = vpop.f32.mrb[192].mxu0 }
 0x279   :  { %v5895_v46 = vpop.f32.mrb[144].mxu1  ;;  %v5840_v24 = vpop.f32.mrb[193].mxu0 }
 0x27a   :  { %v10097_v52 = vadd.f32 %v6398_v48, %v3052_v25  ;;  %v5841_v54 = vadd.f32 %v5840_v24, %v5839_v49  ;;  %v5896_v31 = vpop.f32.mrb[145].mxu1 }
 0x27b   :  { %v5897_v37 = vadd.f32 %v5896_v31, %v5895_v46 }
 0x27c   :  { %v3167_v45 = vmax.f32 %v10067_v21, %v10097_v52  ;;  %v5842_v39 = vpop.f32.mrb[194].mxu0 }
 0x27d   :  { %v3421_v27 = vadd.f32 %v5897_v37, %v5841_v54  ;;  %v5898_v34 = vpop.f32.mrb[146].mxu1  ;;  %v5843_v8 = vpop.f32.mrb[195].mxu0 }
 0x27e   :  { %v5844_v5 = vadd.f32 %v5843_v8, %v5842_v39  ;;  %v5899_v63 = vpop.f32.mrb[147].mxu1 }
 0x27f   :  { %v5900_v6 = vadd.f32 %v5899_v63, %v5898_v34 }
 0x280   :  { %v5845_v55 = vpop.f32.mrb[196].mxu0 }
 0x281   :  { %v3426_v62 = vadd.f32 %v5900_v6, %v5844_v5  ;;  %v5901_v51 = vpop.f32.mrb[148].mxu1  ;;  %v5846_v40 = vpop.f32.mrb[197].mxu0 }
 0x282   :  { %v5847_v18 = vadd.f32 %v5846_v40, %v5845_v55  ;;  %v5902_v20 = vpop.f32.mrb[149].mxu1 }
 0x283   :  { %v5903_v15 = vadd.f32 %v5902_v20, %v5901_v51 }
 0x284   :  { %v5848_v19 = vpop.f32.mrb[198].mxu0 }
 0x285   :  { %v3431_v48 = vadd.f32 %v5903_v15, %v5847_v18  ;;  %v5904_v22 = vpop.f32.mrb[150].mxu1  ;;  %v5849_v32 = vpop.f32.mrb[199].mxu0 }
 0x286   :  { %v5850_v9 = vadd.f32 %v5849_v32, %v5848_v19  ;;  %v5905_v7 = vpop.f32.mrb[151].mxu1 }
 0x287   :  { %v5906_v57 = vadd.f32 %v5905_v7, %v5904_v22 }
 0x288   :  { %v5851_v28 = vpop.f32.mrb[200].mxu0 }
 0x289   :  { %v3436_v43 = vadd.f32 %v5906_v57, %v5850_v9  ;;  %v5907_v23 = vpop.f32.mrb[152].mxu1  ;;  %v5852_v35 = vpop.f32.mrb[201].mxu0 }
 0x28a   :  { %v5853_v36 = vadd.f32 %v5852_v35, %v5851_v28  ;;  %v5908_v26 = vpop.f32.mrb[153].mxu1 }
 0x28b   :  { %v5909_v50 = vadd.f32 %v5908_v26, %v5907_v23 }
 0x28c   :  { %v5854_v42 = vpop.f32.mrb[202].mxu0 }
 0x28d   :  { %v3441_v16 = vadd.f32 %v5909_v50, %v5853_v36  ;;  %v5910_v38 = vpop.f32.mrb[154].mxu1  ;;  %v5855_v60 = vpop.f32.mrb[203].mxu0 }
 0x28e   :  { %v5856_v10 = vadd.f32 %v5855_v60, %v5854_v42  ;;  %v5911_v25 = vpop.f32.mrb[155].mxu1 }
 0x28f   :  { %v5912_v49 = vadd.f32 %v5911_v25, %v5910_v38 }
 0x290   :  { %v5857_v46 = vpop.f32.mrb[204].mxu0 }
 0x291   :  { %v3446_v24 = vadd.f32 %v5912_v49, %v5856_v10  ;;  %v5913_v54 = vpop.f32.mrb[156].mxu1  ;;  %v5858_v31 = vpop.f32.mrb[205].mxu0 }
 0x292   :  { %v5859_v37 = vadd.f32 %v5858_v31, %v5857_v46  ;;  %v5914_v39 = vpop.f32.mrb[157].mxu1 }
 0x293   :  { %v5915_v34 = vadd.f32 %v5914_v39, %v5913_v54 }
 0x294   :  { %v5860_v8 = vpop.f32.mrb[206].mxu0 }
 0x295   :  { %v3451_v5 = vadd.f32 %v5915_v34, %v5859_v37  ;;  %v5916_v63 = vpop.f32.mrb[158].mxu1  ;;  %v5861_v6 = vpop.f32.mrb[207].mxu0 }
 0x296   :  { %v5862_v55 = vadd.f32 %v5861_v6, %v5860_v8  ;;  %v5917_v51 = vpop.f32.mrb[159].mxu1 }
 0x297   :  { %v5918_v40 = vadd.f32 %v5917_v51, %v5916_v63 }
 0x298   :  { %v5951_v18 = vpop.f32.mrb[208].mxu0 }
 0x299   :  { %v3456_v20 = vadd.f32 %v5918_v40, %v5862_v55  ;;  %v5952_v15 = vpop.f32.mrb[209].mxu0  ;;  %v6425_v19 = vpop.f32.mrb[160].mxu1 }
 0x29a   :  { %v5953_v22 = vadd.f32 %v5952_v15, %v5951_v18  ;;  %v3630_v32 = vpop.f32.mrb[161].mxu1 }
 0x29c   :  { %v5954_v9 = vpop.f32.mrb[210].mxu0  ;;  %v3526_v7 = vadd.f32 %v5953_v22, %v3421_v27 }
 0x29d   :  { %v5955_v57 = vpop.f32.mrb[211].mxu0 }
 0x29e   :  { %v5956_v28 = vadd.f32 %v5955_v57, %v5954_v9  ;;  %v3631_v23 = vadd.f32 %v3630_v32, %v3526_v7 }
 0x29f   :  { %v6428_v35 = vpop.f32.mrb[162].mxu1 }
 0x2a0   :  { %v3531_v36 = vadd.f32 %v5956_v28, %v3426_v62  ;;  %v10104_v26 = vmax.f32 %v3160_v2, %v3631_v23  ;;  %v5957_v50 = vpop.f32.mrb[212].mxu0  ;;  %v3640_v42 = vpop.f32.mrb[163].mxu1 }
 0x2a1   :  { %v5958_v38 = vpop.f32.mrb[213].mxu0 }
 0x2a2   :  { %v3636_v60 = vadd.f32 %v6425_v19, %v3531_v36  ;;  %v5959_v10 = vadd.f32 %v5958_v38, %v5957_v50 }
 0x2a3   :  { %v6431_v25 = vpop.f32.mrb[164].mxu1 }
 0x2a4   :  { %v10109_v27 = vmax.f32 %v3161_v33, %v3636_v60  ;;  %v5960_v49 = vpop.f32.mrb[214].mxu0  ;;  %v3536_v46 = vadd.f32 %v5959_v10, %v3431_v48  ;;  %v3650_v54 = vpop.f32.mrb[165].mxu1 }
 0x2a5   :  { %v5961_v62 = vpop.f32.mrb[215].mxu0 }
 0x2a6   :  { %v5962_v31 = vadd.f32 %v5961_v62, %v5960_v49  ;;  %v3641_v37 = vadd.f32 %v3640_v42, %v3536_v46 }
 0x2a7   :  { %v6434_v11 = vpop.f32.mrb[166].mxu1 }
 0x2a8   :  { %v3541_v58 = vadd.f32 %v5962_v31, %v3436_v43  ;;  %v10114_v2 = vmax.f32 %v3162_v4, %v3641_v37  ;;  %v5963_v39 = vpop.f32.mrb[216].mxu0  ;;  %v3660_v34 = vpop.f32.mrb[167].mxu1 }
 0x2a9   :  { %v5964_v8 = vpop.f32.mrb[217].mxu0 }
 0x2aa   :  { %v3646_v63 = vadd.f32 %v6428_v35, %v3541_v58  ;;  %v5965_v61 = vadd.f32 %v5964_v8, %v5963_v39 }
 0x2ac   :  { %v10119_v13 = vmax.f32 %v3163_v56, %v3646_v63  ;;  %v5966_v33 = vpop.f32.mrb[218].mxu0  ;;  %v3546_v48 = vadd.f32 %v5965_v61, %v3441_v16 }
 0x2ad   :  { %v5967_v6 = vpop.f32.mrb[219].mxu0 }
 0x2ae   :  { %v5968_v55 = vadd.f32 %v5967_v6, %v5966_v33  ;;  %v3651_v43 = vadd.f32 %v3650_v54, %v3546_v48 }
 0x2b0   :  { %v3551_v51 = vadd.f32 %v5968_v55, %v3446_v24  ;;  %v10124_v3 = vmax.f32 %v3164_v47, %v3651_v43  ;;  %v5969_v0 = vpop.f32.mrb[220].mxu0 }
 0x2b1   :  { %v5970_v4 = vpop.f32.mrb[221].mxu0 }
 0x2b2   :  { %v3656_v40 = vadd.f32 %v6431_v25, %v3551_v51  ;;  %v5971_v18 = vadd.f32 %v5970_v4, %v5969_v0 }
 0x2b4   :  { %v10129_v41 = vmax.f32 %v3165_v29, %v3656_v40  ;;  %v5972_v12 = vpop.f32.mrb[222].mxu0  ;;  %v3556_v56 = vadd.f32 %v5971_v18, %v3451_v5 }
 0x2b5   :  { %v5973_v16 = vpop.f32.mrb[223].mxu0 }
 0x2b6   :  { %v5974_v15 = vadd.f32 %v5973_v16, %v5972_v12  ;;  %v3661_v19 = vadd.f32 %v3660_v34, %v3556_v56 }
 0x2b8   :  { %v3561_v24 = vadd.f32 %v5974_v15, %v3456_v20  ;;  %v10134_v14 = vmax.f32 %v3166_v44, %v3661_v19  ;;  %v6027_v59 = vpop.f32.mrb[224].mxu0 }
 0x2b9   :  { %v6083_v47 = vpop.f32.mrb[168].mxu1  ;;  %v6028_v22 = vpop.f32.mrb[225].mxu0 }
 0x2ba   :  { %v3666_v32 = vadd.f32 %v6434_v11, %v3561_v24  ;;  %v6029_v9 = vadd.f32 %v6028_v22, %v6027_v59  ;;  %v6084_v7 = vpop.f32.mrb[169].mxu1 }
 0x2bb   :  { %v6085_v1 = vadd.f32 %v6084_v7, %v6083_v47 }
 0x2bc   :  { %v10139_v30 = vmax.f32 %v3167_v45, %v3666_v32  ;;  %v6030_v29 = vpop.f32.mrb[226].mxu0 }
 0x2bd   :  { %v3930_v5 = vadd.f32 %v6085_v1, %v6029_v9  ;;  %v6086_v20 = vpop.f32.mrb[170].mxu1  ;;  %v6031_v57 = vpop.f32.mrb[227].mxu0 }
 0x2be   :  { %v6032_v28 = vadd.f32 %v6031_v57, %v6030_v29  ;;  %v6087_v53 = vpop.f32.mrb[171].mxu1 }
 0x2bf   :  { %v6088_v17 = vadd.f32 %v6087_v53, %v6086_v20 }
 0x2c0   :  { %v6033_v44 = vpop.f32.mrb[228].mxu0 }
 0x2c1   :  { %v3935_v23 = vadd.f32 %v6088_v17, %v6032_v28  ;;  %v6089_v35 = vpop.f32.mrb[172].mxu1  ;;  %v6034_v36 = vpop.f32.mrb[229].mxu0 }
 0x2c2   :  { %v6035_v50 = vadd.f32 %v6034_v36, %v6033_v44  ;;  %v6090_v42 = vpop.f32.mrb[173].mxu1  ;;  %v10156_v44 = vld [vmem:[%s10214_s2] ss:$0 sm:$0xff] }
 0x2c3   :  { %v6091_v38 = vadd.f32 %v6090_v42, %v6089_v35 }
 0x2c4   :  { %v6036_v60 = vpop.f32.mrb[230].mxu0 }
 0x2c5   :  { %v10141_v10 = vadd.f32 %v6091_v38, %v6035_v50  ;;  %v6092_v21 = vpop.f32.mrb[174].mxu1  ;;  %v6037_v52 = vpop.f32.mrb[231].mxu0 }
 0x2c6   :  { %v6038_v45 = vadd.f32 %v6037_v52, %v6036_v60  ;;  %v6093_v25 = vpop.f32.mrb[175].mxu1 }
 0x2c7   :  { %v6094_v49 = vadd.f32 %v6093_v25, %v6092_v21 }
 0x2c8   :  { %v6039_v46 = vpop.f32.mrb[232].mxu0 }
 0x2c9   :  { %v10143_v54 = vadd.f32 %v6094_v49, %v6038_v45  ;;  %v6095_v62 = vpop.f32.mrb[176].mxu1  ;;  %v6040_v31 = vpop.f32.mrb[233].mxu0 }
 0x2ca   :  { %v6041_v37 = vadd.f32 %v6040_v31, %v6039_v46  ;;  %v6096_v11 = vpop.f32.mrb[177].mxu1 }
 0x2cb   :  { %v6097_v58 = vadd.f32 %v6096_v11, %v6095_v62 }
 0x2cc   :  { %v6042_v39 = vpop.f32.mrb[234].mxu0 }
 0x2cd   :  { %v10145_v34 = vadd.f32 %v6097_v58, %v6041_v37  ;;  %v6098_v8 = vpop.f32.mrb[178].mxu1  ;;  %v6043_v63 = vpop.f32.mrb[235].mxu0 }
 0x2ce   :  { %v6044_v61 = vadd.f32 %v6043_v63, %v6042_v39  ;;  %v6099_v33 = vpop.f32.mrb[179].mxu1 }
 0x2cf   :  { %v6100_v48 = vadd.f32 %v6099_v33, %v6098_v8 }
 0x2d0   :  { %v6045_v6 = vpop.f32.mrb[236].mxu0 }
 0x2d1   :  { %v10147_v55 = vadd.f32 %v6100_v48, %v6044_v61  ;;  %v6101_v43 = vpop.f32.mrb[180].mxu1  ;;  %v6046_v51 = vpop.f32.mrb[237].mxu0 }
 0x2d2   :  { %v6047_v0 = vadd.f32 %v6046_v51, %v6045_v6  ;;  %v6102_v4 = vpop.f32.mrb[181].mxu1 }
 0x2d3   :  { %v6103_v40 = vadd.f32 %v6102_v4, %v6101_v43 }
 0x2d4   :  { %v6048_v18 = vpop.f32.mrb[238].mxu0 }
 0x2d5   :  { %v10149_v12 = vadd.f32 %v6103_v40, %v6047_v0  ;;  %v6104_v56 = vpop.f32.mrb[182].mxu1  ;;  %v6049_v16 = vpop.f32.mrb[239].mxu0 }
 0x2d6   :  { %v6050_v15 = vadd.f32 %v6049_v16, %v6048_v18  ;;  %v6105_v19 = vpop.f32.mrb[183].mxu1 }
 0x2d7   :  { %v6106_v24 = vadd.f32 %v6105_v19, %v6104_v56 }
 0x2d8   :  { %v6139_v59 = vpop.f32.mrb[240].mxu0 }
 0x2d9   :  { %v10151_v47 = vadd.f32 %v6106_v24, %v6050_v15  ;;  %v6140_v22 = vpop.f32.mrb[241].mxu0  ;;  %v6461_v32 = vpop.f32.mrb[184].mxu1 }
 0x2da   :  { %v6141_v9 = vadd.f32 %v6140_v22, %v6139_v59  ;;  %v4139_v7 = vpop.f32.mrb[185].mxu1 }
 0x2dc   :  { %v6142_v1 = vpop.f32.mrb[242].mxu0  ;;  %v4035_v29 = vadd.f32 %v6141_v9, %v3930_v5 }
 0x2dd   :  { %v6143_v20 = vpop.f32.mrb[243].mxu0  ;;  %v6464_v57 = vpop.f32.mrb[186].mxu1 }
 0x2de   :  { %v6144_v28 = vadd.f32 %v6143_v20, %v6142_v1  ;;  %v4140_v53 = vadd.f32 %v4139_v7, %v4035_v29  ;;  %v4149_v17 = vpop.f32.mrb[187].mxu1 }
 0x2e0   :  { %v4040_v35 = vadd.f32 %v6144_v28, %v3935_v23  ;;  %v4178_v36 = vmax.f32 %v10104_v26, %v4140_v53  ;;  %v6145_v50 = vpop.f32.mrb[244].mxu0 }
 0x2e1   :  { %v6146_v42 = vpop.f32.mrb[245].mxu0  ;;  %v6467_v38 = vpop.f32.mrb[188].mxu1 }
 0x2e2   :  { %v4145_v60 = vadd.f32 %v6461_v32, %v4040_v35  ;;  %v4193_v21 = vadd.f32 %v10156_v44, %v4178_v36  ;;  %v6147_v5 = vadd.f32 %v6146_v42, %v6145_v50  ;;  %v4159_v52 = vpop.f32.mrb[189].mxu1 }
 0x2e4   :  { %v4179_v45 = vmax.f32 %v10109_v27, %v4145_v60  ;;  %v4201_v25 = vmax.f32 %v4193_v21, 0.0  ;;  %v6148_v49 = vpop.f32.mrb[246].mxu0  ;;  %v4045_v46 = vadd.f32 %v6147_v5, %v10141_v10 }
 0x2e5   :  { %v6149_v62 = vpop.f32.mrb[247].mxu0  ;;  %v6470_v31 = vpop.f32.mrb[190].mxu1 }
 0x2e6   :  { %v4194_v23 = vadd.f32 %v10156_v44, %v4179_v45  ;;  %4210 = vst.msk [vmem:[%s10215_s3] sm:$0xff] %vm4209_vm1, %v4201_v25  ;;  %v6150_v26 = vadd.f32 %v6149_v62, %v6148_v49  ;;  %v4150_v37 = vadd.f32 %v4149_v17, %v4045_v46  ;;  %v4169_v11 = vpop.f32.mrb[191].mxu1 }
 0x2e8   :  { %v4202_v58 = vmax.f32 %v4194_v23, 0.0  ;;  %v4050_v39 = vadd.f32 %v6150_v26, %v10143_v54  ;;  %v4180_v27 = vmax.f32 %v10114_v2, %v4150_v37  ;;  %v6151_v8 = vpop.f32.mrb[248].mxu0 }
 0x2e9   :  { %v6152_v63 = vpop.f32.mrb[249].mxu0 }
 0x2ea   :  { %4211 = vst.msk [vmem:[%s10215_s3 + $0x8] sm:$0xff] %vm4209_vm1, %v4202_v58  ;;  %v4155_v10 = vadd.f32 %v6464_v57, %v4050_v39  ;;  %v4195_v61 = vadd.f32 %v10156_v44, %v4180_v27  ;;  %v6153_v33 = vadd.f32 %v6152_v63, %v6151_v8 }
 0x2ec   :  { %v4181_v48 = vmax.f32 %v10119_v13, %v4155_v10  ;;  %v4203_v6 = vmax.f32 %v4195_v61, 0.0  ;;  %v6154_v43 = vpop.f32.mrb[250].mxu0  ;;  %v4055_v51 = vadd.f32 %v6153_v33, %v10145_v34 }
 0x2ed   :  { %v6155_v54 = vpop.f32.mrb[251].mxu0 }
 0x2ee   :  { %v4196_v2 = vadd.f32 %v10156_v44, %v4181_v48  ;;  %4212 = vst.msk [vmem:[%s10215_s3 + $0x10] sm:$0xff] %vm4209_vm1, %v4203_v6  ;;  %v6156_v0 = vadd.f32 %v6155_v54, %v6154_v43  ;;  %v4160_v4 = vadd.f32 %v4159_v52, %v4055_v51 }
 0x2f0   :  { %v4204_v40 = vmax.f32 %v4196_v2, 0.0  ;;  %v4060_v18 = vadd.f32 %v6156_v0, %v10147_v55  ;;  %v4182_v56 = vmax.f32 %v10124_v3, %v4160_v4  ;;  %v6157_v13 = vpop.f32.mrb[252].mxu0 }
 0x2f1   :  { %v6158_v16 = vpop.f32.mrb[253].mxu0 }
 0x2f2   :  { %4213 = vst.msk [vmem:[%s10215_s3 + $0x18] sm:$0xff] %vm4209_vm1, %v4204_v40  ;;  %v4165_v34 = vadd.f32 %v6467_v38, %v4060_v18  ;;  %v4197_v15 = vadd.f32 %v10156_v44, %v4182_v56  ;;  %v6159_v19 = vadd.f32 %v6158_v16, %v6157_v13 }
 0x2f4   :  { %v4183_v24 = vmax.f32 %v10129_v41, %v4165_v34  ;;  %v4205_v59 = vmax.f32 %v4197_v15, 0.0  ;;  %v6160_v22 = vpop.f32.mrb[254].mxu0  ;;  %v4065_v32 = vadd.f32 %v6159_v19, %v10149_v12 }
 0x2f5   :  { %v6161_v55 = vpop.f32.mrb[255].mxu0 }
 0x2f6   :  { %v4198_v3 = vadd.f32 %v10156_v44, %v4183_v24  ;;  %4214 = vst.msk [vmem:[%s10215_s3 + $0x20] sm:$0xff] %vm4209_vm1, %v4205_v59  ;;  %v6162_v9 = vadd.f32 %v6161_v55, %v6160_v22  ;;  %v4170_v7 = vadd.f32 %v4169_v11, %v4065_v32 }
 0x2f8   :  { %v4206_v1 = vmax.f32 %v4198_v3, 0.0  ;;  %v4070_v29 = vadd.f32 %v6162_v9, %v10151_v47  ;;  %v4184_v20 = vmax.f32 %v10134_v14, %v4170_v7 }
 0x2fa   :  { %4215 = vst.msk [vmem:[%s10215_s3 + $0x28] sm:$0xff] %vm4209_vm1, %v4206_v1  ;;  %v4175_v41 = vadd.f32 %v6470_v31, %v4070_v29  ;;  %v4199_v12 = vadd.f32 %v10156_v44, %v4184_v20 }
 0x2fc   :  { %v4185_v57 = vmax.f32 %v10139_v30, %v4175_v41  ;;  %v4207_v28 = vmax.f32 %v4199_v12, 0.0 }
 0x2fe   :  { %v4200_v53 = vadd.f32 %v10156_v44, %v4185_v57  ;;  %4216 = vst.msk [vmem:[%s10215_s3 + $0x30] sm:$0xff] %vm4209_vm1, %v4207_v28 }
 0x300   :  { %v4208_v47 = vmax.f32 %v4200_v53, 0.0 }
 0x302   :  { %4217 = vst.msk [vmem:[%s10215_s3 + $0x38] sm:$0xff] %vm4209_vm1, %v4208_v47 }

// kernel: mm_student_forward.7
= control target key start
LH: loop header
LB: loop body
LE: loop exit
PB: predicated region body
PF: predicated region fallthrough
CT: control target
= control target key end

     0   :  { %s1667_s12 = smov 0   ;;  %s2417_s0 = inlined_call_operand.vmem [shape: f32[2,32,1728], index: 0, kind: input, shape index: {}]   ;;  %s2418_s1 = inlined_call_operand.vmem [shape: f32[1728,32], index: 1, kind: input, shape index: {}]   ;;  %s2419_s2 = inlined_call_operand.vmem [shape: f32[1,32], index: 2, kind: input, shape index: {}]   ;;  %s2420_s3 = inlined_call_operand.vmem [shape: f32[2,1,32], index: 3, kind: output, shape index: {}]  }
   0x1 LB: > { %s1123_s13 = sadd.s32 4294967295, %s1644_s12   ;;  %p1127_p0 = scmp.ge.s32.totalorder %s1644_s12, 1  ;;  %s1644_s12 = sphi %s1667_s12, %s13_s12  }
   0x2   : > { %p137_p1 = scmp.lt.s32.totalorder %s1644_s12, 3 }
   0x4   : > { %p138_p2 = pnand %p1127_p0, %p137_p1 }
   0x5   : > { %v239_v0 = vld [vmem:[%s2418_s1 + $0x80] sm:$0xff] (!%p138_p2)  ;;  %v240_v1 = vld [vmem:[%s2418_s1 + $0x88] sm:$0xff] (!%p138_p2)  ;;  %p159_p3 = scmp.lt.s32.totalorder (!%p138_p2), %s1123_s13, 1  ;;  %v241_v5 = vld [vmem:[%s2418_s1 + $0x90] sm:$0xff] (!%p138_p2)  ;;  %vm446_vm0 = vcmask (!%p138_p2), 523264   ;;  %vm1058_vm1 = vcmask (!%p138_p2), 261120  }
   0x6   : > { %141 = sbr.rel (%p138_p2) target bundleno = 387 (0x183), region = 32  ;;  %v223_v2 = vld [vmem:[%s2418_s1] sm:$0xff] (!%p138_p2)  ;;  %v1400_v3 = vpack.c.bf16 (!%p138_p2), %v240_v1, %v239_v0  ;;  %v224_v4 = vld [vmem:[%s2418_s1 + $0x8] sm:$0xff] (!%p138_p2)  ;;  %v242_v6 = vld [vmem:[%s2418_s1 + $0x98] sm:$0xff] (!%p138_p2)  ;;  %vm1074_vm2 = vcmask (!%p138_p2), 253952  }
   0x7   : > { %v1402_v7 = vpack.c.bf16 (!%p138_p2), %v224_v4, %v223_v2  ;;  %v1404_v8 = vpack.c.bf16 (!%p138_p2), %v242_v6, %v241_v5  ;;  %v225_v9 = vld [vmem:[%s2418_s1 + $0x10] sm:$0xff] (!%p138_p2)  ;;  %v226_v10 = vld [vmem:[%s2418_s1 + $0x18] sm:$0xff] (!%p138_p2)  ;;  %v243_v11 = vld [vmem:[%s2418_s1 + $0xa0] sm:$0xff] (!%p138_p2) }
   0x8   : > { %1401 = vmatprep.subr.bf16.mxu1 (!%p138_p2), %v1400_v3  ;;  %v244_v12 = vld [vmem:[%s2418_s1 + $0xa8] sm:$0xff] (!%p138_p2)  ;;  %v1406_v13 = vpack.c.bf16 (!%p138_p2), %v226_v10, %v225_v9  ;;  %v227_v15 = vld [vmem:[%s2418_s1 + $0x20] sm:$0xff] (!%p138_p2)  ;;  %v245_v17 = vld [vmem:[%s2418_s1 + $0xb0] sm:$0xff] (!%p138_p2) }
   0x9   : > { %1403 = vmatpush3.bf16.msra.mxu1 (!%p138_p2), %v1402_v7  ;;  %v1408_v14 = vpack.c.bf16 (!%p138_p2), %v244_v12, %v243_v11  ;;  %v228_v16 = vld [vmem:[%s2418_s1 + $0x28] sm:$0xff] (!%p138_p2)  ;;  %v246_v18 = vld [vmem:[%s2418_s1 + $0xb8] sm:$0xff] (!%p138_p2)  ;;  %v303_v19 = vld [vmem:[%s2418_s1 + $0x280] sm:$0xff] (!%p138_p2) }
   0xa   : > { %1405 = vmatprep.subr.bf16.mxu1 (!%p138_p2), %v1404_v8  ;;  %v304_v20 = vld [vmem:[%s2418_s1 + $0x288] sm:$0xff] (!%p138_p2)  ;;  %v1410_v21 = vpack.c.bf16 (!%p138_p2), %v228_v16, %v227_v15  ;;  %v229_v22 = vld [vmem:[%s2418_s1 + $0x30] sm:$0xff] (!%p138_p2)  ;;  %v287_v24 = vld [vmem:[%s2418_s1 + $0x200] sm:$0xff] (!%p138_p2)  ;;  %v1412_v25 = vpack.c.bf16 (!%p138_p2), %v246_v18, %v245_v17 }
   0xb   : > { %v1464_v23 = vpack.c.bf16 (!%p138_p2), %v304_v20, %v303_v19  ;;  %v230_v26 = vld [vmem:[%s2418_s1 + $0x38] sm:$0xff] (!%p138_p2)  ;;  %v247_v27 = vld [vmem:[%s2418_s1 + $0xc0] sm:$0xff] (!%p138_p2)  ;;  %v288_v28 = vld [vmem:[%s2418_s1 + $0x208] sm:$0xff] (!%p138_p2) }
   0xc   : > { %v248_v29 = vld [vmem:[%s2418_s1 + $0xc8] sm:$0xff] (!%p138_p2)  ;;  %v1466_v30 = vpack.c.bf16 (!%p138_p2), %v288_v28, %v287_v24  ;;  %v305_v31 = vld [vmem:[%s2418_s1 + $0x290] sm:$0xff] (!%p138_p2)  ;;  %v306_v32 = vld [vmem:[%s2418_s1 + $0x298] sm:$0xff] (!%p138_p2)  ;;  %v1414_v36 = vpack.c.bf16 (!%p138_p2), %v230_v26, %v229_v22 }
   0xd   : > { %s2422_s13 = smov (!%p159_p3, %s1123_s13), 1  ;;  %1407 = vmatpush3.bf16.msra.mxu1 %v1406_v13  ;;  %1465 = vmatprep.subr.bf16.mxu0 %v1464_v23  ;;  %v1468_v33 = vpack.c.bf16 %v306_v32, %v305_v31  ;;  %v289_v34 = vld [vmem:[%s2418_s1 + $0x210] sm:$0xff]  ;;  %v290_v35 = vld [vmem:[%s2418_s1 + $0x218] sm:$0xff]  ;;  %v231_v37 = vld [vmem:[%s2418_s1 + $0x40] sm:$0xff]  ;;  %v1416_v41 = vpack.c.bf16 %v248_v29, %v247_v27 }
   0xe   : > { %s1628_s21 = smul.u32 448, %s2422_s13  ;;  %1409 = vmatprep.subr.bf16.mxu1 %v1408_v14  ;;  %v232_v38 = vld [vmem:[%s2418_s1 + $0x48] sm:$0xff]  ;;  %1467 = vmatpush3.bf16.msra.mxu0 %v1466_v30  ;;  %v1470_v39 = vpack.c.bf16 %v290_v35, %v289_v34  ;;  %v307_v40 = vld [vmem:[%s2418_s1 + $0x2a0] sm:$0xff]  ;;  %v249_v42 = vld [vmem:[%s2418_s1 + $0xd0] sm:$0xff]  ;;  %s166_s18 = scalar_lea.vmem %s2420_s3, %s2422_s13 }
   0xf   : > { %v250_v43 = vld [vmem:[%s2418_s1 + $0xd8] sm:$0xff]  ;;  %1469 = vmatprep.subr.bf16.mxu0 %v1468_v33  ;;  %v308_v44 = vld [vmem:[%s2418_s1 + $0x2a8] sm:$0xff]  ;;  %v291_v46 = vld [vmem:[%s2418_s1 + $0x220] sm:$0xff]  ;;  %v1418_v49 = vpack.c.bf16 %v232_v38, %v231_v37 }
  0x10   : > { %s1759_s19 = scalar_lea.vmem %s2417_s0, %s1628_s21  ;;  %v1472_v45 = vpack.c.bf16 %v308_v44, %v307_v40  ;;  %v292_v47 = vld [vmem:[%s2418_s1 + $0x228] sm:$0xff]  ;;  %v233_v50 = vld [vmem:[%s2418_s1 + $0x50] sm:$0xff]  ;;  %v310_v53 = vld [vmem:[%s2418_s1 + $0x2b8] sm:$0xff]  ;;  %v1420_v54 = vpack.c.bf16 %v250_v43, %v249_v42 }
  0x11   : > { %1411 = vmatpush3.bf16.msra.mxu1 %v1410_v21  ;;  %v168_v48 = vld [vmem:[%s1759_s19 + $0x8] sm:$0xff]  ;;  %v1474_v51 = vpack.c.bf16 %v292_v47, %v291_v46  ;;  %v309_v52 = vld [vmem:[%s2418_s1 + $0x2b0] sm:$0xff]  ;;  %v234_v55 = vld [vmem:[%s2418_s1 + $0x58] sm:$0xff] }
  0x12   : > { %1413 = vmatprep.subr.bf16.mxu1 %v1412_v25  ;;  %523 = vmatprep.mubr.f32.mxu1 %v168_v48  ;;  %v1476_v56 = vpack.c.bf16 %v310_v53, %v309_v52  ;;  %v293_v57 = vld [vmem:[%s2418_s1 + $0x230] sm:$0xff]  ;;  %v294_v58 = vld [vmem:[%s2418_s1 + $0x238] sm:$0xff]  ;;  %v251_v59 = vld [vmem:[%s2418_s1 + $0xe0] sm:$0xff]  ;;  %v1422_v63 = vpack.c.bf16 %v234_v55, %v233_v50 }
  0x13   : > { %1471 = vmatpush3.bf16.msra.mxu0 %v1470_v39  ;;  %v252_v60 = vld [vmem:[%s2418_s1 + $0xe8] sm:$0xff]  ;;  %v311_v61 = vld [vmem:[%s2418_s1 + $0x2c0] sm:$0xff]  ;;  %v1478_v2 = vpack.c.bf16 %v294_v58, %v293_v57  ;;  %v253_v4 = vld [vmem:[%s2418_s1 + $0xf0] sm:$0xff] }
  0x14   : > { %1473 = vmatprep.subr.bf16.mxu0 %v1472_v45  ;;  %v312_v62 = vld [vmem:[%s2418_s1 + $0x2c8] sm:$0xff]  ;;  %v235_v0 = vld [vmem:[%s2418_s1 + $0x60] sm:$0xff]  ;;  %v1424_v3 = vpack.c.bf16 %v252_v60, %v251_v59  ;;  %v254_v8 = vld [vmem:[%s2418_s1 + $0xf8] sm:$0xff] }
  0x15   : > { %1415 = vmatpush3.bf16.msra.mxu1 %v1414_v36  ;;  %v236_v1 = vld [vmem:[%s2418_s1 + $0x68] sm:$0xff]  ;;  %v1480_v5 = vpack.c.bf16 %v312_v62, %v311_v61  ;;  %v295_v6 = vld [vmem:[%s2418_s1 + $0x240] sm:$0xff]  ;;  %v313_v9 = vld [vmem:[%s2418_s1 + $0x2d0] sm:$0xff]  ;;  %v1428_v15 = vpack.c.bf16 %v254_v8, %v253_v4 }
  0x16   : > { %1417 = vmatprep.subr.bf16.mxu1 %v1416_v41  ;;  %v296_v7 = vld [vmem:[%s2418_s1 + $0x248] sm:$0xff]  ;;  %v314_v10 = vld [vmem:[%s2418_s1 + $0x2d8] sm:$0xff]  ;;  %v1426_v11 = vpack.c.bf16 %v236_v1, %v235_v0  ;;  %v237_v12 = vld [vmem:[%s2418_s1 + $0x70] sm:$0xff] }
  0x17   : > { %1475 = vmatpush3.bf16.msra.mxu0 %v1474_v51  ;;  %v238_v13 = vld [vmem:[%s2418_s1 + $0x78] sm:$0xff]  ;;  %v1482_v14 = vpack.c.bf16 %v296_v7, %v295_v6  ;;  %v271_v16 = vld [vmem:[%s2418_s1 + $0x180] sm:$0xff]  ;;  %v1484_v17 = vpack.c.bf16 %v314_v10, %v313_v9  ;;  %v297_v18 = vld [vmem:[%s2418_s1 + $0x250] sm:$0xff] }
  0x18   : > { %1477 = vmatprep.subr.bf16.mxu0 %v1476_v56  ;;  %v298_v19 = vld [vmem:[%s2418_s1 + $0x258] sm:$0xff]  ;;  %v272_v20 = vld [vmem:[%s2418_s1 + $0x188] sm:$0xff]  ;;  %v315_v21 = vld [vmem:[%s2418_s1 + $0x2e0] sm:$0xff]  ;;  %v1430_v23 = vpack.c.bf16 %v238_v13, %v237_v12 }
  0x19   : > { %1419 = vmatpush3.bf16.msra.mxu1 %v1418_v49  ;;  %v316_v22 = vld [vmem:[%s2418_s1 + $0x2e8] sm:$0xff]  ;;  %v255_v24 = vld [vmem:[%s2418_s1 + $0x100] sm:$0xff]  ;;  %v273_v26 = vld [vmem:[%s2418_s1 + $0x190] sm:$0xff]  ;;  %v1486_v27 = vpack.c.bf16 %v298_v19, %v297_v18  ;;  %v1432_v28 = vpack.c.bf16 %v272_v20, %v271_v16 }
  0x1a   : > { %1421 = vmatprep.subr.bf16.mxu1 %v1420_v54  ;;  %v256_v25 = vld [vmem:[%s2418_s1 + $0x108] sm:$0xff]  ;;  %v274_v29 = vld [vmem:[%s2418_s1 + $0x198] sm:$0xff]  ;;  %v1488_v30 = vpack.c.bf16 %v316_v22, %v315_v21  ;;  %v299_v31 = vld [vmem:[%s2418_s1 + $0x260] sm:$0xff] }
  0x1b   : > { %1479 = vmatpush3.bf16.msra.mxu0 %v1478_v2  ;;  %v300_v32 = vld [vmem:[%s2418_s1 + $0x268] sm:$0xff]  ;;  %v317_v33 = vld [vmem:[%s2418_s1 + $0x2f0] sm:$0xff]  ;;  %v318_v34 = vld [vmem:[%s2418_s1 + $0x2f8] sm:$0xff]  ;;  %v1434_v37 = vpack.c.bf16 %v256_v25, %v255_v24  ;;  %v1436_v41 = vpack.c.bf16 %v274_v29, %v273_v26 }
  0x1c   : > { %1481 = vmatprep.subr.bf16.mxu0 %v1480_v5  ;;  %v172_v35 = vld [vmem:[%s1759_s19 + $0x28] sm:$0xff]  ;;  %v167_v36 = vld [vmem:[%s1759_s19] sm:$0xff]  ;;  %v257_v38 = vld [vmem:[%s2418_s1 + $0x110] sm:$0xff]  ;;  %v1490_v40 = vpack.c.bf16 %v300_v32, %v299_v31  ;;  %v1492_v43 = vpack.c.bf16 %v318_v34, %v317_v33 }
  0x1d   : > { %1423 = vmatpush3.bf16.msra.mxu1 %v1422_v63  ;;  %693 = vmatprep.mubr.f32.mxu0 %v172_v35  ;;  %v258_v39 = vld [vmem:[%s2418_s1 + $0x118] sm:$0xff]  ;;  %v275_v42 = vld [vmem:[%s2418_s1 + $0x1a0] sm:$0xff]  ;;  %v301_v44 = vld [vmem:[%s2418_s1 + $0x270] sm:$0xff] }
  0x1e   : > { %1425 = vmatprep.subr.bf16.mxu1 %v1424_v3  ;;  %v302_v45 = vld [vmem:[%s2418_s1 + $0x278] sm:$0xff]  ;;  %v276_v46 = vld [vmem:[%s2418_s1 + $0x1a8] sm:$0xff]  ;;  %v367_v47 = vld [vmem:[%s2418_s1 + $0x480] sm:$0xff]  ;;  %v1438_v50 = vpack.c.bf16 %v258_v39, %v257_v38 }
  0x1f   : > { %1483 = vmatpush3.bf16.msra.mxu0 %v1482_v14  ;;  %v368_v48 = vld [vmem:[%s2418_s1 + $0x488] sm:$0xff]  ;;  %v182_v49 = vld [vmem:[%s1759_s19 + $0x78] sm:$0xff]  ;;  %v259_v51 = vld [vmem:[%s2418_s1 + $0x120] sm:$0xff]  ;;  %v1494_v53 = vpack.c.bf16 %v302_v45, %v301_v44  ;;  %v1440_v55 = vpack.c.bf16 %v276_v46, %v275_v42 }
  0x20   : > { %1485 = vmatprep.subr.bf16.mxu0 %v1484_v17  ;;  %v260_v52 = vld [vmem:[%s2418_s1 + $0x128] sm:$0xff]  ;;  %v181_v54 = vld [vmem:[%s1759_s19 + $0x70] sm:$0xff]  ;;  %v1528_v57 = vpack.c.bf16 %v368_v48, %v367_v47  ;;  %v351_v58 = vld [vmem:[%s2418_s1 + $0x400] sm:$0xff] }
  0x21   : > { %1427 = vmatpush3.bf16.msra.mxu1 %v1426_v11  ;;  %v277_v56 = vld [vmem:[%s2418_s1 + $0x1b0] sm:$0xff]  ;;  %v352_v59 = vld [vmem:[%s2418_s1 + $0x408] sm:$0xff]  ;;  %v278_v60 = vld [vmem:[%s2418_s1 + $0x1b8] sm:$0xff]  ;;  %v1442_v1 = vpack.c.bf16 %v260_v52, %v259_v51 }
  0x22   : > { %1429 = vmatprep.subr.bf16.mxu1 %v1428_v15  ;;  %v369_v61 = vld [vmem:[%s2418_s1 + $0x490] sm:$0xff]  ;;  %v370_v62 = vld [vmem:[%s2418_s1 + $0x498] sm:$0xff]  ;;  %v196_v0 = vld [vmem:[%s1759_s19 + $0xe8] sm:$0xff]  ;;  %v1530_v4 = vpack.c.bf16 %v352_v59, %v351_v58  ;;  %v1444_v6 = vpack.c.bf16 %v278_v60, %v277_v56 }
  0x23   : > { %1487 = vmatpush3.bf16.msra.mxu0 %v1486_v27  ;;  %v261_v63 = vld [vmem:[%s2418_s1 + $0x130] sm:$0xff]  ;;  %v262_v2 = vld [vmem:[%s2418_s1 + $0x138] sm:$0xff]  ;;  %v171_v3 = vld [vmem:[%s1759_s19 + $0x20] sm:$0xff]  ;;  %v1532_v8 = vpack.c.bf16 %v370_v62, %v369_v61 }
  0x24   : > { %1489 = vmatprep.subr.bf16.mxu0 %v1488_v30  ;;  %v195_v5 = vld [vmem:[%s1759_s19 + $0xe0] sm:$0xff]  ;;  %v353_v9 = vld [vmem:[%s2418_s1 + $0x410] sm:$0xff]  ;;  %v354_v10 = vld [vmem:[%s2418_s1 + $0x418] sm:$0xff]  ;;  %v1446_v17 = vpack.c.bf16 %v262_v2, %v261_v63 }
  0x25   : > { %1431 = vmatpush3.bf16.msra.mxu1 %v1430_v23  ;;  %v279_v7 = vld [vmem:[%s2418_s1 + $0x1c0] sm:$0xff]  ;;  %v280_v11 = vld [vmem:[%s2418_s1 + $0x1c8] sm:$0xff]  ;;  %v210_v16 = vld [vmem:[%s1759_s19 + $0x158] sm:$0xff]  ;;  %v1534_v19 = vpack.c.bf16 %v354_v10, %v353_v9 }
  0x26   : > { %1433 = vmatprep.subr.bf16.mxu1 %v1432_v28  ;;  %v371_v12 = vld [vmem:[%s2418_s1 + $0x4a0] sm:$0xff]  ;;  %v372_v13 = vld [vmem:[%s2418_s1 + $0x4a8] sm:$0xff]  ;;  %v281_v18 = vld [vmem:[%s2418_s1 + $0x1d0] sm:$0xff]  ;;  %v1448_v22 = vpack.c.bf16 %v280_v11, %v279_v7 }
  0x27   : > { %1491 = vmatpush3.bf16.msra.mxu0 %v1490_v40  ;;  %v263_v14 = vld [vmem:[%s2418_s1 + $0x140] sm:$0xff]  ;;  %v264_v15 = vld [vmem:[%s2418_s1 + $0x148] sm:$0xff]  ;;  %v209_v20 = vld [vmem:[%s1759_s19 + $0x150] sm:$0xff]  ;;  %v1536_v24 = vpack.c.bf16 %v372_v13, %v371_v12 }
  0x28   : > { %524 = vmatmul.mubr.f32.vlgmr.msra.gmra.mrb[0].mxu1 %v167_v36  ;;  %1493 = vmatprep.subr.bf16.mxu0 %v1492_v43  ;;  %v186_v21 = vld [vmem:[%s1759_s19 + $0x98] sm:$0xff]  ;;  %v355_v25 = vld [vmem:[%s2418_s1 + $0x420] sm:$0xff]  ;;  %v356_v26 = vld [vmem:[%s2418_s1 + $0x428] sm:$0xff]  ;;  %v1450_v32 = vpack.c.bf16 %v264_v15, %v263_v14 }
  0x29   : > { %1435 = vmatpush3.bf16.msra.mxu1 %v1434_v37  ;;  %528 = vmatprep.mubr.f32.mxu1 %v182_v49  ;;  %v282_v23 = vld [vmem:[%s2418_s1 + $0x1d8] sm:$0xff]  ;;  %v373_v27 = vld [vmem:[%s2418_s1 + $0x4b0] sm:$0xff]  ;;  %v283_v34 = vld [vmem:[%s2418_s1 + $0x1e0] sm:$0xff]  ;;  %v1538_v35 = vpack.c.bf16 %v356_v26, %v355_v25 }
  0x2a   : > { %1437 = vmatprep.subr.bf16.mxu1 %v1436_v41  ;;  %v374_v28 = vld [vmem:[%s2418_s1 + $0x4b8] sm:$0xff]  ;;  %v185_v29 = vld [vmem:[%s1759_s19 + $0x90] sm:$0xff]  ;;  %v200_v36 = vld [vmem:[%s1759_s19 + $0x108] sm:$0xff]  ;;  %v1452_v37 = vpack.c.bf16 %v282_v23, %v281_v18 }
  0x2b   : > { %1495 = vmatpush3.bf16.msra.mxu0 %v1494_v53  ;;  %v265_v30 = vld [vmem:[%s2418_s1 + $0x150] sm:$0xff]  ;;  %v170_v31 = vld [vmem:[%s1759_s19 + $0x18] sm:$0xff]  ;;  %v284_v38 = vld [vmem:[%s2418_s1 + $0x1e8] sm:$0xff]  ;;  %v1540_v39 = vpack.c.bf16 %v374_v28, %v373_v27 }
  0x2c   : > { %529 = vmatmul.mubr.f32.gmra.mrb[2].mxu1 %v181_v54  ;;  %1529 = vmatprep.subr.bf16.mxu0 %v1528_v57  ;;  %v266_v33 = vld [vmem:[%s2418_s1 + $0x158] sm:$0xff]  ;;  %v357_v40 = vld [vmem:[%s2418_s1 + $0x430] sm:$0xff]  ;;  %v375_v42 = vld [vmem:[%s2418_s1 + $0x4c0] sm:$0xff]  ;;  %v1456_v51 = vpack.c.bf16 %v284_v38, %v283_v34 }
  0x2d   : > { %1439 = vmatpush3.bf16.msra.mxu1 %v1438_v50  ;;  %533 = vmatprep.mubr.f32.mxu1 %v196_v0  ;;  %v358_v41 = vld [vmem:[%s2418_s1 + $0x438] sm:$0xff]  ;;  %v376_v43 = vld [vmem:[%s2418_s1 + $0x4c8] sm:$0xff]  ;;  %v199_v44 = vld [vmem:[%s1759_s19 + $0x100] sm:$0xff]  ;;  %v1454_v46 = vpack.c.bf16 %v266_v33, %v265_v30 }
  0x2e   : > { %1441 = vmatprep.subr.bf16.mxu1 %v1440_v55  ;;  %694 = vmatmul.mubr.f32.vlgmr.msra.gmra.mrb[0].mxu0 %v171_v3  ;;  %v267_v45 = vld [vmem:[%s2418_s1 + $0x160] sm:$0xff]  ;;  %v268_v47 = vld [vmem:[%s2418_s1 + $0x168] sm:$0xff]  ;;  %v285_v48 = vld [vmem:[%s2418_s1 + $0x1f0] sm:$0xff]  ;;  %v1542_v49 = vpack.c.bf16 %v358_v41, %v357_v40  ;;  %v1544_v53 = vpack.c.bf16 %v376_v43, %v375_v42 }
  0x2f   : > { %1531 = vmatpush3.bf16.msra.mxu0 %v1530_v4  ;;  %698 = vmatprep.mubr.f32.mxu0 %v186_v21  ;;  %v214_v50 = vld [vmem:[%s1759_s19 + $0x178] sm:$0xff]  ;;  %v359_v54 = vld [vmem:[%s2418_s1 + $0x440] sm:$0xff]  ;;  %v360_v55 = vld [vmem:[%s2418_s1 + $0x448] sm:$0xff]  ;;  %v1458_v59 = vpack.c.bf16 %v268_v47, %v267_v45 }
  0x30   : > { %534 = vmatmul.mubr.f32.gmra.mrb[4].mxu1 %v195_v5  ;;  %1533 = vmatprep.subr.bf16.mxu0 %v1532_v8  ;;  %v286_v52 = vld [vmem:[%s2418_s1 + $0x1f8] sm:$0xff]  ;;  %v377_v56 = vld [vmem:[%s2418_s1 + $0x4d0] sm:$0xff]  ;;  %v335_v62 = vld [vmem:[%s2418_s1 + $0x380] sm:$0xff]  ;;  %v1546_v63 = vpack.c.bf16 %v360_v55, %v359_v54 }
  0x31   : > { %1443 = vmatpush3.bf16.msra.mxu1 %v1442_v1  ;;  %538 = vmatprep.mubr.f32.mxu1 %v210_v16  ;;  %v378_v57 = vld [vmem:[%s2418_s1 + $0x4d8] sm:$0xff]  ;;  %v213_v58 = vld [vmem:[%s1759_s19 + $0x170] sm:$0xff]  ;;  %v1460_v0 = vpack.c.bf16 %v286_v52, %v285_v48  ;;  %v336_v1 = vld [vmem:[%s2418_s1 + $0x388] sm:$0xff] }
  0x32   : > { %1445 = vmatprep.subr.bf16.mxu1 %v1444_v6  ;;  %699 = vmatmul.mubr.f32.gmra.mrb[2].mxu0 %v185_v29  ;;  %v269_v60 = vld [vmem:[%s2418_s1 + $0x170] sm:$0xff]  ;;  %v270_v61 = vld [vmem:[%s2418_s1 + $0x178] sm:$0xff]  ;;  %v1548_v2 = vpack.c.bf16 %v378_v57, %v377_v56  ;;  %v379_v5 = vld [vmem:[%s2418_s1 + $0x4e0] sm:$0xff]  ;;  %v1496_v10 = vpack.c.bf16 %v336_v1, %v335_v62 }
  0x33   : > { %1535 = vmatpush3.bf16.msra.mxu0 %v1534_v19  ;;  %703 = vmatprep.mubr.f32.mxu0 %v200_v36  ;;  %v361_v3 = vld [vmem:[%s2418_s1 + $0x450] sm:$0xff]  ;;  %v362_v4 = vld [vmem:[%s2418_s1 + $0x458] sm:$0xff]  ;;  %v380_v6 = vld [vmem:[%s2418_s1 + $0x4e8] sm:$0xff]  ;;  %v1462_v8 = vpack.c.bf16 %v270_v61, %v269_v60 }
  0x34   : > { %539 = vmatmul.mubr.f32.gmra.mrb[6].mxu1 %v209_v20  ;;  %1537 = vmatprep.subr.bf16.mxu0 %v1536_v24  ;;  %v176_v7 = vld [vmem:[%s1759_s19 + $0x48] sm:$0xff]  ;;  %v1550_v9 = vpack.c.bf16 %v362_v4, %v361_v3  ;;  %v319_v11 = vld [vmem:[%s2418_s1 + $0x300] sm:$0xff]  ;;  %v337_v13 = vld [vmem:[%s2418_s1 + $0x390] sm:$0xff]  ;;  %v1552_v14 = vpack.c.bf16 %v380_v6, %v379_v5 }
  0x35   : > { %1447 = vmatpush3.bf16.msra.mxu1 %v1446_v17  ;;  %608 = vmatprep.mubr.f32.mxu1 %v170_v31  ;;  %v320_v12 = vld [vmem:[%s2418_s1 + $0x308] sm:$0xff]  ;;  %v338_v15 = vld [vmem:[%s2418_s1 + $0x398] sm:$0xff]  ;;  %v363_v16 = vld [vmem:[%s2418_s1 + $0x460] sm:$0xff] }
  0x36   : > { %1449 = vmatprep.subr.bf16.mxu1 %v1448_v22  ;;  %704 = vmatmul.mubr.f32.gmra.mrb[4].mxu0 %v199_v44  ;;  %v364_v17 = vld [vmem:[%s2418_s1 + $0x468] sm:$0xff]  ;;  %v381_v18 = vld [vmem:[%s2418_s1 + $0x4f0] sm:$0xff]  ;;  %v382_v19 = vld [vmem:[%s2418_s1 + $0x4f8] sm:$0xff]  ;;  %v1498_v21 = vpack.c.bf16 %v320_v12, %v319_v11  ;;  %v1500_v23 = vpack.c.bf16 %v338_v15, %v337_v13 }
  0x37   : > { %1539 = vmatpush3.bf16.msra.mxu0 %v1538_v35  ;;  %708 = vmatprep.mubr.f32.mxu0 %v214_v50  ;;  %v169_v20 = vld [vmem:[%s1759_s19 + $0x10] sm:$0xff]  ;;  %v184_v22 = vld [vmem:[%s1759_s19 + $0x88] sm:$0xff]  ;;  %v322_v25 = vld [vmem:[%s2418_s1 + $0x318] sm:$0xff]  ;;  %v1554_v27 = vpack.c.bf16 %v364_v17, %v363_v16  ;;  %v1556_v29 = vpack.c.bf16 %v382_v19, %v381_v18 }
  0x38   : > { %1541 = vmatprep.subr.bf16.mxu0 %v1540_v39  ;;  %v321_v24 = vld [vmem:[%s2418_s1 + $0x310] sm:$0xff]  ;;  %v339_v26 = vld [vmem:[%s2418_s1 + $0x3a0] sm:$0xff]  ;;  %v340_v28 = vld [vmem:[%s2418_s1 + $0x3a8] sm:$0xff] }
  0x39   : > { %1451 = vmatpush3.bf16.msra.mxu1 %v1450_v32  ;;  %v365_v30 = vld [vmem:[%s2418_s1 + $0x470] sm:$0xff]  ;;  %v366_v31 = vld [vmem:[%s2418_s1 + $0x478] sm:$0xff]  ;;  %v183_v32 = vld [vmem:[%s1759_s19 + $0x80] sm:$0xff]  ;;  %v1502_v33 = vpack.c.bf16 %v322_v25, %v321_v24  ;;  %v1504_v35 = vpack.c.bf16 %v340_v28, %v339_v26 }
  0x3a   : > { %1453 = vmatprep.subr.bf16.mxu1 %v1452_v37  ;;  %709 = vmatmul.mubr.f32.gmra.mrb[6].mxu0 %v213_v58  ;;  %v198_v34 = vld [vmem:[%s1759_s19 + $0xf8] sm:$0xff]  ;;  %v323_v36 = vld [vmem:[%s2418_s1 + $0x320] sm:$0xff]  ;;  %v324_v37 = vld [vmem:[%s2418_s1 + $0x328] sm:$0xff]  ;;  %v1558_v38 = vpack.c.bf16 %v366_v31, %v365_v30 }
  0x3b   : > { %1543 = vmatpush3.bf16.msra.mxu0 %v1542_v49  ;;  %863 = vmatprep.mubr.f32.mxu0 %v176_v7  ;;  %v341_v39 = vld [vmem:[%s2418_s1 + $0x3b0] sm:$0xff]  ;;  %v342_v40 = vld [vmem:[%s2418_s1 + $0x3b8] sm:$0xff]  ;;  %v415_v41 = vld [vmem:[%s2418_s1 + $0x600] sm:$0xff]  ;;  %v1506_v44 = vpack.c.bf16 %v324_v37, %v323_v36 }
  0x3c   : > { %1545 = vmatprep.subr.bf16.mxu0 %v1544_v53  ;;  %v416_v42 = vld [vmem:[%s2418_s1 + $0x608] sm:$0xff]  ;;  %v197_v43 = vld [vmem:[%s1759_s19 + $0xf0] sm:$0xff]  ;;  %v326_v48 = vld [vmem:[%s2418_s1 + $0x338] sm:$0xff] }
  0x3d   : > { %1455 = vmatpush3.bf16.msra.mxu1 %v1454_v46  ;;  %v212_v45 = vld [vmem:[%s1759_s19 + $0x168] sm:$0xff]  ;;  %v1508_v46 = vpack.c.bf16 %v342_v40, %v341_v39  ;;  %v325_v47 = vld [vmem:[%s2418_s1 + $0x330] sm:$0xff]  ;;  %v343_v49 = vld [vmem:[%s2418_s1 + $0x3c0] sm:$0xff]  ;;  %v1593_v53 = vpack.c.bf16 %v416_v42, %v415_v41 }
  0x3e   : > { %1457 = vmatprep.subr.bf16.mxu1 %v1456_v51  ;;  %v344_v50 = vld [vmem:[%s2418_s1 + $0x3c8] sm:$0xff]  ;;  %v1646_v51 = vmov 0.0|0.0   ;;  %v175_v52 = vld [vmem:[%s1759_s19 + $0x40] sm:$0xff]  ;;  %v417_v54 = vld [vmem:[%s2418_s1 + $0x610] sm:$0xff]  ;;  %v1510_v58 = vpack.c.bf16 %v326_v48, %v325_v47 }
  0x3f   : > { %1547 = vmatpush3.bf16.msra.mxu0 %v1546_v63  ;;  %v418_v55 = vld [vmem:[%s2418_s1 + $0x618] sm:$0xff]  ;;  %v211_v57 = vld [vmem:[%s1759_s19 + $0x160] sm:$0xff]  ;;  %v328_v61 = vld [vmem:[%s2418_s1 + $0x348] sm:$0xff] }
  0x40   : > { %1549 = vmatprep.subr.bf16.mxu0 %v1548_v2  ;;  %v190_v56 = vld [vmem:[%s1759_s19 + $0xb8] sm:$0xff]  ;;  %v327_v60 = vld [vmem:[%s2418_s1 + $0x340] sm:$0xff]  ;;  %v345_v63 = vld [vmem:[%s2418_s1 + $0x3d0] sm:$0xff]  ;;  %v1596_v1 = vpack.c.bf16 %v418_v55, %v417_v54 }
  0x41   : > { %1459 = vmatpush3.bf16.msra.mxu1 %v1458_v59  ;;  %v1512_v59 = vpack.c.bf16 %v344_v50, %v343_v49  ;;  %v174_v62 = vld [vmem:[%s1759_s19 + $0x38] sm:$0xff]  ;;  %v189_v2 = vld [vmem:[%s1759_s19 + $0xb0] sm:$0xff]  ;;  %v419_v3 = vld [vmem:[%s2418_s1 + $0x620] sm:$0xff]  ;;  %v1514_v6 = vpack.c.bf16 %v328_v61, %v327_v60 }
  0x42   : > { %1461 = vmatprep.subr.bf16.mxu1 %v1460_v0  ;;  %v346_v0 = vld [vmem:[%s2418_s1 + $0x3d8] sm:$0xff]  ;;  %v420_v4 = vld [vmem:[%s2418_s1 + $0x628] sm:$0xff]  ;;  %v203_v13 = vld [vmem:[%s1759_s19 + $0x120] sm:$0xff] }
  0x43   : > { %1551 = vmatpush3.bf16.msra.mxu0 %v1550_v9  ;;  %v204_v5 = vld [vmem:[%s1759_s19 + $0x128] sm:$0xff]  ;;  %v1516_v7 = vpack.c.bf16 %v346_v0, %v345_v63  ;;  %v330_v9 = vld [vmem:[%s2418_s1 + $0x358] sm:$0xff]  ;;  %v1599_v12 = vpack.c.bf16 %v420_v4, %v419_v3  ;;  %v331_v19 = vld [vmem:[%s2418_s1 + $0x360] sm:$0xff] }
  0x44   : > { %1553 = vmatprep.subr.bf16.mxu0 %v1552_v14  ;;  %v348_v11 = vld [vmem:[%s2418_s1 + $0x3e8] sm:$0xff]  ;;  %v421_v14 = vld [vmem:[%s2418_s1 + $0x630] sm:$0xff]  ;;  %v422_v15 = vld [vmem:[%s2418_s1 + $0x638] sm:$0xff] }
  0x45   : > { %1463 = vmatpush3.bf16.msra.mxu1 %v1462_v8  ;;  %v329_v8 = vld [vmem:[%s2418_s1 + $0x350] sm:$0xff]  ;;  %v218_v16 = vld [vmem:[%s1759_s19 + $0x198] sm:$0xff]  ;;  %v423_v25 = vld [vmem:[%s2418_s1 + $0x640] sm:$0xff] }
  0x46   : > { %1497 = vmatprep.subr.bf16.mxu1 %v1496_v10  ;;  %v347_v10 = vld [vmem:[%s2418_s1 + $0x3e0] sm:$0xff]  ;;  %v1518_v17 = vpack.c.bf16 %v330_v9, %v329_v8  ;;  %v217_v24 = vld [vmem:[%s1759_s19 + $0x190] sm:$0xff]  ;;  %v424_v26 = vld [vmem:[%s2418_s1 + $0x648] sm:$0xff] }
  0x47   : > { %1555 = vmatpush3.bf16.msra.mxu0 %v1554_v27  ;;  %v1520_v18 = vpack.c.bf16 %v348_v11, %v347_v10  ;;  %v180_v27 = vld [vmem:[%s1759_s19 + $0x68] sm:$0xff]  ;;  %v333_v30 = vld [vmem:[%s2418_s1 + $0x370] sm:$0xff]  ;;  %v334_v31 = vld [vmem:[%s2418_s1 + $0x378] sm:$0xff] }
  0x48   : > { %609 = vmatmul.mubr.f32.vlgmr.msra.gmra.mrb[8].mxu1 %v169_v20  ;;  %1557 = vmatprep.subr.bf16.mxu0 %v1556_v29  ;;  %v332_v20 = vld [vmem:[%s2418_s1 + $0x368] sm:$0xff]  ;;  %v426_v36 = vld [vmem:[%s2418_s1 + $0x658] sm:$0xff]  ;;  %v1526_v37 = vpack.c.bf16 %v334_v31, %v333_v30  ;;  %v383_v39 = vld [vmem:[%s2418_s1 + $0x500] sm:$0xff] }
  0x49   : > { %1499 = vmatpush3.bf16.msra.mxu1 %v1498_v21  ;;  %613 = vmatprep.mubr.f32.mxu1 %v184_v22  ;;  %v349_v21 = vld [vmem:[%s2418_s1 + $0x3f0] sm:$0xff]  ;;  %v350_v22 = vld [vmem:[%s2418_s1 + $0x3f8] sm:$0xff]  ;;  %v1522_v28 = vpack.c.bf16 %v332_v20, %v331_v19  ;;  %v384_v40 = vld [vmem:[%s2418_s1 + $0x508] sm:$0xff] }
  0x4a   : > { %1501 = vmatprep.subr.bf16.mxu1 %v1500_v23  ;;  %v1602_v23 = vpack.c.bf16 %v422_v15, %v421_v14  ;;  %v1524_v29 = vpack.c.bf16 %v350_v22, %v349_v21  ;;  %v401_v41 = vld [vmem:[%s2418_s1 + $0x590] sm:$0xff]  ;;  %v402_v42 = vld [vmem:[%s2418_s1 + $0x598] sm:$0xff]  ;;  %v1562_v47 = vpack.c.bf16 %v384_v40, %v383_v39  ;;  %v188_v48 = vld [vmem:[%s1759_s19 + $0xa8] sm:$0xff] }
  0x4b   : > { %1559 = vmatpush3.bf16.msra.mxu0 %v1558_v38  ;;  %v1564_v49 = vpack.c.bf16 %v402_v42, %v401_v41  ;;  %v385_v50 = vld [vmem:[%s2418_s1 + $0x510] sm:$0xff]  ;;  %v404_v54 = vld [vmem:[%s2418_s1 + $0x5a8] sm:$0xff]  ;;  %v202_v60 = vld [vmem:[%s1759_s19 + $0x118] sm:$0xff] }
  0x4c   : > { %614 = vmatmul.mubr.f32.gmra.mrb[10].mxu1 %v183_v32  ;;  %1592 = vmatprep.subr.bf16.mxu0 %v1646_v51  ;;  %v399_v32 = vld [vmem:[%s2418_s1 + $0x580] sm:$0xff]  ;;  %v388_v63 = vld [vmem:[%s2418_s1 + $0x528] sm:$0xff]  ;;  %v405_v0 = vld [vmem:[%s2418_s1 + $0x5b0] sm:$0xff] }
  0x4d   : > { %1503 = vmatpush3.bf16.msra.mxu1 %v1502_v33  ;;  %618 = vmatprep.mubr.f32.mxu1 %v198_v34  ;;  %v400_v33 = vld [vmem:[%s2418_s1 + $0x588] sm:$0xff]  ;;  %v1605_v34 = vpack.c.bf16 %v424_v26, %v423_v25  ;;  %v431_v3 = vld [vmem:[%s2418_s1 + $0x680] sm:$0xff]  ;;  %v389_v9 = vld [vmem:[%s2418_s1 + $0x530] sm:$0xff] }
  0x4e   : > { %1505 = vmatprep.subr.bf16.mxu1 %v1504_v35  ;;  %864 = vmatmul.mubr.f32.vlgmr.msra.gmra.mrb[8].mxu0 %v175_v52  ;;  %v425_v35 = vld [vmem:[%s2418_s1 + $0x650] sm:$0xff]  ;;  %v1560_v38 = vpack.c.bf16 %v400_v33, %v399_v32  ;;  %v386_v52 = vld [vmem:[%s2418_s1 + $0x518] sm:$0xff]  ;;  %v432_v4 = vld [vmem:[%s2418_s1 + $0x688] sm:$0xff] }
  0x4f   : > { %1594 = vmatpush1.bf16.msra.mxu0 %v1593_v53  ;;  %868 = vmatprep.mubr.f32.mxu0 %v190_v56  ;;  %v403_v53 = vld [vmem:[%s2418_s1 + $0x5a0] sm:$0xff]  ;;  %v429_v56 = vld [vmem:[%s2418_s1 + $0x670] sm:$0xff]  ;;  %v390_v10 = vld [vmem:[%s2418_s1 + $0x538] sm:$0xff] }
  0x50   : > { %619 = vmatmul.mubr.f32.gmra.mrb[12].mxu1 %v197_v43  ;;  %1595 = vmatprep.subr.bf16.mxu0 %v1646_v51  ;;  %v1608_v43 = vpack.c.bf16 %v426_v36, %v425_v35  ;;  %v1568_v61 = vpack.c.bf16 %v404_v54, %v403_v53  ;;  %v407_v11 = vld [vmem:[%s2418_s1 + $0x5c0] sm:$0xff]  ;;  %v433_v14 = vld [vmem:[%s2418_s1 + $0x690] sm:$0xff]  ;;  %v434_v15 = vld [vmem:[%s2418_s1 + $0x698] sm:$0xff] }
  0x51   : > { %1507 = vmatpush3.bf16.msra.mxu1 %v1506_v44  ;;  %623 = vmatprep.mubr.f32.mxu1 %v212_v45  ;;  %v427_v44 = vld [vmem:[%s2418_s1 + $0x660] sm:$0xff]  ;;  %v428_v45 = vld [vmem:[%s2418_s1 + $0x668] sm:$0xff]  ;;  %v178_v21 = vld [vmem:[%s1759_s19 + $0x58] sm:$0xff] }
  0x52   : > { %1509 = vmatprep.subr.bf16.mxu1 %v1508_v46  ;;  %869 = vmatmul.mubr.f32.gmra.mrb[10].mxu0 %v189_v2  ;;  %v173_v46 = vld [vmem:[%s1759_s19 + $0x30] sm:$0xff]  ;;  %v1611_v55 = vpack.c.bf16 %v428_v45, %v427_v44  ;;  %v391_v19 = vld [vmem:[%s2418_s1 + $0x540] sm:$0xff]  ;;  %v392_v20 = vld [vmem:[%s2418_s1 + $0x548] sm:$0xff] }
  0x53   : > { %1597 = vmatpush1.bf16.msra.mxu0 %v1596_v1  ;;  %873 = vmatprep.mubr.f32.mxu0 %v204_v5  ;;  %v406_v1 = vld [vmem:[%s2418_s1 + $0x5b8] sm:$0xff]  ;;  %v201_v5 = vld [vmem:[%s1759_s19 + $0x110] sm:$0xff]  ;;  %v435_v25 = vld [vmem:[%s2418_s1 + $0x6a0] sm:$0xff] }
  0x54   : > { %624 = vmatmul.mubr.f32.gmra.mrb[14].mxu1 %v211_v57  ;;  %1598 = vmatprep.subr.bf16.mxu0 %v1646_v51  ;;  %v430_v57 = vld [vmem:[%s2418_s1 + $0x678] sm:$0xff]  ;;  %v1572_v8 = vpack.c.bf16 %v406_v1, %v405_v0  ;;  %v409_v22 = vld [vmem:[%s2418_s1 + $0x5d0] sm:$0xff]  ;;  %v436_v26 = vld [vmem:[%s2418_s1 + $0x6a8] sm:$0xff] }
  0x55   : > { %1511 = vmatpush3.bf16.msra.mxu1 %v1510_v58  ;;  %778 = vmatprep.mubr.f32.mxu1 %v174_v62  ;;  %v187_v58 = vld [vmem:[%s1759_s19 + $0xa0] sm:$0xff]  ;;  %v1614_v2 = vpack.c.bf16 %v430_v57, %v429_v56  ;;  %v394_v30 = vld [vmem:[%s2418_s1 + $0x558] sm:$0xff]  ;;  %v412_v32 = vld [vmem:[%s2418_s1 + $0x5e8] sm:$0xff]  ;;  %v1623_v33 = vpack.c.bf16 %v436_v26, %v435_v25 }
  0x56   : > { %1513 = vmatprep.subr.bf16.mxu1 %v1512_v59  ;;  %874 = vmatmul.mubr.f32.gmra.mrb[12].mxu0 %v203_v13  ;;  %v1566_v59 = vpack.c.bf16 %v386_v52, %v385_v50  ;;  %v387_v62 = vld [vmem:[%s2418_s1 + $0x520] sm:$0xff]  ;;  %v1617_v13 = vpack.c.bf16 %v432_v4, %v431_v3  ;;  %v438_v35 = vld [vmem:[%s2418_s1 + $0x6b8] sm:$0xff]  ;;  %v396_v39 = vld [vmem:[%s2418_s1 + $0x568] sm:$0xff] }
  0x57   : > { %1600 = vmatpush1.bf16.msra.mxu0 %v1599_v12  ;;  %878 = vmatprep.mubr.f32.mxu0 %v218_v16  ;;  %v408_v12 = vld [vmem:[%s2418_s1 + $0x5c8] sm:$0xff]  ;;  %v215_v16 = vld [vmem:[%s1759_s19 + $0x180] sm:$0xff]  ;;  %v413_v40 = vld [vmem:[%s2418_s1 + $0x5f0] sm:$0xff] }
  0x58   : > { %1601 = vmatprep.subr.bf16.mxu0 %v1646_v51  ;;  %v411_v31 = vld [vmem:[%s2418_s1 + $0x5e0] sm:$0xff]  ;;  %v414_v41 = vld [vmem:[%s2418_s1 + $0x5f8] sm:$0xff]  ;;  %v397_v45 = vld [vmem:[%s2418_s1 + $0x570] sm:$0xff] }
  0x59   : > { %1515 = vmatpush3.bf16.msra.mxu1 %v1514_v6  ;;  %v1570_v6 = vpack.c.bf16 %v388_v63, %v387_v62  ;;  %v1588_v44 = vpack.c.bf16 %v414_v41, %v413_v40  ;;  %v208_v50 = vld [vmem:[%s1759_s19 + $0x148] sm:$0xff]  ;;  %v177_v52 = vld [vmem:[%s1759_s19 + $0x50] sm:$0xff]  ;;  %v207_v54 = vld [vmem:[%s1759_s19 + $0x140] sm:$0xff] }
  0x5a   : > { %1517 = vmatprep.subr.bf16.mxu1 %v1516_v7  ;;  %879 = vmatmul.mubr.f32.gmra.mrb[14].mxu0 %v217_v24  ;;  %v216_v7 = vld [vmem:[%s1759_s19 + $0x188] sm:$0xff]  ;;  %v1620_v24 = vpack.c.bf16 %v434_v15, %v433_v14  ;;  %v191_v56 = vld [vmem:[%s1759_s19 + $0xc0] sm:$0xff]  ;;  %v206_v57 = vld [vmem:[%s1759_s19 + $0x138] sm:$0xff] }
  0x5b   : > { %1603 = vmatpush1.bf16.msra.mxu0 %v1602_v23  ;;  %1130 = vmatprep.mubr.msk.f32.mxu0 %vm446_vm0, %v180_v27  ;;  %v410_v23 = vld [vmem:[%s2418_s1 + $0x5d8] sm:$0xff]  ;;  %v1578_v27 = vpack.c.bf16 %v392_v20, %v391_v19  ;;  %v192_v53 = vld [vmem:[%s1759_s19 + $0xc8] sm:$0xff] }
  0x5c   : > { %1604 = vmatprep.subr.bf16.mxu0 %v1646_v51 }
  0x5d   : > { %1519 = vmatpush3.bf16.msra.mxu1 %v1518_v17  ;;  %v1574_v17 = vpack.c.bf16 %v390_v10, %v389_v9 }
  0x5e   : > { %1521 = vmatprep.subr.bf16.mxu1 %v1520_v18  ;;  %v1576_v18 = vpack.c.bf16 %v408_v12, %v407_v11 }
  0x5f   : > { %1606 = vmatpush1.bf16.msra.mxu0 %v1605_v34  ;;  %v437_v34 = vld [vmem:[%s2418_s1 + $0x6b0] sm:$0xff] }
  0x60   : > { %1607 = vmatprep.subr.bf16.mxu0 %v1646_v51  ;;  %v1626_v42 = vpack.c.bf16 %v438_v35, %v437_v34 }
  0x61   : > { %1523 = vmatpush3.bf16.msra.mxu1 %v1522_v28  ;;  %v1580_v28 = vpack.c.bf16 %v410_v23, %v409_v22  ;;  %v1129_v22 = vld [vmem:[%s2419_s2] ss:$0 sm:$0xff] }
  0x62   : > { %1525 = vmatprep.subr.bf16.mxu1 %v1524_v29  ;;  %v393_v29 = vld [vmem:[%s2418_s1 + $0x550] sm:$0xff] }
  0x63   : > { %1609 = vmatpush1.bf16.msra.mxu0 %v1608_v43  ;;  %v1582_v36 = vpack.c.bf16 %v394_v30, %v393_v29 }
  0x64   : > { %1610 = vmatprep.subr.bf16.mxu0 %v1646_v51 }
  0x65   : > { %1527 = vmatpush3.bf16.msra.mxu1 %v1526_v37  ;;  %v1584_v37 = vpack.c.bf16 %v412_v32, %v411_v31 }
  0x66   : > { %1561 = vmatprep.subr.bf16.mxu1 %v1560_v38  ;;  %v395_v38 = vld [vmem:[%s2418_s1 + $0x560] sm:$0xff] }
  0x67   : > { %1612 = vmatpush1.bf16.msra.mxu0 %v1611_v55  ;;  %v1586_v43 = vpack.c.bf16 %v396_v39, %v395_v38  ;;  %v222_v55 = vld [vmem:[%s1759_s19 + $0x1b8] sm:$0xff] }
  0x68   : > { %779 = vmatmul.mubr.f32.vlgmr.msra.gmra.mrb[16].mxu1 %v173_v46  ;;  %1613 = vmatprep.subr.bf16.mxu0 %v1646_v51  ;;  %v398_v46 = vld [vmem:[%s2418_s1 + $0x578] sm:$0xff] }
  0x69   : > { %1563 = vmatpush3.bf16.msra.mxu1 %v1562_v47  ;;  %783 = vmatprep.mubr.f32.mxu1 %v188_v48  ;;  %v179_v47 = vld [vmem:[%s1759_s19 + $0x60] sm:$0xff]  ;;  %v1590_v48 = vpack.c.bf16 %v398_v46, %v397_v45 }
  0x6a   : > { %1565 = vmatprep.subr.bf16.mxu1 %v1564_v49  ;;  %v193_v49 = vld [vmem:[%s1759_s19 + $0xd0] sm:$0xff] }
  0x6b   : > { %1615 = vmatpush1.bf16.msra.mxu0 %v1614_v2 }
  0x6c   : > { %784 = vmatmul.mubr.f32.gmra.mrb[18].mxu1 %v187_v58  ;;  %1616 = vmatprep.subr.bf16.mxu0 %v1646_v51  ;;  %v221_v58 = vld [vmem:[%s1759_s19 + $0x1b0] sm:$0xff] }
  0x6d   : > { %1567 = vmatpush3.bf16.msra.mxu1 %v1566_v59  ;;  %788 = vmatprep.mubr.f32.mxu1 %v202_v60  ;;  %v205_v59 = vld [vmem:[%s1759_s19 + $0x130] sm:$0xff]  ;;  %v220_v60 = vld [vmem:[%s1759_s19 + $0x1a8] sm:$0xff] }
  0x6e   : > { %1569 = vmatprep.subr.bf16.mxu1 %v1568_v61  ;;  %v219_v61 = vld [vmem:[%s1759_s19 + $0x1a0] sm:$0xff] }
  0x6f   : > { %1618 = vmatpush1.bf16.msra.mxu0 %v1617_v13 }
  0x70   : > { %789 = vmatmul.mubr.f32.gmra.mrb[20].mxu1 %v201_v5  ;;  %1619 = vmatprep.subr.bf16.mxu0 %v1646_v51 }
  0x71   : > { %1571 = vmatpush3.bf16.msra.mxu1 %v1570_v6  ;;  %793 = vmatprep.mubr.f32.mxu1 %v216_v7 }
  0x72   : > { %1573 = vmatprep.subr.bf16.mxu1 %v1572_v8 }
  0x73   : > { %1621 = vmatpush1.bf16.msra.mxu0 %v1620_v24 }
  0x74   : > { %794 = vmatmul.mubr.f32.gmra.mrb[22].mxu1 %v215_v16  ;;  %1622 = vmatprep.subr.bf16.mxu0 %v1646_v51 }
  0x75   : > { %1575 = vmatpush3.bf16.msra.mxu1 %v1574_v17  ;;  %948 = vmatprep.mubr.f32.mxu1 %v178_v21 }
  0x76   : > { %1577 = vmatprep.subr.bf16.mxu1 %v1576_v18 }
  0x77   : > { %1624 = vmatpush1.bf16.msra.mxu0 %v1623_v33 }
  0x78   : > { %1625 = vmatprep.subr.bf16.mxu0 %v1646_v51  ;;  %v194_v51 = vld [vmem:[%s1759_s19 + $0xd8] sm:$0xff] }
  0x79   : > { %1579 = vmatpush3.bf16.msra.mxu1 %v1578_v27 }
  0x7a   : > { %1581 = vmatprep.subr.bf16.mxu1 %v1580_v28 }
  0x7b   : > { %1627 = vmatpush1.bf16.msra.mxu0 %v1626_v42 }
  0x7d   : > { %1583 = vmatpush3.bf16.msra.mxu1 %v1582_v36 }
  0x7e   : > { %1585 = vmatprep.subr.bf16.mxu1 %v1584_v37  ;;  %1034 = vmatmul.mubr.f32.vlgmr.msra.gmra.mrb[16].mxu0 %v179_v47 }
  0x7f   : > { %1131 = vmatprep.mubr.msk.f32.mxu0 %vm446_vm0, %v194_v51 }
  0x81   : > { %1587 = vmatpush3.bf16.msra.mxu1 %v1586_v43 }
  0x82   : > { %1589 = vmatprep.subr.bf16.mxu1 %v1588_v44  ;;  %1039 = vmatmul.mubr.f32.gmra.mrb[18].mxu0 %v193_v49 }
  0x83   : > { %1132 = vmatprep.mubr.msk.f32.mxu0 %vm446_vm0, %v208_v50 }
  0x85   : > { %1591 = vmatpush3.bf16.msra.mxu1 %v1590_v48 }
  0x86   : > { %1044 = vmatmul.mubr.f32.gmra.mrb[20].mxu0 %v207_v54 }
  0x87   : > { %1133 = vmatprep.mubr.msk.f32.mxu0 %vm446_vm0, %v222_v55 }
  0x88   : > { %949 = vmatmul.mubr.f32.vlgmr.msra.gmra.mrb[24].mxu1 %v177_v52 }
  0x89   : > { %953 = vmatprep.mubr.f32.mxu1 %v192_v53 }
  0x8a   : > { %1049 = vmatmul.mubr.f32.gmra.mrb[22].mxu0 %v221_v58 }
  0x8c   : > { %954 = vmatmul.mubr.f32.gmra.mrb[26].mxu1 %v191_v56 }
  0x8d   : > { %958 = vmatprep.mubr.f32.mxu1 %v206_v57 }
  0x90   : > { %959 = vmatmul.mubr.f32.gmra.mrb[28].mxu1 %v205_v59 }
  0x91   : > { %963 = vmatprep.mubr.f32.mxu1 %v220_v60 }
  0x94   : > { %964 = vmatmul.mubr.f32.gmra.mrb[30].mxu1 %v219_v61 }
  0xfb   : > { %v1168_v62 = vpop.f32.mrb[0].mxu1 }
  0xfc   : > { %v1169_v63 = vpop.f32.mrb[1].mxu1 }
  0xfd   : > { %v1170_v0 = vadd.f32 %v1169_v63, %v1168_v62 }
  0xff   : > { %v1171_v1 = vpop.f32.mrb[2].mxu1  ;;  %v526_v25 = vadd.f32 %v1170_v0, %v1129_v22 }
 0x100   : > { %v1172_v2 = vpop.f32.mrb[3].mxu1 }
 0x101   : > { %v1173_v3 = vadd.f32 %v1172_v2, %v1171_v1  ;;  %v1256_v4 = vpop.f32.mrb[0].mxu0 }
 0x102   : > { %v1257_v6 = vpop.f32.mrb[1].mxu0 }
 0x103   : > { %v1174_v5 = vpop.f32.mrb[4].mxu1  ;;  %v1258_v8 = vadd.f32 %v1257_v6, %v1256_v4  ;;  %v531_v30 = vadd.f32 %v1173_v3, %v1129_v22 }
 0x104   : > { %v1175_v7 = vpop.f32.mrb[5].mxu1 }
 0x105   : > { %v1176_v9 = vadd.f32 %v1175_v7, %v1174_v5  ;;  %v1259_v11 = vpop.f32.mrb[2].mxu0 }
 0x106   : > { %v1260_v13 = vpop.f32.mrb[3].mxu0 }
 0x107   : > { %v1177_v10 = vpop.f32.mrb[6].mxu1  ;;  %v1261_v15 = vadd.f32 %v1260_v13, %v1259_v11  ;;  %v536_v36 = vadd.f32 %v1176_v9, %v1129_v22 }
 0x108   : > { %v1178_v12 = vpop.f32.mrb[7].mxu1 }
 0x109   : > { %v1179_v14 = vadd.f32 %v1178_v12, %v1177_v10  ;;  %v1262_v16 = vpop.f32.mrb[4].mxu0 }
 0x10a   : > { %v1263_v17 = vpop.f32.mrb[5].mxu0 }
 0x10b   : > { %v1264_v18 = vadd.f32 %v1263_v17, %v1262_v16  ;;  %v541_v45 = vadd.f32 %v1179_v14, %v1129_v22 }
 0x10d   : > { %v1265_v19 = vpop.f32.mrb[6].mxu0 }
 0x10e   : > { %v1266_v20 = vpop.f32.mrb[7].mxu0 }
 0x10f   : > { %v1267_v21 = vadd.f32 %v1266_v20, %v1265_v19 }
 0x11b   : > { %v1212_v23 = vpop.f32.mrb[8].mxu1 }
 0x11c   : > { %v1213_v24 = vpop.f32.mrb[9].mxu1 }
 0x11d   : > { %v1214_v26 = vadd.f32 %v1213_v24, %v1212_v23 }
 0x11f   : > { %v611_v27 = vadd.f32 %v1214_v26, %v526_v25  ;;  %v1215_v28 = vpop.f32.mrb[10].mxu1 }
 0x120   : > { %v1216_v29 = vpop.f32.mrb[11].mxu1 }
 0x121   : > { %v1217_v31 = vadd.f32 %v1216_v29, %v1215_v28  ;;  %v696_v32 = vadd.f32 %v1258_v8, %v611_v27  ;;  %v1344_v39 = vpop.f32.mrb[8].mxu0 }
 0x122   : > { %v1345_v40 = vpop.f32.mrb[9].mxu0 }
 0x123   : > { %v616_v33 = vadd.f32 %v1217_v31, %v531_v30  ;;  %v1218_v34 = vpop.f32.mrb[12].mxu1  ;;  %v1346_v43 = vadd.f32 %v1345_v40, %v1344_v39 }
 0x124   : > { %v1219_v35 = vpop.f32.mrb[13].mxu1 }
 0x125   : > { %v701_v37 = vadd.f32 %v1261_v15, %v616_v33  ;;  %v1220_v38 = vadd.f32 %v1219_v35, %v1218_v34  ;;  %v1347_v51 = vpop.f32.mrb[10].mxu0 }
 0x126   : > { %v1348_v48 = vpop.f32.mrb[11].mxu0 }
 0x127   : > { %v621_v41 = vadd.f32 %v1220_v38, %v536_v36  ;;  %v1221_v42 = vpop.f32.mrb[14].mxu1  ;;  %v1349_v50 = vadd.f32 %v1348_v48, %v1347_v51 }
 0x128   : > { %v1222_v44 = vpop.f32.mrb[15].mxu1 }
 0x129   : > { %v706_v46 = vadd.f32 %v1264_v18, %v621_v41  ;;  %v1223_v47 = vadd.f32 %v1222_v44, %v1221_v42  ;;  %v1350_v53 = vpop.f32.mrb[12].mxu0 }
 0x12a   : > { %v1351_v54 = vpop.f32.mrb[13].mxu0 }
 0x12b   : > { %v626_v49 = vadd.f32 %v1223_v47, %v541_v45  ;;  %v1352_v55 = vadd.f32 %v1351_v54, %v1350_v53 }
 0x12d   : > { %v711_v52 = vadd.f32 %v1267_v21, %v626_v49  ;;  %v1353_v56 = vpop.f32.mrb[14].mxu0 }
 0x12e   : > { %v1354_v57 = vpop.f32.mrb[15].mxu0 }
 0x12f   : > { %v1355_v58 = vadd.f32 %v1354_v57, %v1353_v56 }
 0x13b   : > { %v1300_v59 = vpop.f32.mrb[16].mxu1 }
 0x13c   : > { %v1301_v60 = vpop.f32.mrb[17].mxu1 }
 0x13d   : > { %v1302_v61 = vadd.f32 %v1301_v60, %v1300_v59 }
 0x13f   : > { %v781_v62 = vadd.f32 %v1302_v61, %v696_v32  ;;  %v1303_v63 = vpop.f32.mrb[18].mxu1 }
 0x140   : > { %v1304_v0 = vpop.f32.mrb[19].mxu1 }
 0x141   : > { %v1305_v1 = vadd.f32 %v1304_v0, %v1303_v63  ;;  %v866_v2 = vadd.f32 %v1346_v43, %v781_v62 }
 0x143   : > { %v786_v3 = vadd.f32 %v1305_v1, %v701_v37  ;;  %v1306_v4 = vpop.f32.mrb[20].mxu1 }
 0x144   : > { %v1307_v5 = vpop.f32.mrb[21].mxu1 }
 0x145   : > { %v871_v6 = vadd.f32 %v1349_v50, %v786_v3  ;;  %v1308_v7 = vadd.f32 %v1307_v5, %v1306_v4 }
 0x147   : > { %v791_v8 = vadd.f32 %v1308_v7, %v706_v46  ;;  %v1309_v9 = vpop.f32.mrb[22].mxu1 }
 0x148   : > { %v1310_v10 = vpop.f32.mrb[23].mxu1 }
 0x149   : > { %v876_v11 = vadd.f32 %v1352_v55, %v791_v8  ;;  %v1311_v12 = vadd.f32 %v1310_v10, %v1309_v9 }
 0x14b   : > { %v796_v13 = vadd.f32 %v1311_v12, %v711_v52 }
 0x14d   : > { %v881_v14 = vadd.f32 %v1355_v58, %v796_v13 }
 0x151   : > { %v1035_v15 = vpop.f32.mrb[16].mxu0 }
 0x152   : > { %v1037_v16 = vpop.f32.mrb[17].mxu0 }
 0x155   : > { %v1040_v17 = vpop.f32.mrb[18].mxu0 }
 0x156   : > { %v1042_v18 = vpop.f32.mrb[19].mxu0 }
 0x159   : > { %v1045_v22 = vpop.f32.mrb[20].mxu0 }
 0x15a   : > { %v1047_v23 = vpop.f32.mrb[21].mxu0 }
 0x15b   : > { %v1388_v19 = vpop.f32.mrb[24].mxu1 }
 0x15c   : > { %v1389_v20 = vpop.f32.mrb[25].mxu1 }
 0x15d   : > { %v1390_v21 = vadd.f32 %v1389_v20, %v1388_v19  ;;  %v1050_v29 = vpop.f32.mrb[22].mxu0 }
 0x15e   : > { %v1052_v30 = vpop.f32.mrb[23].mxu0 }
 0x15f   : > { %v1391_v24 = vpop.f32.mrb[26].mxu1  ;;  %v951_v25 = vadd.f32 %v1390_v21, %v866_v2 }
 0x160   : > { %v1392_v26 = vpop.f32.mrb[27].mxu1 }
 0x161   : > { %v1036_v27 = vadd.f32 %v1035_v15, %v951_v25  ;;  %v1393_v28 = vadd.f32 %v1392_v26, %v1391_v24 }
 0x163   : > { %v1394_v31 = vpop.f32.mrb[28].mxu1  ;;  %v956_v32 = vadd.f32 %v1393_v28, %v871_v6  ;;  %v1054_v34 = vmax.f32 %v1036_v27, 0.0 }
 0x164   : > { %v1395_v33 = vpop.f32.mrb[29].mxu1 }
 0x165   : > { %v1041_v35 = vadd.f32 %v1040_v17, %v956_v32  ;;  %v1396_v36 = vadd.f32 %v1395_v33, %v1394_v31  ;;  %v1059_v41 = vsel %vm1058_vm1, %v1054_v34, 0.0 }
 0x167   : > { %v1055_v37 = vmax.f32 %v1041_v35, 0.0  ;;  %v1397_v38 = vpop.f32.mrb[30].mxu1  ;;  %v961_v39 = vadd.f32 %v1396_v36, %v876_v11 }
 0x168   : > { %v1398_v40 = vpop.f32.mrb[31].mxu1 }
 0x169   : > { %v1060_v42 = vsel %vm1058_vm1, %v1055_v37, 0.0  ;;  %v1046_v43 = vadd.f32 %v1045_v22, %v961_v39  ;;  %v1399_v44 = vadd.f32 %v1398_v40, %v1397_v38 }
 0x16a   : > { %v1061_v45 = vadd.f32 %v1060_v42, %v1059_v41 }
 0x16b   : > { %v1056_v46 = vmax.f32 %v1046_v43, 0.0  ;;  %v966_v47 = vadd.f32 %v1399_v44, %v881_v14 }
 0x16d   : > { %v1062_v51 = vsel %vm1058_vm1, %v1056_v46, 0.0  ;;  %v1051_v48 = vadd.f32 %v1050_v29, %v966_v47 }
 0x16e   : > { %v1063_v49 = vadd.f32 %v1062_v51, %v1061_v45 }
 0x16f   : > { %v1057_v50 = vmax.f32 %v1051_v48, 0.0 }
 0x171   : > { %v1064_v52 = vsel %vm1058_vm1, %v1057_v50, 0.0 }
 0x172   : > { %v1065_v53 = vadd.f32 %v1064_v52, %v1063_v49 }
 0x174   : > { %v1066_v54 = vrot.slane %v1065_v53, 4 }
 0x176   : > { %v1067_v55 = vadd.f32 %v1066_v54, %v1065_v53 }
 0x178   : > { %v1068_v56 = vrot.slane %v1067_v55, 2 }
 0x17a   : > { %v1069_v57 = vadd.f32 %v1068_v56, %v1067_v55 }
 0x17c   : > { %v1070_v58 = vrot.slane %v1069_v57, 1 }
 0x17e   : > { %v1071_v59 = vadd.f32 %v1070_v58, %v1069_v57 }
 0x180   : > { %v1073_v60 = vmul.f32 0.03125, %v1071_v59 }
 0x182   : > { %1075 = vst.msk [vmem:[%s166_s18] sm:$0x1] %vm1074_vm2, %v1073_v60 }
 0x183 PF: > { %s13_s12 = sadd.s32 1, %s1644_s12  }
 0x184   : > { %p10_p4 = scmp.ge.s32.totalorder %s13_s12, 4  }
 0x186   :  { %12 = sbr.rel (!%p10_p4) target bundleno = 1 (0x1), region = 62 }

// kernel: mm_student_forward.8
= control target key start
LH: loop header
LB: loop body
LE: loop exit
PB: predicated region body
PF: predicated region fallthrough
CT: control target
= control target key end

     0   :  { %s2162_s24 = smov 0   ;;  %s2444_s0 = inlined_call_operand.vmem [shape: f32[2,40,1], index: 0, kind: input, shape index: {}]   ;;  %s2445_s1 = inlined_call_operand.vmem [shape: f32[3,1,32], index: 1, kind: input, shape index: {}]   ;;  %s2446_s2 = inlined_call_operand.vmem [shape: f32[1,32], index: 2, kind: input, shape index: {}]   ;;  %s2447_s3 = inlined_call_operand.vmem [shape: f32[3,32,64], index: 3, kind: input, shape index: {}]   ;;  %s2448_s4 = inlined_call_operand.vmem [shape: f32[1,64], index: 4, kind: input, shape index: {}]   ;;  %s2449_s5 = inlined_call_operand.vmem [shape: f32[3,64,32], index: 5, kind: input, shape index: {}]   ;;  %s2450_s6 = inlined_call_operand.vmem [shape: f32[1,32], index: 6, kind: input, shape index: {}]   ;;  %s2451_s7 = inlined_call_operand.vmem [shape: f32[2,5,32], index: 7, kind: output, shape index: {}]  }
   0x1 LB: > { %s1639_s25 = sadd.s32 4294967295, %s2115_s24   ;;  %p1643_p0 = scmp.ge.s32.totalorder %s2115_s24, 1  ;;  %s2115_s24 = sphi %s2162_s24, %s17_s24  }
   0x2   : > { %p237_p1 = scmp.lt.s32.totalorder %s2115_s24, 3 }
   0x4   : > { %p238_p2 = pnand %p1643_p0, %p237_p1 }
   0x5   : > { %p268_p3 = scmp.lt.s32.totalorder (!%p238_p2), %s1639_s25, 1  ;;  %v2117_v0 = vmov (!%p238_p2), 0   ;;  %vm287_vm0 = vcmask (!%p238_p2), 1040384   ;;  %v2118_v17 = vmov (!%p238_p2), 0.0|0.0   ;;  %vm2119_vm1 = vmmov (!%p238_p2), 0  }
   0x6   : > { %241 = sbr.rel (%p238_p2) target bundleno = 1338 (0x53a), region = 48  ;;  %2108 = vset.pattern.permute.xlu1 (!%p238_p2), %v2117_v0  ;;  %2107 = vset.pattern.permute.xlu0 (!%p238_p2), %v2117_v0  ;;  %v2120_v18 = vmov (!%p238_p2), 0.0   ;;  %v441_v19 = vlaneseq (!%p238_p2)  ;;  %v1647_v20 = vld [vmem:[%s2445_s1] ss:$0 sm:$0xff] (!%p238_p2)  ;;  %v1649_v21 = vld [vmem:[%s2445_s1 + $0x1] ss:$0 sm:$0xff] (!%p238_p2) }
   0x7   : > { %1978 = vmatprep.subr.bf16.mxu0 (!%p238_p2), %v2118_v17  ;;  %1984 = vmatprep.subr.bf16.mxu1 (!%p238_p2), %v2118_v17  ;;  %v1651_v25 = vld [vmem:[%s2445_s1 + $0x2] ss:$0 sm:$0xff] (!%p238_p2)  ;;  %v1646_v31 = vld [vmem:[%s2446_s2] ss:$0 sm:$0xff] (!%p238_p2)  ;;  %vm372_vm2 = vcmask (!%p238_p2), 1046528   ;;  %vm414_vm3 = vcmask (!%p238_p2), 1045504  }
   0x8   : > { %1810 = vmatprep.mubr.msk.f32.mxu0 (!%p238_p2), %vm2119_vm1, %v2120_v18  ;;  %1829 = vmatprep.mubr.msk.f32.mxu1 (!%p238_p2), %vm2119_vm1, %v2120_v18  ;;  %v2195_v24 = vshrl.u32 (!%p238_p2), %v441_v19, 7  ;;  %vm471_vm6 = vcmask (!%p238_p2), 326656   ;;  %vm678_vm11 = vcmask (!%p238_p2), 261120   ;;  %vm664_vm12 = vcmask (!%p238_p2), 1044480  }
   0x9   : > { %vm971_vm13 = vcmask (!%p238_p2), 162816   ;;  %vm976_vm14 = vcmask (!%p238_p2), 1043456   ;;  %vm1162_vm15 = vcmask (!%p238_p2), 523264  }
   0xa   : > { %v447_v35 = vmul.u32 (!%p238_p2), 2, %v2195_v24 }
   0xd   : > { %s2453_s25 = smov (!%p268_p3, %s1639_s25), 1 }
   0xe   : > { %s2093_s26 = smul.u32 40, %s2453_s25  ;;  %s1645_s30 = sshll.u32 %s2453_s25, 3 }
   0xf   : > { %s276_s10 = scalar_lea.vmem %s2451_s7, %s1645_s30 }
  0x10   : > { %s272_s29 = scalar_lea.vmem %s2444_s0, %s2093_s26 }
  0x11   : > { %v278_v1 = vld [vmem:[%s272_s29 + $0x8] sm:$0xff]  ;;  %v279_v2 = vld [vmem:[%s272_s29 + $0x10] sm:$0xff]  ;;  %v277_v3 = vld [vmem:[%s272_s29] sm:$0xff] }
  0x12   : > { %v289_v4 = vrot.slane %v278_v1, 7  ;;  %v291_v5 = vrot.slane %v279_v2, 7  ;;  %v288_v6 = vrot.slane %v277_v3, 7  ;;  %v280_v7 = vld [vmem:[%s272_s29 + $0x18] sm:$0xff]  ;;  %v281_v9 = vld [vmem:[%s272_s29 + $0x20] sm:$0xff]  ;;  %v443_v1 = vadd.s32 8, %v2195_v24 }
  0x13   : > { %v293_v8 = vrot.slane %v280_v7, 7  ;;  %v295_v14 = vrot.slane %v281_v9, 7 }
  0x14   : > { %v292_v10 = vsel %vm287_vm0, %v289_v4, %v291_v5  ;;  %v299_v11 = vsel %vm287_vm0, 0.0, %v288_v6  ;;  %v290_v13 = vsel %vm287_vm0, %v288_v6, %v289_v4 }
  0x15   : > { %320 = vperm.xlu1 %2108, %v292_v10   ;;  %312 = vperm.xlu0 %2107, %v299_v11   ;;  %v294_v12 = vsel %vm287_vm0, %v291_v5, %v293_v8  ;;  %v300_v15 = vsel %vm287_vm0, %v295_v14, 0.0  ;;  %v296_v16 = vsel %vm287_vm0, %v293_v8, %v295_v14 }
  0x19   : > { %324 = vperm.xlu1 %2108, %v294_v12   ;;  %316 = vperm.xlu0 %2107, %v290_v13  }
  0x1d   : > { %351 = vperm.xlu1 %2108, %v300_v15   ;;  %328 = vperm.xlu0 %2107, %v296_v16  }
  0x94   : > { %v321_v22 = vpop.permute.xlu1 %320  ;;  %v313_v23 = vpop.permute.xlu0 %312 }
  0x95   : > { %v362_v26 = vmul.f32 %v1649_v21, %v321_v22  ;;  %v339_v27 = vmul.f32 %v1647_v20, %v321_v22  ;;  %v404_v28 = vmul.f32 %v1651_v25, %v321_v22  ;;  %v337_v29 = vmul.f32 %v1647_v20, %v313_v23 }
  0x96   : > { %v360_v30 = vmul.f32 %v1649_v21, %v313_v23  ;;  %v402_v32 = vmul.f32 %v1651_v25, %v313_v23 }
  0x97   : > { %v376_v36 = vrot.slane %v362_v26, 1  ;;  %v344_v40 = vadd.f32 %v1646_v31, %v339_v27  ;;  %v418_v41 = vrot.slane %v404_v28, 2  ;;  %v342_v44 = vadd.f32 %v1646_v31, %v337_v29 }
  0x98   : > { %v325_v33 = vpop.permute.xlu1 %324  ;;  %v317_v34 = vpop.permute.xlu0 %316  ;;  %v373_v45 = vrot.slane %v360_v30, 1  ;;  %v415_v48 = vrot.slane %v402_v32, 2  ;;  %v446_v28 = vand.u32 127, %v441_v19  ;;  %v459_v29 = vadd.s32 1, %v447_v35 }
  0x99   : > { %v363_v37 = vmul.f32 %v1649_v21, %v325_v33  ;;  %v405_v38 = vmul.f32 %v1651_v25, %v325_v33  ;;  %v338_v39 = vmul.f32 %v1647_v20, %v317_v34  ;;  %v361_v42 = vmul.f32 %v1649_v21, %v317_v34 }
  0x9a   : > { %v403_v43 = vmul.f32 %v1651_v25, %v317_v34  ;;  %v340_v46 = vmul.f32 %v1647_v20, %v325_v33  ;;  %v448_v32 = vmul.u32 2, %v443_v1  ;;  %v444_v33 = vadd.s32 16, %v2195_v24 }
  0x9b   : > { %v378_v47 = vrot.slane %v363_v37, 1  ;;  %v343_v49 = vadd.f32 %v1646_v31, %v338_v39  ;;  %v374_v50 = vrot.slane %v361_v42, 1  ;;  %v420_v55 = vrot.slane %v405_v38, 2  ;;  %v674_v39 = vld [vmem:[%s2447_s3] sm:$0xff] }
  0x9c   : > { %v416_v51 = vrot.slane %v403_v43, 2  ;;  %v352_v52 = vpop.permute.xlu1 %351  ;;  %v329_v53 = vpop.permute.xlu0 %328  ;;  %v345_v62 = vadd.f32 %v1646_v31, %v340_v46  ;;  %vm450_vm4 = vcmp.eq.s32.totalorder %v446_v28, %v447_v35  ;;  %vm462_vm5 = vcmp.eq.s32.totalorder %v446_v28, %v459_v29 }
  0x9d   : > { %v379_v54 = vsel %vm372_vm2, %v376_v36, %v378_v47  ;;  %v365_v56 = vmul.f32 %v1649_v21, %v352_v52  ;;  %v341_v57 = vmul.f32 %v1647_v20, %v329_v53  ;;  %v364_v58 = vmul.f32 %v1649_v21, %v329_v53 }
  0x9e   : > { %v406_v59 = vmul.f32 %v1651_v25, %v329_v53  ;;  %v375_v60 = vsel %vm372_vm2, %v373_v45, %v374_v50  ;;  %v377_v61 = vsel %vm372_vm2, %v374_v50, %v376_v36  ;;  %v417_v5 = vsel %vm414_vm3, %v415_v48, %v416_v51  ;;  %v676_v48 = vld [vmem:[%s2447_s3 + $0x10] sm:$0xff]  ;;  %v1668_v53 = vld [vmem:[%s2447_s3 + $0x20] sm:$0xff] }
  0x9f   : > { %v382_v63 = vrot.slane %v365_v56, 1  ;;  %v389_v0 = vadd.f32 %v375_v60, %v342_v44  ;;  %v380_v2 = vrot.slane %v364_v58, 1  ;;  %v390_v4 = vadd.f32 %v377_v61, %v343_v49  ;;  %v677_v49 = vld [vmem:[%s2447_s3 + $0x18] sm:$0xff] }
  0xa0   : > { %v422_v3 = vrot.slane %v406_v59, 2  ;;  %v407_v6 = vmul.f32 %v1651_v25, %v352_v52  ;;  %v419_v7 = vsel %vm414_vm3, %v416_v51, %v418_v41  ;;  %v391_v9 = vadd.f32 %v379_v54, %v344_v40  ;;  %v675_v40 = vld [vmem:[%s2447_s3 + $0x8] sm:$0xff] }
  0xa1   : > { %v431_v8 = vadd.f32 %v417_v5, %v389_v0  ;;  %v346_v10 = vadd.f32 %v1646_v31, %v341_v57  ;;  %v381_v11 = vsel %vm372_vm2, %v378_v47, %v380_v2  ;;  %v432_v12 = vadd.f32 %v419_v7, %v390_v4  ;;  %v1669_v54 = vld [vmem:[%s2447_s3 + $0x28] sm:$0xff] }
  0xa2   : > { %v421_v13 = vsel %vm414_vm3, %v418_v41, %v420_v55  ;;  %v383_v14 = vsel %vm372_vm2, %v380_v2, %v382_v63  ;;  %v392_v15 = vadd.f32 %v381_v11, %v345_v62  ;;  %v423_v21 = vsel %vm414_vm3, %v420_v55, %v422_v3  ;;  %v1670_v62 = vld [vmem:[%s2447_s3 + $0x30] sm:$0xff]  ;;  %v1671_v63 = vld [vmem:[%s2447_s3 + $0x38] sm:$0xff] }
  0xa3   : > { %v436_v16 = vmax.f32 %v431_v8, 0.0  ;;  %v433_v20 = vadd.f32 %v421_v13, %v391_v9  ;;  %v437_v22 = vmax.f32 %v432_v12, 0.0  ;;  %v424_v23 = vrot.slane %v407_v6, 2 }
  0xa4   : > { %v434_v25 = vadd.f32 %v423_v21, %v392_v15  ;;  %v393_v26 = vadd.f32 %v383_v14, %v346_v10  ;;  %v460_v19 = vadd.s32 1, %v448_v32  ;;  %v449_v38 = vmul.u32 2, %v444_v33 }
  0xa5   : > { %v1979_v27 = vpack.c.bf16 %v437_v22, %v436_v16  ;;  %v438_v30 = vmax.f32 %v433_v20, 0.0  ;;  %v425_v36 = vsel %vm414_vm3, %v422_v3, %v424_v23  ;;  %v2232_v24 = vsel %vm450_vm4, 1.0, %v2120_v18  ;;  %v1675_v23 = vld [vmem:[%s2447_s3 + $0x40] sm:$0xff] }
  0xa6   : > { %v439_v31 = vmax.f32 %v434_v25, 0.0  ;;  %v435_v37 = vadd.f32 %v425_v36, %v393_v26  ;;  %v2235_v35 = vsel %vm462_vm5, 1.0, %v2120_v18  ;;  %vm451_vm7 = vcmp.eq.s32.totalorder %v446_v28, %v448_v32  ;;  %v1676_v25 = vld [vmem:[%s2447_s3 + $0x48] sm:$0xff]  ;;  %v1678_v32 = vld [vmem:[%s2447_s3 + $0x58] sm:$0xff]  ;;  %v1664_v36 = vld [vmem:[%s2448_s4] ss:$0 sm:$0xff] }
  0xa7   : > { %1980 = vmatpush3.bf16.msra.mxu0 %v1979_v27  ;;  %1986 = vmatpush3.bf16.msra.mxu1 %v1979_v27  ;;  %vm463_vm8 = vcmp.eq.s32.totalorder %v446_v28, %v460_v19  ;;  %v461_v42 = vadd.s32 1, %v449_v38  ;;  %v1991_v43 = vpack.c.bf16 %v675_v40, %v674_v39  ;;  %v2246_v44 = vsel %vm451_vm7, 1.0, %v2120_v18 }
  0xa8   : > { %1981 = vmatprep.subr.bf16.mxu0 %v2118_v17  ;;  %1987 = vmatprep.subr.bf16.mxu1 %v2118_v17  ;;  %v1982_v34 = vpack.c.bf16 %v439_v31, %v438_v30  ;;  %v440_v41 = vmax.f32 %v435_v37, 0.0  ;;  %v2249_v45 = vsel %vm463_vm8, 1.0, %v2120_v18  ;;  %vm452_vm9 = vcmp.eq.s32.totalorder %v446_v28, %v449_v38  ;;  %v1677_v31 = vld [vmem:[%s2447_s3 + $0x50] sm:$0xff] }
  0xa9   : > { %vm464_vm10 = vcmp.eq.s32.totalorder %v446_v28, %v461_v42  ;;  %v1654_v46 = vsel %vm452_vm9, 1.0, %v2120_v18  ;;  %v1994_v50 = vpack.c.bf16 %v677_v49, %v676_v48  ;;  %v1997_v59 = vpack.c.bf16 %v1669_v54, %v1668_v53  ;;  %v1156_v53 = vld [vmem:[%s2449_s5 + $0x10] sm:$0xff]  ;;  %v1157_v54 = vld [vmem:[%s2449_s5 + $0x18] sm:$0xff] }
  0xaa   : > { %v1657_v47 = vsel %vm464_vm10, 1.0, %v2120_v18  ;;  %v2000_v5 = vpack.c.bf16 %v1671_v63, %v1670_v62  ;;  %v2003_v29 = vpack.c.bf16 %v1676_v25, %v1675_v23  ;;  %v1692_v62 = vld [vmem:[%s2449_s5 + $0x48] sm:$0xff]  ;;  %vm1144_vm4 = vcmask 1042432  }
  0xab   : > { %1983 = vmatpush3.bf16.msra.mxu0 %v1982_v34  ;;  %1989 = vmatpush3.bf16.msra.mxu1 %v1982_v34  ;;  %v2006_v34 = vpack.c.bf16 %v1678_v32, %v1677_v31  ;;  %v1702_v31 = vld [vmem:[%s2449_s5 + $0x88] sm:$0xff]  ;;  %vm1434_vm5 = vcmask 80896  }
  0xac   : > { %1808 = vmatprep.subr.mxu0 %v2120_v18  ;;  %1827 = vmatprep.subr.mxu1 %v2120_v18 }
  0xaf   : > { %1809 = vmatpush3.msra.mxu0 %v440_v41  ;;  %1828 = vmatpush3.msra.mxu1 %v440_v41 }
  0xb0   : > { %1811 = vmatmul.mubr.msk.f32.vlgmr.msra.gmra.mrb[0].mxu0 %vm471_vm6, %v2232_v24  ;;  %1830 = vmatmul.mubr.msk.f32.vlgmr.msra.gmra.mrb[0].mxu1 %vm471_vm6, %v2235_v35 }
  0xb1   : > { %1813 = vmatprep.mubr.msk.f32.mxu0 %vm2119_vm1, %v2120_v18  ;;  %1832 = vmatprep.mubr.msk.f32.mxu1 %vm2119_vm1, %v2120_v18 }
  0xb2   : > { %1990 = vmatprep.subr.bf16.mxu0 %v2118_v17 }
  0xb3   : > { %1992 = vmatpush3.bf16.msra.mxu0 %v1991_v43 }
  0xb4   : > { %1814 = vmatmul.mubr.msk.f32.gmra.mrb[2].mxu0 %vm471_vm6, %v2246_v44  ;;  %1833 = vmatmul.mubr.msk.f32.gmra.mrb[2].mxu1 %vm471_vm6, %v2249_v45 }
  0xb5   : > { %1816 = vmatprep.mubr.msk.f32.mxu0 %vm2119_vm1, %v2120_v18  ;;  %1835 = vmatprep.mubr.msk.f32.mxu1 %vm2119_vm1, %v2120_v18 }
  0xb6   : > { %1993 = vmatprep.subr.bf16.mxu0 %v2118_v17 }
  0xb7   : > { %1995 = vmatpush3.bf16.msra.mxu0 %v1994_v50 }
  0xb8   : > { %1817 = vmatmul.mubr.msk.f32.gmra.mrb[4].mxu0 %vm471_vm6, %v1654_v46  ;;  %1836 = vmatmul.mubr.msk.f32.gmra.mrb[4].mxu1 %vm471_vm6, %v1657_v47  ;;  %vm1584_vm6 = vcmask 258048  }
  0xb9   : > { %1846 = vmatprep.mubr.msk.f32.mxu0 %vm2119_vm1, %v2120_v18  ;;  %1996 = vmatprep.subr.bf16.mxu0 %v2118_v17 }
  0xba   : > { %1904 = vmatprep.mubr.msk.f32.mxu1 %vm971_vm13, %v2235_v35 }
 0x183   : > { %v547_v51 = vpop.f32.mrb[0].mxu0  ;;  %v636_v52 = vpop.f32.mrb[0].mxu1 }
 0x184   : > { %v650_v55 = vmax.f32 %v547_v51, %v636_v52  ;;  %v1812_v56 = vpop.f32.mrb[1].mxu0  ;;  %v1831_v57 = vpop.f32.mrb[1].mxu1  ;;  %v1154_v51 = vld [vmem:[%s2449_s5] sm:$0xff]  ;;  %v1155_v52 = vld [vmem:[%s2449_s5 + $0x8] sm:$0xff] }
 0x185   : > { %v2020_v56 = vpack.c.bf16 %v1157_v54, %v1156_v53  ;;  %v1158_v57 = vld [vmem:[%s2449_s5 + $0x20] sm:$0xff] }
 0x186   : > { %v656_v58 = vrot.slane %v650_v55, 7  ;;  %v2016_v55 = vpack.c.bf16 %v1155_v52, %v1154_v51 }
 0x187   : > { %v552_v60 = vpop.f32.mrb[2].mxu0  ;;  %v641_v61 = vpop.f32.mrb[2].mxu1 }
 0x188   : > { %v663_v0 = vsel %vm287_vm0, 0.0, %v656_v58  ;;  %v651_v1 = vmax.f32 %v552_v60, %v641_v61  ;;  %v1815_v2 = vpop.f32.mrb[3].mxu0  ;;  %v1834_v3 = vpop.f32.mrb[3].mxu1  ;;  %v1691_v61 = vld [vmem:[%s2449_s5 + $0x40] sm:$0xff] }
 0x189   : > { %1847 = vmatmul.mubr.msk.f32.vlgmr.msra.gmra.mrb[6].mxu0 %vm678_vm11, %v663_v0  ;;  %v775_v12 = vrot.slane %v663_v0, 1  ;;  %v874_v13 = vrot.slane %v663_v0, 2  ;;  %v2032_v63 = vpack.c.bf16 %v1692_v62, %v1691_v61 }
 0x18a   : > { %v657_v4 = vrot.slane %v651_v1, 7  ;;  %1849 = vmatprep.mubr.msk.f32.mxu0 %vm2119_vm1, %v2120_v18  ;;  %1998 = vmatpush3.bf16.msra.mxu0 %v1997_v59  ;;  %v1161_v59 = vld [vmem:[%s2449_s5 + $0x38] sm:$0xff] }
 0x18b   : > { %v557_v6 = vpop.f32.mrb[4].mxu0  ;;  %v646_v7 = vpop.f32.mrb[4].mxu1  ;;  %1999 = vmatprep.subr.bf16.mxu0 %v2118_v17 }
 0x18c   : > { %v652_v8 = vmax.f32 %v557_v6, %v646_v7  ;;  %v1818_v9 = vpop.f32.mrb[5].mxu0  ;;  %v1837_v10 = vpop.f32.mrb[5].mxu1  ;;  %v658_v11 = vsel %vm287_vm0, %v656_v58, %v657_v4  ;;  %v1159_v58 = vld [vmem:[%s2449_s5 + $0x28] sm:$0xff]  ;;  %v1693_v7 = vld [vmem:[%s2449_s5 + $0x50] sm:$0xff] }
 0x18d   : > { %1850 = vmatmul.mubr.msk.f32.gmra.mrb[8].mxu0 %vm678_vm11, %v658_v11  ;;  %v776_v14 = vrot.slane %v658_v11, 1  ;;  %v875_v15 = vrot.slane %v658_v11, 2 }
 0x18e   : > { %v659_v16 = vrot.slane %v652_v8, 7  ;;  %1852 = vmatprep.mubr.msk.f32.mxu0 %vm2119_vm1, %v2120_v18  ;;  %2001 = vmatpush3.bf16.msra.mxu0 %v2000_v5  ;;  %v1694_v8 = vld [vmem:[%s2449_s5 + $0x58] sm:$0xff] }
 0x18f   : > { %v777_v20 = vsel %vm372_vm2, %v775_v12, %v776_v14  ;;  %2002 = vmatprep.subr.bf16.mxu0 %v2118_v17  ;;  %v876_v21 = vsel %vm414_vm3, %v874_v13, %v875_v15  ;;  %v2036_v12 = vpack.c.bf16 %v1694_v8, %v1693_v7 }
 0x190   : > { %v660_v22 = vsel %vm287_vm0, %v657_v4, %v659_v16  ;;  %v1695_v16 = vld [vmem:[%s2449_s5 + $0x60] sm:$0xff] }
 0x191   : > { %v665_v26 = vsel %vm664_vm12, %v660_v22, 0.0 }
 0x192   : > { %1853 = vmatmul.mubr.msk.f32.gmra.mrb[10].mxu0 %vm678_vm11, %v665_v26  ;;  %v778_v27 = vrot.slane %v665_v26, 1  ;;  %v877_v28 = vrot.slane %v665_v26, 2 }
 0x193   : > { %1863 = vmatprep.mubr.msk.f32.mxu0 %vm2119_vm1, %v2120_v18 }
 0x194   : > { %v779_v30 = vsel %vm372_vm2, %v776_v14, %v778_v27  ;;  %v878_v33 = vsel %vm414_vm3, %v875_v15, %v877_v28 }
 0x196   : > { %1864 = vmatmul.mubr.msk.f32.vlgmr.msra.gmra.mrb[6].mxu0 %vm678_vm11, %v777_v20  ;;  %v1696_v20 = vld [vmem:[%s2449_s5 + $0x68] sm:$0xff] }
 0x197   : > { %1866 = vmatprep.mubr.msk.f32.mxu0 %vm2119_vm1, %v2120_v18  ;;  %2004 = vmatpush3.bf16.msra.mxu0 %v2003_v29  ;;  %v2040_v23 = vpack.c.bf16 %v1696_v20, %v1695_v16 }
 0x198   : > { %2005 = vmatprep.subr.bf16.mxu0 %v2118_v17 }
 0x19a   : > { %1867 = vmatmul.mubr.msk.f32.gmra.mrb[8].mxu0 %vm678_vm11, %v779_v30  ;;  %v1701_v30 = vld [vmem:[%s2449_s5 + $0x80] sm:$0xff] }
 0x19b   : > { %1869 = vmatprep.mubr.msk.f32.mxu0 %vm2119_vm1, %v2120_v18  ;;  %2007 = vmatpush3.bf16.msra.mxu0 %v2006_v34  ;;  %v2048_v32 = vpack.c.bf16 %v1702_v31, %v1701_v30  ;;  %v1704_v34 = vld [vmem:[%s2449_s5 + $0x98] sm:$0xff] }
 0x19e   : > { %1870 = vmatmul.mubr.msk.f32.gmra.mrb[10].mxu0 %vm678_vm11, %v778_v27  ;;  %v1697_v27 = vld [vmem:[%s2449_s5 + $0x70] sm:$0xff] }
 0x19f   : > { %1880 = vmatprep.mubr.msk.f32.mxu0 %vm2119_vm1, %v2120_v18 }
 0x1a2   : > { %1881 = vmatmul.mubr.msk.f32.vlgmr.msra.gmra.mrb[6].mxu0 %vm678_vm11, %v876_v21 }
 0x1a3   : > { %1883 = vmatprep.mubr.msk.f32.mxu0 %vm2119_vm1, %v2120_v18 }
 0x1a6   : > { %1884 = vmatmul.mubr.msk.f32.gmra.mrb[8].mxu0 %vm678_vm11, %v878_v33  ;;  %v1703_v33 = vld [vmem:[%s2449_s5 + $0x90] sm:$0xff] }
 0x1a7   : > { %1886 = vmatprep.mubr.msk.f32.mxu0 %vm2119_vm1, %v2120_v18 }
 0x1aa   : > { %1887 = vmatmul.mubr.msk.f32.gmra.mrb[10].mxu0 %vm678_vm11, %v877_v28  ;;  %v1698_v28 = vld [vmem:[%s2449_s5 + $0x78] sm:$0xff] }
 0x1ab   : > { %1895 = vmatprep.mubr.msk.f32.mxu0 %vm971_vm13, %v2232_v24  ;;  %v2044_v29 = vpack.c.bf16 %v1698_v28, %v1697_v27 }
 0x275   : > { %v951_v37 = vpop.f32.mrb[6].mxu0 }
 0x276   : > { %v1882_v19 = vpop.f32.mrb[7].mxu0  ;;  %v2072_v38 = vadd.f32 %v1664_v36, %v951_v37  ;;  %v1705_v37 = vld [vmem:[%s2449_s5 + $0xa0] sm:$0xff] }
 0x277   : > { %v1706_v19 = vld [vmem:[%s2449_s5 + $0xa8] sm:$0xff] }
 0x278   : > { %v968_v42 = vmax.f32 %v2072_v38, 0.0  ;;  %v2056_v38 = vpack.c.bf16 %v1706_v19, %v1705_v37 }
 0x279   : > { %v956_v39 = vpop.f32.mrb[8].mxu0 }
 0x27a   : > { %v2073_v40 = vadd.f32 %v1664_v36, %v956_v39  ;;  %v1885_v41 = vpop.f32.mrb[9].mxu0  ;;  %v1707_v39 = vld [vmem:[%s2449_s5 + $0xb0] sm:$0xff] }
 0x27c   : > { %v969_v43 = vmax.f32 %v2073_v40, 0.0  ;;  %v1708_v40 = vld [vmem:[%s2449_s5 + $0xb8] sm:$0xff] }
 0x27d   : > { %v961_v46 = vpop.f32.mrb[10].mxu0  ;;  %v2060_v41 = vpack.c.bf16 %v1708_v40, %v1707_v39 }
 0x27e   : > { %v2008_v47 = vpack.c.bf16 %v969_v43, %v968_v42  ;;  %v2074_v48 = vadd.f32 %v1664_v36, %v961_v46  ;;  %v1888_v49 = vpop.f32.mrb[11].mxu0  ;;  %v2052_v36 = vpack.c.bf16 %v1704_v34, %v1703_v33  ;;  %v1688_v42 = vld [vmem:[%s2450_s6] ss:$0 sm:$0xff] }
 0x280   : > { %v970_v50 = vmax.f32 %v2074_v48, 0.0  ;;  %2009 = vmatprep.subr.bf16.mxu0 %v2008_v47  ;;  %2013 = vmatprep.subr.bf16.mxu1 %v2008_v47 }
 0x281   : > { %2011 = vmatpush3.bf16.msra.mxu0 %v2008_v47  ;;  %2015 = vmatpush3.bf16.msra.mxu1 %v2008_v47 }
 0x282   : > { %1893 = vmatprep.subr.msk.mxu0 %vm976_vm14, %v970_v50  ;;  %1902 = vmatprep.subr.msk.mxu1 %vm976_vm14, %v970_v50 }
 0x285   : > { %1894 = vmatpush3.msk.msra.mxu0 %vm976_vm14, %v970_v50  ;;  %1903 = vmatpush3.msk.msra.mxu1 %vm976_vm14, %v970_v50 }
 0x286   : > { %1896 = vmatmul.mubr.msk.f32.vlgmr.msra.gmra.mrb[12].mxu0 %vm971_vm13, %v2246_v44  ;;  %1905 = vmatmul.mubr.msk.f32.vlgmr.msra.gmra.mrb[6].mxu1 %vm971_vm13, %v2249_v45  ;;  %v2024_v44 = vpack.c.bf16 %v1159_v58, %v1158_v57  ;;  %v1160_v45 = vld [vmem:[%s2449_s5 + $0x30] sm:$0xff] }
 0x287   : > { %2017 = vmatprep.subr.bf16.mxu1 %v2016_v55  ;;  %2064 = vmatprep.subr.bf16.mxu0 %v2118_v17  ;;  %v2028_v60 = vpack.c.bf16 %v1161_v59, %v1160_v45 }
 0x288   : > { %2019 = vmatpush3.bf16.msra.mxu1 %v2016_v55  ;;  %1968 = vmatprep.mubr.msk.f32.mxu0 %vm2119_vm1, %v2120_v18 }
 0x289   : > { %2021 = vmatprep.subr.bf16.mxu1 %v2020_v56 }
 0x28c   : > { %2023 = vmatpush3.bf16.msra.mxu1 %v2020_v56 }
 0x28d   : > { %2025 = vmatprep.subr.bf16.mxu1 %v2024_v44 }
 0x290   : > { %2027 = vmatpush3.bf16.msra.mxu1 %v2024_v44 }
 0x291   : > { %2029 = vmatprep.subr.bf16.mxu1 %v2028_v60 }
 0x294   : > { %2031 = vmatpush3.bf16.msra.mxu1 %v2028_v60 }
 0x295   : > { %2033 = vmatprep.subr.bf16.mxu1 %v2032_v63 }
 0x359   : > { %v1897_v0 = vpop.f32.mrb[12].mxu0  ;;  %v1906_v1 = vpop.f32.mrb[6].mxu1 }
 0x35a   : > { %v1135_v2 = vmax.f32 %v1897_v0, %v1906_v1  ;;  %v1046_v3 = vpop.f32.mrb[13].mxu0  ;;  %v1125_v4 = vpop.f32.mrb[7].mxu1 }
 0x35b   : > { %v1134_v5 = vmax.f32 %v1046_v3, %v1125_v4 }
 0x35c   : > { %v1139_v6 = vrot.slane %v1135_v2, 7 }
 0x35d   : > { %v1138_v9 = vrot.slane %v1134_v5, 7 }
 0x35f   : > { %v1140_v10 = vsel %vm287_vm0, %v1138_v9, %v1139_v6  ;;  %v1143_v11 = vsel %vm287_vm0, 0.0, %v1138_v9  ;;  %vm1437_vm0 = vcmask 1041408  }
 0x360   : > { %v1255_v13 = vrot.slane %v1143_v11, 1  ;;  %v1348_v14 = vrot.slane %v1143_v11, 2  ;;  %1923 = vmatprep.mubr.msk.f32.mxu1 %vm1162_vm15, %v1143_v11  ;;  %v1145_v15 = vsel %vm1144_vm4, %v1140_v10, 0.0 }
 0x361   : > { %1924 = vmatmul.mubr.msk.f32.vlgmr.msra.gmra.mrb[8].mxu1 %vm1162_vm15, %v1145_v15  ;;  %v1256_v21 = vrot.slane %v1145_v15, 1  ;;  %v1349_v22 = vrot.slane %v1145_v15, 2 }
 0x362   : > { %2035 = vmatpush3.bf16.msra.mxu1 %v2032_v63 }
 0x363   : > { %2037 = vmatprep.subr.bf16.mxu1 %v2036_v12  ;;  %v1257_v25 = vsel %vm372_vm2, %v1255_v13, %v1256_v21  ;;  %v1350_v26 = vsel %vm414_vm3, %v1348_v14, %v1349_v22  ;;  %vm2121_vm2 = vmmov 1  }
 0x364   : > { %1942 = vmatprep.mubr.msk.f32.mxu1 %vm1162_vm15, %v1257_v25  ;;  %vm2066_vm3 = vmpackc.low %vm1437_vm0, %vm2121_vm2 }
 0x366   : > { %2039 = vmatpush3.bf16.msra.mxu1 %v2036_v12 }
 0x367   : > { %2041 = vmatprep.subr.bf16.mxu1 %v2040_v23 }
 0x36a   : > { %2043 = vmatpush3.bf16.msra.mxu1 %v2040_v23 }
 0x36b   : > { %2045 = vmatprep.subr.bf16.mxu1 %v2044_v29 }
 0x36e   : > { %2047 = vmatpush3.bf16.msra.mxu1 %v2044_v29 }
 0x36f   : > { %2049 = vmatprep.subr.bf16.mxu1 %v2048_v32 }
 0x371   : > { %1943 = vmatmul.mubr.msk.f32.vlgmr.msra.gmra.mrb[8].mxu1 %vm1162_vm15, %v1256_v21 }
 0x372   : > { %2051 = vmatpush3.bf16.msra.mxu1 %v2048_v32  ;;  %1961 = vmatprep.mubr.msk.f32.mxu1 %vm1162_vm15, %v1350_v26 }
 0x373   : > { %2053 = vmatprep.subr.bf16.mxu1 %v2052_v36 }
 0x376   : > { %2055 = vmatpush3.bf16.msra.mxu1 %v2052_v36 }
 0x377   : > { %2057 = vmatprep.subr.bf16.mxu1 %v2056_v38 }
 0x37a   : > { %2059 = vmatpush3.bf16.msra.mxu1 %v2056_v38 }
 0x37b   : > { %2061 = vmatprep.subr.bf16.mxu1 %v2060_v41 }
 0x37e   : > { %2063 = vmatpush3.bf16.msra.mxu1 %v2060_v41 }
 0x381   : > { %1962 = vmatmul.mubr.msk.f32.vlgmr.msra.gmra.mrb[8].mxu1 %vm1162_vm15, %v1349_v22 }
 0x454   : > { %v1963_v43 = vpop.f32.mrb[8].mxu1 }
 0x455   : > { %v2075_v46 = vadd.f32 %v1963_v43, %v1688_v42  ;;  %v1421_v47 = vpop.f32.mrb[9].mxu1 }
 0x456   : > { %v2076_v48 = vadd.f32 %v1688_v42, %v1421_v47 }
 0x457   : > { %v1433_v49 = vmax.f32 %v2075_v46, 0.0 }
 0x458   : > { %v1432_v50 = vmax.f32 %v2076_v48, 0.0 }
 0x45a   : > { %v2065_v51 = vpack.c.bf16 %v1433_v49, %v1432_v50 }
 0x45c   : > { %2067 = vmatpush3.bf16.msk.msra.mxu0 %vm2066_vm3, %v2065_v51 }
 0x45d   : > { %2068 = vmatprep.subr.bf16.mxu0 %v2118_v17 }
 0x45f   : > { %1969 = vmatmul.mubr.msk.f32.vlgmr.msra.gmra.mrb[14].mxu0 %vm1434_vm5, %v2232_v24 }
 0x460   : > { %2071 = vmatpush3.bf16.msk.msra.mxu0 %vm2066_vm3, %v2065_v51  ;;  %1975 = vmatprep.mubr.msk.f32.mxu0 %vm2119_vm1, %v2120_v18 }
 0x463   : > { %1976 = vmatmul.mubr.msk.f32.vlgmr.msra.gmra.mrb[16].mxu0 %vm1434_vm5, %v2235_v35 }
 0x532   : > { %v1507_v52 = vpop.f32.mrb[14].mxu0 }
 0x533   : > { %v1970_v53 = vpop.f32.mrb[15].mxu0 }
 0x536   : > { %v1579_v54 = vpop.f32.mrb[16].mxu0 }
 0x537   : > { %v1583_v55 = vmax.f32 %v1507_v52, %v1579_v54  ;;  %v1977_v56 = vpop.f32.mrb[17].mxu0 }
 0x539   : > { %1585 = vst.msk [vmem:[%s276_s10] sm:$0x1f] %vm1584_vm6, %v1583_v55 }
 0x53a PF: > { %s17_s24 = sadd.s32 1, %s2115_s24  }
 0x53b   : > { %p14_p4 = scmp.ge.s32.totalorder %s17_s24, 4  }
 0x53d   :  { %16 = sbr.rel (!%p14_p4) target bundleno = 1 (0x1), region = 84 }

// kernel: mm_student_forward.9
= control target key start
LH: loop header
LB: loop body
LE: loop exit
PB: predicated region body
PF: predicated region fallthrough
CT: control target
= control target key end

     0   :  { %v564_v3 = vmov 0.0|0.0   ;;  %vm565_vm0 = vmmov 0   ;;  %v566_v6 = vmov 0.0   ;;  %vm72_vm1 = vcmask 261120   ;;  %s775_s0 = inlined_call_operand.vmem [shape: f32[2,32], index: 0, kind: input, shape index: {}]   ;;  %s776_s1 = inlined_call_operand.vmem [shape: f32[2,160], index: 1, kind: input, shape index: {}]   ;;  %s777_s2 = inlined_call_operand.vmem [shape: f32[2,32], index: 2, kind: input, shape index: {}]   ;;  %s778_s3 = inlined_call_operand.vmem [shape: f32[32,32], index: 3, kind: input, shape index: {}]   ;;  %s779_s4 = inlined_call_operand.vmem [shape: f32[160,32], index: 4, kind: input, shape index: {}]   ;;  %s780_s5 = inlined_call_operand.vmem [shape: f32[1,32], index: 5, kind: input, shape index: {}]   ;;  %s781_s6 = inlined_call_operand.vmem [shape: f32[32,32], index: 6, kind: input, shape index: {}]   ;;  %s782_s7 = inlined_call_operand.vmem [shape: f32[1,32], index: 7, kind: input, shape index: {}]   ;;  %s783_s8 = inlined_call_operand.vmem [shape: f32[32,8], index: 8, kind: input, shape index: {}]   ;;  %s784_s9 = inlined_call_operand.vmem [shape: f32[1,8], index: 9, kind: input, shape index: {}]   ;;  %s785_s10 = inlined_call_operand.hbm [shape: f32[2,8], index: 10, kind: output, shape index: {}]  }
   0x1   :  { %v42_v0 = vld [vmem:[%s779_s4] sm:$0xff]  ;;  %v43_v1 = vld [vmem:[%s779_s4 + $0x8] sm:$0xff]  ;;  %v44_v2 = vld [vmem:[%s779_s4 + $0x10] sm:$0xff]  ;;  %486 = vmatprep.subr.bf16.mxu0 %v564_v3  ;;  %516 = vmatprep.subr.bf16.mxu1 %v564_v3 }
   0x2   :  { %v487_v4 = vpack.c.bf16 %v43_v1, %v42_v0  ;;  %v45_v5 = vld [vmem:[%s779_s4 + $0x18] sm:$0xff]  ;;  %461 = vmatprep.mubr.msk.f32.mxu1 %vm565_vm0, %v566_v6  ;;  %v46_v8 = vld [vmem:[%s779_s4 + $0x20] sm:$0xff]  ;;  %v47_v9 = vld [vmem:[%s779_s4 + $0x28] sm:$0xff] }
   0x3   :  { %v490_v7 = vpack.c.bf16 %v45_v5, %v44_v2  ;;  %v37_v10 = vld [vmem:[%s778_s3] sm:$0xff]  ;;  %v38_v11 = vld [vmem:[%s778_s3 + $0x8] sm:$0xff]  ;;  %v39_v13 = vld [vmem:[%s778_s3 + $0x10] sm:$0xff]  ;;  %v493_v14 = vpack.c.bf16 %v47_v9, %v46_v8 }
   0x4   :  { %488 = vmatpush1.bf16.msra.mxu0 %v487_v4  ;;  %v517_v12 = vpack.c.bf16 %v38_v11, %v37_v10  ;;  %v40_v15 = vld [vmem:[%s778_s3 + $0x18] sm:$0xff]  ;;  %v48_v16 = vld [vmem:[%s779_s4 + $0x30] sm:$0xff]  ;;  %v430_v19 = vld.sshfl [vmem:[%s776_s1] sm:$0x33 pattern:$0x76325410] }
   0x5   :  { %489 = vmatprep.subr.bf16.mxu0 %v564_v3  ;;  %v49_v17 = vld [vmem:[%s779_s4 + $0x38] sm:$0xff]  ;;  %v520_v18 = vpack.c.bf16 %v40_v15, %v39_v13  ;;  %v70_v20 = vcombine.high %v430_v19, %v430_v19 }
   0x6   :  { %518 = vmatpush3.bf16.msra.mxu1 %v517_v12 }
   0x7   :  { %519 = vmatprep.subr.bf16.mxu1 %v564_v3 }
   0x8   :  { %491 = vmatpush1.bf16.msra.mxu0 %v490_v7 }
   0x9   :  { %492 = vmatprep.subr.bf16.mxu0 %v564_v3 }
   0xa   :  { %15 = vsyncpa [#allocation3], 0  ;;  %v496_v21 = vpack.c.bf16 %v49_v17, %v48_v16  ;;  %431 = vmatprep.mubr.msk.f32.mxu0 %vm72_vm1, %v70_v20  ;;  %v50_v22 = vld [vmem:[%s779_s4 + $0x40] sm:$0xff]  ;;  %v51_v23 = vld [vmem:[%s779_s4 + $0x48] sm:$0xff]  ;;  %521 = vmatpush3.bf16.msra.mxu1 %v520_v18  ;;  %vm228_vm2 = vcmask 254976   ;;  %s567_s19 = smov [#allocation2]  }
   0xb   :  { %v36_v24 = vld [vmem:[%s775_s0] sm:$0x3]  ;;  %522 = vmatprep.subr.bf16.mxu1 %v564_v3  ;;  %v499_v25 = vpack.c.bf16 %v51_v23, %v50_v22  ;;  %v52_v26 = vld [vmem:[%s779_s4 + $0x50] sm:$0xff]  ;;  %v53_v27 = vld [vmem:[%s779_s4 + $0x58] sm:$0xff]  ;;  %s422_s20 = sshll.u32 %s567_s19, 4  ;;  %vm414_vm3 = vcmask 58368   ;;  %s423_s20 = int_to_ptr.vmem [resolvable:$true] %s422_s20 }
   0xc   :  { %494 = vmatpush1.bf16.msra.mxu0 %v493_v14  ;;  %v502_v28 = vpack.c.bf16 %v53_v27, %v52_v26  ;;  %v54_v29 = vld [vmem:[%s779_s4 + $0x60] sm:$0xff]  ;;  %v55_v30 = vld [vmem:[%s779_s4 + $0x68] sm:$0xff]  ;;  %v56_v32 = vld [vmem:[%s779_s4 + $0x70] sm:$0xff]  ;;  %p545_p1 = scmp.lt.s32.totalorder %s423_s20, %s423_s20 }
   0xd   :  { %495 = vmatprep.subr.bf16.mxu0 %v564_v3  ;;  %462 = vmatmul.mubr.msk.f32.vlgmr.msra.gmra.mrb[0].mxu1 %vm72_vm1, %v36_v24  ;;  %v505_v31 = vpack.c.bf16 %v55_v30, %v54_v29  ;;  %v57_v33 = vld [vmem:[%s779_s4 + $0x78] sm:$0xff]  ;;  %v58_v35 = vld [vmem:[%s779_s4 + $0x80] sm:$0xff]  ;;  %v59_v36 = vld [vmem:[%s779_s4 + $0x88] sm:$0xff] }
   0xe   :  { %472 = vmatprep.mubr.msk.f32.mxu1 %vm565_vm0, %v566_v6  ;;  %v508_v34 = vpack.c.bf16 %v57_v33, %v56_v32  ;;  %v511_v37 = vpack.c.bf16 %v59_v36, %v58_v35  ;;  %v60_v38 = vld [vmem:[%s779_s4 + $0x90] sm:$0xff]  ;;  %v61_v39 = vld [vmem:[%s779_s4 + $0x98] sm:$0xff]  ;;  %v433_v44 = vld [vmem:[%s780_s5] ss:$0 sm:$0xff] }
   0xf   :  { %v514_v40 = vpack.c.bf16 %v61_v39, %v60_v38  ;;  %v245_v51 = vld [vmem:[%s781_s6] sm:$0xff]  ;;  %v246_v52 = vld [vmem:[%s781_s6 + $0x8] sm:$0xff]  ;;  %v247_v54 = vld [vmem:[%s781_s6 + $0x10] sm:$0xff] }
  0x10   :  { %497 = vmatpush1.bf16.msra.mxu0 %v496_v21  ;;  %v523_v53 = vpack.c.bf16 %v246_v52, %v245_v51  ;;  %v248_v55 = vld [vmem:[%s781_s6 + $0x18] sm:$0xff]  ;;  %v242_v1 = vld [vmem:[%s777_s2] sm:$0x3]  ;;  %v331_v5 = vld [vmem:[%s783_s8 + $0x8] sm:$0xff] }
  0x11   :  { %498 = vmatprep.subr.bf16.mxu0 %v564_v3  ;;  %v526_v56 = vpack.c.bf16 %v248_v55, %v247_v54  ;;  %v330_v4 = vld [vmem:[%s783_s8] sm:$0xff]  ;;  %v332_v10 = vld [vmem:[%s783_s8 + $0x10] sm:$0xff]  ;;  %v333_v11 = vld [vmem:[%s783_s8 + $0x18] sm:$0xff]  ;;  %s540_s8 = scalar_lea.vmem %s423_s20, 32 }
  0x12   :  { %524 = vmatpush3.bf16.msra.mxu1 %v523_v53  ;;  %v529_v8 = vpack.c.bf16 %v331_v5, %v330_v4  ;;  %v532_v12 = vpack.c.bf16 %v333_v11, %v332_v10  ;;  %v434_v13 = vld [vmem:[%s782_s7] ss:$0 sm:$0xff]  ;;  %p541_p0 = scmp.ne.s32.totalorder %s423_s20, %s540_s8  ;;  %p546_p2 = scmp.lt.s32.totalorder %s540_s8, %s540_s8 }
  0x13   :  { %525 = vmatprep.subr.bf16.mxu1 %v564_v3 }
  0x14   :  { %500 = vmatpush1.bf16.msra.mxu0 %v499_v25  ;;  %p547_p3 = por %p546_p2, %p545_p1 }
  0x15   :  { %501 = vmatprep.subr.bf16.mxu0 %v564_v3 }
  0x16   :  { %527 = vmatpush3.bf16.msra.mxu1 %v526_v56  ;;  %p548_p4 = pnand %p547_p3, %p541_p0 }
  0x17   :  { %528 = vmatprep.subr.bf16.mxu1 %v564_v3 }
  0x18   :  { %503 = vmatpush1.bf16.msra.mxu0 %v502_v28 }
  0x19   :  { %504 = vmatprep.subr.bf16.mxu0 %v564_v3 }
  0x1c   :  { %506 = vmatpush1.bf16.msra.mxu0 %v505_v31 }
  0x1d   :  { %507 = vmatprep.subr.bf16.mxu0 %v564_v3 }
  0x20   :  { %509 = vmatpush1.bf16.msra.mxu0 %v508_v34 }
  0x21   :  { %510 = vmatprep.subr.bf16.mxu0 %v564_v3 }
  0x24   :  { %512 = vmatpush1.bf16.msra.mxu0 %v511_v37 }
  0x25   :  { %513 = vmatprep.subr.bf16.mxu0 %v564_v3 }
  0x28   :  { %515 = vmatpush1.bf16.msra.mxu0 %v514_v40 }
  0x2b   :  { %140 = vmatmul.mubr.f32.vlgmr.msra.gmra.mrb[0].mxu0 %v430_v19 }
  0xe0   :  { %v214_v41 = vpop.f32.mrb[0].mxu1 }
  0xe1   :  { %v463_v42 = vpop.f32.mrb[1].mxu1 }
  0xfe   :  { %v141_v43 = vpop.f32.mrb[0].mxu0 }
  0xff   :  { %v215_v45 = vadd.f32 %v214_v41, %v141_v43  ;;  %v143_v46 = vpop.f32.mrb[1].mxu0 }
 0x101   :  { %v225_v47 = vadd.f32 %v433_v44, %v215_v45 }
 0x103   :  { %v226_v48 = vmax.f32 %v225_v47, 0.0 }
 0x105   :  { %v227_v49 = vand.u32 2147483647, %v226_v48 }
 0x107   :  { %v229_v50 = vsel %vm228_vm2, %v227_v49, 0.0 }
 0x108   :  { %230 = vadd.xlane.f32.xlu0 %v229_v50 }
 0x195   :  { %v231_v57 = vpop.xlane.xlu0 %230 }
 0x196   :  { %v232_v58 = vrot.slane %v231_v57, 4 }
 0x198   :  { %v233_v59 = vadd.f32 %v232_v58, %v231_v57 }
 0x19a   :  { %v234_v60 = vrot.slane %v233_v59, 2 }
 0x19c   :  { %v235_v61 = vadd.f32 %v234_v60, %v233_v59 }
 0x19e   :  { %v236_v62 = vrot.slane %v235_v61, 1 }
 0x1a0   :  { %v237_v63 = vadd.f32 %v236_v62, %v235_v61 }
 0x1a2   :  { %534 = vpush %v237_v63 }
 0x1d3   :  { %s535_s27 = spop %534 }
 0x1d4   :  { %v239_v0 = vstv %s535_s27 }
 0x1d5   :  { %v241_v2 = vmul.f32 0.015625, %v239_v0 }
 0x1d7   :  { %v243_v7 = vmul.f32 %v242_v1, %v241_v2 }
 0x1d9   :  { %v244_v9 = vadd.f32 %v243_v7, %v226_v48 }
 0x1db   :  { %473 = vmatmul.mubr.msk.f32.vlgmr.msra.gmra.mrb[2].mxu1 %vm72_vm1, %v244_v9 }
 0x1dc   :  { %530 = vmatpush3.bf16.msra.mxu1 %v529_v8  ;;  %483 = vmatprep.mubr.msk.f32.mxu1 %vm565_vm0, %v566_v6 }
 0x1dd   :  { %531 = vmatprep.subr.bf16.mxu1 %v564_v3  ;;  %v436_v3 = vld [vmem:[%s784_s9] ss:$0 sm:$0xff] }
 0x1e0   :  { %533 = vmatpush3.bf16.msra.mxu1 %v532_v12 }
 0x2ae   :  { %v325_v14 = vpop.f32.mrb[2].mxu1 }
 0x2af   :  { %v326_v15 = vadd.f32 %v434_v13, %v325_v14  ;;  %v474_v16 = vpop.f32.mrb[3].mxu1 }
 0x2b1   :  { %v329_v6 = vmax.f32 %v326_v15, 0.0 }
 0x2b3   :  { %484 = vmatmul.mubr.msk.f32.vlgmr.msra.gmra.mrb[4].mxu1 %vm72_vm1, %v329_v6 }
 0x386   :  { %v410_v17 = vpop.f32.mrb[4].mxu1 }
 0x387   :  { %v411_v18 = vadd.f32 %v436_v3, %v410_v17  ;;  %v485_v19 = vpop.f32.mrb[5].mxu1 }
 0x389   :  { %415 = vst.msk [vmem:[#allocation2] sm:$0x3] %vm414_vm3, %v411_v18 }
 0x38a   :  { %551 = shalt.err (!%p548_p4)
}
 0x38b   :  { %s552_s1 = scalar_lea.hbm %s785_s10, 32 }
 0x38c   :  { %p553_p5 = scmp.ne.s32.totalorder %s785_s10, %s552_s1  ;;  %p556_p6 = scmp.lt.u32.totalorder %s552_s1, %s785_s10 }
 0x38e   :  { %p558_p7 = pnand %p556_p6, %p553_p5 }
 0x390   :  { %561 = shalt.err (!%p558_p7)
}
 0x391   :  { %425 = dma.vmem_to_hbm [thread:$0]  %s423_s20, 32, %s785_s10, [#allocation3]  }
 0x392   :  { %562 = dma.done.wait [#allocation3], 32  }
 0x393   :  { %563 = vsyncadd [#allocation3], 4294967264 }
 0x394   :  { %429 = vsyncpa [#allocation3], 1 }

</bundles_post_ra>
